<compile_context>
chip_gen: v5e
topology: v5e:2x2
jax: 0.10.0
libtpu: 0.0.40
codegen_flags: <defaults>
</compile_context>

<pallas_src>
import jax
import jax.numpy as jnp
from jax import lax
from jax.experimental import pallas as pl
from jax.experimental.pallas import tpu as pltpu


def _round_up(n, m):
    return ((n + m - 1) // m) * m


# --------------------------------------------------------------------------------------
# Stage 1: per-point spectral phase features (hoisted out of the pairwise tiling).
# Output layout: [:, 0:K] = sqrt(w)*cos(<F, p>),  [:, K:2K] = sqrt(w)*sin(<F, p>)
# --------------------------------------------------------------------------------------
def _phase_feature_kernel(p_ref, f_ref, w_ref, o_ref):
    # Phase projections <F_k, p_i> on the MXU: (tile_rows, d) x (d, K) -> (tile_rows, K)
    proj = jnp.dot(p_ref[...], f_ref[...], preferred_element_type=jnp.float32)
    w = w_ref[...]                                           # (1, K) sqrt-weights, bcast rows
    o_ref[...] = jnp.concatenate([w * jnp.cos(proj), w * jnp.sin(proj)], axis=-1)


# --------------------------------------------------------------------------------------
# Stage 2: pairwise covariance as ONE MXU matmul (NT contraction over 2K)
# --------------------------------------------------------------------------------------
def _pairwise_cov_kernel(fx_ref, fy_ref, o_ref):
    nt = (((1,), (1,)), ((), ()))        # contract last dim of both operands (NT matmul)
    o_ref[...] = lax.dot_general(fx_ref[...], fy_ref[...], nt,
                                 preferred_element_type=jnp.float32)


def eigenbasis_sum_cov(x, y, freqs, weights, *, target_tm=256, feat_tile=256,
                       vmem_budget=24 * 1024 * 1024):
    """Unnormalized covariance: cov[i,j] = sum_k w_k * cos(<F_k, x_i - y_j>)."""
    n_x, d = x.shape
    n_y, _ = y.shape
    K = freqs.shape[0]
    K2 = 2 * K
    itemsize = 4                                               # f32

    x = jnp.asarray(x, jnp.float32)
    y = jnp.asarray(y, jnp.float32)
    freqs_t = jnp.asarray(freqs, jnp.float32).T                # (d, K): lane-dense
    sqrt_w = jnp.sqrt(jnp.asarray(weights, jnp.float32)).reshape(1, K)

    # ---- tile selection ----------------------------------------------------------------
    tm = min(target_tm, _round_up(n_x, 8))                     # rows: multiple of 8 sublanes
    n_x_pad = _round_up(n_x, tm)

    def _stage2_vmem(tn):
        # double-buffered x tile + y tile + output tile
        return 2 * tm * K2 * itemsize + 2 * tn * K2 * itemsize + 2 * tm * tn * itemsize

    n_y_min = _round_up(n_y, 128)                              # lanes: multiple of 128
    if _stage2_vmem(n_y_min) <= vmem_budget:
        tn = n_y_min                                           # y features fully resident:
    else:                                                      # constant block idx => 1 DMA
        tn = 128
        for cand in (1024, 512, 256):
            if cand <= n_y_min and _stage2_vmem(cand) <= vmem_budget:
                tn = cand
                break
    n_y_pad = _round_up(n_y, tn)

    if n_x_pad != n_x:
        x = jnp.pad(x, ((0, n_x_pad - n_x), (0, 0)))
    if n_y_pad != n_y:
        y = jnp.pad(y, ((0, n_y_pad - n_y), (0, 0)))

    # ---- Stage 1: one fused feature call over concat(x_pad, y_pad) ----------------------
    n_tot = n_x_pad + n_y_pad
    n_tot_pad = _round_up(n_tot, feat_tile)
    pts = jnp.concatenate([x, y], axis=0)
    if n_tot_pad != n_tot:
        pts = jnp.pad(pts, ((0, n_tot_pad - n_tot), (0, 0)))

    feats = pl.pallas_call(
        _phase_feature_kernel,
        out_shape=jax.ShapeDtypeStruct((n_tot_pad, K2), jnp.float32),
        grid_spec=pltpu.PrefetchScalarGridSpec(
            num_scalar_prefetch=0,
            grid=(n_tot_pad // feat_tile,),
            in_specs=[
                pl.BlockSpec((feat_tile, d), lambda i: (i, 0)),   # point tile
                pl.BlockSpec((d, K), lambda i: (0, 0)),           # frequencies (d, K), resident
                pl.BlockSpec((1, K), lambda i: (0, 0)),           # sqrt spectral weights
            ],
            out_specs=pl.BlockSpec((feat_tile, K2), lambda i: (i, 0)),
        ),
        compiler_params=pltpu.CompilerParams(
            dimension_semantics=("parallel",),
        ),
    )(pts, freqs_t, sqrt_w)

    fx = feats[:n_x_pad]                              # (n_x_pad, 2K)
    fy = feats[n_x_pad:n_x_pad + n_y_pad]             # (n_y_pad, 2K)

    # ---- Stage 2: cov = fx @ fy^T --------------------------------------------------------
    cov = pl.pallas_call(
        _pairwise_cov_kernel,
        out_shape=jax.ShapeDtypeStruct((n_x_pad, n_y_pad), jnp.float32),
        grid_spec=pltpu.PrefetchScalarGridSpec(
            num_scalar_prefetch=0,
            grid=(n_x_pad // tm, n_y_pad // tn),
            in_specs=[
                pl.BlockSpec((tm, K2), lambda i, j: (i, 0)),   # x features tile (held over j)
                pl.BlockSpec((tn, K2), lambda i, j: (j, 0)),   # y features tile / resident slab
            ],
            out_specs=pl.BlockSpec((tm, tn), lambda i, j: (i, j)),   # lane-dense output tile
        ),
        compiler_params=pltpu.CompilerParams(
            dimension_semantics=("parallel", "parallel"),
            vmem_limit_bytes=32 * 1024 * 1024,   # v5e scoped default is 16 MiB; safe on v7x
        ),
    )(fx, fy)

    if n_x_pad != n_x or n_y_pad != n_y:
        cov = cov[:n_x, :n_y]
    return cov


class EigenbasisSumKernel:
    """JAX/Pallas port of the torch EigenbasisSumKernel (synthetic manifold/measure)."""

    def __init__(self, freqs, lengthscale=0.25, variance=1.5, key=None):
        self.freqs = jnp.asarray(freqs, jnp.float32)                  # (K, d) eigenspace freqs
        self.lb_eigenvalues = jnp.sum(self.freqs * self.freqs, -1)    # lmd_k = ||F_k||^2
        self.weights = jnp.exp(-0.5 * (lengthscale ** 2) * self.lb_eigenvalues)  # measure(lmd_k)
        self.variance = jnp.array([variance], jnp.float32)            # measure.variance
        # normalizer = forward(point, point, normalize=False)[0, 0] for a random manifold point
        if key is None:
            key = jax.random.PRNGKey(1)
        point = jax.random.uniform(key, (1, self.freqs.shape[1]), jnp.float32)
        self.normalizer = self._forward_unnormalized_ref(point, point)[0, 0]

    def _forward_unnormalized_ref(self, x, y):
        # Pure-JAX reference (and 1x1 normalizer case): direct cos(<F, x_i> - <F, y_j>).
        phase = (x @ self.freqs.T)[:, None, :] - (y @ self.freqs.T)[None, :, :]
        return jnp.sum(jnp.cos(phase) * self.weights[None, None, :], axis=-1)

    def __call__(self, x, y=None, normalize=True):
        if y is None:
            y = x
        cov = eigenbasis_sum_cov(x, y, self.freqs, self.weights)      # hot path in Pallas
        if normalize:
            return jnp.abs(self.variance[0]) * cov / self.normalizer
        return cov


if __name__ == "__main__":
    key = jax.random.PRNGKey(0)
    kx, ky, kf, kp = jax.random.split(key, 4)

    n_x, n_y, d, K = 256, 512, 8, 128
    x = jax.random.normal(kx, (n_x, d), jnp.float32)
    y = jax.random.normal(ky, (n_y, d), jnp.float32)
    # deterministic integer-lattice frequencies for the K eigenspaces
    freqs = jnp.round(3.0 * jax.random.normal(kf, (K, d), jnp.float32)).astype(jnp.float32)

    kern = EigenbasisSumKernel(freqs, key=kp)
    out = kern(x, y)                     # normalized covariance, shape (n_x, n_y)
    out = jax.block_until_ready(out)

    # pure-JAX reference check
    cov_ref = kern._forward_unnormalized_ref(x, y)
    ref = jnp.abs(kern.variance[0]) * cov_ref / kern.normalizer
    assert out.shape == (n_x, n_y), out.shape
    assert jnp.allclose(out, ref, atol=1e-3, rtol=1e-3), float(jnp.max(jnp.abs(out - ref)))

    # ragged-shape check (exercises the pad + slice tail handling)
    xr, yr = x[:100], y[:200]
    out_r = jax.block_until_ready(kern(xr, yr))
    ref_r = jnp.abs(kern.variance[0]) * kern._forward_unnormalized_ref(xr, yr) / kern.normalizer
    assert out_r.shape == (100, 200), out_r.shape
    assert jnp.allclose(out_r, ref_r, atol=1e-3, rtol=1e-3), float(jnp.max(jnp.abs(out_r - ref_r)))

    # symmetric call (y=None) check
    out_s = jax.block_until_ready(kern(x))
    ref_s = jnp.abs(kern.variance[0]) * kern._forward_unnormalized_ref(x, x) / kern.normalizer
    assert jnp.allclose(out_s, ref_s, atol=1e-3, rtol=1e-3), float(jnp.max(jnp.abs(out_s - ref_s)))

    print("KERNEL_OK")
</pallas_src>

<mosaic_0001>
module attributes {stable_mosaic.version = 11 : i64} {
  func.func @_phase_feature_kernel(%arg0: i32, %arg1: memref<256x8xf32, #tpu.memory_space<vmem>>, %arg2: memref<8x128xf32, #tpu.memory_space<vmem>>, %arg3: memref<1x128xf32, #tpu.memory_space<vmem>>, %arg4: memref<256x256xf32, #tpu.memory_space<vmem>>) attributes {dimension_semantics = [#tpu.dimension_semantics<parallel>], iteration_bounds = array<i64: 3>, scalar_prefetch = 0 : i64, scratch_operands = 0 : i64, tpu.core_type = #tpu.core_type<tc>, window_params = [{transform_indices = @transform_0, window_bounds = array<i64: 256, 8>}, {pipeline_mode = #tpu.pipeline_mode<synchronous>, transform_indices = @transform_1, window_bounds = array<i64: 8, 128>}, {pipeline_mode = #tpu.pipeline_mode<synchronous>, transform_indices = @transform_2, window_bounds = array<i64: 1, 128>}, {transform_indices = @transform_3, window_bounds = array<i64: 256, 256>}]} {
    %c0 = arith.constant 0 : index
    %c0_0 = arith.constant 0 : index
    %0 = vector.load %arg1[%c0, %c0_0] : memref<256x8xf32, #tpu.memory_space<vmem>>, vector<256x8xf32>
    %c0_1 = arith.constant 0 : index
    %c0_2 = arith.constant 0 : index
    %1 = vector.load %arg2[%c0_1, %c0_2] : memref<8x128xf32, #tpu.memory_space<vmem>>, vector<8x128xf32>
    %cst = arith.constant dense<0.000000e+00> : vector<256x128xf32>
    %2 = tpu.matmul %0, %1, %cst {dimension_numbers = #tpu.dot_dimension_numbers<[1], [0], [0], [1], [0, 0, 1, 1], [], []>} : vector<256x8xf32>, vector<8x128xf32>, vector<256x128xf32> -> vector<256x128xf32>
    %c0_3 = arith.constant 0 : index
    %c0_4 = arith.constant 0 : index
    %3 = vector.load %arg3[%c0_3, %c0_4] : memref<1x128xf32, #tpu.memory_space<vmem>>, vector<1x128xf32>
    %4 = math.cos %2 : vector<256x128xf32>
    %5 = vector.broadcast %3 : vector<1x128xf32> to vector<256x128xf32>
    %6 = arith.mulf %5, %4 : vector<256x128xf32>
    %7 = math.sin %2 : vector<256x128xf32>
    %8 = vector.broadcast %3 : vector<1x128xf32> to vector<256x128xf32>
    %9 = arith.mulf %8, %7 : vector<256x128xf32>
    %10 = tpu.concatenate %6, %9 in 1 : vector<256x128xf32>, vector<256x128xf32> -> vector<256x256xf32>
    %c0_5 = arith.constant 0 : index
    %c0_6 = arith.constant 0 : index
    %11 = vector.load %arg4[%c0_5, %c0_6] : memref<256x256xf32, #tpu.memory_space<vmem>>, vector<256x256xf32>
    tpu.vector_store %arg4[%c0_5, %c0_6], %10 {strides = array<i32>} : memref<256x256xf32, #tpu.memory_space<vmem>>, vector<256x256xf32>,
    return
  }
  func.func @transform_0(%arg0: i32) -> (i32, i32) {
    %c0_i32 = arith.constant 0 : i32
    %c0_i32_0 = arith.constant 0 : i32
    return %arg0, %c0_i32 : i32, i32
  }
  func.func @transform_1(%arg0: i32) -> (i32, i32) {
    %c0_i32 = arith.constant 0 : i32
    %c0_i32_0 = arith.constant 0 : i32
    %c0_i32_1 = arith.constant 0 : i32
    return %c0_i32, %c0_i32_0 : i32, i32
  }
  func.func @transform_2(%arg0: i32) -> (i32, i32) {
    %c0_i32 = arith.constant 0 : i32
    %c0_i32_0 = arith.constant 0 : i32
    %c0_i32_1 = arith.constant 0 : i32
    return %c0_i32, %c0_i32_0 : i32, i32
  }
  func.func @transform_3(%arg0: i32) -> (i32, i32) {
    %c0_i32 = arith.constant 0 : i32
    %c0_i32_0 = arith.constant 0 : i32
    return %arg0, %c0_i32 : i32, i32
  }
}

</mosaic_0001>

<bundles_post_ra>
// kernel: tpu_custom_call.1
= control target key start
LH: loop header
LB: loop body
LE: loop exit
PB: predicated region body
PF: predicated region fallthrough
CT: control target
= control target key end

     0   :  { %8 = vsyncpa [#allocation3], 0  ;;  %s17849_s0 = inlined_call_operand.vmem [shape: f32[768,8], index: 0, kind: input, shape index: {}]   ;;  %s17850_s1 = inlined_call_operand.vmem [shape: f32[8,128], index: 1, kind: input, shape index: {}]   ;;  %s17851_s2 = inlined_call_operand.vmem [shape: f32[1,128], index: 2, kind: input, shape index: {}]   ;;  %s17852_s3 = inlined_call_operand.hbm [shape: f32[768,256], index: 3, kind: output, shape index: {}]  }
   0x1   :  { %10 = vsyncpa [#allocation3 + $0x1], 0  ;;  %s10899_s12 = smov 0   ;;  %s10901_s13 = smov 0  }
   0x2   :  { %s10903_s14 = smov 0   ;;  %s10905_s15 = smov 0  }
   0x3 LB: > { %s10920_s16 = sadd.s32 4294967295, %s10868_s15   ;;  %s10514_s17 = sadd.s32 4294967294, %s10868_s15   ;;  %s10868_s15 = sphi %s10905_s15, %s18876_s15   ;;  %s10864_s14 = sphi %s10903_s14, %s18875_s14   ;;  %s10860_s13 = sphi %s10901_s13, %s18874_s13   ;;  %s10856_s12 = sphi %s10899_s12, %s18873_s12  }
   0x4   : > { %s10924_s18 = sadd.s32 1, %s10868_s15   ;;  %s91_s19 = sadd.s32 1, %s10864_s14 }
   0x5   : > { %s88_s20 = ssub.s32 %s10868_s15, %s10924_s18  ;;  %p101_p0 = scmp.ne.s32.totalorder %s10864_s14, %s10860_s13 }
   0x6   : > { %p89_p1 = scmp.eq.s32.totalorder %s88_s20, 0  ;;  %p102_p2 = scmp.eq.s32.totalorder %s10920_s16, 2 }
   0x7   : > { %p107_p3 = scmp.ne.s32.totalorder %s10860_s13, %s10856_s12  ;;  %p108_p4 = scmp.eq.s32.totalorder %s10514_s17, 2 }
   0x8   : > { %s10935_s21 = scalar_select %p89_p1, %s10864_s14, %s91_s19  }
   0x9   : > { %p10937_p5 = por %p102_p2, %p101_p0  ;;  %p10941_p6 = por %p108_p4, %p107_p3 }
   0xa   : > { %p10517_p7 = scmp.ge.s32.totalorder %s10868_s15, 1  ;;  %p141_p8 = scmp.lt.s32.totalorder %s10868_s15, 4 }
   0xc   : > { %p142_p9 = pnand %p10517_p7, %p141_p8 }
   0xe   : > { %145 = sbr.rel (%p142_p9) target bundleno = 1475 (0x5c3), region = 32 }
  0x13   : > { %s10519_s24 = sshll.u32 %s10920_s16, 5  ;;  %v204_v0 = vld [vmem:[%s17850_s1] sm:$0xff]  ;;  %vm205_vm0 = vcmask 64512   ;;  %v17858_v45 = vmov 920167782   ;;  %s162_s4 = sand.u32 1, %s10860_s13  }
  0x14   : > { %p166_p10 = scmp.lt.s32.totalorder %s10519_s24, 95  ;;  %317 = vmatpush.msra.mxu0 %v204_v0  ;;  %10753 = vmatpush.msra.mxu1 %v204_v0  ;;  %v17856_v47 = vmov 1326507024   ;;  %v17866_v51 = vmov 2475754826   ;;  %s17065_s5 = sshll.u32 %s162_s4, 9 }
  0x15   : > { %10754 = vmatpush.msra.mxu2 %v204_v0  ;;  %10755 = vmatpush.msra.mxu3 %v204_v0  ;;  %v17863_v53 = vmov 2131351028   ;;  %v17868_v57 = vmov 2102212464   ;;  %v17861_v62 = vmov 683565275  }
  0x16   : > { %s18878_s24 = smov (!%p166_p10, %s10519_s24), 95  ;;  %s17087_s8 = scalar_lea.vmem [#allocation2], %s17065_s5 }
  0x17   : > { %s10520_s27 = sshll.u32 %s18878_s24, 3  ;;  %s10752_s11 = sshll.u32 %s10920_s16, 9 }
  0x18   : > { %s10954_s30 = scalar_lea.vmem %s17849_s0, %s10520_s27  ;;  %s10448_s19 = scalar_lea.hbm %s17852_s3, %s10752_s11 }
  0x19   : > { %v172_v1 = vld [vmem:[%s10954_s30] sm:$0xff]  ;;  %v173_v4 = vld [vmem:[%s10954_s30 + $0x8] sm:$0xff]  ;;  %v174_v8 = vld [vmem:[%s10954_s30 + $0x10] sm:$0xff]  ;;  %s10449_s20 = sshll.u32 %s17087_s8, 4  ;;  %s10451_s24 = sshll.u32 %s10448_s19, 4  ;;  %s10450_s20 = int_to_ptr.vmem [resolvable:$true] %s10449_s20  ;;  %s10452_s24 = int_to_ptr.hbm [resolvable:$true] %s10451_s24 }
  0x1a   : > { %10521 = vmatmul.msk.f32.vlgmr.msra.gmra.mxu0 %vm205_vm0, %v172_v1  ;;  %v180_v2 = vld [vmem:[%s10954_s30 + $0x40] sm:$0xff]  ;;  %v181_v5 = vld [vmem:[%s10954_s30 + $0x48] sm:$0xff]  ;;  %v182_v10 = vld [vmem:[%s10954_s30 + $0x50] sm:$0xff]  ;;  %s10436_s25 = scalar_lea.sflag [#allocation3], %s162_s4  ;;  %s10820_s26 = sshra.s32 %s10452_s24, 4  ;;  %s10821_s26 = int_to_ptr.hbm [resolvable:$true] %s10820_s26 }
  0x1b   : > { %10529 = vmatmul.msk.f32.vlgmr.msra.gmra.mxu1 %vm205_vm0, %v180_v2  ;;  %v188_v3 = vld [vmem:[%s10954_s30 + $0x80] sm:$0xff]  ;;  %v189_v7 = vld [vmem:[%s10954_s30 + $0x88] sm:$0xff]  ;;  %v190_v11 = vld [vmem:[%s10954_s30 + $0x90] sm:$0xff]  ;;  %s10822_s27 = scalar_lea.hbm %s10821_s26, 512  ;;  %p10827_p0 = scmp.lt.s32.totalorder %s10821_s26, %s17852_s3 }
  0x1c   : > { %10537 = vmatmul.msk.f32.vlgmr.msra.gmra.mxu2 %vm205_vm0, %v188_v3  ;;  %v196_v6 = vld [vmem:[%s10954_s30 + $0xc0] sm:$0xff]  ;;  %v197_v9 = vld [vmem:[%s10954_s30 + $0xc8] sm:$0xff]  ;;  %v175_v12 = vld [vmem:[%s10954_s30 + $0x18] sm:$0xff]  ;;  %p10823_p11 = scmp.ne.s32.totalorder %s10821_s26, %s10822_s27 }
  0x1d   : > { %10545 = vmatmul.msk.f32.vlgmr.msra.gmra.mxu3 %vm205_vm0, %v196_v6  ;;  %v198_v13 = vld [vmem:[%s10954_s30 + $0xd0] sm:$0xff]  ;;  %v183_v14 = vld [vmem:[%s10954_s30 + $0x58] sm:$0xff]  ;;  %v176_v16 = vld [vmem:[%s10954_s30 + $0x20] sm:$0xff] }
  0x1e   : > { %v191_v15 = vld [vmem:[%s10954_s30 + $0x98] sm:$0xff]  ;;  %v184_v18 = vld [vmem:[%s10954_s30 + $0x60] sm:$0xff]  ;;  %v177_v20 = vld [vmem:[%s10954_s30 + $0x28] sm:$0xff]  ;;  %p10824_p12 = pnand %p10823_p11, %p10937_p5 }
  0x1f   : > { %v199_v17 = vld [vmem:[%s10954_s30 + $0xd8] sm:$0xff]  ;;  %v192_v19 = vld [vmem:[%s10954_s30 + $0xa0] sm:$0xff]  ;;  %v185_v22 = vld [vmem:[%s10954_s30 + $0x68] sm:$0xff] }
  0x20   : > { %v200_v21 = vld [vmem:[%s10954_s30 + $0xe0] sm:$0xff]  ;;  %v193_v23 = vld [vmem:[%s10954_s30 + $0xa8] sm:$0xff]  ;;  %v178_v24 = vld [vmem:[%s10954_s30 + $0x30] sm:$0xff]  ;;  %p10825_p13 = pneg %p10824_p12 }
  0x21   : > { %v201_v25 = vld [vmem:[%s10954_s30 + $0xe8] sm:$0xff]  ;;  %v186_v26 = vld [vmem:[%s10954_s30 + $0x70] sm:$0xff]  ;;  %v179_v28 = vld [vmem:[%s10954_s30 + $0x38] sm:$0xff] }
  0x22   : > { %10522 = vmatmul.msk.f32.gmra.mxu0 %vm205_vm0, %v173_v4  ;;  %v194_v27 = vld [vmem:[%s10954_s30 + $0xb0] sm:$0xff]  ;;  %v187_v30 = vld [vmem:[%s10954_s30 + $0x78] sm:$0xff] }
  0x23   : > { %10530 = vmatmul.msk.f32.gmra.mxu1 %vm205_vm0, %v181_v5  ;;  %v202_v29 = vld [vmem:[%s10954_s30 + $0xf0] sm:$0xff]  ;;  %v195_v31 = vld [vmem:[%s10954_s30 + $0xb8] sm:$0xff] }
  0x24   : > { %10538 = vmatmul.msk.f32.gmra.mxu2 %vm205_vm0, %v189_v7  ;;  %v203_v32 = vld [vmem:[%s10954_s30 + $0xf8] sm:$0xff]  ;;  %s10826_s30 = scalar_lea.hbm %s17852_s3, 1536 }
  0x25   : > { %10546 = vmatmul.msk.f32.gmra.mxu3 %vm205_vm0, %v197_v9  ;;  %p10828_p1 = scmp.lt.s32.totalorder %s10826_s30, %s10822_s27 }
  0x27   : > { %p10829_p2 = por %p10828_p1, %p10827_p0 }
  0x29   : > { %p10830_p3 = pnand %p10829_p2, %p10825_p13 }
  0x2a   : > { %10523 = vmatmul.msk.f32.gmra.mxu0 %vm205_vm0, %v174_v8 }
  0x2b   : > { %10531 = vmatmul.msk.f32.gmra.mxu1 %vm205_vm0, %v182_v10 }
  0x2c   : > { %10539 = vmatmul.msk.f32.gmra.mxu2 %vm205_vm0, %v190_v11 }
  0x2d   : > { %10547 = vmatmul.msk.f32.gmra.mxu3 %vm205_vm0, %v198_v13 }
  0x32   : > { %10524 = vmatmul.msk.f32.gmra.mxu0 %vm205_vm0, %v175_v12 }
  0x33   : > { %10532 = vmatmul.msk.f32.gmra.mxu1 %vm205_vm0, %v183_v14 }
  0x34   : > { %10540 = vmatmul.msk.f32.gmra.mxu2 %vm205_vm0, %v191_v15 }
  0x35   : > { %10548 = vmatmul.msk.f32.gmra.mxu3 %vm205_vm0, %v199_v17 }
  0x3a   : > { %10525 = vmatmul.msk.f32.gmra.mxu0 %vm205_vm0, %v176_v16 }
  0x3b   : > { %10533 = vmatmul.msk.f32.gmra.mxu1 %vm205_vm0, %v184_v18 }
  0x3c   : > { %10541 = vmatmul.msk.f32.gmra.mxu2 %vm205_vm0, %v192_v19 }
  0x3d   : > { %10549 = vmatmul.msk.f32.gmra.mxu3 %vm205_vm0, %v200_v21 }
  0x42   : > { %10526 = vmatmul.msk.f32.gmra.mxu0 %vm205_vm0, %v177_v20 }
  0x43   : > { %10534 = vmatmul.msk.f32.gmra.mxu1 %vm205_vm0, %v185_v22 }
  0x44   : > { %10542 = vmatmul.msk.f32.gmra.mxu2 %vm205_vm0, %v193_v23 }
  0x45   : > { %10550 = vmatmul.msk.f32.gmra.mxu3 %vm205_vm0, %v201_v25 }
  0x4a   : > { %10527 = vmatmul.msk.f32.gmra.mxu0 %vm205_vm0, %v178_v24 }
  0x4b   : > { %10535 = vmatmul.msk.f32.gmra.mxu1 %vm205_vm0, %v186_v26 }
  0x4c   : > { %10543 = vmatmul.msk.f32.gmra.mxu2 %vm205_vm0, %v194_v27 }
  0x4d   : > { %10551 = vmatmul.msk.f32.gmra.mxu3 %vm205_vm0, %v202_v29 }
  0x52   : > { %10528 = vmatmul.msk.f32.gmra.mxu0 %vm205_vm0, %v179_v28 }
  0x53   : > { %10536 = vmatmul.msk.f32.gmra.mxu1 %vm205_vm0, %v187_v30 }
  0x54   : > { %10544 = vmatmul.msk.f32.gmra.mxu2 %vm205_vm0, %v195_v31 }
  0x55   : > { %10552 = vmatmul.msk.f32.gmra.mxu3 %vm205_vm0, %v203_v32 }
  0x97   : > { %v11020_v33 = vpop.f32.mrf.mxu0 }
  0x98   : > { %18241 = vst [vmem:[#allocation5_spill] sm:$0xff] %v11020_v33  ;;  %v419_v34 = vand.u32 2139095040, %v11020_v33  ;;  %v416_v50 = vand.u32 2147483647, %v11020_v33 }
  0x9a   : > { %v420_v35 = vshrl.u32 %v419_v34, 23  ;;  %v423_v1 = vand.u32 8388607, %v416_v50 }
  0x9c   : > { %v10553_v36 = vadd.s32 4294967169, %v420_v35  ;;  %v424_v8 = vor.u32 8388608, %v423_v1 }
  0x9e   : > { %v426_v37 = vadd.s32 1, %v10553_v36  ;;  %v11079_v16 = vshll.u32 %v424_v8, 8 }
  0x9f   : > { %v11023_v38 = vpop.f32.mrf.mxu0 }
  0xa0   : > { %vm427_vm1 = vcmp.gt.s32.totalorder %v426_v37, 0  ;;  %18242 = vst [vmem:[#allocation6_spill] sm:$0xff] %v11023_v38  ;;  %v573_v40 = vand.u32 2139095040, %v11023_v38  ;;  %v465_v20 = vand.u32 65535, %v11079_v16  ;;  %v17860_v26 = vand.u32 2147483647, %v11023_v38 }
  0xa1   : > { %v428_v39 = vsel %vm427_vm1, %v426_v37, 0 }
  0xa2   : > { %v430_v41 = vand.u32 31, %v428_v39  ;;  %v574_v42 = vshrl.u32 %v573_v40, 23  ;;  %v11031_v49 = vshrl.u32 %v428_v39, 5 }
  0xa4   : > { %v11026_v43 = vsub.s32 32, %v430_v41  ;;  %v10556_v44 = vadd.s32 4294967169, %v574_v42  ;;  %v445_v46 = vshll.u32 %v17858_v45, %v430_v41  ;;  %v436_v52 = vshll.u32 %v17866_v51, %v430_v41 }
  0xa5   : > { %v439_v54 = vshll.u32 %v17863_v53, %v430_v41  ;;  %v442_v59 = vshll.u32 %v17868_v57, %v430_v41  ;;  %vm451_vm2 = vcmp.lt.s32.totalorder %v11031_v49, 4  ;;  %v433_v63 = vshll.u32 %v17861_v62, %v430_v41 }
  0xa6   : > { %v446_v48 = vshrl.u32 %v17856_v47, %v11026_v43  ;;  %v580_v55 = vadd.s32 1, %v10556_v44  ;;  %v437_v56 = vshrl.u32 %v17863_v53, %v11026_v43  ;;  %v440_v58 = vshrl.u32 %v17868_v57, %v11026_v43 }
  0xa7   : > { %v443_v60 = vshrl.u32 %v17858_v45, %v11026_v43  ;;  %v434_v0 = vshrl.u32 %v17866_v51, %v11026_v43  ;;  %vm448_vm4 = vcmp.lt.s32.totalorder %v11031_v49, 1  ;;  %vm450_vm5 = vcmp.lt.s32.totalorder %v11031_v49, 3  ;;  %v11089_v21 = vpop.f32.mrf.mxu0 }
  0xa8   : > { %v447_v61 = vor.u32 %v446_v48, %v445_v46  ;;  %vm581_vm3 = vcmp.gt.s32.totalorder %v580_v55, 0  ;;  %v11049_v2 = vor.u32 %v437_v56, %v436_v52  ;;  %v11051_v3 = vor.u32 %v440_v58, %v439_v54  ;;  %18243 = vst [vmem:[#allocation7_spill] sm:$0xff] %v11089_v21 }
  0xa9   : > { %v444_v4 = vor.u32 %v443_v60, %v442_v59  ;;  %v582_v6 = vsel %vm581_vm3, %v580_v55, 0  ;;  %v11057_v7 = vor.u32 %v434_v0, %v433_v63  ;;  %vm449_vm6 = vcmp.lt.s32.totalorder %v11031_v49, 2 }
  0xaa   : > { %v461_v5 = vsel %vm451_vm2, %v447_v61, 1326507024  ;;  %v460_v10 = vsel %vm448_vm4, %v11049_v2, %v11051_v3  ;;  %v584_v12 = vand.u32 31, %v582_v6  ;;  %v11098_v27 = vshrl.u32 %v582_v6, 5 }
  0xab   : > { %v457_v9 = vsel %vm451_vm2, %v444_v4, 920167782  ;;  %v462_v11 = vsel %vm450_vm5, %v444_v4, %v461_v5  ;;  %v456_v13 = vsel %vm448_vm4, %v11057_v7, %v11049_v2  ;;  %v727_v37 = vand.u32 2139095040, %v11089_v21 }
  0xac   : > { %v458_v14 = vsel %vm450_vm5, %v11051_v3, %v457_v9  ;;  %v11077_v15 = vsel %vm449_vm6, %v460_v10, %v462_v11  ;;  %v11081_v17 = vsub.s32 32, %v584_v12  ;;  %v596_v23 = vshll.u32 %v17868_v57, %v584_v12 }
  0xad   : > { %v11085_v18 = vsel %vm449_vm6, %v456_v13, %v458_v14  ;;  %v468_v19 = vshrl.u32 %v11077_v15, 16  ;;  %v587_v28 = vshll.u32 %v17861_v62, %v584_v12  ;;  %v590_v30 = vshll.u32 %v17866_v51, %v584_v12 }
  0xae   : > { %v490_v22 = vshrl.u32 %v11085_v18, 16  ;;  %v597_v24 = vshrl.u32 %v17858_v45, %v11081_v17  ;;  %v588_v29 = vshrl.u32 %v17866_v51, %v11081_v17  ;;  %v599_v31 = vshll.u32 %v17858_v45, %v584_v12 }
  0xaf   : > { %v11095_v25 = vmul.u32 %v468_v19, %v465_v20  ;;  %v600_v32 = vshrl.u32 %v17856_v47, %v11081_v17  ;;  %v591_v34 = vshrl.u32 %v17863_v53, %v11081_v17  ;;  %v593_v35 = vshll.u32 %v17863_v53, %v584_v12 }
  0xb0   : > { %v594_v36 = vshrl.u32 %v17868_v57, %v11081_v17  ;;  %v11113_v39 = vmul.u32 %v490_v22, %v465_v20  ;;  %v598_v40 = vor.u32 %v597_v24, %v596_v23  ;;  %v466_v41 = vshrl.u32 %v11079_v16, 16 }
  0xb1   : > { %v577_v42 = vand.u32 8388607, %v17860_v26  ;;  %vm605_vm7 = vcmp.lt.s32.totalorder %v11098_v27, 4  ;;  %v467_v44 = vand.u32 65535, %v11077_v15  ;;  %v473_v46 = vshll.u32 %v11095_v25, 16 }
  0xb2   : > { %v489_v48 = vand.u32 65535, %v11085_v18  ;;  %v601_v52 = vor.u32 %v600_v32, %v599_v31  ;;  %v11122_v54 = vor.u32 %v588_v29, %v587_v28  ;;  %v11124_v55 = vor.u32 %v591_v34, %v590_v30 }
  0xb3   : > { %v11126_v56 = vor.u32 %v594_v36, %v593_v35  ;;  %v728_v58 = vshrl.u32 %v727_v37, 23  ;;  %v495_v59 = vshll.u32 %v11113_v39, 16  ;;  %vm602_vm8 = vcmp.lt.s32.totalorder %v11098_v27, 1 }
  0xb4   : > { %vm604_vm9 = vcmp.lt.s32.totalorder %v11098_v27, 3  ;;  %v611_v60 = vsel %vm605_vm7, %v598_v40, 920167782  ;;  %v578_v61 = vor.u32 8388608, %v577_v42  ;;  %v469_v63 = vmul.u32 %v467_v44, %v465_v20 }
  0xb5   : > { %v11133_v0 = vmul.u32 %v467_v44, %v466_v41  ;;  %v491_v1 = vmul.u32 %v489_v48, %v465_v20  ;;  %v615_v4 = vsel %vm605_vm7, %v601_v52, 1326507024  ;;  %v11137_v5 = vmul.u32 %v489_v48, %v466_v41 }
  0xb6   : > { %v610_v6 = vsel %vm602_vm8, %v11122_v54, %v11124_v55  ;;  %v612_v8 = vsel %vm604_vm9, %v11126_v56, %v611_v60  ;;  %v10559_v9 = vadd.s32 4294967169, %v728_v58  ;;  %vm477_vm10 = vc.u32 %v469_v63, %v473_v46 }
  0xb7   : > { %v479_v10 = vadd.s32 %v473_v46, %v469_v63  ;;  %vm499_vm11 = vc.u32 %v491_v1, %v495_v59  ;;  %v11146_v11 = vadd.s32 %v495_v59, %v491_v1  ;;  %vm603_vm12 = vcmp.lt.s32.totalorder %v11098_v27, 2 }
  0xb8   : > { %v614_v12 = vsel %vm602_vm8, %v11124_v55, %v11126_v56  ;;  %v616_v13 = vsel %vm604_vm9, %v598_v40, %v615_v4  ;;  %v475_v14 = vshll.u32 %v11133_v0, 16  ;;  %v613_v15 = vsel %vm603_vm12, %v610_v6, %v612_v8 }
  0xb9   : > { %v11158_v18 = vshll.u32 %v578_v61, 8  ;;  %v17870_v20 = vmov 0   ;;  %v497_v24 = vshll.u32 %v11137_v5, 16  ;;  %v734_v28 = vadd.s32 1, %v10559_v9 }
  0xba   : > { %v478_v23 = vsel %vm477_vm10, 1, %v17870_v20  ;;  %v472_v29 = vmul.u32 %v468_v19, %v466_v41  ;;  %vm481_vm13 = vc.u32 %v479_v10, %v475_v14  ;;  %v500_v30 = vsel %vm499_vm11, 1, %v17870_v20 }
  0xbb   : > { %v617_v31 = vsel %vm603_vm12, %v614_v12, %v616_v13  ;;  %v494_v32 = vmul.u32 %v490_v22, %v466_v41  ;;  %vm503_vm14 = vc.u32 %v11146_v11, %v497_v24  ;;  %v644_v34 = vshrl.u32 %v613_v15, 16  ;;  %v11173_v22 = vpop.f32.mrf.mxu0 }
  0xbc   : > { %v480_v35 = vadd.s32 %v478_v23, %v472_v29  ;;  %v619_v36 = vand.u32 65535, %v11158_v18  ;;  %v482_v37 = vsel %vm481_vm13, 1, %v17870_v20  ;;  %v622_v42 = vshrl.u32 %v617_v31, 16  ;;  %18244 = vst [vmem:[#allocation8_spill] sm:$0xff] %v11173_v22 }
  0xbd   : > { %v502_v40 = vadd.s32 %v500_v30, %v494_v32  ;;  %vm735_vm15 = vcmp.gt.s32.totalorder %v734_v28, 0  ;;  %v504_v19 = vsel %vm503_vm14, 1, %v17870_v20  ;;  %v643_v58 = vand.u32 65535, %v613_v15 }
  0xbe   : > { %v11171_v44 = vmul.u32 %v644_v34, %v619_v36  ;;  %v484_v46 = vadd.s32 %v482_v37, %v480_v35  ;;  %v736_v48 = vsel %vm735_vm15, %v734_v28, 0  ;;  %v11175_v52 = vmul.u32 %v622_v42, %v619_v36 }
  0xbf   : > { %v506_v41 = vadd.s32 %v504_v19, %v502_v40  ;;  %v432_v59 = vshrl.u32 %v17861_v62, %v11026_v43  ;;  %v474_v60 = vshrl.u32 %v11095_v25, 16  ;;  %v621_v61 = vand.u32 65535, %v617_v31 }
  0xc0   : > { %v496_v63 = vshrl.u32 %v11113_v39, 16  ;;  %v649_v1 = vshll.u32 %v11171_v44, 16  ;;  %v738_v4 = vand.u32 31, %v736_v48  ;;  %v620_v8 = vshrl.u32 %v11158_v18, 16 }
  0xc1   : > { %v485_v6 = vadd.s32 %v484_v46, %v474_v60  ;;  %v881_v9 = vand.u32 2139095040, %v11173_v22  ;;  %v627_v12 = vshll.u32 %v11175_v52, 16  ;;  %v645_v13 = vmul.u32 %v643_v58, %v619_v36 }
  0xc2   : > { %v507_v10 = vadd.s32 %v506_v41, %v496_v63  ;;  %v17854_v14 = vand.u32 2147483647, %v11089_v21  ;;  %v452_v43 = vsel %vm448_vm4, %v432_v59, %v11057_v7  ;;  %v476_v25 = vshrl.u32 %v11133_v0, 16 }
  0xc3   : > { %v11190_v39 = vmul.u32 %v621_v61, %v620_v8  ;;  %v11192_v15 = vmul.u32 %v643_v58, %v620_v8  ;;  %v498_v23 = vshrl.u32 %v11137_v5, 16  ;;  %v623_v28 = vmul.u32 %v621_v61, %v619_v36 }
  0xc4   : > { %vm653_vm0 = vc.u32 %v645_v13, %v649_v1  ;;  %v11195_v29 = vsub.s32 32, %v738_v4  ;;  %v453_v30 = vsel %vm451_vm2, %v11051_v3, 2102212464  ;;  %v11200_v31 = vadd.s32 %v485_v6, %v476_v25 }
  0xc5   : > { %v11202_v32 = vadd.s32 %v649_v1, %v645_v13  ;;  %v882_v7 = vshrl.u32 %v881_v9, 23  ;;  %v508_v0 = vadd.s32 %v507_v10, %v498_v23  ;;  %v626_v35 = vmul.u32 %v622_v42, %v620_v8 }
  0xc6   : > { %vm631_vm1 = vc.u32 %v623_v28, %v627_v12  ;;  %v633_v37 = vadd.s32 %v627_v12, %v623_v28  ;;  %v629_v40 = vshll.u32 %v11190_v39, 16  ;;  %v648_v19 = vmul.u32 %v644_v34, %v620_v8 }
  0xc7   : > { %v651_v36 = vshll.u32 %v11192_v15, 16  ;;  %v654_v46 = vsel %vm653_vm0, 1, %v17870_v20  ;;  %v750_v41 = vshll.u32 %v17868_v57, %v738_v4  ;;  %v751_v3 = vshrl.u32 %v17858_v45, %v11195_v29 }
  0xc8   : > { %v753_v58 = vshll.u32 %v17858_v45, %v738_v4  ;;  %v754_v59 = vshrl.u32 %v17856_v47, %v11195_v29  ;;  %v632_v42 = vsel %vm631_vm1, 1, %v17870_v20  ;;  %v11217_v34 = vshrl.u32 %v736_v48, 5 }
  0xc9   : > { %vm657_vm2 = vc.u32 %v11202_v32, %v651_v36  ;;  %v10562_v60 = vadd.s32 4294967169, %v882_v7  ;;  %vm11219_vm3 = vc.u32 %v633_v37, %v629_v40  ;;  %v656_v63 = vadd.s32 %v654_v46, %v648_v19 }
  0xca   : > { %v741_v1 = vshll.u32 %v17861_v62, %v738_v4  ;;  %v744_v6 = vshll.u32 %v17866_v51, %v738_v4  ;;  %v742_v8 = vshrl.u32 %v17866_v51, %v11195_v29  ;;  %v745_v9 = vshrl.u32 %v17863_v53, %v11195_v29 }
  0xcb   : > { %v747_v10 = vshll.u32 %v17863_v53, %v738_v4  ;;  %v748_v48 = vshrl.u32 %v17868_v57, %v11195_v29  ;;  %v11235_v12 = vadd.s32 %v11146_v11, %v497_v24  ;;  %v658_v13 = vsel %vm657_vm2, 1, %v17870_v20 }
  0xcc   : > { %v752_v25 = vor.u32 %v751_v3, %v750_v41  ;;  %v755_v23 = vor.u32 %v754_v59, %v753_v58  ;;  %v454_v28 = vsel %vm450_vm5, %v11049_v2, %v453_v30  ;;  %v634_v7 = vadd.s32 %v632_v42, %v626_v35 }
  0xcd   : > { %vm759_vm4 = vcmp.lt.s32.totalorder %v11217_v34, 4  ;;  %v888_v4 = vadd.s32 1, %v10562_v60  ;;  %vm511_vm10 = vc.u32 %v11200_v31, %v11235_v12  ;;  %v512_v37 = vadd.s32 1, %v508_v0 }
  0xce   : > { %v636_v5 = vsel %vm11219_vm3, 1, %v17870_v20  ;;  %v731_v11 = vand.u32 8388607, %v17854_v14  ;;  %v660_v24 = vadd.s32 %v658_v13, %v656_v63  ;;  %v11249_v40 = vor.u32 %v742_v8, %v741_v1 }
  0xcf   : > { %v11251_v19 = vor.u32 %v745_v9, %v744_v6  ;;  %v11253_v2 = vor.u32 %v748_v48, %v747_v10  ;;  %vm756_vm5 = vcmp.lt.s32.totalorder %v11217_v34, 1  ;;  %vm758_vm11 = vcmp.lt.s32.totalorder %v11217_v34, 3 }
  0xd0   : > { %v765_v30 = vsel %vm759_vm4, %v752_v25, 920167782  ;;  %v769_v35 = vsel %vm759_vm4, %v755_v23, 1326507024  ;;  %v455_v46 = vsel %vm449_vm6, %v452_v43, %v454_v28  ;;  %v638_v41 = vadd.s32 %v636_v5, %v634_v7 }
  0xd1   : > { %vm889_vm13 = vcmp.gt.s32.totalorder %v888_v4, 0  ;;  %v513_v3 = vsel %vm511_vm10, %v512_v37, %v508_v0  ;;  %v628_v58 = vshrl.u32 %v11175_v52, 16  ;;  %v650_v59 = vshrl.u32 %v11171_v44, 16 }
  0xd2   : > { %v732_v42 = vor.u32 8388608, %v731_v11  ;;  %v764_v60 = vsel %vm756_vm5, %v11249_v40, %v11251_v19  ;;  %v766_v61 = vsel %vm758_vm11, %v11253_v2, %v765_v30  ;;  %v768_v49 = vsel %vm756_vm5, %v11251_v19, %v11253_v2 }
  0xd3   : > { %v770_v52 = vsel %vm758_vm11, %v752_v25, %v769_v35  ;;  %v509_v44 = vmul.u32 %v11079_v16, %v455_v46  ;;  %v586_v43 = vshrl.u32 %v17861_v62, %v11081_v17  ;;  %v661_v0 = vadd.s32 %v660_v24, %v650_v59 }
  0xd4   : > { %v890_v63 = vsel %vm889_vm13, %v888_v4, 0  ;;  %v607_v1 = vsel %vm605_vm7, %v11126_v56, 2102212464  ;;  %v639_v6 = vadd.s32 %v638_v41, %v628_v58  ;;  %vm757_vm6 = vcmp.lt.s32.totalorder %v11217_v34, 2 }
  0xd5   : > { %v514_v8 = vadd.s32 %v513_v3, %v509_v44  ;;  %v652_v9 = vshrl.u32 %v11192_v15, 16  ;;  %v11288_v10 = vsel %vm757_vm6, %v764_v60, %v766_v61  ;;  %v11292_v16 = vsel %vm757_vm6, %v768_v49, %v770_v52 }
  0xd6   : > { %v630_v17 = vshrl.u32 %v11190_v39, 16  ;;  %v11295_v48 = vshll.u32 %v732_v42, 8  ;;  %v892_v13 = vand.u32 31, %v890_v63  ;;  %v606_v56 = vsel %vm602_vm8, %v586_v43, %v11122_v54 }
  0xd7   : > { %v608_v25 = vsel %vm604_vm9, %v11124_v55, %v607_v1  ;;  %v662_v23 = vadd.s32 %v661_v0, %v652_v9  ;;  %v776_v7 = vshrl.u32 %v11292_v16, 16  ;;  %v798_v4 = vshrl.u32 %v11288_v10, 16 }
  0xd8   : > { %v11303_v28 = vadd.s32 %v639_v6, %v630_v17  ;;  %v515_v37 = vadd.s32 536870912, %v514_v8  ;;  %v609_v39 = vsel %vm603_vm12, %v606_v56, %v608_v25  ;;  %v11312_v5 = vadd.s32 %v11202_v32, %v651_v36 }
  0xd9   : > { %v773_v54 = vand.u32 65535, %v11295_v48  ;;  %v11315_v11 = vsub.s32 32, %v892_v13  ;;  %v666_v55 = vadd.s32 1, %v662_v23  ;;  %v663_v15 = vmul.u32 %v11158_v18, %v609_v39 }
  0xda   : > { %vm665_vm7 = vc.u32 %v11303_v28, %v11312_v5  ;;  %v11325_v27 = vshrl.u32 %v515_v37, 30  ;;  %v17853_v32 = vand.u32 2147483647, %v11173_v22  ;;  %v775_v36 = vand.u32 65535, %v11292_v16 }
  0xdb   : > { %v11321_v24 = vmul.u32 %v776_v7, %v773_v54  ;;  %v11323_v30 = vmul.u32 %v798_v4, %v773_v54  ;;  %v797_v35 = vand.u32 65535, %v11288_v10  ;;  %v904_v46 = vshll.u32 %v17868_v57, %v892_v13 }
  0xdc   : > { %v905_v41 = vshrl.u32 %v17858_v45, %v11315_v11  ;;  %v667_v3 = vsel %vm665_vm7, %v666_v55, %v662_v23  ;;  %v11334_v58 = vshrl.u32 %v890_v63, 5  ;;  %v907_v59 = vshll.u32 %v17858_v45, %v892_v13 }
  0xdd   : > { %v908_v42 = vshrl.u32 %v17856_v47, %v11315_v11  ;;  %v781_v18 = vshll.u32 %v11321_v24, 16  ;;  %v803_v60 = vshll.u32 %v11323_v30, 16  ;;  %v895_v61 = vshll.u32 %v17861_v62, %v892_v13 }
  0xde   : > { %v898_v49 = vshll.u32 %v17866_v51, %v892_v13  ;;  %v896_v52 = vshrl.u32 %v17866_v51, %v11315_v11  ;;  %v899_v44 = vshrl.u32 %v17863_v53, %v11315_v11  ;;  %v901_v43 = vshll.u32 %v17863_v53, %v892_v13 }
  0xdf   : > { %v902_v0 = vshrl.u32 %v17868_v57, %v11315_v11  ;;  %v774_v63 = vshrl.u32 %v11295_v48, 16  ;;  %v777_v1 = vmul.u32 %v775_v36, %v773_v54  ;;  %v799_v6 = vmul.u32 %v797_v35, %v773_v54 }
  0xe0   : > { %v906_v9 = vor.u32 %v905_v41, %v904_v46  ;;  %v517_v10 = vshll.u32 %v11325_v27, 30  ;;  %v11352_v17 = vadd.s32 %v667_v3, %v663_v15  ;;  %v909_v56 = vor.u32 %v908_v42, %v907_v59  ;;  %v11381_v46 = vpop.f32.mrf.mxu0 }
  0xe1   : > { %vm913_vm8 = vcmp.lt.s32.totalorder %v11334_v58, 4  ;;  %v11355_v25 = vmul.u32 %v775_v36, %v774_v63  ;;  %vm11357_vm9 = vc.u32 %v777_v1, %v781_v18  ;;  %v11361_v13 = vmul.u32 %v797_v35, %v774_v63  ;;  %18251 = vst [vmem:[#allocation9_spill] sm:$0xff] %v11381_v46 }
  0xe2   : > { %vm11363_vm12 = vc.u32 %v799_v6, %v803_v60  ;;  %v885_v39 = vand.u32 8388607, %v17853_v32  ;;  %v11369_v54 = vor.u32 %v896_v52, %v895_v61  ;;  %v11371_v55 = vor.u32 %v899_v44, %v898_v49 }
  0xe3   : > { %v11373_v15 = vor.u32 %v902_v0, %v901_v43  ;;  %v11375_v36 = vadd.s32 %v803_v60, %v799_v6  ;;  %vm910_vm14 = vcmp.lt.s32.totalorder %v11334_v58, 1  ;;  %vm912_vm15 = vcmp.lt.s32.totalorder %v11334_v58, 3 }
  0xe4   : > { %v919_v35 = vsel %vm913_vm8, %v906_v9, 920167782  ;;  %v11383_v41 = vsub.s32 %v514_v8, %v517_v10  ;;  %v669_v3 = vadd.s32 536870912, %v11352_v17  ;;  %v787_v59 = vadd.s32 %v781_v18, %v777_v1 }
  0xe5   : > { %v923_v42 = vsel %vm913_vm8, %v909_v56, 1326507024  ;;  %v783_v60 = vshll.u32 %v11355_v25, 16  ;;  %v786_v61 = vsel %vm11357_vm9, 1, %v17870_v20  ;;  %v802_v49 = vmul.u32 %v798_v4, %v774_v63 }
  0xe6   : > { %v805_v52 = vshll.u32 %v11361_v13, 16  ;;  %v808_v8 = vsel %vm11363_vm12, 1, %v17870_v20  ;;  %v886_v44 = vor.u32 8388608, %v885_v39  ;;  %v918_v18 = vsel %vm910_vm14, %v11369_v54, %v11371_v55 }
  0xe7   : > { %v920_v43 = vsel %vm912_vm15, %v11373_v15, %v919_v35  ;;  %v922_v4 = vsel %vm910_vm14, %v11371_v55, %v11373_v15  ;;  %v924_v0 = vsel %vm912_vm15, %v906_v9, %v923_v42  ;;  %v1035_v1 = vand.u32 2139095040, %v11381_v46 }
  0xe8   : > { %vm811_vm0 = vc.u32 %v11375_v36, %v805_v52  ;;  %v780_v6 = vmul.u32 %v776_v7, %v774_v63  ;;  %vm789_vm1 = vc.u32 %v787_v59, %v783_v60  ;;  %vm911_vm2 = vcmp.lt.s32.totalorder %v11334_v58, 2 }
  0xe9   : > { %v520_v10 = vsub.s32 0, %v11383_v41  ;;  %v810_v56 = vadd.s32 %v808_v8, %v802_v49  ;;  %v11417_v23 = vsel %vm911_vm2, %v918_v18, %v920_v43  ;;  %v812_v39 = vsel %vm811_vm0, 1, %v17870_v20 }
  0xea   : > { %v788_v37 = vadd.s32 %v786_v61, %v780_v6  ;;  %v11422_v9 = vsel %vm911_vm2, %v922_v4, %v924_v0  ;;  %v11424_v35 = vshll.u32 %v886_v44, 8  ;;  %vm519_vm3 = vcmp.lt.s32.totalorder %v11383_v41, 0 }
  0xeb   : > { %v11427_v16 = vshrl.u32 %v669_v3, 30  ;;  %v790_v7 = vsel %vm789_vm1, 1, %v17870_v20  ;;  %v1036_v63 = vshrl.u32 %v1035_v1, 23  ;;  %v952_v59 = vshrl.u32 %v11417_v23, 16 }
  0xec   : > { %v814_v42 = vadd.s32 %v812_v39, %v810_v56  ;;  %v930_v60 = vshrl.u32 %v11422_v9, 16  ;;  %v521_v61 = vsel %vm519_vm3, %v520_v10, %v11383_v41  ;;  %v792_v49 = vadd.s32 %v790_v7, %v788_v37 }
  0xed   : > { %v927_v8 = vand.u32 65535, %v11424_v35  ;;  %v671_v44 = vshll.u32 %v11427_v16, 30  ;;  %v804_v18 = vshrl.u32 %v11323_v30, 16  ;;  %v10565_v43 = vadd.s32 4294967169, %v1036_v63 }
  0xee   : > { %v782_v3 = vshrl.u32 %v11321_v24, 16  ;;  %v522_v0 = vclz %v521_v61  ;;  %v740_v56 = vshrl.u32 %v17861_v62, %v11195_v29  ;;  %v951_v37 = vand.u32 65535, %v11417_v23 }
  0xef   : > { %v11437_v4 = vmul.u32 %v952_v59, %v927_v8  ;;  %v815_v1 = vadd.s32 %v814_v42, %v804_v18  ;;  %v11439_v6 = vmul.u32 %v930_v60, %v927_v8  ;;  %v11445_v39 = vsub.s32 %v11352_v17, %v671_v44 }
  0xf0   : > { %v793_v10 = vadd.s32 %v792_v49, %v782_v3  ;;  %v806_v30 = vshrl.u32 %v11361_v13, 16  ;;  %v929_v7 = vand.u32 65535, %v11422_v9  ;;  %v1042_v24 = vadd.s32 1, %v10565_v43 }
  0xf1   : > { %v761_v63 = vsel %vm759_vm4, %v11253_v2, 2102212464  ;;  %v784_v42 = vshrl.u32 %v11355_v25, 16  ;;  %v928_v61 = vshrl.u32 %v11424_v35, 16  ;;  %v957_v29 = vshll.u32 %v11437_v4, 16 }
  0xf2   : > { %v10554_v49 = vadd.s32 4294967294, %v522_v0  ;;  %v816_v23 = vadd.s32 %v815_v1, %v806_v30  ;;  %v935_v17 = vshll.u32 %v11439_v6, 16  ;;  %v760_v13 = vsel %vm756_vm5, %v740_v56, %v11249_v40 }
  0xf3   : > { %v11459_v9 = vadd.s32 %v793_v10, %v784_v42  ;;  %v953_v44 = vmul.u32 %v951_v37, %v927_v8  ;;  %v11461_v18 = vmul.u32 %v951_v37, %v928_v61  ;;  %v762_v2 = vsel %vm758_vm11, %v11251_v19, %v761_v63 }
  0xf4   : > { %v931_v25 = vmul.u32 %v929_v7, %v927_v8  ;;  %v11466_v43 = vmul.u32 %v929_v7, %v928_v61  ;;  %vm1043_vm4 = vcmp.gt.s32.totalorder %v1042_v24, 0  ;;  %v674_v3 = vsub.s32 0, %v11445_v39 }
  0xf5   : > { %v11470_v0 = vadd.s32 %v11375_v36, %v805_v52  ;;  %vm961_vm10 = vc.u32 %v953_v44, %v957_v29  ;;  %v11472_v40 = vadd.s32 %v957_v29, %v953_v44  ;;  %vm673_vm5 = vcmp.lt.s32.totalorder %v11445_v39, 0 }
  0xf6   : > { %v820_v1 = vadd.s32 1, %v816_v23  ;;  %vm939_vm13 = vc.u32 %v931_v25, %v935_v17  ;;  %v941_v56 = vadd.s32 %v935_v17, %v931_v25  ;;  %v959_v19 = vshll.u32 %v11461_v18, 16 }
  0xf7   : > { %vm819_vm11 = vc.u32 %v11459_v9, %v11470_v0  ;;  %v1044_v8 = vsel %vm1043_vm4, %v1042_v24, 0  ;;  %vm10555_vm7 = vcmp.lt.s32.totalorder %v10554_v49, 0  ;;  %v763_v10 = vsel %vm757_vm6, %v760_v13, %v762_v2 }
  0xf8   : > { %v937_v36 = vshll.u32 %v11466_v43, 16  ;;  %v962_v52 = vsel %vm961_vm10, 1, %v17870_v20  ;;  %v675_v37 = vsel %vm673_vm5, %v674_v3, %v11445_v39  ;;  %v940_v30 = vsel %vm939_vm13, 1, %v17870_v20 }
  0xf9   : > { %v956_v7 = vmul.u32 %v952_v59, %v928_v61  ;;  %vm965_vm9 = vc.u32 %v11472_v40, %v959_v19  ;;  %v821_v63 = vsel %vm819_vm11, %v820_v1, %v816_v23  ;;  %v934_v42 = vmul.u32 %v930_v60, %v928_v61  ;;  %v11495_v23 = vpop.f32.mrf.mxu0 }
  0xfa   : > { %vm943_vm12 = vc.u32 %v941_v56, %v937_v36  ;;  %v1046_v29 = vand.u32 31, %v1044_v8  ;;  %v817_v24 = vmul.u32 %v11295_v48, %v763_v10  ;;  %v966_v13 = vsel %vm965_vm9, 1, %v17870_v20  ;;  %18252 = vst [vmem:[#allocation10_spill] sm:$0xff] %v11495_v23 }
  0xfb   : > { %v964_v17 = vadd.s32 %v962_v52, %v956_v7  ;;  %v942_v34 = vadd.s32 %v940_v30, %v934_v42  ;;  %v11488_v44 = vsel %vm10555_vm7, 0, %v10554_v49  ;;  %v676_v2 = vclz %v675_v37 }
  0xfc   : > { %v11490_v25 = vadd.s32 %v821_v63, %v817_v24  ;;  %v944_v59 = vsel %vm943_vm12, 1, %v17870_v20  ;;  %v11493_v3 = vsub.s32 32, %v1046_v29  ;;  %v530_v61 = vsub.s32 4294967266, %v11488_v44 }
  0xfd   : > { %v968_v60 = vadd.s32 %v966_v13, %v964_v17  ;;  %v946_v48 = vadd.s32 %v944_v59, %v942_v34  ;;  %v11498_v1 = vadd.s32 4294967294, %v676_v2  ;;  %v958_v49 = vshrl.u32 %v11437_v4, 16 }
  0xfe   : > { %v823_v56 = vadd.s32 536870912, %v11490_v25  ;;  %v17855_v10 = vand.u32 2147483647, %v11381_v46  ;;  %v936_v36 = vshrl.u32 %v11439_v6, 16  ;;  %v1061_v52 = vshll.u32 %v17858_v45, %v1046_v29 }
  0xff   : > { %v1062_v37 = vshrl.u32 %v17856_v47, %v11493_v3  ;;  %v1189_v30 = vand.u32 2139095040, %v11495_v23  ;;  %v894_v7 = vshrl.u32 %v17861_v62, %v11315_v11  ;;  %v915_v63 = vsel %vm913_vm8, %v11373_v15, 2102212464 }
 0x100   : > { %v969_v42 = vadd.s32 %v968_v60, %v958_v49  ;;  %v11513_v4 = vshrl.u32 %v1044_v8, 5  ;;  %v947_v24 = vadd.s32 %v946_v48, %v936_v36  ;;  %v960_v6 = vshrl.u32 %v11461_v18, 16 }
 0x101   : > { %v1058_v17 = vshll.u32 %v17868_v57, %v1046_v29  ;;  %v1059_v34 = vshrl.u32 %v17858_v45, %v11493_v3  ;;  %v1052_v13 = vshll.u32 %v17866_v51, %v1046_v29  ;;  %v1053_v11 = vshrl.u32 %v17863_v53, %v11493_v3 }
 0x102   : > { %v1055_v2 = vshll.u32 %v17863_v53, %v1046_v29  ;;  %v1056_v15 = vshrl.u32 %v17868_v57, %v11493_v3  ;;  %v11525_v8 = vshrl.u32 %v823_v56, 30  ;;  %v938_v59 = vshrl.u32 %v11466_v43, 16 }
 0x103   : > { %v1063_v18 = vor.u32 %v1062_v37, %v1061_v52  ;;  %v1190_v60 = vshrl.u32 %v1189_v30, 23  ;;  %v970_v48 = vadd.s32 %v969_v42, %v960_v6  ;;  %v1049_v49 = vshll.u32 %v17861_v62, %v1046_v29 }
 0x104   : > { %v1050_v36 = vshrl.u32 %v17866_v51, %v11493_v3  ;;  %vm1067_vm6 = vcmp.lt.s32.totalorder %v11513_v4, 4  ;;  %v914_v32 = vsel %vm910_vm14, %v894_v7, %v11369_v54  ;;  %v916_v56 = vsel %vm912_vm15, %v11371_v55, %v915_v63 }
 0x105   : > { %v11538_v14 = vadd.s32 %v947_v24, %v938_v59  ;;  %v1060_v43 = vor.u32 %v1059_v34, %v1058_v17  ;;  %v11541_v52 = vadd.s32 %v11472_v40, %v959_v19  ;;  %v1039_v29 = vand.u32 8388607, %v17855_v10 }
 0x106   : > { %v11545_v37 = vor.u32 %v1053_v11, %v1052_v13  ;;  %v11547_v30 = vor.u32 %v1056_v15, %v1055_v2  ;;  %vm1064_vm8 = vcmp.lt.s32.totalorder %v11513_v4, 1  ;;  %vm1066_vm14 = vcmp.lt.s32.totalorder %v11513_v4, 3 }
 0x107   : > { %v1077_v54 = vsel %vm1067_vm6, %v1063_v18, 1326507024  ;;  %v10568_v55 = vadd.s32 4294967169, %v1190_v60  ;;  %v526_v7 = vsub.s32 32, %v11488_v44  ;;  %v974_v63 = vadd.s32 1, %v970_v48 }
 0x108   : > { %v11554_v40 = vor.u32 %v1050_v36, %v1049_v49  ;;  %v531_v19 = vadd.s32 127, %v530_v61  ;;  %v917_v42 = vsel %vm911_vm2, %v914_v32, %v916_v56  ;;  %vm973_vm15 = vc.u32 %v11538_v14, %v11541_v52 }
 0x109   : > { %v1073_v24 = vsel %vm1067_vm6, %v1060_v43, 920167782  ;;  %v1040_v6 = vor.u32 8388608, %v1039_v29  ;;  %v1076_v17 = vsel %vm1064_vm8, %v11545_v37, %v11547_v30  ;;  %v1078_v34 = vsel %vm1066_vm14, %v1060_v43, %v1077_v54 }
 0x10a   : > { %v1196_v13 = vadd.s32 1, %v10568_v55  ;;  %v510_v58 = vadd.s32 %v11235_v12, %v11200_v31  ;;  %vm10558_vm0 = vcmp.lt.s32.totalorder %v11498_v1, 0  ;;  %v825_v32 = vshll.u32 %v11525_v8, 30 }
 0x10b   : > { %v975_v61 = vsel %vm973_vm15, %v974_v63, %v970_v48  ;;  %vm1065_vm1 = vcmp.lt.s32.totalorder %v11513_v4, 2  ;;  %v1072_v11 = vsel %vm1064_vm8, %v11554_v40, %v11545_v37  ;;  %v1074_v2 = vsel %vm1066_vm14, %v11547_v30, %v1073_v24 }
 0x10c   : > { %v532_v15 = vshll.u32 %v531_v19, 23  ;;  %v971_v59 = vmul.u32 %v11424_v35, %v917_v42  ;;  %v11583_v31 = vsel %vm1065_vm1, %v1076_v17, %v1078_v34  ;;  %v528_v12 = vshrl.u32 %v510_v58, %v526_v7 }
 0x10d   : > { %v11585_v18 = vshll.u32 %v1040_v6, 8  ;;  %vm1197_vm2 = vcmp.gt.s32.totalorder %v1196_v13, 0  ;;  %v11588_v60 = vsel %vm10558_vm0, 0, %v11498_v1  ;;  %v11591_v48 = vsub.s32 %v11490_v25, %v825_v32 }
 0x10e   : > { %v976_v49 = vadd.s32 %v975_v61, %v971_v59  ;;  %v11595_v36 = vsel %vm1065_vm1, %v1072_v11, %v1074_v2  ;;  %v1084_v35 = vshrl.u32 %v11583_v31, 16  ;;  %v527_v56 = vshll.u32 %v11383_v41, %v11488_v44 }
 0x10f   : > { %v533_v43 = vor.u32 4788187, %v532_v15  ;;  %v1198_v29 = vsel %vm1197_vm2, %v1196_v13, 0  ;;  %v684_v54 = vsub.s32 4294967266, %v11588_v60  ;;  %v1081_v1 = vand.u32 65535, %v11585_v18 }
 0x110   : > { %v1106_v55 = vshrl.u32 %v11595_v36, 16  ;;  %v529_v25 = vor.u32 %v528_v12, %v527_v56  ;;  %v828_v7 = vsub.s32 0, %v11591_v48  ;;  %v977_v63 = vadd.s32 536870912, %v976_v49 }
 0x111   : > { %vm827_vm3 = vcmp.lt.s32.totalorder %v11591_v48, 0  ;;  %v11605_v19 = vmul.u32 %v1084_v35, %v1081_v1  ;;  %v1200_v42 = vand.u32 31, %v1198_v29  ;;  %v534_v24 = vand.u32 2147483647, %v533_v43 }
 0x112   : > { %v680_v41 = vsub.s32 32, %v11588_v60  ;;  %v664_v44 = vadd.s32 %v11312_v5, %v11303_v28  ;;  %v685_v6 = vadd.s32 127, %v684_v54  ;;  %v1083_v17 = vand.u32 65535, %v11583_v31 }
 0x113   : > { %v11611_v34 = vmul.u32 %v1106_v55, %v1081_v1  ;;  %v536_v13 = vcvt.s32.f32 %v529_v25  ;;  %v829_v58 = vsel %vm827_vm3, %v828_v7, %v11591_v48  ;;  %v11614_v32 = vshrl.u32 %v977_v63, 30 }
 0x114   : > { %v1105_v61 = vand.u32 65535, %v11595_v36  ;;  %v1089_v11 = vshll.u32 %v11605_v19, 16  ;;  %v11618_v2 = vsub.s32 32, %v1200_v42  ;;  %v681_v28 = vshll.u32 %v11445_v39, %v11588_v60 }
 0x115   : > { %v11620_v15 = vmul.f32 %v536_v13, %v534_v24  ;;  %v682_v5 = vshrl.u32 %v664_v44, %v680_v41  ;;  %v1082_v59 = vshrl.u32 %v11585_v18, 16  ;;  %v686_v31 = vshll.u32 %v685_v6, 23 }
 0x116   : > { %v830_v12 = vclz %v829_v58  ;;  %v1085_v56 = vmul.u32 %v1083_v17, %v1081_v1  ;;  %v1111_v43 = vshll.u32 %v11611_v34, 16  ;;  %v979_v54 = vshll.u32 %v11614_v32, 30 }
 0x117   : > { %v1107_v36 = vmul.u32 %v1105_v61, %v1081_v1  ;;  %v11627_v25 = vmul.u32 %v1105_v61, %v1082_v59  ;;  %v17865_v7 = vand.u32 2147483647, %v11495_v23  ;;  %v11630_v63 = vmul.u32 %v1083_v17, %v1082_v59 }
 0x118   : > { %vm11632_vm4 = vc.u32 %v1085_v56, %v1089_v11  ;;  %v1212_v39 = vshll.u32 %v17868_v57, %v1200_v42  ;;  %v1213_v60 = vshrl.u32 %v17858_v45, %v11618_v2  ;;  %v1095_v41 = vadd.s32 %v1089_v11, %v1085_v56 }
 0x119   : > { %v11639_v44 = vshrl.u32 %v1198_v29, 5  ;;  %v1215_v1 = vshll.u32 %v17858_v45, %v1200_v42  ;;  %v1216_v6 = vshrl.u32 %v17856_v47, %v11618_v2  ;;  %vm1115_vm10 = vc.u32 %v1107_v36, %v1111_v43 }
 0x11a   : > { %v11644_v17 = vadd.s32 %v1111_v43, %v1107_v36  ;;  %v1203_v13 = vshll.u32 %v17861_v62, %v1200_v42  ;;  %v1206_v58 = vshll.u32 %v17866_v51, %v1200_v42  ;;  %v1204_v61 = vshrl.u32 %v17866_v51, %v11618_v2 }
 0x11b   : > { %v1207_v11 = vshrl.u32 %v17863_v53, %v11618_v2  ;;  %v1209_v29 = vshll.u32 %v17863_v53, %v1200_v42  ;;  %v1210_v56 = vshrl.u32 %v17868_v57, %v11618_v2  ;;  %v11655_v10 = vsub.s32 %v976_v49, %v979_v54 }
 0x11c   : > { %v1091_v43 = vshll.u32 %v11630_v63, 16  ;;  %v1113_v36 = vshll.u32 %v11627_v25, 16  ;;  %v1214_v47 = vor.u32 %v1213_v60, %v1212_v39  ;;  %v1088_v45 = vmul.u32 %v1084_v35, %v1082_v59 }
 0x11d   : > { %v1116_v26 = vsel %vm1115_vm10, 1, %v17870_v20  ;;  %v1217_v62 = vor.u32 %v1216_v6, %v1215_v1  ;;  %vm1221_vm5 = vcmp.lt.s32.totalorder %v11639_v44, 4  ;;  %v1094_v42 = vsel %vm11632_vm4, 1, %v17870_v20 }
 0x11e   : > { %vm11664_vm13 = vc.u32 %v1095_v41, %v1091_v43  ;;  %v1110_v49 = vmul.u32 %v1106_v55, %v1082_v59  ;;  %vm1119_vm11 = vc.u32 %v11644_v17, %v1113_v36  ;;  %v1193_v35 = vand.u32 8388607, %v17865_v7 }
 0x11f   : > { %v11673_v54 = vor.u32 %v1204_v61, %v1203_v13  ;;  %v11675_v39 = vor.u32 %v1207_v11, %v1206_v58  ;;  %v11677_v60 = vor.u32 %v1210_v56, %v1209_v29  ;;  %vm1218_vm7 = vcmp.lt.s32.totalorder %v11639_v44, 1 }
 0x120   : > { %v1118_v24 = vadd.s32 %v1116_v26, %v1110_v49  ;;  %vm1220_vm9 = vcmp.lt.s32.totalorder %v11639_v44, 3  ;;  %v1227_v55 = vsel %vm1221_vm5, %v1214_v47, 920167782  ;;  %v687_v59 = vor.u32 4788187, %v686_v31 }
 0x121   : > { %v1096_v41 = vadd.s32 %v1094_v42, %v1088_v45  ;;  %v1120_v1 = vsel %vm1119_vm11, 1, %v17870_v20  ;;  %v1231_v6 = vsel %vm1221_vm5, %v1217_v62, 1326507024  ;;  %v538_v13 = vxor.u32 2147483648, %v11620_v15 }
 0x122   : > { %v683_v58 = vor.u32 %v682_v5, %v681_v28  ;;  %v1098_v26 = vsel %vm11664_vm13, 1, %v17870_v20  ;;  %v10560_v61 = vadd.s32 4294967294, %v830_v12  ;;  %v1194_v11 = vor.u32 8388608, %v1193_v35 }
 0x123   : > { %v1226_v31 = vsel %vm1218_vm7, %v11673_v54, %v11675_v39  ;;  %v1228_v45 = vsel %vm1220_vm9, %v11677_v60, %v1227_v55  ;;  %v982_v62 = vsub.s32 0, %v11655_v10  ;;  %v1122_v29 = vadd.s32 %v1120_v1, %v1118_v24 }
 0x124   : > { %v1230_v53 = vsel %vm1218_vm7, %v11675_v39, %v11677_v60  ;;  %v1232_v28 = vsel %vm1220_vm9, %v1214_v47, %v1231_v6  ;;  %v688_v5 = vand.u32 2147483647, %v687_v59  ;;  %vm981_vm12 = vcmp.lt.s32.totalorder %v11655_v10, 0 }
 0x125   : > { %v1100_v12 = vadd.s32 %v1098_v26, %v1096_v41  ;;  %vm1219_vm15 = vcmp.lt.s32.totalorder %v11639_v44, 2  ;;  %vm418_vm0 = vcmp.lt.s32.totalorder %v11020_v33, 0  ;;  %v690_v56 = vcvt.s32.f32 %v683_v58 }
 0x126   : > { %v1112_v43 = vshrl.u32 %v11611_v34, 16  ;;  %v11710_v42 = vsel %vm1219_vm15, %v1226_v31, %v1228_v45  ;;  %vm10561_vm2 = vcmp.lt.s32.totalorder %v10560_v61, 0  ;;  %v1090_v49 = vshrl.u32 %v11605_v19, 16 }
 0x127   : > { %v11715_v47 = vsel %vm1219_vm15, %v1230_v53, %v1232_v28  ;;  %v11717_v35 = vshll.u32 %v1194_v11, 8  ;;  %v539_v24 = vsel %vm418_vm0, %v538_v13, %v11620_v15  ;;  %v983_v55 = vsel %vm981_vm12, %v982_v62, %v11655_v10 }
 0x128   : > { %v1123_v34 = vadd.s32 %v1122_v29, %v1112_v43  ;;  %vm11725_vm3 = vcmp.le.f32.partialorder %v416_v50, 0.7853982  ;;  %v691_v19 = vmul.f32 %v690_v56, %v688_v5  ;;  %v1101_v41 = vadd.s32 %v1100_v12, %v1090_v49 }
 0x129   : > { %v1260_v1 = vshrl.u32 %v11710_v42, 16  ;;  %v11730_v6 = vsel %vm10561_vm2, 0, %v10560_v61  ;;  %v18259_v58 = vmov 683565275   ;;  %v1114_v15 = vshrl.u32 %v11627_v25, 16 }
 0x12a   : > { %v1048_v26 = vshrl.u32 %v18259_v58, %v11493_v3  ;;  %v1238_v13 = vshrl.u32 %v11715_v47, 16  ;;  %v11739_v50 = vsel %vm11725_vm3, %v11020_v33, %v539_v24  ;;  %v984_v11 = vclz %v983_v55 }
 0x12b   : > { %v1092_v31 = vshrl.u32 %v11630_v63, 16  ;;  %v1235_v45 = vand.u32 65535, %v11717_v35  ;;  %v1069_v61 = vsel %vm1067_vm6, %v11547_v30, 2102212464  ;;  %v1124_v62 = vadd.s32 %v1123_v34, %v1114_v15  ;;  %v11787_v15 = vpop.f32.mrf.mxu0 }
 0x12c   : > { %v838_v3 = vsub.s32 4294967266, %v11730_v6  ;;  %v11753_v28 = vmul.f32 %v11739_v50, %v11739_v50  ;;  %v692_v5 = vxor.u32 2147483648, %v691_v19  ;;  %v1068_v63 = vsel %vm1064_vm8, %v1048_v26, %v11554_v40  ;;  %18263 = vst [vmem:[#allocation11_spill] sm:$0xff] %v11787_v15 }
 0x12d   : > { %v11747_v29 = vadd.s32 %v1101_v41, %v1092_v31  ;;  %v11749_v53 = vmul.u32 %v1260_v1, %v1235_v45  ;;  %v11758_v12 = vmul.u32 %v1238_v13, %v1235_v45  ;;  %v10563_v56 = vadd.s32 4294967294, %v984_v11 }
 0x12e   : > { %v1070_v30 = vsel %vm1066_vm14, %v11545_v37, %v1069_v61  ;;  %v11766_v43 = vadd.s32 %v11644_v17, %v1113_v36  ;;  %v1259_v49 = vand.u32 65535, %v11710_v42  ;;  %v18260_v24 = vand.u32 2147483647, %v11023_v38 }
 0x12f   : > { %vm572_vm8 = vcmp.lt.s32.totalorder %v11023_v38, 0  ;;  %v1128_v40 = vadd.s32 1, %v1124_v62  ;;  %v1237_v34 = vand.u32 65535, %v11715_v47  ;;  %v839_v41 = vadd.s32 127, %v838_v3 }
 0x130   : > { %vm11771_vm6 = vcmp.le.f32.partialorder %v18260_v24, 0.7853982  ;;  %vm1127_vm14 = vc.u32 %v11747_v29, %v11766_v43  ;;  %v1236_v37 = vshrl.u32 %v11717_v35, 16  ;;  %v1265_v25 = vshll.u32 %v11749_v53, 16 }
 0x131   : > { %v545_v17 = vmul.f32 -0.001358992, %v11753_v28  ;;  %v818_v36 = vadd.s32 %v11470_v0, %v11459_v9  ;;  %v1071_v42 = vsel %vm1065_vm1, %v1068_v63, %v1070_v30  ;;  %v1243_v26 = vshll.u32 %v11758_v12, 16 }
 0x132   : > { %v693_v47 = vsel %vm572_vm8, %v692_v5, %v691_v19  ;;  %vm10564_vm4 = vcmp.lt.s32.totalorder %v10563_v56, 0  ;;  %v1261_v11 = vmul.u32 %v1259_v49, %v1235_v45  ;;  %v11791_v31 = vmul.u32 %v1259_v49, %v1236_v37 }
 0x133   : > { %v834_v61 = vsub.s32 32, %v11730_v6  ;;  %v1129_v3 = vsel %vm1127_vm14, %v1128_v40, %v1124_v62  ;;  %v1239_v24 = vmul.u32 %v1237_v34, %v1235_v45  ;;  %v11794_v7 = vmul.u32 %v1237_v34, %v1236_v37 }
 0x134   : > { %v840_v9 = vshll.u32 %v839_v41, 23  ;;  %v1125_v0 = vmul.u32 %v11585_v18, %v1071_v42  ;;  %vm1269_vm1 = vc.u32 %v1261_v11, %v1265_v25  ;;  %v11797_v4 = vadd.s32 %v1265_v25, %v1261_v11 }
 0x135   : > { %v11799_v63 = vsel %vm10564_vm4, 0, %v10563_v56  ;;  %vm1247_vm10 = vc.u32 %v1239_v24, %v1243_v26  ;;  %v1249_v19 = vadd.s32 %v1243_v26, %v1239_v24  ;;  %v1343_v5 = vand.u32 2139095040, %v11787_v15 }
 0x136   : > { %v552_v30 = vmul.f32 -0.00019511016, %v11753_v28  ;;  %v11806_v45 = vsel %vm11771_vm6, %v11023_v38, %v693_v47  ;;  %v1130_v62 = vadd.s32 %v1129_v3, %v1125_v0  ;;  %v1267_v49 = vshll.u32 %v11791_v31, 16 }
 0x137   : > { %v835_v18 = vshll.u32 %v11591_v48, %v11730_v6  ;;  %v836_v40 = vshrl.u32 %v818_v36, %v834_v61  ;;  %v1245_v56 = vshll.u32 %v11794_v7, 16  ;;  %v1270_v34 = vsel %vm1269_vm1, 1, %v17870_v20 }
 0x138   : > { %v992_v41 = vsub.s32 4294967266, %v11799_v63  ;;  %v1248_v25 = vsel %vm1247_vm10, 1, %v17870_v20  ;;  %v1264_v42 = vmul.u32 %v1260_v1, %v1236_v37  ;;  %vm1273_vm13 = vc.u32 %v11797_v4, %v1267_v49 }
 0x139   : > { %v841_v26 = vor.u32 4788187, %v840_v9  ;;  %v1242_v47 = vmul.u32 %v1238_v13, %v1236_v37  ;;  %vm1251_vm11 = vc.u32 %v1249_v19, %v1245_v56  ;;  %v1344_v11 = vshrl.u32 %v1343_v5, 23 }
 0x13a   : > { %v546_v3 = vadd.f32 0.041655596, %v545_v17  ;;  %v1131_v48 = vadd.s32 536870912, %v1130_v62  ;;  %v1272_v6 = vadd.s32 %v1270_v34, %v1264_v42  ;;  %v553_v36 = vadd.f32 0.008332121, %v552_v30 }
 0x13b   : > { %v837_v61 = vor.u32 %v836_v40, %v835_v18  ;;  %v1250_v24 = vadd.s32 %v1248_v25, %v1242_v47  ;;  %v1274_v0 = vsel %vm1273_vm13, 1, %v17870_v20  ;;  %v11821_v51 = vmul.f32 %v11806_v45, %v11806_v45 }
 0x13c   : > { %v993_v1 = vadd.s32 127, %v992_v41  ;;  %v1252_v57 = vsel %vm1251_vm11, 1, %v17870_v20  ;;  %v540_v9 = vsub.s32 4, %v11325_v27  ;;  %v842_v13 = vand.u32 2147483647, %v841_v26 }
 0x13d   : > { %v10571_v37 = vadd.s32 4294967169, %v1344_v11  ;;  %v988_v17 = vsub.s32 32, %v11799_v63  ;;  %v11826_v19 = vshrl.u32 %v1131_v48, 30  ;;  %v1276_v5 = vadd.s32 %v1274_v0, %v1272_v6 }
 0x13e   : > { %v547_v30 = vmul.f32 %v546_v3, %v11753_v28  ;;  %v554_v18 = vmul.f32 %v553_v36, %v11753_v28  ;;  %v844_v40 = vcvt.s32.f32 %v837_v61  ;;  %v1254_v56 = vadd.s32 %v1252_v57, %v1250_v24 }
 0x13f   : > { %v706_v34 = vmul.f32 -0.00019511016, %v11821_v51  ;;  %vm726_vm12 = vcmp.lt.s32.totalorder %v11089_v21, 0  ;;  %v972_v41 = vadd.s32 %v11541_v52, %v11538_v14  ;;  %v994_v25 = vshll.u32 %v993_v1, 23 }
 0x140   : > { %v1266_v42 = vshrl.u32 %v11749_v53, 16  ;;  %v541_v26 = vsel %vm418_vm0, %v540_v9, %v11325_v27  ;;  %v845_v47 = vmul.f32 %v844_v40, %v842_v13  ;;  %v1244_v11 = vshrl.u32 %v11758_v12, 16 }
 0x141   : > { %v1350_v3 = vadd.s32 1, %v10571_v37  ;;  %v694_v57 = vsub.s32 4, %v11427_v16  ;;  %v990_v48 = vshrl.u32 %v972_v41, %v988_v17  ;;  %v1133_v6 = vshll.u32 %v11826_v19, 30 }
 0x142   : > { %v1277_v36 = vadd.s32 %v1276_v5, %v1266_v42  ;;  %v548_v61 = vadd.f32 -0.4999988, %v547_v30  ;;  %v555_v24 = vadd.f32 -0.16666654, %v554_v18  ;;  %v699_v14 = vmul.f32 -0.001358992, %v11821_v51 }
 0x143   : > { %v1255_v52 = vadd.s32 %v1254_v56, %v1244_v11  ;;  %v707_v53 = vadd.f32 0.008332121, %v706_v34  ;;  %v989_v0 = vshll.u32 %v11655_v10, %v11799_v63  ;;  %v995_v27 = vor.u32 4788187, %v994_v25 }
 0x144   : > { %v1268_v1 = vshrl.u32 %v11791_v31, 16  ;;  %v846_v12 = vxor.u32 2147483648, %v845_v47  ;;  %v1202_v9 = vshrl.u32 %v18259_v58, %v11618_v2  ;;  %v1246_v13 = vshrl.u32 %v11794_v7, 16 }
 0x145   : > { %vm1351_vm0 = vcmp.gt.s32.totalorder %v1350_v3, 0  ;;  %v991_v37 = vor.u32 %v990_v48, %v989_v0  ;;  %v11848_v17 = vsub.s32 %v1130_v62, %v1133_v6  ;;  %v1223_v5 = vsel %vm1221_vm5, %v11677_v60, 2102212464 }
 0x146   : > { %v1278_v30 = vadd.s32 %v1277_v36, %v1268_v1  ;;  %v11855_v10 = vsel %vm11725_vm3, 0, %v541_v26  ;;  %v549_v63 = vmul.f32 %v548_v61, %v11753_v28  ;;  %v695_v2 = vsel %vm572_vm8, %v694_v57, %v11427_v16 }
 0x147   : > { %18264 = vst [vmem:[#allocation12_spill] sm:$0xff] %v11855_v10  ;;  %v11861_v7 = vadd.s32 %v1255_v52, %v1246_v13  ;;  %v556_v62 = vmul.f32 %v555_v24, %v11753_v28  ;;  %v700_v18 = vadd.f32 0.041655596, %v699_v14  ;;  %v996_v40 = vand.u32 2147483647, %v995_v27 }
 0x148   : > { %v1352_v56 = vsel %vm1351_vm0, %v1350_v3, 0  ;;  %v847_v60 = vsel %vm726_vm12, %v846_v12, %v845_v47  ;;  %v1222_v59 = vsel %vm1218_vm7, %v1202_v9, %v11673_v54  ;;  %v1224_v34 = vsel %vm1220_vm9, %v11675_v39, %v1223_v5 }
 0x149   : > { %v11875_v16 = vadd.s32 %v11797_v4, %v1267_v49  ;;  %v708_v28 = vmul.f32 %v707_v53, %v11821_v51  ;;  %v998_v41 = vcvt.s32.f32 %v991_v37  ;;  %v1136_v25 = vsub.s32 0, %v11848_v17 }
 0x14a   : > { %v1282_v42 = vadd.s32 1, %v1278_v30  ;;  %v18265_v26 = vand.u32 2147483647, %v11089_v21  ;;  %vm1135_vm7 = vcmp.lt.s32.totalorder %v11848_v17, 0  ;;  %v1354_v54 = vand.u32 31, %v1352_v56 }
 0x14b   : > { %vm1281_vm9 = vc.u32 %v11861_v7, %v11875_v16  ;;  %v11889_v39 = vand.u32 3, %v11855_v10  ;;  %v999_v4 = vmul.f32 %v998_v41, %v996_v40  ;;  %v1225_v49 = vsel %vm1219_vm15, %v1222_v59, %v1224_v34 }
 0x14c   : > { %vm11881_vm5 = vcmp.le.f32.partialorder %v18265_v26, 0.7853982  ;;  %v11898_v11 = vadd.f32 1.0, %v549_v63  ;;  %v557_v3 = vadd.f32 1.0, %v556_v62  ;;  %v11902_v57 = vsel %vm11771_vm6, 0, %v695_v2 }
 0x14d   : > { %v11894_v31 = vsel %vm11881_vm5, %v11089_v21, %v847_v60  ;;  %18269 = vst [vmem:[#allocation14_spill] sm:$0xff] %v11902_v57  ;;  %v701_v48 = vmul.f32 %v700_v18, %v11821_v51  ;;  %v709_v6 = vadd.f32 -0.16666654, %v708_v28  ;;  %v1137_v36 = vsel %vm1135_vm7, %v1136_v25, %v11848_v17 }
 0x14e   : > { %18268 = vst [vmem:[#allocation13_spill] sm:$0xff] %v11898_v11  ;;  %v1283_v61 = vsel %vm1281_vm9, %v1282_v42, %v1278_v30  ;;  %v11908_v24 = vmul.f32 %v11894_v31, %v11894_v31  ;;  %v1279_v44 = vmul.u32 %v11717_v35, %v1225_v49  ;;  %v11911_v14 = vsub.s32 32, %v1354_v54 }
 0x14f   : > { %vm565_vm15 = vcmp.eq.s32.totalorder %v11889_v39, 2  ;;  %vm880_vm2 = vcmp.lt.s32.totalorder %v11173_v22, 0  ;;  %v1000_v55 = vxor.u32 2147483648, %v999_v4  ;;  %v11916_v52 = vand.u32 3, %v11902_v57 }
 0x150   : > { %v18270_v53 = vand.u32 2147483647, %v11173_v22  ;;  %v1138_v27 = vclz %v1137_v36  ;;  %v11924_v1 = vadd.s32 %v1283_v61, %v1279_v44  ;;  %v11927_v35 = vmul.f32 %v557_v3, %v11739_v50  ;;  %v11962_v44 = vpop.f32.mrf.mxu0 }
 0x151   : > { %v17872_v12 = vxor.u32 2147483648, %v11898_v11  ;;  %v702_v9 = vadd.f32 -0.4999988, %v701_v48  ;;  %v710_v13 = vmul.f32 %v709_v6, %v11821_v51  ;;  %vm562_vm6 = vcmp.eq.s32.totalorder %v11889_v39, 0  ;;  %18279 = vst [vmem:[#allocation16_spill] sm:$0xff] %v11962_v44 }
 0x152   : > { %vm11920_vm3 = vcmp.le.f32.partialorder %v18270_v53, 0.7853982  ;;  %18273 = vst [vmem:[#allocation15_spill] sm:$0xff] %v11927_v35  ;;  %v860_v37 = vmul.f32 -0.00019511016, %v11908_v24  ;;  %v1001_v50 = vsel %vm880_vm2, %v1000_v55, %v999_v4  ;;  %v11939_v18 = vshrl.u32 %v1352_v56, 5 }
 0x153   : > { %v17873_v5 = vand.u32 2147483647, %v11787_v15  ;;  %v18274_v30 = vmov 2102212464   ;;  %v18275_v2 = vmov 920167782   ;;  %v1357_v41 = vshll.u32 %v18259_v58, %v1354_v54 }
 0x154   : > { %v1366_v63 = vshll.u32 %v18274_v30, %v1354_v54  ;;  %v1367_v62 = vshrl.u32 %v18275_v2, %v11911_v14  ;;  %v1369_v40 = vshll.u32 %v18275_v2, %v1354_v54  ;;  %v18276_v60 = vmov 1326507024  }
 0x155   : > { %v1370_v59 = vshrl.u32 %v18276_v60, %v11911_v14  ;;  %v10566_v34 = vadd.s32 4294967294, %v1138_v27  ;;  %v1285_v28 = vadd.s32 536870912, %v11924_v1  ;;  %v18277_v25 = vmov 2475754826  }
 0x156   : > { %v1360_v42 = vshll.u32 %v18277_v25, %v1354_v54  ;;  %v1358_v26 = vshrl.u32 %v18277_v25, %v11911_v14  ;;  %v18278_v49 = vmov 2131351028   ;;  %v1364_v3 = vshrl.u32 %v18274_v30, %v11911_v14 }
 0x157   : > { %v1361_v4 = vshrl.u32 %v18278_v49, %v11911_v14  ;;  %v1363_v56 = vshll.u32 %v18278_v49, %v1354_v54  ;;  %vm561_vm8 = vcmp.lt.s32.totalorder %v11889_v39, 2  ;;  %v567_v6 = vsel %vm565_vm15, %v17872_v12, %v11927_v35 }
 0x158   : > { %v703_v36 = vmul.f32 %v702_v9, %v11821_v51  ;;  %v1368_v61 = vor.u32 %v1367_v62, %v1366_v63  ;;  %v711_v55 = vadd.f32 1.0, %v710_v13  ;;  %v861_v54 = vadd.f32 0.008332121, %v860_v37 }
 0x159   : > { %v1371_v53 = vor.u32 %v1370_v59, %v1369_v40  ;;  %vm1375_vm14 = vcmp.lt.s32.totalorder %v11939_v18, 4  ;;  %v853_v27 = vmul.f32 -0.001358992, %v11908_v24  ;;  %v11969_v20 = vsel %vm11920_vm3, %v11173_v22, %v1001_v50 }
 0x15a   : > { %vm10567_vm4 = vcmp.lt.s32.totalorder %v10566_v34, 0  ;;  %v11971_v48 = vshrl.u32 %v1285_v28, 30  ;;  %v1347_v51 = vand.u32 8388607, %v17873_v5  ;;  %v11975_v9 = vor.u32 %v1358_v26, %v1357_v41 }
 0x15b   : > { %v11977_v13 = vor.u32 %v1361_v4, %v1360_v42  ;;  %v11979_v37 = vor.u32 %v1364_v3, %v1363_v56  ;;  %vm559_vm1 = vweird.f32 %v11020_v33  ;;  %vm1372_vm10 = vcmp.lt.s32.totalorder %v11939_v18, 1 }
 0x15c   : > { %18280 = vst [vmem:[#allocation17_spill] sm:$0xff] %v11971_v48  ;;  %vm1374_vm13 = vcmp.lt.s32.totalorder %v11939_v18, 3  ;;  %v1381_v63 = vsel %vm1375_vm14, %v1368_v61, 920167782  ;;  %v1497_v62 = vand.u32 2139095040, %v11962_v44  ;;  %v18281_v50 = vxor.u32 2147483648, %v11927_v35 }
 0x15d   : > { %v848_v59 = vsub.s32 4, %v11525_v8  ;;  %v862_v28 = vmul.f32 %v861_v54, %v11908_v24  ;;  %v1385_v41 = vsel %vm1375_vm14, %v1371_v53, 1326507024  ;;  %v11996_v42 = vadd.f32 1.0, %v703_v36 }
 0x15e   : > { %v564_v40 = vsel %vm562_vm6, %v11898_v11, %v18281_v50  ;;  %v11999_v26 = vmul.f32 %v711_v55, %v11806_v45  ;;  %v12003_v4 = vmul.f32 %v11969_v20, %v11969_v20  ;;  %v1287_v56 = vshll.u32 %v11971_v48, 30 }
 0x15f   : > { %18282 = vst [vmem:[#allocation18_spill] sm:$0xff] %v11996_v42  ;;  %vm716_vm11 = vcmp.eq.s32.totalorder %v11916_v52, 0  ;;  %v12008_v3 = vsel %vm10567_vm4, 0, %v10566_v34  ;;  %v1348_v54 = vor.u32 8388608, %v1347_v51  ;;  %v1380_v36 = vsel %vm1372_vm10, %v11975_v9, %v11977_v13 }
 0x160   : > { %18283 = vst [vmem:[#allocation19_spill] sm:$0xff] %v11999_v26  ;;  %v1382_v45 = vsel %vm1374_vm13, %v11979_v37, %v1381_v63  ;;  %v854_v55 = vadd.f32 0.041655596, %v853_v27  ;;  %v1384_v53 = vsel %vm1372_vm10, %v11977_v13, %v11979_v37  ;;  %v1386_v34 = vsel %vm1374_vm13, %v1368_v61, %v1385_v41 }
 0x161   : > { %v1498_v50 = vshrl.u32 %v1497_v62, 23  ;;  %v568_v51 = vsel %vm561_vm8, %v564_v40, %v567_v6  ;;  %v849_v12 = vsel %vm726_vm12, %v848_v59, %v11525_v8  ;;  %v863_v5 = vadd.f32 -0.16666654, %v862_v28 }
 0x162   : > { %vm1373_vm0 = vcmp.lt.s32.totalorder %v11939_v18, 2  ;;  %vm715_vm7 = vcmp.lt.s32.totalorder %v11916_v52, 2  ;;  %v1007_v27 = vmul.f32 -0.001358992, %v12003_v4  ;;  %v1146_v63 = vsub.s32 4294967266, %v12008_v3 }
 0x163   : > { %v12033_v11 = vsub.s32 %v11924_v1, %v1287_v56  ;;  %v12037_v39 = vsel %vm1373_vm0, %v1380_v36, %v1382_v45  ;;  %v17876_v6 = vxor.u32 2147483648, %v11996_v42  ;;  %v1014_v8 = vmul.f32 -0.00019511016, %v12003_v4 }
 0x164   : > { %v12043_v61 = vsel %vm1373_vm0, %v1384_v53, %v1386_v34  ;;  %v12045_v62 = vshll.u32 %v1348_v54, 8  ;;  %v17880_v40 = vxor.u32 2147483648, %v11999_v26  ;;  %vm719_vm12 = vcmp.eq.s32.totalorder %v11916_v52, 2 }
 0x165   : > { %v855_v1 = vmul.f32 %v854_v55, %v11908_v24  ;;  %v10574_v59 = vadd.s32 4294967169, %v1498_v50  ;;  %v12052_v28 = vsel %vm559_vm1, nan, %v568_v51  ;;  %v12056_v41 = vsel %vm11881_vm5, 0, %v849_v12 }
 0x166   : > { %18284 = vst [vmem:[#allocation20_spill] sm:$0xff] %v12052_v28  ;;  %v864_v56 = vmul.f32 %v863_v5, %v11908_v24  ;;  %v17883_v54 = vshrl.u32 %v12037_v39, 16  ;;  %v1008_v36 = vadd.f32 0.041655596, %v1007_v27  ;;  %v1147_v45 = vadd.s32 127, %v1146_v63 }
 0x167   : > { %18285 = vst [vmem:[#allocation21_spill] sm:$0xff] %v12056_v41  ;;  %v1290_v53 = vsub.s32 0, %v12033_v11  ;;  %v721_v55 = vsel %vm719_vm12, %v17876_v6, %v11999_v26  ;;  %v1015_v50 = vadd.f32 0.008332121, %v1014_v8  ;;  %vm1289_vm9 = vcmp.lt.s32.totalorder %v12033_v11, 0 }
 0x168   : > { %v1389_v47 = vand.u32 65535, %v12045_v62  ;;  %v718_v12 = vsel %vm716_vm11, %v11996_v42, %v17880_v40  ;;  %v856_v5 = vadd.f32 -0.4999988, %v855_v1  ;;  %v1142_v51 = vsub.s32 32, %v12008_v3 }
 0x169   : > { %v1504_v27 = vadd.s32 1, %v10574_v59  ;;  %v865_v63 = vadd.f32 1.0, %v864_v56  ;;  %v12074_v34 = vand.u32 3, %v12056_v41  ;;  %v1126_v8 = vadd.s32 %v11766_v43, %v11747_v29 }
 0x16a   : > { %v12080_v6 = vmul.u32 %v17883_v54, %v1389_v47  ;;  %v1009_v33 = vmul.f32 %v1008_v36, %v12003_v4  ;;  %v1148_v26 = vshll.u32 %v1147_v45, 23  ;;  %v1291_v40 = vsel %vm1289_vm9, %v1290_v53, %v12033_v11 }
 0x16b   : > { %v18286_v1 = vshrl.u32 %v12043_v61, 16  ;;  %v12090_v59 = vsel %vm715_vm7, %v718_v12, %v721_v55  ;;  %v1002_v56 = vsub.s32 4, %v11614_v32  ;;  %v1016_v29 = vmul.f32 %v1015_v50, %v12003_v4 }
 0x16c   : > { %v1413_v43 = vand.u32 65535, %v12037_v39  ;;  %v857_v54 = vmul.f32 %v856_v5, %v11908_v24  ;;  %v1144_v36 = vshrl.u32 %v1126_v8, %v1142_v51  ;;  %v1391_v45 = vand.u32 65535, %v12043_v61 }
 0x16d   : > { %v12086_v42 = vmul.u32 %v18286_v1, %v1389_v47  ;;  %vm1505_vm5 = vcmp.gt.s32.totalorder %v1504_v27, 0  ;;  %v12098_v53 = vmul.f32 %v865_v63, %v11894_v31  ;;  %v1292_v1 = vclz %v1291_v40 }
 0x16e   : > { %v1390_v52 = vshrl.u32 %v12045_v62, 16  ;;  %v1419_v55 = vshll.u32 %v12080_v6, 16  ;;  %vm870_vm15 = vcmp.eq.s32.totalorder %v12074_v34, 0  ;;  %v1010_v12 = vadd.f32 -0.4999988, %v1009_v33  ;;  %v12113_v33 = vpop.f32.mrf.mxu1 }
 0x16f   : > { %18287 = vst [vmem:[#allocation22_spill] sm:$0xff] %v12098_v53  ;;  %v1143_v50 = vshll.u32 %v11848_v17, %v12008_v3  ;;  %v1149_v35 = vor.u32 4788187, %v1148_v26  ;;  %v1397_v24 = vshll.u32 %v12086_v42, 16  ;;  %v1017_v5 = vadd.f32 -0.16666654, %v1016_v29 }
 0x170   : > { %v1415_v51 = vmul.u32 %v1413_v43, %v1389_v47  ;;  %v12106_v8 = vmul.u32 %v1413_v43, %v1390_v52  ;;  %v1506_v31 = vsel %vm1505_vm5, %v1504_v27, 0  ;;  %v1003_v40 = vsel %vm880_vm2, %v1002_v56, %v11614_v32  ;;  %18288 = vst [vmem:[#allocation23_spill] sm:$0xff] %v12113_v33 }
 0x171   : > { %v1145_v63 = vor.u32 %v1144_v36, %v1143_v50  ;;  %v1393_v41 = vmul.u32 %v1391_v45, %v1389_v47  ;;  %v12111_v57 = vmul.u32 %v1391_v45, %v1390_v52  ;;  %v12115_v10 = vadd.f32 1.0, %v857_v54 }
 0x172   : > { %v10569_v17 = vadd.s32 4294967294, %v1292_v1  ;;  %vm1423_vm6 = vc.u32 %v1415_v51, %v1419_v55  ;;  %v12117_v26 = vadd.s32 %v1419_v55, %v1415_v51  ;;  %v1150_v3 = vand.u32 2147483647, %v1149_v35 }
 0x173   : > { %18289 = vst [vmem:[#allocation24_spill] sm:$0xff] %v12115_v10  ;;  %vm1401_vm8 = vc.u32 %v1393_v41, %v1397_v24  ;;  %v1403_v29 = vadd.s32 %v1397_v24, %v1393_v41  ;;  %v1508_v27 = vand.u32 31, %v1506_v31  ;;  %v17889_v43 = vxor.u32 2147483648, %v12098_v53 }
 0x174   : > { %v1011_v32 = vmul.f32 %v1010_v12, %v12003_v4  ;;  %v1018_v47 = vmul.f32 %v1017_v5, %v12003_v4  ;;  %v17890_v56 = vshll.u32 %v12106_v8, 16  ;;  %v1152_v36 = vcvt.s32.f32 %v1145_v63 }
 0x175   : > { %v1399_v54 = vshll.u32 %v12111_v57, 16  ;;  %v18290_v45 = vmov 0   ;;  %v1651_v55 = vand.u32 2139095040, %v12113_v33  ;;  %vm10570_vm2 = vcmp.lt.s32.totalorder %v10569_v17, 0 }
 0x176   : > { %v1424_v1 = vsel %vm1423_vm6, 1, %v18290_v45  ;;  %v1402_v35 = vsel %vm1401_vm8, 1, %v18290_v45  ;;  %v18291_v41 = vshrl.u32 %v12037_v39, 16  ;;  %vm1427_vm4 = vc.u32 %v12117_v26, %v17890_v56 }
 0x177   : > { %v12132_v4 = vmul.f32 %v1152_v36, %v1150_v3  ;;  %v18292_v12 = vshrl.u32 %v12043_v61, 16  ;;  %vm1405_vm11 = vc.u32 %v1403_v29, %v1399_v54  ;;  %v12136_v5 = vsub.s32 32, %v1508_v27 }
 0x178   : > { %v1418_v50 = vmul.u32 %v18291_v41, %v1390_v52  ;;  %v12143_v51 = vsel %vm870_vm15, %v12115_v10, %v17889_v43  ;;  %v12148_v63 = vsel %vm11920_vm3, 0, %v1003_v40  ;;  %v12150_v36 = vsel %vm10570_vm2, 0, %v10569_v17 }
 0x179   : > { %v1396_v24 = vmul.u32 %v18292_v12, %v1390_v52  ;;  %18293 = vst [vmem:[#allocation25_spill] sm:$0xff] %v12148_v63  ;;  %v1428_v52 = vsel %vm1427_vm4, 1, %v18290_v45  ;;  %v1652_v29 = vshrl.u32 %v1651_v55, 23  ;;  %v12153_v54 = vadd.f32 1.0, %v1011_v32 }
 0x17a   : > { %v1426_v3 = vadd.s32 %v1424_v1, %v1418_v50  ;;  %v1019_v41 = vadd.f32 1.0, %v1018_v47  ;;  %v1406_v43 = vsel %vm1405_vm11, 1, %v18290_v45  ;;  %v1154_v39 = vxor.u32 2147483648, %v12132_v4 }
 0x17b   : > { %v1404_v61 = vadd.s32 %v1402_v35, %v1396_v24  ;;  %18294 = vst [vmem:[#allocation26_spill] sm:$0xff] %v12153_v54  ;;  %v1523_v40 = vshll.u32 %v18275_v2, %v1508_v27  ;;  %v1524_v17 = vshrl.u32 %v18276_v60, %v12136_v5  ;;  %v1300_v1 = vsub.s32 4294967266, %v12150_v36 }
 0x17c   : > { %v1420_v55 = vshrl.u32 %v12080_v6, 16  ;;  %v1430_v32 = vadd.s32 %v1428_v52, %v1426_v3  ;;  %v12164_v35 = vshrl.u32 %v1506_v31, 5  ;;  %v1514_v50 = vshll.u32 %v18277_v25, %v1508_v27 }
 0x17d   : > { %v1408_v47 = vadd.s32 %v1406_v43, %v1404_v61  ;;  %v1517_v24 = vshll.u32 %v18278_v49, %v1508_v27  ;;  %v10577_v12 = vadd.s32 4294967169, %v1652_v29  ;;  %vm1034_vm3 = vcmp.lt.s32.totalorder %v11381_v46, 0 }
 0x17e   : > { %v1515_v56 = vshrl.u32 %v18278_v49, %v12136_v5  ;;  %v1518_v0 = vshrl.u32 %v18274_v30, %v12136_v5  ;;  %v1520_v28 = vshll.u32 %v18274_v30, %v1508_v27  ;;  %v1521_v6 = vshrl.u32 %v18275_v2, %v12136_v5 }
 0x17f   : > { %v1356_v31 = vshrl.u32 %v18259_v58, %v11911_v14  ;;  %v1377_v43 = vsel %vm1375_vm14, %v11979_v37, 2102212464  ;;  %v1398_v3 = vshrl.u32 %v12086_v42, 16  ;;  %v1525_v61 = vor.u32 %v1524_v17, %v1523_v40 }
 0x180   : > { %v1301_v52 = vadd.s32 127, %v1300_v1  ;;  %v1422_v29 = vshrl.u32 %v12106_v8, 16  ;;  %v1431_v15 = vadd.s32 %v1430_v32, %v1420_v55  ;;  %vm1529_vm7 = vcmp.lt.s32.totalorder %v12164_v35, 4 }
 0x181   : > { %v1409_v48 = vadd.s32 %v1408_v47, %v1398_v3  ;;  %v18295_v22 = vand.u32 2147483647, %v11962_v44  ;;  %v1511_v23 = vshll.u32 %v18259_v58, %v1508_v27  ;;  %v1658_v14 = vadd.s32 1, %v10577_v12 }
 0x182   : > { %vm873_vm12 = vcmp.eq.s32.totalorder %v12074_v34, 2  ;;  %v18296_v37 = vand.u32 2147483647, %v11381_v46  ;;  %v1512_v40 = vshrl.u32 %v18277_v25, %v12136_v5  ;;  %v12196_v17 = vor.u32 %v1515_v56, %v1514_v50 }
 0x183   : > { %v1501_v45 = vand.u32 8388607, %v18295_v22  ;;  %v12198_v1 = vor.u32 %v1518_v0, %v1517_v24  ;;  %v1522_v55 = vor.u32 %v1521_v6, %v1520_v28  ;;  %vm869_vm9 = vcmp.lt.s32.totalorder %v12074_v34, 2 }
 0x184   : > { %vm12190_vm14 = vcmp.le.f32.partialorder %v18296_v37, 0.7853982  ;;  %v1400_v22 = vshrl.u32 %v12111_v57, 16  ;;  %vm1526_vm5 = vcmp.lt.s32.totalorder %v12164_v35, 1  ;;  %vm1528_vm15 = vcmp.lt.s32.totalorder %v12164_v35, 3 }
 0x185   : > { %v1539_v27 = vsel %vm1529_vm7, %v1525_v61, 1326507024  ;;  %v1280_v12 = vadd.s32 %v11875_v16, %v11861_v7  ;;  %v1296_v56 = vsub.s32 32, %v12150_v36  ;;  %v1376_v28 = vsel %vm1372_vm10, %v1356_v31, %v11975_v9 }
 0x186   : > { %v1432_v0 = vadd.s32 %v1431_v15, %v1422_v29  ;;  %v1302_v32 = vshll.u32 %v1301_v52, 23  ;;  %v1378_v57 = vsel %vm1374_vm13, %v11977_v13, %v1377_v43  ;;  %v12215_v47 = vadd.s32 %v1409_v48, %v1400_v22 }
 0x187   : > { %vm1659_vm6 = vcmp.gt.s32.totalorder %v1658_v14, 0  ;;  %vm17917_vm8 = vweird.f32 %v11023_v38  ;;  %v1502_v50 = vor.u32 8388608, %v1501_v45  ;;  %v12218_v24 = vor.u32 %v1512_v40, %v1511_v23 }
 0x188   : > { %v1538_v7 = vsel %vm1526_vm5, %v12196_v17, %v12198_v1  ;;  %v1540_v15 = vsel %vm1528_vm15, %v1522_v55, %v1539_v27  ;;  %v12227_v16 = vmul.f32 %v1019_v41, %v11969_v20  ;;  %v1155_v48 = vsel %vm1034_vm3, %v1154_v39, %v12132_v4 }
 0x189   : > { %v18300_v9 = vshll.u32 %v12106_v8, 16  ;;  %v1535_v13 = vsel %vm1529_vm7, %v1522_v55, 920167782  ;;  %vm17916_vm10 = vweird.f32 %v11089_v21  ;;  %v1298_v45 = vshrl.u32 %v1280_v12, %v1296_v56 }
 0x18a   : > { %18299 = vst [vmem:[#allocation27_spill] sm:$0xff] %v12227_v16  ;;  %v1436_v6 = vadd.s32 1, %v1432_v0  ;;  %vm1527_vm13 = vcmp.lt.s32.totalorder %v12164_v35, 2  ;;  %v1660_v20 = vsel %vm1659_vm6, %v1658_v14, 0  ;;  %v1297_v41 = vshll.u32 %v12033_v11, %v12150_v36 }
 0x18b   : > { %v12235_v23 = vadd.s32 %v12117_v26, %v18300_v9  ;;  %v1379_v4 = vsel %vm1373_vm0, %v1376_v28, %v1378_v57  ;;  %v12249_v8 = vsel %vm1527_vm13, %v1538_v7, %v1540_v15  ;;  %v1303_v26 = vor.u32 4788187, %v1302_v32 }
 0x18c   : > { %v1534_v39 = vsel %vm1526_vm5, %v12218_v24, %v12196_v17  ;;  %v1536_v11 = vsel %vm1528_vm15, %v12198_v1, %v1535_v13  ;;  %v12258_v36 = vshll.u32 %v1502_v50, 8  ;;  %v18301_v18 = vxor.u32 2147483648, %v12115_v10 }
 0x18d   : > { %vm1435_vm2 = vc.u32 %v12215_v47, %v12235_v23  ;;  %v12266_v43 = vand.u32 3, %v12148_v63  ;;  %v12271_v3 = vsel %vm12190_vm14, %v11381_v46, %v1155_v48  ;;  %v1662_v61 = vand.u32 31, %v1660_v20 }
 0x18e   : > { %v875_v31 = vsel %vm873_vm12, %v18301_v18, %v12098_v53  ;;  %v1299_v29 = vor.u32 %v1298_v45, %v1297_v41  ;;  %v1437_v14 = vsel %vm1435_vm2, %v1436_v6, %v1432_v0  ;;  %v17903_v37 = vshrl.u32 %v12249_v8, 16 }
 0x18f   : > { %v876_v52 = vsel %vm869_vm9, %v12143_v51, %v875_v31  ;;  %v17901_v40 = vxor.u32 2147483648, %v12227_v16  ;;  %v17900_v55 = vxor.u32 2147483648, %v12153_v54  ;;  %v1433_v22 = vmul.u32 %v12045_v62, %v1379_v4 }
 0x190   : > { %v12282_v27 = vsel %vm1527_vm13, %v1534_v39, %v1536_v11  ;;  %v18302_v12 = vsub.s32 4, %v11826_v19  ;;  %v12291_v51 = vmul.f32 %v12271_v3, %v12271_v3  ;;  %v1304_v56 = vand.u32 2147483647, %v1303_v26  ;;  %v12340_v39 = vpop.f32.mrf.mxu1 }
 0x191   : > { %v1543_v28 = vand.u32 65535, %v12258_v36  ;;  %v12297_v62 = vsel %vm17917_vm8, nan, %v12090_v59  ;;  %vm1024_vm0 = vcmp.eq.s32.totalorder %v12266_v43, 0  ;;  %v12300_v0 = vadd.s32 %v1437_v14, %v1433_v22  ;;  %18306 = vst [vmem:[#allocation31_spill] sm:$0xff] %v12340_v39 }
 0x192   : > { %v1157_v34 = vsel %vm1034_vm3, %v18302_v12, %v11826_v19  ;;  %18303 = vst [vmem:[#allocation28_spill] sm:$0xff] %v12297_v62  ;;  %v12302_v32 = vsub.s32 32, %v1662_v61  ;;  %vm1027_vm4 = vcmp.eq.s32.totalorder %v12266_v43, 2  ;;  %v1306_v19 = vcvt.s32.f32 %v1299_v29 }
 0x193   : > { %v12307_v57 = vmul.u32 %v17903_v37, %v1543_v28  ;;  %v17902_v50 = vshrl.u32 %v12282_v27, 16  ;;  %v12312_v7 = vsel %vm17916_vm10, nan, %v876_v52  ;;  %v12317_v59 = vsel %vm1024_vm0, %v12153_v54, %v17901_v40 }
 0x194   : > { %18304 = vst [vmem:[#allocation29_spill] sm:$0xff] %v12312_v7  ;;  %v12322_v15 = vsel %vm1027_vm4, %v17900_v55, %v12227_v16  ;;  %v12326_v48 = vsel %vm12190_vm14, 0, %v1157_v34  ;;  %v1161_v9 = vmul.f32 -0.001358992, %v12291_v51  ;;  %v12329_v13 = vmul.f32 %v1306_v19, %v1304_v56 }
 0x195   : > { %18305 = vst [vmem:[#allocation30_spill] sm:$0xff] %v12326_v48  ;;  %v12332_v45 = vshrl.u32 %v12258_v36, 16  ;;  %v17914_v6 = vand.u32 2147483647, %v12113_v33  ;;  %v1439_v41 = vadd.s32 536870912, %v12300_v0  ;;  %v1545_v4 = vand.u32 65535, %v12249_v8 }
 0x196   : > { %v1674_v26 = vshll.u32 %v18274_v30, %v1662_v61  ;;  %v1675_v42 = vshrl.u32 %v18275_v2, %v12302_v32  ;;  %v1551_v11 = vshll.u32 %v12307_v57, 16  ;;  %v1567_v18 = vand.u32 65535, %v12282_v27 }
 0x197   : > { %v12346_v31 = vmul.u32 %v17902_v50, %v1543_v28  ;;  %v12348_v52 = vshrl.u32 %v1660_v20, 5  ;;  %v1665_v29 = vshll.u32 %v18259_v58, %v1662_v61  ;;  %v1666_v14 = vshrl.u32 %v18277_v25, %v12302_v32 }
 0x198   : > { %v1668_v22 = vshll.u32 %v18277_v25, %v1662_v61  ;;  %v1671_v12 = vshll.u32 %v18278_v49, %v1662_v61  ;;  %v1669_v34 = vshrl.u32 %v18278_v49, %v12302_v32  ;;  %v1672_v56 = vshrl.u32 %v18274_v30, %v12302_v32  ;;  %v12550_v44 = vpop.f32.mrf.mxu1 }
 0x199   : > { %v1677_v19 = vshll.u32 %v18275_v2, %v1662_v61  ;;  %v1678_v20 = vshrl.u32 %v18276_v60, %v12302_v32  ;;  %v1547_v55 = vmul.u32 %v1545_v4, %v1543_v28  ;;  %v1655_v40 = vand.u32 8388607, %v17914_v6  ;;  %18322 = vst [vmem:[#allocation33_spill] sm:$0xff] %v12550_v44 }
 0x19a   : > { %v1676_v50 = vor.u32 %v1675_v42, %v1674_v26  ;;  %v1805_v37 = vand.u32 2139095040, %v12340_v39  ;;  %v12365_v54 = vshrl.u32 %v1439_v41, 30  ;;  %v12368_v16 = vmul.u32 %v1545_v4, %v12332_v45 }
 0x19b   : > { %v1569_v21 = vmul.u32 %v1567_v18, %v1543_v28  ;;  %vm1683_vm11 = vcmp.lt.s32.totalorder %v12348_v52, 4  ;;  %vm12371_vm3 = vc.u32 %v1547_v55, %v1551_v11  ;;  %v1557_v38 = vadd.s32 %v1551_v11, %v1547_v55 }
 0x19c   : > { %v1573_v10 = vshll.u32 %v12346_v31, 16  ;;  %v1806_v53 = vshrl.u32 %v1805_v37, 23  ;;  %vm1023_vm12 = vcmp.lt.s32.totalorder %v12266_v43, 2  ;;  %v12377_v26 = vor.u32 %v1666_v14, %v1665_v29 }
 0x19d   : > { %v12379_v41 = vor.u32 %v1669_v34, %v1668_v22  ;;  %v12381_v42 = vor.u32 %v1672_v56, %v1671_v12  ;;  %v1679_v4 = vor.u32 %v1678_v20, %v1677_v19  ;;  %vm1680_vm14 = vcmp.lt.s32.totalorder %v12348_v52, 1  ;;  %v18309_v22 = vld [vmem:[#allocation10_spill] sm:$0xff]  ;;  %v18312_v20 = vld [vmem:[#allocation8_spill] sm:$0xff] }
 0x19e   : > { %vm1682_vm9 = vcmp.lt.s32.totalorder %v12348_v52, 3  ;;  %v1689_v28 = vsel %vm1683_vm11, %v1676_v50, 920167782  ;;  %v10580_v55 = vadd.s32 4294967169, %v1806_v53  ;;  %v1168_v11 = vmul.f32 -0.00019511016, %v12291_v51 }
 0x19f   : > { %v1441_v37 = vshll.u32 %v12365_v54, 30  ;;  %v12390_v29 = vmul.u32 %v1567_v18, %v12332_v45  ;;  %v1656_v14 = vor.u32 8388608, %v1655_v40  ;;  %vm1188_vm6 = vcmp.lt.s32.totalorder %v18309_v22, 0 }
 0x1a0   : > { %v18310_v12 = vshrl.u32 %v12249_v8, 16  ;;  %v1553_v56 = vshll.u32 %v12368_v16, 16  ;;  %v18311_v19 = vmov 0   ;;  %vm1577_vm2 = vc.u32 %v1569_v21, %v1573_v10 }
 0x1a1   : > { %v1556_v53 = vsel %vm12371_vm3, 1, %v18311_v19  ;;  %vm17935_vm0 = vweird.f32 %v18312_v20  ;;  %v12401_v6 = vadd.s32 %v1573_v10, %v1569_v21  ;;  %v1688_v40 = vsel %vm1680_vm14, %v12377_v26, %v12379_v41 }
 0x1a2   : > { %v1550_v34 = vmul.u32 %v18310_v12, %v12332_v45  ;;  %v1690_v8 = vsel %vm1682_vm9, %v12381_v42, %v1689_v28  ;;  %v1693_v18 = vsel %vm1683_vm11, %v1679_v4, 1326507024  ;;  %v1162_v12 = vadd.f32 0.041655596, %v1161_v9 }
 0x1a3   : > { %v1308_v61 = vxor.u32 2147483648, %v12329_v13  ;;  %vm1559_vm4 = vc.u32 %v1557_v38, %v1553_v56  ;;  %v1812_v63 = vadd.s32 1, %v10580_v55  ;;  %v18313_v21 = vand.u32 2147483647, %v18309_v22 }
 0x1a4   : > { %v12420_v7 = vsub.s32 %v12300_v0, %v1441_v37  ;;  %v1558_v62 = vadd.s32 %v1556_v53, %v1550_v34  ;;  %v1575_v28 = vshll.u32 %v12390_v29, 16  ;;  %vm1681_vm10 = vcmp.lt.s32.totalorder %v12348_v52, 2 }
 0x1a5   : > { %vm12415_vm3 = vcmp.le.f32.partialorder %v18313_v21, 0.7853982  ;;  %v1578_v9 = vsel %vm1577_vm2, 1, %v18311_v19  ;;  %v12427_v38 = vsel %vm1681_vm10, %v1688_v40, %v1690_v8  ;;  %v1692_v4 = vsel %vm1680_vm14, %v12379_v41, %v12381_v42 }
 0x1a6   : > { %v1694_v0 = vsel %vm1682_vm9, %v1676_v50, %v1693_v18  ;;  %v1560_v55 = vsel %vm1559_vm4, 1, %v18311_v19  ;;  %v18316_v37 = vshrl.u32 %v12282_v27, 16  ;;  %vm1581_vm2 = vc.u32 %v12401_v6, %v1575_v28 }
 0x1a7   : > { %v12440_v56 = vshll.u32 %v1656_v14, 8  ;;  %v1030_v53 = vsel %vm1023_vm12, %v12317_v59, %v12322_v15  ;;  %v1163_v40 = vmul.f32 %v1162_v12, %v12291_v51  ;;  %v1169_v8 = vadd.f32 0.008332121, %v1168_v11  ;;  %v18317_v14 = vld [vmem:[#allocation17_spill] sm:$0xff] }
 0x1a8   : > { %v1572_v34 = vmul.u32 %v18316_v37, %v12332_v45  ;;  %vm1813_vm8 = vcmp.gt.s32.totalorder %v1812_v63, 0  ;;  %v1444_v50 = vsub.s32 0, %v12420_v7  ;;  %v12450_v27 = vsel %vm1681_vm10, %v1692_v4, %v1694_v0 }
 0x1a9   : > { %v1722_v45 = vshrl.u32 %v12427_v38, 16  ;;  %v1310_v21 = vsub.s32 4, %v18317_v14  ;;  %vm1443_vm4 = vcmp.lt.s32.totalorder %v12420_v7, 0  ;;  %v1562_v37 = vadd.s32 %v1560_v55, %v1558_v62 }
 0x1aa   : > { %v1580_v18 = vadd.s32 %v1578_v9, %v1572_v34  ;;  %v1582_v43 = vsel %vm1581_vm2, 1, %v18311_v19  ;;  %v12457_v59 = vand.u32 3, %v12326_v48  ;;  %v1309_v15 = vsel %vm1188_vm6, %v1308_v61, %v12329_v13 }
 0x1ab   : > { %v1697_v11 = vand.u32 65535, %v12440_v56  ;;  %v1814_v12 = vsel %vm1813_vm8, %v1812_v63, 0  ;;  %v12465_v9 = vsel %vm17935_vm0, nan, %v1030_v53  ;;  %v1170_v4 = vmul.f32 %v1169_v8, %v12291_v51 }
 0x1ac   : > { %18318 = vst [vmem:[#allocation17_spill] sm:$0xff] %v12465_v9  ;;  %v1552_v62 = vshrl.u32 %v12307_v57, 16  ;;  %v1700_v0 = vshrl.u32 %v12450_v27, 16  ;;  %v12470_v55 = vadd.f32 -0.4999988, %v1163_v40  ;;  %v1445_v34 = vsel %vm1443_vm4, %v1444_v50, %v12420_v7 }
 0x1ad   : > { %v1584_v48 = vadd.s32 %v1582_v43, %v1580_v18  ;;  %v12473_v33 = vmul.u32 %v1722_v45, %v1697_v11  ;;  %v1311_v63 = vsel %vm1188_vm6, %v1310_v21, %v18317_v14  ;;  %v12481_v13 = vsel %vm12415_vm3, %v18309_v22, %v1309_v15 }
 0x1ae   : > { %v1563_v61 = vadd.s32 %v1562_v37, %v1552_v62  ;;  %v1816_v57 = vand.u32 31, %v1814_v12  ;;  %v1510_v53 = vshrl.u32 %v18259_v58, %v12136_v5  ;;  %v1574_v40 = vshrl.u32 %v12346_v31, 16 }
 0x1af   : > { %v1699_v8 = vand.u32 65535, %v12450_v27  ;;  %v1721_v50 = vand.u32 65535, %v12427_v38  ;;  %v1171_v18 = vadd.f32 -0.16666654, %v1170_v4  ;;  %v1446_v43 = vclz %v1445_v34 }
 0x1b0   : > { %v1554_v14 = vshrl.u32 %v12368_v16, 16  ;;  %v12489_v21 = vmul.u32 %v1700_v0, %v1697_v11  ;;  %v1531_v37 = vsel %vm1529_vm7, %v12198_v1, 2102212464  ;;  %v1585_v15 = vadd.s32 %v1584_v48, %v1574_v40 }
 0x1b1   : > { %v1698_v62 = vshrl.u32 %v12440_v56, 16  ;;  %v1727_v5 = vshll.u32 %v12473_v33, 16  ;;  %v12498_v31 = vsel %vm12415_vm3, 0, %v1311_v63  ;;  %v12502_v38 = vmul.f32 %v12481_v13, %v12481_v13 }
 0x1b2   : > { %18319 = vst [vmem:[#allocation32_spill] sm:$0xff] %v12498_v31  ;;  %v12504_v16 = vadd.s32 %v1563_v61, %v1554_v14  ;;  %v12506_v27 = vsub.s32 32, %v1816_v57  ;;  %v1530_v1 = vsel %vm1526_vm5, %v1510_v53, %v12218_v24  ;;  %v1576_v48 = vshrl.u32 %v12390_v29, 16 }
 0x1b3   : > { %v12512_v4 = vmul.u32 %v1699_v8, %v1698_v62  ;;  %v1723_v34 = vmul.u32 %v1721_v50, %v1697_v11  ;;  %v12514_v10 = vadd.s32 4294967294, %v1446_v43  ;;  %v1532_v63 = vsel %vm1528_vm15, %v12196_v17, %v1531_v37 }
 0x1b4   : > { %v12520_v61 = vadd.s32 %v12401_v6, %v1575_v28  ;;  %v1705_v40 = vshll.u32 %v12489_v21, 16  ;;  %v1586_v14 = vadd.s32 %v1585_v15, %v1576_v48  ;;  %v1701_v20 = vmul.u32 %v1699_v8, %v1697_v11 }
 0x1b5   : > { %vm1731_vm7 = vc.u32 %v1723_v34, %v1727_v5  ;;  %v12526_v29 = vmul.u32 %v1721_v50, %v1698_v62  ;;  %v1726_v53 = vmul.u32 %v1722_v45, %v1698_v62  ;;  %v1831_v43 = vshll.u32 %v18275_v2, %v1816_v57 }
 0x1b6   : > { %vm1589_vm5 = vc.u32 %v12504_v16, %v12520_v61  ;;  %v1832_v17 = vshrl.u32 %v18276_v60, %v12506_v27  ;;  %v1707_v6 = vshll.u32 %v12512_v4, 16  ;;  %v12532_v28 = vshrl.u32 %v1814_v12, 5 }
 0x1b7   : > { %v1828_v11 = vshll.u32 %v18274_v30, %v1816_v57  ;;  %v1829_v8 = vshrl.u32 %v18275_v2, %v12506_v27  ;;  %vm12537_vm15 = vc.u32 %v1701_v20, %v1705_v40  ;;  %v1711_v50 = vadd.s32 %v1705_v40, %v1701_v20 }
 0x1b8   : > { %v1732_v45 = vsel %vm1731_vm7, 1, %v18311_v19  ;;  %v12542_v15 = vadd.s32 %v1727_v5, %v1723_v34  ;;  %v1822_v48 = vshll.u32 %v18277_v25, %v1816_v57  ;;  %v1823_v12 = vshrl.u32 %v18278_v49, %v12506_v27 }
 0x1b9   : > { %v1825_v24 = vshll.u32 %v18278_v49, %v1816_v57  ;;  %v1826_v9 = vshrl.u32 %v18274_v30, %v12506_v27  ;;  %v1819_v20 = vshll.u32 %v18259_v58, %v1816_v57  ;;  %v1820_v5 = vshrl.u32 %v18277_v25, %v12506_v27 }
 0x1ba   : > { %v1833_v34 = vor.u32 %v1832_v17, %v1831_v43  ;;  %v1590_v40 = vadd.s32 1, %v1586_v14  ;;  %v1704_v46 = vmul.u32 %v1700_v0, %v1698_v62  ;;  %v1830_v60 = vor.u32 %v1829_v8, %v1828_v11 }
 0x1bb   : > { %vm1837_vm8 = vcmp.lt.s32.totalorder %v12532_v28, 4  ;;  %v1710_v49 = vsel %vm12537_vm15, 1, %v18311_v19  ;;  %vm12560_vm12 = vc.u32 %v1711_v50, %v1707_v6  ;;  %v1734_v22 = vadd.s32 %v1732_v45, %v1726_v53 }
 0x1bc   : > { %v18325_v57 = vshll.u32 %v12526_v29, 16  ;;  %v18326_v43 = vand.u32 2147483647, %v12340_v39  ;;  %v12569_v0 = vor.u32 %v1823_v12, %v1822_v48  ;;  %v12571_v62 = vor.u32 %v1826_v9, %v1825_v24  ;;  %v12775_v39 = vpop.f32.mrf.mxu1 }
 0x1bd   : > { %v1959_v11 = vand.u32 2139095040, %v12550_v44  ;;  %v12574_v8 = vor.u32 %v1820_v5, %v1819_v20  ;;  %vm1834_vm3 = vcmp.lt.s32.totalorder %v12532_v28, 1  ;;  %vm1836_vm2 = vcmp.lt.s32.totalorder %v12532_v28, 3  ;;  %18339 = vst [vmem:[#allocation38_spill] sm:$0xff] %v12775_v39 }
 0x1be   : > { %vm1735_vm6 = vc.u32 %v12542_v15, %v18325_v57  ;;  %v1809_v17 = vand.u32 8388607, %v18326_v43  ;;  %v1847_v53 = vsel %vm1837_vm8, %v1833_v34, 1326507024  ;;  %v1172_v6 = vmul.f32 %v1171_v18, %v12291_v51 }
 0x1bf   : > { %v1712_v37 = vadd.s32 %v1710_v49, %v1704_v46  ;;  %v1736_v50 = vsel %vm1735_vm6, 1, %v18311_v19  ;;  %v1843_v9 = vsel %vm1837_vm8, %v1830_v60, 920167782  ;;  %v1322_v24 = vmul.f32 -0.00019511016, %v12502_v38 }
 0x1c0   : > { %vm10573_vm4 = vcmp.lt.s32.totalorder %v12514_v10, 0  ;;  %v1533_v45 = vsel %vm1527_vm13, %v1530_v1, %v1532_v63  ;;  %v1714_v48 = vsel %vm12560_vm12, 1, %v18311_v19  ;;  %v1591_v46 = vsel %vm1589_vm5, %v1590_v40, %v1586_v14 }
 0x1c1   : > { %v1810_v49 = vor.u32 8388608, %v1809_v17  ;;  %v1846_v18 = vsel %vm1834_vm3, %v12569_v0, %v12571_v62  ;;  %v1848_v12 = vsel %vm1836_vm2, %v1830_v60, %v1847_v53  ;;  %v1738_v20 = vadd.s32 %v1736_v50, %v1734_v22 }
 0x1c2   : > { %v1842_v30 = vsel %vm1834_vm3, %v12574_v8, %v12569_v0  ;;  %v1844_v35 = vsel %vm1836_vm2, %v12571_v62, %v1843_v9  ;;  %v1960_v1 = vshrl.u32 %v1959_v11, 23  ;;  %v1165_v63 = vmul.f32 %v12470_v55, %v12291_v51 }
 0x1c3   : > { %v1587_v14 = vmul.u32 %v12258_v36, %v1533_v45  ;;  %v1716_v5 = vadd.s32 %v1714_v48, %v1712_v37  ;;  %vm1835_vm13 = vcmp.lt.s32.totalorder %v12532_v28, 2  ;;  %v1323_v60 = vadd.f32 0.008332121, %v1322_v24 }
 0x1c4   : > { %v12614_v22 = vsel %vm10573_vm4, 0, %v12514_v10  ;;  %v1728_v34 = vshrl.u32 %v12473_v33, 16  ;;  %v12619_v40 = vsel %vm1835_vm13, %v1846_v18, %v1848_v12  ;;  %v1706_v51 = vshrl.u32 %v12489_v21, 16 }
 0x1c5   : > { %v12621_v57 = vadd.s32 %v1591_v46, %v1587_v14  ;;  %v12626_v36 = vsel %vm1835_vm13, %v1842_v30, %v1844_v35  ;;  %v12628_v55 = vshll.u32 %v1810_v49, 8  ;;  %v1173_v43 = vadd.f32 1.0, %v1172_v6 }
 0x1c6   : > { %v12631_v10 = vand.u32 3, %v12498_v31  ;;  %v1739_v17 = vadd.s32 %v1738_v20, %v1728_v34  ;;  %v10583_v33 = vadd.s32 4294967169, %v1960_v1  ;;  %v1315_v11 = vmul.f32 -0.001358992, %v12502_v38 }
 0x1c7   : > { %v1454_v53 = vsub.s32 4294967266, %v12614_v22  ;;  %v1717_v37 = vadd.s32 %v1716_v5, %v1706_v51  ;;  %v1854_v50 = vshrl.u32 %v12619_v40, 16  ;;  %v1324_v21 = vmul.f32 %v1323_v60, %v12502_v38 }
 0x1c8   : > { %v1664_v9 = vshrl.u32 %v18259_v58, %v12302_v32  ;;  %v1730_v24 = vshrl.u32 %v12526_v29, 16  ;;  %v1876_v6 = vshrl.u32 %v12626_v36, 16  ;;  %v12641_v45 = vadd.f32 1.0, %v1165_v63 }
 0x1c9   : > { %v1593_v48 = vadd.s32 536870912, %v12621_v57  ;;  %v1708_v46 = vshrl.u32 %v12512_v4, 16  ;;  %v1851_v49 = vand.u32 65535, %v12628_v55  ;;  %v12647_v18 = vmul.f32 %v1173_v43, %v12271_v3 }
 0x1ca   : > { %18327 = vst [vmem:[#allocation34_spill] sm:$0xff] %v12641_v45  ;;  %v1685_v12 = vsel %vm1683_vm11, %v12381_v42, 2102212464  ;;  %v1740_v32 = vadd.s32 %v1739_v17, %v1730_v24  ;;  %v1966_v20 = vadd.s32 1, %v10583_v33  ;;  %v1316_v30 = vadd.f32 0.041655596, %v1315_v11 }
 0x1cb   : > { %18328 = vst [vmem:[#allocation35_spill] sm:$0xff] %v12647_v18  ;;  %v1455_v35 = vadd.s32 127, %v1454_v53  ;;  %v12652_v1 = vadd.s32 %v1717_v37, %v1708_v46  ;;  %v12656_v63 = vmul.u32 %v1854_v50, %v1851_v49  ;;  %v1325_v4 = vadd.f32 -0.16666654, %v1324_v21 }
 0x1cc   : > { %v1450_v14 = vsub.s32 32, %v12614_v22  ;;  %v1684_v3 = vsel %vm1680_vm14, %v1664_v9, %v12377_v26  ;;  %v12662_v5 = vmul.u32 %v1876_v6, %v1851_v49  ;;  %v12664_v42 = vshrl.u32 %v1593_v48, 30 }
 0x1cd   : > { %v1686_v60 = vsel %vm1682_vm9, %v12379_v41, %v1685_v12  ;;  %v18329_v34 = vshll.u32 %v12526_v29, 16  ;;  %v1853_v43 = vand.u32 65535, %v12619_v40  ;;  %v1434_v17 = vadd.s32 %v12235_v23, %v12215_v47 }
 0x1ce   : > { %v1744_v33 = vadd.s32 1, %v1740_v32  ;;  %v1875_v26 = vand.u32 65535, %v12626_v36  ;;  %vm1967_vm11 = vcmp.gt.s32.totalorder %v1966_v20, 0  ;;  %v1317_v11 = vmul.f32 %v1316_v30, %v12502_v38 }
 0x1cf   : > { %v12672_v51 = vadd.s32 %v12542_v15, %v18329_v34  ;;  %v1456_v53 = vshll.u32 %v1455_v35, 23  ;;  %v1859_v41 = vshll.u32 %v12656_v63, 16  ;;  %vm1178_vm9 = vcmp.eq.s32.totalorder %v12457_v59, 0 }
 0x1d0   : > { %v1326_v29 = vmul.f32 %v1325_v4, %v12502_v38  ;;  %v1687_v15 = vsel %vm1681_vm10, %v1684_v3, %v1686_v60  ;;  %v1852_v47 = vshrl.u32 %v12628_v55, 16  ;;  %v1881_v23 = vshll.u32 %v12662_v5, 16 }
 0x1d1   : > { %vm1743_vm14 = vc.u32 %v12652_v1, %v12672_v51  ;;  %v1452_v36 = vshrl.u32 %v1434_v17, %v1450_v14  ;;  %v1595_v37 = vshll.u32 %v12664_v42, 30  ;;  %v1855_v21 = vmul.u32 %v1853_v43, %v1851_v49 }
 0x1d2   : > { %v1968_v9 = vsel %vm1967_vm11, %v1966_v20, 0  ;;  %v1745_v24 = vsel %vm1743_vm14, %v1744_v33, %v1740_v32  ;;  %v12689_v48 = vmul.u32 %v1853_v43, %v1852_v47  ;;  %v1877_v46 = vmul.u32 %v1875_v26, %v1851_v49 }
 0x1d3   : > { %v12691_v12 = vmul.u32 %v1875_v26, %v1852_v47  ;;  %v1451_v30 = vshll.u32 %v12420_v7, %v12614_v22  ;;  %v1457_v52 = vor.u32 4788187, %v1456_v53  ;;  %v1741_v35 = vmul.u32 %v12440_v56, %v1687_v15 }
 0x1d4   : > { %vm1863_vm10 = vc.u32 %v1855_v21, %v1859_v41  ;;  %v1865_v4 = vadd.s32 %v1859_v41, %v1855_v21  ;;  %vm1885_vm7 = vc.u32 %v1877_v46, %v1881_v23  ;;  %v12696_v14 = vadd.s32 %v1881_v23, %v1877_v46 }
 0x1d5   : > { %v1970_v3 = vand.u32 31, %v1968_v9  ;;  %v17930_v20 = vxor.u32 2147483648, %v12647_v18  ;;  %v1318_v32 = vadd.f32 -0.4999988, %v1317_v11  ;;  %v12700_v60 = vsub.s32 %v12621_v57, %v1595_v37 }
 0x1d6   : > { %v12702_v49 = vadd.s32 %v1745_v24, %v1741_v35  ;;  %v1327_v34 = vadd.f32 1.0, %v1326_v29  ;;  %v1453_v43 = vor.u32 %v1452_v36, %v1451_v30  ;;  %v1861_v7 = vshll.u32 %v12689_v48, 16  ;;  %v18331_v24 = vld [vmem:[#allocation11_spill] sm:$0xff] }
 0x1d7   : > { %v17931_v56 = vshll.u32 %v12691_v12, 16  ;;  %v1458_v22 = vand.u32 2147483647, %v1457_v52  ;;  %v1864_v17 = vsel %vm1863_vm10, 1, %v18311_v19  ;;  %v1880_v33 = vmul.u32 %v1876_v6, %v1852_v47 }
 0x1d8   : > { %v1886_v26 = vsel %vm1885_vm7, 1, %v18311_v19  ;;  %v1858_v11 = vmul.u32 %v1854_v50, %v1852_v47  ;;  %vm1867_vm5 = vc.u32 %v1865_v4, %v1861_v7  ;;  %v12713_v57 = vsub.s32 32, %v1970_v3 }
 0x1d9   : > { %vm1889_vm15 = vc.u32 %v12696_v14, %v17931_v56  ;;  %v12720_v53 = vsel %vm1178_vm9, %v12641_v45, %v17930_v20  ;;  %v1598_v41 = vsub.s32 0, %v12700_v60  ;;  %v1747_v40 = vadd.s32 536870912, %v12702_v49 }
 0x1da   : > { %v1460_v50 = vcvt.s32.f32 %v1453_v43  ;;  %vm1597_vm12 = vcmp.lt.s32.totalorder %v12700_v60, 0  ;;  %v1866_v29 = vadd.s32 %v1864_v17, %v1858_v11  ;;  %v1888_v15 = vadd.s32 %v1886_v26, %v1880_v33 }
 0x1db   : > { %v12727_v47 = vmul.f32 %v1318_v32, %v12502_v38  ;;  %v1868_v36 = vsel %vm1867_vm5, 1, %v18311_v19  ;;  %v1890_v37 = vsel %vm1889_vm15, 1, %v18311_v19  ;;  %v12733_v21 = vmul.f32 %v1327_v34, %v12481_v13 }
 0x1dc   : > { %vm1342_vm6 = vcmp.lt.s32.totalorder %v18331_v24, 0  ;;  %v1461_v46 = vmul.f32 %v1460_v50, %v1458_v22  ;;  %v1985_v30 = vshll.u32 %v18275_v2, %v1970_v3  ;;  %v18332_v52 = vmov 1326507024  }
 0x1dd   : > { %18330 = vst [vmem:[#allocation36_spill] sm:$0xff] %v12733_v21  ;;  %v1986_v35 = vshrl.u32 %v18332_v52, %v12713_v57  ;;  %v1599_v38 = vsel %vm1597_vm12, %v1598_v41, %v12700_v60  ;;  %v12740_v4 = vshrl.u32 %v1747_v40, 30  ;;  %v17938_v32 = vand.u32 2147483647, %v12550_v44 }
 0x1de   : > { %v12743_v43 = vshrl.u32 %v1968_v9, 5  ;;  %v1870_v7 = vadd.s32 %v1868_v36, %v1866_v29  ;;  %v1892_v17 = vadd.s32 %v1890_v37, %v1888_v15  ;;  %v18334_v13 = vmov 2102212464  }
 0x1df   : > { %18333 = vst [vmem:[#allocation37_spill] sm:$0xff] %v12740_v4  ;;  %v1982_v34 = vshll.u32 %v18334_v13, %v1970_v3  ;;  %v1983_v22 = vshrl.u32 %v18275_v2, %v12713_v57  ;;  %v1976_v33 = vshll.u32 %v18277_v25, %v1970_v3  ;;  %v18335_v26 = vmov 2131351028  }
 0x1e0   : > { %v1977_v11 = vshrl.u32 %v18335_v26, %v12713_v57  ;;  %v1979_v41 = vshll.u32 %v18335_v26, %v1970_v3  ;;  %v1980_v40 = vshrl.u32 %v18334_v13, %v12713_v57  ;;  %v1462_v50 = vxor.u32 2147483648, %v1461_v46 }
 0x1e1   : > { %v1600_v9 = vclz %v1599_v38  ;;  %v1882_v29 = vshrl.u32 %v12662_v5, 16  ;;  %v1987_v15 = vor.u32 %v1986_v35, %v1985_v30  ;;  %v1860_v36 = vshrl.u32 %v12656_v63, 16 }
 0x1e2   : > { %v1973_v37 = vshll.u32 %v18259_v58, %v1970_v3  ;;  %v1974_v20 = vshrl.u32 %v18277_v25, %v12713_v57  ;;  %vm1991_vm4 = vcmp.lt.s32.totalorder %v12743_v43, 4  ;;  %v18336_v6 = vand.u32 2147483647, %v18331_v24 }
 0x1e3   : > { %v1818_v38 = vshrl.u32 %v18259_v58, %v12506_v27  ;;  %v1893_v5 = vadd.s32 %v1892_v17, %v1882_v29  ;;  %v1963_v63 = vand.u32 8388607, %v17938_v32  ;;  %v1984_v30 = vor.u32 %v1983_v22, %v1982_v34 }
 0x1e4   : > { %vm12762_vm11 = vcmp.le.f32.partialorder %v18336_v6, 0.7853982  ;;  %v1749_v3 = vshll.u32 %v12740_v4, 30  ;;  %v1871_v35 = vadd.s32 %v1870_v7, %v1860_v36  ;;  %v12771_v56 = vor.u32 %v1977_v11, %v1976_v33 }
 0x1e5   : > { %v12773_v31 = vor.u32 %v1980_v40, %v1979_v41  ;;  %v1884_v6 = vshrl.u32 %v12691_v12, 16  ;;  %vm1988_vm14 = vcmp.lt.s32.totalorder %v12743_v43, 1  ;;  %vm1990_vm9 = vcmp.lt.s32.totalorder %v12743_v43, 3 }
 0x1e6   : > { %v2001_v27 = vsel %vm1991_vm4, %v1987_v15, 1326507024  ;;  %v1463_v17 = vsel %vm1342_vm6, %v1462_v50, %v1461_v46  ;;  %v1839_v7 = vsel %vm1837_vm8, %v12571_v62, 2102212464  ;;  %v1862_v34 = vshrl.u32 %v12689_v48, 16 }
 0x1e7   : > { %v12788_v22 = vor.u32 %v1974_v20, %v1973_v37  ;;  %v10575_v33 = vadd.s32 4294967294, %v1600_v9  ;;  %v1894_v11 = vadd.s32 %v1893_v5, %v1884_v6  ;;  %v1964_v41 = vor.u32 8388608, %v1963_v63  ;;  %v18343_v63 = vld [vmem:[#allocation9_spill] sm:$0xff] }
 0x1e8   : > { %v1997_v40 = vsel %vm1991_vm4, %v1984_v30, 920167782  ;;  %vm1332_vm10 = vcmp.eq.s32.totalorder %v12631_v10, 0  ;;  %v12793_v29 = vadd.s32 %v1871_v35, %v1862_v34  ;;  %v2000_v46 = vsel %vm1988_vm14, %v12771_v56, %v12773_v31 }
 0x1e9   : > { %v2002_v62 = vsel %vm1990_vm9, %v1984_v30, %v2001_v27  ;;  %v2113_v48 = vand.u32 2139095040, %v12775_v39  ;;  %vm1181_vm8 = vcmp.eq.s32.totalorder %v12457_v59, 2  ;;  %v12804_v20 = vsub.s32 %v12702_v49, %v1749_v3 }
 0x1ea   : > { %v1838_v50 = vsel %vm1834_vm3, %v1818_v38, %v12574_v8  ;;  %v1840_v9 = vsel %vm1836_vm2, %v12569_v0, %v1839_v7  ;;  %v18340_v15 = vshll.u32 %v12691_v12, 16  ;;  %vm1177_vm7 = vcmp.lt.s32.totalorder %v12457_v59, 2 }
 0x1eb   : > { %vm1989_vm5 = vcmp.lt.s32.totalorder %v12743_v43, 2  ;;  %v1996_v49 = vsel %vm1988_vm14, %v12788_v22, %v12771_v56  ;;  %v1998_v8 = vsel %vm1990_vm9, %v12773_v31, %v1997_v40  ;;  %v2114_v37 = vshrl.u32 %v2113_v48, 23 }
 0x1ec   : > { %v12815_v36 = vadd.s32 %v12696_v14, %v18340_v15  ;;  %v12827_v0 = vadd.f32 1.0, %v12727_v47  ;;  %vm1331_vm3 = vcmp.lt.s32.totalorder %v12631_v10, 2  ;;  %vm10576_vm2 = vcmp.lt.s32.totalorder %v10575_v33, 0 }
 0x1ed   : > { %v1898_v12 = vadd.s32 1, %v1894_v11  ;;  %v12832_v14 = vsel %vm1989_vm5, %v2000_v46, %v2002_v62  ;;  %v12837_v38 = vsel %vm12762_vm11, %v18331_v24, %v1463_v17  ;;  %v12841_v5 = vshll.u32 %v1964_v41, 8  ;;  %v18345_v17 = vld [vmem:[#allocation10_spill] sm:$0xff] }
 0x1ee   : > { %18341 = vst [vmem:[#allocation39_spill] sm:$0xff] %v12815_v36  ;;  %vm1897_vm15 = vc.u32 %v12793_v29, %v12815_v36  ;;  %v10586_v47 = vadd.s32 4294967169, %v2114_v37  ;;  %vm17983_vm12 = vweird.f32 %v18343_v63  ;;  %v17937_v30 = vxor.u32 2147483648, %v12733_v21 }
 0x1ef   : > { %18342 = vst [vmem:[#allocation40_spill] sm:$0xff] %v12827_v0  ;;  %v18344_v3 = vsub.s32 4, %v12365_v54  ;;  %v1841_v6 = vsel %vm1835_vm13, %v1838_v50, %v1840_v9  ;;  %v12854_v27 = vsel %vm1989_vm5, %v1996_v49, %v1998_v8  ;;  %vm17982_vm0 = vweird.f32 %v18345_v17 }
 0x1f0   : > { %v12857_v7 = vsel %vm10576_vm2, 0, %v10575_v33  ;;  %v1752_v34 = vsub.s32 0, %v12804_v20  ;;  %v17940_v41 = vshrl.u32 %v12832_v14, 16  ;;  %v2120_v40 = vadd.s32 1, %v10586_v47 }
 0x1f1   : > { %v1465_v35 = vsel %vm1342_vm6, %v18344_v3, %v12365_v54  ;;  %v17936_v46 = vxor.u32 2147483648, %v12827_v0  ;;  %v12864_v54 = vmul.f32 %v12837_v38, %v12837_v38  ;;  %vm1751_vm13 = vcmp.lt.s32.totalorder %v12804_v20, 0 }
 0x1f2   : > { %v1899_v28 = vsel %vm1897_vm15, %v1898_v12, %v1894_v11  ;;  %v1895_v33 = vmul.u32 %v12628_v55, %v1841_v6  ;;  %v2005_v62 = vand.u32 65535, %v12841_v5  ;;  %v17939_v48 = vshrl.u32 %v12854_v27, 16 }
 0x1f3   : > { %vm2121_vm6 = vcmp.gt.s32.totalorder %v2120_v40, 0  ;;  %v1334_v50 = vsel %vm1332_vm10, %v12827_v0, %v17937_v30  ;;  %vm1335_vm2 = vcmp.eq.s32.totalorder %v12631_v10, 2  ;;  %v1608_v9 = vsub.s32 4294967266, %v12857_v7 }
 0x1f4   : > { %v2122_v15 = vsel %vm2121_vm6, %v2120_v40, 0  ;;  %v18346_v11 = vxor.u32 2147483648, %v12641_v45  ;;  %v1753_v49 = vsel %vm1751_vm13, %v1752_v34, %v12804_v20  ;;  %v12886_v8 = vadd.s32 %v1899_v28, %v1895_v33 }
 0x1f5   : > { %v12890_v37 = vmul.u32 %v17940_v41, %v2005_v62  ;;  %v1337_v47 = vsel %vm1335_vm2, %v17936_v46, %v12733_v21  ;;  %v12900_v3 = vsel %vm12762_vm11, 0, %v1465_v35  ;;  %v2124_v6 = vand.u32 31, %v2122_v15 }
 0x1f6   : > { %v1183_v55 = vsel %vm1181_vm8, %v18346_v11, %v12647_v18  ;;  %18347 = vst [vmem:[#allocation41_spill] sm:$0xff] %v12900_v3  ;;  %v1338_v34 = vsel %vm1331_vm3, %v1334_v50, %v1337_v47  ;;  %v1469_v40 = vmul.f32 -0.001358992, %v12864_v54  ;;  %v2007_v28 = vand.u32 65535, %v12832_v14 }
 0x1f7   : > { %v1184_v12 = vsel %vm1177_vm7, %v12720_v53, %v1183_v55  ;;  %v12908_v59 = vmul.u32 %v17939_v48, %v2005_v62  ;;  %v1476_v53 = vmul.f32 -0.00019511016, %v12864_v54  ;;  %v1604_v33 = vsub.s32 32, %v12857_v7 }
 0x1f8   : > { %v12912_v11 = vadd.s32 127, %v1608_v9  ;;  %v1754_v23 = vclz %v1753_v49  ;;  %v12916_v35 = vsel %vm17983_vm12, nan, %v1184_v12  ;;  %v1901_v10 = vadd.s32 536870912, %v12886_v8 }
 0x1f9   : > { %18348 = vst [vmem:[#allocation42_spill] sm:$0xff] %v12916_v35  ;;  %v2013_v50 = vshll.u32 %v12890_v37, 16  ;;  %v2029_v55 = vand.u32 65535, %v12854_v27  ;;  %v12923_v47 = vsel %vm17982_vm0, nan, %v1338_v34  ;;  %v12926_v46 = vand.u32 3, %v12900_v3 }
 0x1fa   : > { %18349 = vst [vmem:[#allocation43_spill] sm:$0xff] %v12923_v47  ;;  %v1588_v9 = vadd.s32 %v12520_v61, %v12504_v16  ;;  %v12930_v49 = vsub.s32 32, %v2124_v6  ;;  %v1470_v12 = vadd.f32 0.041655596, %v1469_v40  ;;  %v2006_v30 = vshrl.u32 %v12841_v5, 16 }
 0x1fb   : > { %v2009_v32 = vmul.u32 %v2007_v28, %v2005_v62  ;;  %v2035_v48 = vshll.u32 %v12908_v59, 16  ;;  %v1477_v41 = vadd.f32 0.008332121, %v1476_v53  ;;  %v1610_v17 = vshll.u32 %v12912_v11, 23 }
 0x1fc   : > { %v1606_v63 = vshrl.u32 %v1588_v9, %v1604_v33  ;;  %v12935_v34 = vadd.s32 4294967294, %v1754_v23  ;;  %v12937_v0 = vshrl.u32 %v1901_v10, 30  ;;  %v12939_v21 = vmul.u32 %v2007_v28, %v2006_v30 }
 0x1fd   : > { %vm12941_vm11 = vc.u32 %v2009_v32, %v2013_v50  ;;  %v2031_v61 = vmul.u32 %v2029_v55, %v2005_v62  ;;  %v2019_v40 = vadd.s32 %v2013_v50, %v2009_v32  ;;  %v12945_v45 = vmul.u32 %v2029_v55, %v2006_v30 }
 0x1fe   : > { %18350 = vst [vmem:[#allocation44_spill] sm:$0xff] %v12937_v0  ;;  %v2136_v18 = vshll.u32 %v18334_v13, %v2124_v6  ;;  %v2137_v53 = vshrl.u32 %v18275_v2, %v12930_v49  ;;  %v12957_v23 = vshrl.u32 %v2122_v15, 5  ;;  %v2127_v62 = vshll.u32 %v18259_v58, %v2124_v6 }
 0x1ff   : > { %vm12950_vm10 = vc.u32 %v2031_v61, %v2035_v48  ;;  %v12954_v11 = vadd.s32 %v2035_v48, %v2031_v61  ;;  %v2130_v32 = vshll.u32 %v18277_v25, %v2124_v6  ;;  %v2139_v10 = vshll.u32 %v18275_v2, %v2124_v6  ;;  %v12971_v61 = vpop.f32.mrf.mxu1 }
 0x200   : > { %v2140_v50 = vshrl.u32 %v18332_v52, %v12930_v49  ;;  %v2128_v55 = vshrl.u32 %v18277_v25, %v12930_v49  ;;  %v2131_v48 = vshrl.u32 %v18335_v26, %v12930_v49  ;;  %v2133_v9 = vshll.u32 %v18335_v26, %v2124_v6  ;;  %18355 = vst [vmem:[#allocation45_spill] sm:$0xff] %v12971_v61 }
 0x201   : > { %v2134_v15 = vshrl.u32 %v18334_v13, %v12930_v49  ;;  %v18356_v28 = vshrl.u32 %v12832_v14, 16  ;;  %v2015_v47 = vshll.u32 %v12939_v21, 16  ;;  %v2037_v35 = vshll.u32 %v12945_v45, 16 }
 0x202   : > { %v2138_v44 = vor.u32 %v2137_v53, %v2136_v18  ;;  %v2018_v24 = vsel %vm12941_vm11, 1, %v18311_v19  ;;  %v18357_v4 = vshrl.u32 %v12854_v27, 16  ;;  %v2040_v36 = vsel %vm12950_vm10, 1, %v18311_v19 }
 0x203   : > { %v2012_v3 = vmul.u32 %v18356_v28, %v2006_v30  ;;  %vm2145_vm8 = vcmp.lt.s32.totalorder %v12957_v23, 4  ;;  %vm12986_vm7 = vc.u32 %v2019_v40, %v2015_v47  ;;  %vm2043_vm3 = vc.u32 %v12954_v11, %v2037_v35 }
 0x204   : > { %v2034_v6 = vmul.u32 %v18357_v4, %v2006_v30  ;;  %v18360_v18 = vand.u32 2147483647, %v12775_v39  ;;  %v2141_v53 = vor.u32 %v2140_v50, %v2139_v10  ;;  %v12995_v27 = vor.u32 %v2128_v55, %v2127_v62 }
 0x205   : > { %v12997_v4 = vor.u32 %v2131_v48, %v2130_v32  ;;  %v12999_v30 = vor.u32 %v2134_v15, %v2133_v9  ;;  %v2267_v33 = vand.u32 2139095040, %v12971_v61  ;;  %vm2142_vm15 = vcmp.lt.s32.totalorder %v12957_v23, 1 }
 0x206   : > { %v2117_v16 = vand.u32 8388607, %v18360_v18  ;;  %v2042_v47 = vadd.s32 %v2040_v36, %v2034_v6  ;;  %vm2144_vm13 = vcmp.lt.s32.totalorder %v12957_v23, 3  ;;  %v2151_v40 = vsel %vm2145_vm8, %v2138_v44, 920167782 }
 0x207   : > { %v1471_v28 = vmul.f32 %v1470_v12, %v12864_v54  ;;  %v1478_v10 = vmul.f32 %v1477_v41, %v12864_v54  ;;  %v2020_v62 = vadd.s32 %v2018_v24, %v2012_v3  ;;  %v2044_v32 = vsel %vm2043_vm3, 1, %v18311_v19 }
 0x208   : > { %v1605_v50 = vshll.u32 %v12700_v60, %v12857_v7  ;;  %v1611_v55 = vor.u32 4788187, %v1610_v17  ;;  %v2022_v36 = vsel %vm12986_vm7, 1, %v18311_v19  ;;  %v2155_v48 = vsel %vm2145_vm8, %v2141_v53, 1326507024 }
 0x209   : > { %v2118_v9 = vor.u32 8388608, %v2117_v16  ;;  %v2150_v41 = vsel %vm2142_vm15, %v12995_v27, %v12997_v4  ;;  %v2152_v24 = vsel %vm2144_vm13, %v12999_v30, %v2151_v40  ;;  %v2268_v3 = vshrl.u32 %v2267_v33, 23 }
 0x20a   : > { %v1607_v60 = vor.u32 %v1606_v63, %v1605_v50  ;;  %vm10579_vm6 = vcmp.lt.s32.totalorder %v12935_v34, 0  ;;  %v1903_v17 = vshll.u32 %v12937_v0, 30  ;;  %v2046_v7 = vadd.s32 %v2044_v32, %v2042_v47  ;;  %v18361_v50 = vld [vmem:[#allocation16_spill] sm:$0xff] }
 0x20b   : > { %v2024_v12 = vadd.s32 %v2022_v36, %v2020_v62  ;;  %vm2143_vm2 = vcmp.lt.s32.totalorder %v12957_v23, 2  ;;  %v2154_v15 = vsel %vm2142_vm15, %v12997_v4, %v12999_v30  ;;  %v2156_v6 = vsel %vm2144_vm13, %v2138_v44, %v2155_v48  ;;  %v18378_v23 = vld [vmem:[#allocation39_spill] sm:$0xff] }
 0x20c   : > { %v1472_v14 = vadd.f32 -0.4999988, %v1471_v28  ;;  %v1612_v18 = vand.u32 2147483647, %v1611_v55  ;;  %v2036_v63 = vshrl.u32 %v12908_v59, 16  ;;  %v13035_v16 = vsel %vm2143_vm2, %v2150_v41, %v2152_v24 }
 0x20d   : > { %v13038_v53 = vsel %vm10579_vm6, 0, %v12935_v34  ;;  %v2014_v33 = vshrl.u32 %v12890_v37, 16  ;;  %v13041_v47 = vshll.u32 %v2118_v9, 8  ;;  %v10589_v40 = vadd.s32 4294967169, %v2268_v3 }
 0x20e   : > { %v1614_v62 = vcvt.s32.f32 %v1607_v60  ;;  %v1972_v44 = vshrl.u32 %v18259_v58, %v12713_v57  ;;  %v2047_v28 = vadd.s32 %v2046_v7, %v2036_v63  ;;  %v13047_v59 = vsel %vm2143_vm2, %v2154_v15, %v2156_v6 }
 0x20f   : > { %v1479_v32 = vadd.f32 -0.16666654, %v1478_v10  ;;  %vm1496_vm11 = vcmp.lt.s32.totalorder %v18361_v50, 0  ;;  %v13051_v34 = vsub.s32 %v12886_v8, %v1903_v17  ;;  %v2025_v55 = vadd.s32 %v2024_v12, %v2014_v33 }
 0x210   : > { %v17959_v37 = vshrl.u32 %v13035_v16, 16  ;;  %v1615_v36 = vmul.f32 %v1614_v62, %v1612_v18  ;;  %v1762_v48 = vsub.s32 4294967266, %v13038_v53  ;;  %v1993_v57 = vsel %vm1991_vm4, %v12773_v31, 2102212464 }
 0x211   : > { %v2038_v9 = vshrl.u32 %v12945_v45, 16  ;;  %v2016_v41 = vshrl.u32 %v12939_v21, 16  ;;  %v2159_v10 = vand.u32 65535, %v13041_v47  ;;  %v17958_v24 = vshrl.u32 %v13047_v59, 16 }
 0x212   : > { %v2274_v8 = vadd.s32 1, %v10589_v40  ;;  %v1473_v3 = vmul.f32 %v1472_v14, %v12864_v54  ;;  %v1618_v60 = vsub.s32 4, %v12664_v42  ;;  %v1992_v17 = vsel %vm1988_vm14, %v1972_v44, %v12788_v22 }
 0x213   : > { %v2048_v7 = vadd.s32 %v2047_v28, %v2038_v9  ;;  %v18362_v31 = vand.u32 2147483647, %v18361_v50  ;;  %v1906_v21 = vsub.s32 0, %v13051_v34  ;;  %v1994_v15 = vsel %vm1990_vm9, %v12771_v56, %v1993_v57 }
 0x214   : > { %v13077_v6 = vadd.s32 %v2025_v55, %v2016_v41  ;;  %v13081_v14 = vmul.u32 %v17959_v37, %v2159_v10  ;;  %v1616_v22 = vxor.u32 2147483648, %v1615_v36  ;;  %v1758_v18 = vsub.s32 32, %v13038_v53 }
 0x215   : > { %vm13069_vm4 = vcmp.le.f32.partialorder %v18362_v31, 0.7853982  ;;  %v1763_v63 = vadd.s32 127, %v1762_v48  ;;  %vm1905_vm14 = vcmp.lt.s32.totalorder %v13051_v34, 0  ;;  %v13088_v33 = vadd.s32 %v12954_v11, %v2037_v35 }
 0x216   : > { %v13092_v56 = vmul.u32 %v17958_v24, %v2159_v10  ;;  %v2183_v40 = vand.u32 65535, %v13035_v16  ;;  %vm2275_vm9 = vcmp.gt.s32.totalorder %v2274_v8, 0  ;;  %v1742_v62 = vadd.s32 %v12672_v51, %v12652_v1 }
 0x217   : > { %v1995_v44 = vsel %vm1989_vm5, %v1992_v17, %v1994_v15  ;;  %v2052_v28 = vadd.s32 1, %v2048_v7  ;;  %v2161_v55 = vand.u32 65535, %v13047_v59  ;;  %v1907_v45 = vsel %vm1905_vm14, %v1906_v21, %v13051_v34 }
 0x218   : > { %vm2051_vm10 = vc.u32 %v13077_v6, %v13088_v33  ;;  %v2160_v35 = vshrl.u32 %v13041_v47, 16  ;;  %v2189_v11 = vshll.u32 %v13081_v14, 16  ;;  %v1480_v48 = vmul.f32 %v1479_v32, %v12864_v54 }
 0x219   : > { %v1617_v1 = vsel %vm1496_vm11, %v1616_v22, %v1615_v36  ;;  %v1760_v51 = vshrl.u32 %v1742_v62, %v1758_v18  ;;  %v2276_v43 = vsel %vm2275_vm9, %v2274_v8, 0  ;;  %v1764_v57 = vshll.u32 %v1763_v63, 23 }
 0x21a   : > { %v2167_v9 = vshll.u32 %v13092_v56, 16  ;;  %v2185_v41 = vmul.u32 %v2183_v40, %v2159_v10  ;;  %v13109_v17 = vmul.u32 %v2183_v40, %v2160_v35  ;;  %v1908_v31 = vclz %v1907_v45 }
 0x21b   : > { %v2049_v21 = vmul.u32 %v12841_v5, %v1995_v44  ;;  %v2053_v15 = vsel %vm2051_vm10, %v2052_v28, %v2048_v7  ;;  %v2163_v24 = vmul.u32 %v2161_v55, %v2159_v10  ;;  %v13112_v37 = vmul.u32 %v2161_v55, %v2160_v35 }
 0x21c   : > { %vm2193_vm5 = vc.u32 %v2185_v41, %v2189_v11  ;;  %v13114_v54 = vadd.s32 %v2189_v11, %v2185_v41  ;;  %v2278_v32 = vand.u32 31, %v2276_v43  ;;  %v1481_v36 = vadd.f32 1.0, %v1480_v48 }
 0x21d   : > { %v13119_v8 = vsel %vm1496_vm11, %v1618_v60, %v12664_v42  ;;  %v13124_v22 = vsel %vm13069_vm4, %v18361_v50, %v1617_v1  ;;  %v1759_v5 = vshll.u32 %v12804_v20, %v13038_v53  ;;  %v13128_v10 = vadd.s32 %v2053_v15, %v2049_v21 }
 0x21e   : > { %vm2171_vm7 = vc.u32 %v2163_v24, %v2167_v9  ;;  %v2173_v7 = vadd.s32 %v2167_v9, %v2163_v24  ;;  %v17960_v18 = vshll.u32 %v13109_v17, 16  ;;  %v1765_v40 = vor.u32 4788187, %v1764_v57 }
 0x21f   : > { %v1761_v63 = vor.u32 %v1760_v51, %v1759_v5  ;;  %v10581_v62 = vadd.s32 4294967294, %v1908_v31  ;;  %v2194_v42 = vsel %vm2193_vm5, 1, %v18311_v19  ;;  %v2169_v60 = vshll.u32 %v13112_v37, 16 }
 0x220   : > { %v18365_v44 = vshrl.u32 %v13035_v16, 16  ;;  %vm2197_vm3 = vc.u32 %v13114_v54, %v17960_v18  ;;  %v13138_v20 = vsub.s32 32, %v2278_v32  ;;  %v13140_v53 = vadd.f32 1.0, %v1473_v3 }
 0x221   : > { %v13143_v24 = vmul.f32 %v1481_v36, %v12837_v38  ;;  %v13147_v55 = vmul.f32 %v13124_v22, %v13124_v22  ;;  %v2172_v45 = vsel %vm2171_vm7, 1, %v18311_v19  ;;  %v2055_v16 = vadd.s32 536870912, %v13128_v10 }
 0x222   : > { %v2188_v28 = vmul.u32 %v18365_v44, %v2160_v35  ;;  %18366 = vst [vmem:[#allocation46_spill] sm:$0xff] %v13140_v53  ;;  %v18368_v11 = vshrl.u32 %v13047_v59, 16  ;;  %vm2175_vm6 = vc.u32 %v2173_v7, %v2169_v60  ;;  %v1766_v51 = vand.u32 2147483647, %v1765_v40 }
 0x223   : > { %18367 = vst [vmem:[#allocation47_spill] sm:$0xff] %v13143_v24  ;;  %v1768_v57 = vcvt.s32.f32 %v1761_v63  ;;  %vm10582_vm11 = vcmp.lt.s32.totalorder %v10581_v62, 0  ;;  %v2198_v3 = vsel %vm2197_vm3, 1, %v18311_v19  ;;  %v2290_v41 = vshll.u32 %v18334_v13, %v2278_v32 }
 0x224   : > { %v2166_v48 = vmul.u32 %v18368_v11, %v2160_v35  ;;  %v2196_v1 = vadd.s32 %v2194_v42, %v2188_v28  ;;  %v2291_v31 = vshrl.u32 %v18275_v2, %v13138_v20  ;;  %v2176_v21 = vsel %vm2175_vm6, 1, %v18311_v19 }
 0x225   : > { %v13159_v15 = vshrl.u32 %v2276_v43, 5  ;;  %v2293_v59 = vshll.u32 %v18275_v2, %v2278_v32  ;;  %v2294_v35 = vshrl.u32 %v18332_v52, %v13138_v20  ;;  %v13164_v36 = vshrl.u32 %v2055_v16, 30 }
 0x226   : > { %v2174_v38 = vadd.s32 %v2172_v45, %v2166_v48  ;;  %v2200_v5 = vadd.s32 %v2198_v3, %v2196_v1  ;;  %v2281_v7 = vshll.u32 %v18259_v58, %v2278_v32  ;;  %v2284_v63 = vshll.u32 %v18277_v25, %v2278_v32  ;;  %v18369_v45 = vld [vmem:[#allocation23_spill] sm:$0xff] }
 0x227   : > { %v2282_v40 = vshrl.u32 %v18277_v25, %v13138_v20  ;;  %v2285_v42 = vshrl.u32 %v18335_v26, %v13138_v20  ;;  %v2287_v43 = vshll.u32 %v18335_v26, %v2278_v32  ;;  %v2288_v60 = vshrl.u32 %v18334_v13, %v13138_v20 }
 0x228   : > { %v1623_v28 = vmul.f32 -0.001358992, %v13147_v55  ;;  %vm1650_vm14 = vcmp.lt.s32.totalorder %v18369_v45, 0  ;;  %v2178_v16 = vadd.s32 %v2176_v21, %v2174_v38  ;;  %v2292_v11 = vor.u32 %v2291_v31, %v2290_v41 }
 0x229   : > { %v1769_v48 = vmul.f32 %v1768_v57, %v1766_v51  ;;  %v2190_v1 = vshrl.u32 %v13081_v14, 16  ;;  %v2295_v3 = vor.u32 %v2294_v35, %v2293_v59  ;;  %vm2299_vm9 = vcmp.lt.s32.totalorder %v13159_v15, 4 }
 0x22a   : > { %v13181_v18 = vsel %vm10582_vm11, 0, %v10581_v62  ;;  %v2057_v32 = vshll.u32 %v13164_v36, 30  ;;  %v2168_v9 = vshrl.u32 %v13092_v56, 16  ;;  %v18370_v44 = vand.u32 2147483647, %v12971_v61 }
 0x22b   : > { %v18371_v0 = vand.u32 2147483647, %v18369_v45  ;;  %v2201_v14 = vadd.s32 %v2200_v5, %v2190_v1  ;;  %v13193_v51 = vor.u32 %v2282_v40, %v2281_v7  ;;  %v13195_v57 = vor.u32 %v2285_v42, %v2284_v63 }
 0x22c   : > { %v2271_v39 = vand.u32 8388607, %v18370_v44  ;;  %v13197_v62 = vor.u32 %v2288_v60, %v2287_v43  ;;  %v2179_v41 = vadd.s32 %v2178_v16, %v2168_v9  ;;  %vm2296_vm5 = vcmp.lt.s32.totalorder %v13159_v15, 1 }
 0x22d   : > { %vm13189_vm10 = vcmp.le.f32.partialorder %v18371_v0, 0.7853982  ;;  %vm2298_vm7 = vcmp.lt.s32.totalorder %v13159_v15, 3  ;;  %v2305_v56 = vsel %vm2299_vm9, %v2292_v11, 920167782  ;;  %vm1489_vm3 = vcmp.eq.s32.totalorder %v12926_v46, 2 }
 0x22e   : > { %v1630_v0 = vmul.f32 -0.00019511016, %v13147_v55  ;;  %v1770_v31 = vxor.u32 2147483648, %v1769_v48  ;;  %v2192_v21 = vshrl.u32 %v13109_v17, 16  ;;  %v2309_v59 = vsel %vm2299_vm9, %v2295_v3, 1326507024 }
 0x22f   : > { %v1916_v35 = vsub.s32 4294967266, %v13181_v18  ;;  %v2126_v9 = vshrl.u32 %v18259_v58, %v12930_v49  ;;  %v2170_v5 = vshrl.u32 %v13112_v37, 16  ;;  %v2272_v7 = vor.u32 8388608, %v2271_v39 }
 0x230   : > { %v2147_v63 = vsel %vm2145_vm8, %v12999_v30, 2102212464  ;;  %v2202_v40 = vadd.s32 %v2201_v14, %v2192_v21  ;;  %v2304_v42 = vsel %vm2296_vm5, %v13193_v51, %v13195_v57  ;;  %v2306_v43 = vsel %vm2298_vm7, %v13197_v62, %v2305_v56  ;;  %v13268_v56 = vpop.f32.mrf.mxu1 }
 0x231   : > { %vm1486_vm6 = vcmp.eq.s32.totalorder %v12926_v46, 0  ;;  %v13224_v49 = vsub.s32 %v13128_v10, %v2057_v32  ;;  %v13226_v39 = vadd.s32 %v2179_v41, %v2170_v5  ;;  %v2308_v30 = vsel %vm2296_vm5, %v13195_v57, %v13197_v62  ;;  %18375 = vst [vmem:[#allocation48_spill] sm:$0xff] %v13268_v56 }
 0x232   : > { %v2310_v37 = vsel %vm2298_vm7, %v2292_v11, %v2309_v59  ;;  %v17965_v60 = vxor.u32 2147483648, %v13143_v24  ;;  %v1631_v44 = vadd.f32 0.008332121, %v1630_v0  ;;  %v1771_v16 = vsel %vm1650_vm14, %v1770_v31, %v1769_v48 }
 0x233   : > { %vm2297_vm8 = vcmp.lt.s32.totalorder %v13159_v15, 2  ;;  %v2146_v10 = vsel %vm2142_vm15, %v2126_v9, %v12995_v27  ;;  %v2148_v1 = vsel %vm2144_vm13, %v12997_v4, %v2147_v63  ;;  %v18374_v3 = vshll.u32 %v13109_v17, 16 }
 0x234   : > { %v13251_v32 = vsel %vm2297_vm8, %v2304_v42, %v2306_v43  ;;  %vm1485_vm11 = vcmp.lt.s32.totalorder %v12926_v46, 2  ;;  %v1917_v48 = vadd.s32 127, %v1916_v35  ;;  %v2206_v14 = vadd.s32 1, %v2202_v40 }
 0x235   : > { %v13247_v11 = vadd.s32 %v13114_v54, %v18374_v3  ;;  %v13256_v27 = vsel %vm2297_vm8, %v2308_v30, %v2310_v37  ;;  %v13258_v41 = vshll.u32 %v2272_v7, 8  ;;  %v1624_v4 = vadd.f32 0.041655596, %v1623_v28 }
 0x236   : > { %v13263_v17 = vsel %vm13189_vm10, %v18369_v45, %v1771_v16  ;;  %v2060_v54 = vsub.s32 0, %v13224_v49  ;;  %v1912_v0 = vsub.s32 32, %v13181_v18  ;;  %vm2059_vm13 = vcmp.lt.s32.totalorder %v13224_v49, 0 }
 0x237   : > { %vm2205_vm15 = vc.u32 %v13226_v39, %v13247_v11  ;;  %v2149_v31 = vsel %vm2143_vm2, %v2146_v10, %v2148_v1  ;;  %v17967_v28 = vshrl.u32 %v13251_v32, 16  ;;  %v18376_v21 = vxor.u32 2147483648, %v13140_v53  ;;  %v18379_v10 = vld [vmem:[#allocation37_spill] sm:$0xff] }
 0x238   : > { %v13283_v35 = vsel %vm13069_vm4, 0, %v13119_v8  ;;  %v1632_v9 = vmul.f32 %v1631_v44, %v13147_v55  ;;  %v17966_v5 = vshrl.u32 %v13256_v27, 16  ;;  %v1896_v7 = vadd.s32 %v18378_v23, %v12793_v29 }
 0x239   : > { %v1491_v59 = vsel %vm1489_vm3, %v18376_v21, %v13143_v24  ;;  %18377 = vst [vmem:[#allocation49_spill] sm:$0xff] %v13283_v35  ;;  %v1918_v63 = vshll.u32 %v1917_v48, 23  ;;  %v2207_v42 = vsel %vm2205_vm15, %v2206_v14, %v2202_v40  ;;  %v2313_v43 = vand.u32 65535, %v13258_v41 }
 0x23a   : > { %v13292_v30 = vmul.f32 %v13263_v17, %v13263_v17  ;;  %v2061_v37 = vsel %vm2059_vm13, %v2060_v54, %v13224_v49  ;;  %v2203_v12 = vmul.u32 %v13041_v47, %v2149_v31  ;;  %v2421_v8 = vand.u32 2139095040, %v13268_v56 }
 0x23b   : > { %v1488_v29 = vsel %vm1486_vm6, %v13140_v53, %v17965_v60  ;;  %v1625_v40 = vmul.f32 %v1624_v4, %v13147_v55  ;;  %v1914_v44 = vshrl.u32 %v1896_v7, %v1912_v0  ;;  %v13305_v16 = vmul.u32 %v17967_v28, %v2313_v43 }
 0x23c   : > { %v1772_v1 = vsub.s32 4, %v18379_v10  ;;  %v13308_v3 = vadd.s32 %v2207_v42, %v2203_v12  ;;  %v13312_v47 = vmul.u32 %v17966_v5, %v2313_v43  ;;  %v2422_v48 = vshrl.u32 %v2421_v8, 23 }
 0x23d   : > { %v1913_v14 = vshll.u32 %v13051_v34, %v13181_v18  ;;  %v1919_v54 = vor.u32 4788187, %v1918_v63  ;;  %v2062_v31 = vclz %v2061_v37  ;;  %v2337_v4 = vand.u32 65535, %v13251_v32 }
 0x23e   : > { %v1492_v0 = vsel %vm1485_vm11, %v1488_v29, %v1491_v59  ;;  %v1633_v21 = vadd.f32 -0.16666654, %v1632_v9  ;;  %v1784_v23 = vmul.f32 -0.00019511016, %v13292_v30  ;;  %v2315_v7 = vand.u32 65535, %v13256_v27 }
 0x23f   : > { %v1915_v42 = vor.u32 %v1914_v44, %v1913_v14  ;;  %v2314_v12 = vshrl.u32 %v13258_v41, 16  ;;  %v2343_v8 = vshll.u32 %v13305_v16, 16  ;;  %v10592_v60 = vadd.s32 4294967169, %v2422_v48 }
 0x240   : > { %v1626_v5 = vadd.f32 -0.4999988, %v1625_v40  ;;  %v1773_v34 = vsel %vm1650_vm14, %v1772_v1, %v18379_v10  ;;  %v2209_v18 = vadd.s32 536870912, %v13308_v3  ;;  %v2321_v46 = vshll.u32 %v13312_v47, 16  ;;  %v18380_v1 = vld [vmem:[#allocation11_spill] sm:$0xff] }
 0x241   : > { %v1920_v59 = vand.u32 2147483647, %v1919_v54  ;;  %v10584_v9 = vadd.s32 4294967294, %v2062_v31  ;;  %v2339_v63 = vmul.u32 %v2337_v4, %v2313_v43  ;;  %v13328_v37 = vmul.u32 %v2337_v4, %v2314_v12 }
 0x242   : > { %v1634_v29 = vmul.f32 %v1633_v21, %v13147_v55  ;;  %v1785_v44 = vadd.f32 0.008332121, %v1784_v23  ;;  %v2317_v14 = vmul.u32 %v2315_v7, %v2313_v43  ;;  %v13331_v28 = vmul.u32 %v2315_v7, %v2314_v12 }
 0x243   : > { %v1922_v40 = vcvt.s32.f32 %v1915_v42  ;;  %vm2347_vm2 = vc.u32 %v2339_v63, %v2343_v8  ;;  %v13333_v48 = vadd.s32 %v2343_v8, %v2339_v63  ;;  %v2428_v10 = vadd.s32 1, %v10592_v60 }
 0x244   : > { %vm17981_vm4 = vweird.f32 %v18380_v1  ;;  %v1627_v53 = vmul.f32 %v1626_v5, %v13147_v55  ;;  %v13337_v54 = vshrl.u32 %v2209_v18, 30  ;;  %vm2325_vm14 = vc.u32 %v2317_v14, %v2321_v46 }
 0x245   : > { %v2327_v31 = vadd.s32 %v2321_v46, %v2317_v14  ;;  %v1777_v4 = vmul.f32 -0.001358992, %v13292_v30  ;;  %v1923_v21 = vmul.f32 %v1922_v40, %v1920_v59  ;;  %vm10585_vm3 = vcmp.lt.s32.totalorder %v10584_v9, 0 }
 0x246   : > { %18381 = vst [vmem:[#allocation39_spill] sm:$0xff] %v13337_v54  ;;  %v17970_v43 = vshll.u32 %v13328_v37, 16  ;;  %v1635_v23 = vadd.f32 1.0, %v1634_v29  ;;  %v1786_v7 = vmul.f32 %v1785_v44, %v13292_v30  ;;  %v2323_v42 = vshll.u32 %v13331_v28, 16 }
 0x247   : > { %v2348_v60 = vsel %vm2347_vm2, 1, %v18311_v19  ;;  %v2326_v8 = vsel %vm2325_vm14, 1, %v18311_v19  ;;  %v18382_v55 = vshrl.u32 %v13251_v32, 16  ;;  %vm2429_vm11 = vcmp.gt.s32.totalorder %v2428_v10, 0 }
 0x248   : > { %vm2351_vm6 = vc.u32 %v13333_v48, %v17970_v43  ;;  %v13350_v18 = vsel %vm10585_vm3, 0, %v10584_v9  ;;  %v2211_v46 = vshll.u32 %v13337_v54, 30  ;;  %v18383_v59 = vshrl.u32 %v13256_v27, 16 }
 0x249   : > { %v2342_v5 = vmul.u32 %v18382_v55, %v2314_v12  ;;  %vm2329_vm15 = vc.u32 %v2327_v31, %v2323_v42  ;;  %v13357_v29 = vsel %vm13189_vm10, 0, %v1773_v34  ;;  %v1778_v44 = vadd.f32 0.041655596, %v1777_v4  ;;  %v18387_v34 = vld [vmem:[#allocation31_spill] sm:$0xff] }
 0x24a   : > { %v2320_v63 = vmul.u32 %v18383_v59, %v2314_v12  ;;  %18384 = vst [vmem:[#allocation37_spill] sm:$0xff] %v13357_v29  ;;  %v1924_v32 = vxor.u32 2147483648, %v1923_v21  ;;  %v1787_v40 = vadd.f32 -0.16666654, %v1786_v7  ;;  %v2352_v43 = vsel %vm2351_vm6, 1, %v18311_v19 }
 0x24b   : > { %v2350_v14 = vadd.s32 %v2348_v60, %v2342_v5  ;;  %v2430_v24 = vsel %vm2429_vm11, %v2428_v10, 0  ;;  %v13360_v9 = vadd.f32 1.0, %v1627_v53  ;;  %v13363_v61 = vmul.f32 %v1635_v23, %v13124_v22 }
 0x24c   : > { %v2328_v55 = vadd.s32 %v2326_v8, %v2320_v63  ;;  %v2070_v27 = vsub.s32 4294967266, %v13350_v18  ;;  %v2330_v12 = vsel %vm2329_vm15, 1, %v18311_v19  ;;  %v13368_v38 = vand.u32 3, %v13283_v35 }
 0x24d   : > { %18385 = vst [vmem:[#allocation50_spill] sm:$0xff] %v13360_v9  ;;  %v18388_v31 = vand.u32 2147483647, %v18387_v34  ;;  %vm1804_vm13 = vcmp.lt.s32.totalorder %v18387_v34, 0  ;;  %v13378_v53 = vsub.s32 %v13308_v3, %v2211_v46  ;;  %v13382_v22 = vsel %vm17981_vm4, nan, %v1492_v0  ;;  %v13417_v46 = vpop.f32.mrf.mxu1 }
 0x24e   : > { %18386 = vst [vmem:[#allocation51_spill] sm:$0xff] %v13363_v61  ;;  %v1925_v10 = vsel %vm1804_vm13, %v1924_v32, %v1923_v21  ;;  %v2354_v23 = vadd.s32 %v2352_v43, %v2350_v14  ;;  %v2432_v7 = vand.u32 31, %v2430_v24  ;;  %v1779_v42 = vmul.f32 %v1778_v44, %v13292_v30 }
 0x24f   : > { %vm13372_vm10 = vcmp.le.f32.partialorder %v18388_v31, 0.7853982  ;;  %18391 = vst [vmem:[#allocation52_spill] sm:$0xff] %v13382_v22  ;;  %v1788_v60 = vmul.f32 %v1787_v40, %v13292_v30  ;;  %v13389_v8 = vand.u32 3, %v13357_v29  ;;  %v2332_v5 = vadd.s32 %v2330_v12, %v2328_v55 }
 0x250   : > { %v2071_v59 = vadd.s32 127, %v2070_v27  ;;  %v2344_v0 = vshrl.u32 %v13305_v16, 16  ;;  %v13397_v21 = vsel %vm13372_vm10, %v18387_v34, %v1925_v10  ;;  %v2214_v43 = vsub.s32 0, %v13378_v53  ;;  %18393 = vst [vmem:[#allocation54_spill] sm:$0xff] %v13417_v46 }
 0x251   : > { %v2280_v63 = vshrl.u32 %v18259_v58, %v13138_v20  ;;  %v2322_v44 = vshrl.u32 %v13312_v47, 16  ;;  %vm2213_vm2 = vcmp.lt.s32.totalorder %v13378_v53, 0  ;;  %v2301_v32 = vsel %vm2299_vm9, %v13197_v62, 2102212464 }
 0x252   : > { %v2355_v14 = vadd.s32 %v2354_v23, %v2344_v0  ;;  %v13407_v16 = vsub.s32 32, %v2432_v7  ;;  %v1780_v40 = vadd.f32 -0.4999988, %v1779_v42  ;;  %v1789_v55 = vadd.f32 1.0, %v1788_v60 }
 0x253   : > { %v2050_v27 = vadd.s32 %v13088_v33, %v13077_v6  ;;  %v2333_v12 = vadd.s32 %v2332_v5, %v2322_v44  ;;  %v13413_v20 = vmul.f32 %v13397_v21, %v13397_v21  ;;  %v2066_v47 = vsub.s32 32, %v13350_v18 }
 0x254   : > { %18392 = vst [vmem:[#allocation53_spill] sm:$0xff] %v13407_v16  ;;  %v2072_v31 = vshll.u32 %v2071_v59, 23  ;;  %v2346_v10 = vshrl.u32 %v13328_v37, 16  ;;  %v2215_v62 = vsel %vm2213_vm2, %v2214_v43, %v13378_v53  ;;  %v2300_v23 = vsel %vm2296_vm5, %v2280_v63, %v13193_v51 }
 0x255   : > { %v2302_v6 = vsel %vm2298_vm7, %v13195_v57, %v2301_v32  ;;  %v2324_v33 = vshrl.u32 %v13331_v28, 16  ;;  %v2444_v5 = vshll.u32 %v18334_v13, %v2432_v7  ;;  %v2445_v59 = vshrl.u32 %v18275_v2, %v13407_v16 }
 0x256   : > { %v2356_v42 = vadd.s32 %v2355_v14, %v2346_v10  ;;  %v13433_v43 = vshrl.u32 %v2430_v24, 5  ;;  %v2447_v51 = vshll.u32 %v18275_v2, %v2432_v7  ;;  %v2448_v63 = vshrl.u32 %v18332_v52, %v13407_v16 }
 0x257   : > { %v13431_v0 = vadd.s32 %v2333_v12, %v2324_v33  ;;  %v18394_v57 = vshll.u32 %v13328_v37, 16  ;;  %v2435_v44 = vshll.u32 %v18259_v58, %v2432_v7  ;;  %v2438_v32 = vshll.u32 %v18277_v25, %v2432_v7 }
 0x258   : > { %v2575_v14 = vand.u32 2139095040, %v13417_v46  ;;  %v2436_v24 = vshrl.u32 %v18277_v25, %v13407_v16  ;;  %v2439_v12 = vshrl.u32 %v18335_v26, %v13407_v16  ;;  %v2441_v10 = vshll.u32 %v18335_v26, %v2432_v7 }
 0x259   : > { %v13441_v28 = vadd.s32 %v13333_v48, %v18394_v57  ;;  %v2442_v37 = vshrl.u32 %v18334_v13, %v13407_v16  ;;  %vm1640_vm9 = vcmp.eq.s32.totalorder %v13368_v38, 0  ;;  %v1931_v48 = vmul.f32 -0.001358992, %v13413_v20 }
 0x25a   : > { %v2067_v33 = vshll.u32 %v13224_v49, %v13350_v18  ;;  %v2360_v57 = vadd.s32 1, %v2356_v42  ;;  %v2446_v3 = vor.u32 %v2445_v59, %v2444_v5  ;;  %v2068_v60 = vshrl.u32 %v2050_v27, %v2066_v47 }
 0x25b   : > { %vm2359_vm5 = vc.u32 %v13431_v0, %v13441_v28  ;;  %v2449_v1 = vor.u32 %v2448_v63, %v2447_v51  ;;  %vm2453_vm7 = vcmp.lt.s32.totalorder %v13433_v43, 4  ;;  %v2073_v7 = vor.u32 4788187, %v2072_v31 }
 0x25c   : > { %v2216_v35 = vclz %v2215_v62  ;;  %v2303_v29 = vsel %vm2297_vm8, %v2300_v23, %v2302_v6  ;;  %v18395_v22 = vand.u32 2147483647, %v13268_v56  ;;  %v13464_v16 = vor.u32 %v2436_v24, %v2435_v44  ;;  %v18399_v44 = vld [vmem:[#allocation44_spill] sm:$0xff] }
 0x25d   : > { %v13466_v49 = vor.u32 %v2439_v12, %v2438_v32  ;;  %v13468_v18 = vor.u32 %v2442_v37, %v2441_v10  ;;  %v2576_v27 = vshrl.u32 %v2575_v14, 23  ;;  %vm1643_vm14 = vcmp.eq.s32.totalorder %v13368_v38, 2  ;;  %v18400_v12 = vld [vmem:[#allocation33_spill] sm:$0xff] }
 0x25e   : > { %v2425_v54 = vand.u32 8388607, %v18395_v22  ;;  %v2361_v47 = vsel %vm2359_vm5, %v2360_v57, %v2356_v42  ;;  %vm2450_vm3 = vcmp.lt.s32.totalorder %v13433_v43, 1  ;;  %vm2452_vm6 = vcmp.lt.s32.totalorder %v13433_v43, 3 }
 0x25f   : > { %v2459_v15 = vsel %vm2453_vm7, %v2446_v3, 920167782  ;;  %vm1639_vm8 = vcmp.lt.s32.totalorder %v13368_v38, 2  ;;  %v1781_v22 = vmul.f32 %v1780_v40, %v13292_v30  ;;  %v1938_v31 = vmul.f32 -0.00019511016, %v13413_v20 }
 0x260   : > { %v2357_v62 = vmul.u32 %v13258_v41, %v2303_v29  ;;  %v2463_v23 = vsel %vm2453_vm7, %v2449_v1, 1326507024  ;;  %v13482_v6 = vmul.f32 %v1789_v55, %v13263_v17  ;;  %v1932_v42 = vadd.f32 0.041655596, %v1931_v48 }
 0x261   : > { %v2069_v5 = vor.u32 %v2068_v60, %v2067_v33  ;;  %v10587_v59 = vadd.s32 4294967294, %v2216_v35  ;;  %v2426_v63 = vor.u32 8388608, %v2425_v54  ;;  %v2458_v30 = vsel %vm2450_vm3, %v13464_v16, %v13466_v49 }
 0x262   : > { %18396 = vst [vmem:[#allocation55_spill] sm:$0xff] %v13482_v6  ;;  %v13484_v51 = vadd.s32 %v2361_v47, %v2357_v62  ;;  %v2460_v41 = vsel %vm2452_vm6, %v13468_v18, %v2459_v15  ;;  %vm18018_vm11 = vweird.f32 %v18361_v50  ;;  %v2074_v1 = vand.u32 2147483647, %v2073_v7 }
 0x263   : > { %v2462_v17 = vsel %vm2450_vm3, %v13466_v49, %v13468_v18  ;;  %v2464_v35 = vsel %vm2452_vm6, %v2446_v3, %v2463_v23  ;;  %v10595_v54 = vadd.s32 4294967169, %v2576_v27  ;;  %v18397_v29 = vxor.u32 2147483648, %v13363_v61 }
 0x264   : > { %v13505_v55 = vadd.f32 1.0, %v1781_v22  ;;  %v1939_v60 = vadd.f32 0.008332121, %v1938_v31  ;;  %vm2451_vm15 = vcmp.lt.s32.totalorder %v13433_v43, 2  ;;  %v1926_v32 = vsub.s32 4, %v18399_v44 }
 0x265   : > { %v1642_v40 = vsel %vm1640_vm9, %v13360_v9, %v18397_v29  ;;  %v2076_v14 = vcvt.s32.f32 %v2069_v5  ;;  %vm10588_vm2 = vcmp.lt.s32.totalorder %v10587_v59, 0  ;;  %v13511_v24 = vsel %vm2451_vm15, %v2458_v30, %v2460_v41 }
 0x266   : > { %18398 = vst [vmem:[#allocation56_spill] sm:$0xff] %v13505_v55  ;;  %v17985_v3 = vxor.u32 2147483648, %v13482_v6  ;;  %vm1958_vm5 = vcmp.lt.s32.totalorder %v18400_v12, 0  ;;  %v2363_v10 = vadd.s32 536870912, %v13484_v51  ;;  %v13518_v37 = vsel %vm2451_vm15, %v2462_v17, %v2464_v35 }
 0x267   : > { %v13520_v48 = vshll.u32 %v2426_v63, 8  ;;  %vm1793_vm9 = vcmp.lt.s32.totalorder %v13389_v8, 2  ;;  %v1933_v33 = vmul.f32 %v1932_v42, %v13413_v20  ;;  %v2077_v57 = vmul.f32 %v2076_v14, %v2074_v1 }
 0x268   : > { %v2582_v7 = vadd.s32 1, %v10595_v54  ;;  %v18401_v27 = vxor.u32 2147483648, %v13360_v9  ;;  %vm18016_vm4 = vweird.f32 %v18369_v45  ;;  %v1940_v15 = vmul.f32 %v1939_v60, %v13413_v20 }
 0x269   : > { %v13531_v22 = vsel %vm10588_vm2, 0, %v10587_v59  ;;  %v17986_v31 = vshrl.u32 %v13511_v24, 16  ;;  %vm1794_vm0 = vcmp.eq.s32.totalorder %v13389_v8, 0  ;;  %v17984_v23 = vxor.u32 2147483648, %v13505_v55 }
 0x26a   : > { %v1645_v47 = vsel %vm1643_vm14, %v18401_v27, %v13363_v61  ;;  %v18402_v42 = vand.u32 2147483647, %v18400_v12  ;;  %v2470_v63 = vshrl.u32 %v13518_v37, 16  ;;  %v1796_v59 = vsel %vm1794_vm0, %v13505_v55, %v17985_v3 }
 0x26b   : > { %v1646_v62 = vsel %vm1639_vm8, %v1642_v40, %v1645_v47  ;;  %v1927_v38 = vsel %vm1804_vm13, %v1926_v32, %v18399_v44  ;;  %v13551_v30 = vshrl.u32 %v2363_v10, 30  ;;  %v2467_v41 = vand.u32 65535, %v13520_v48 }
 0x26c   : > { %vm13540_vm12 = vcmp.le.f32.partialorder %v18402_v42, 0.7853982  ;;  %v1934_v1 = vadd.f32 -0.4999988, %v1933_v33  ;;  %v2078_v17 = vxor.u32 2147483648, %v2077_v57  ;;  %v2224_v35 = vsub.s32 4294967266, %v13531_v22 }
 0x26d   : > { %vm2583_vm14 = vcmp.gt.s32.totalorder %v2582_v7, 0  ;;  %v13557_v54 = vsel %vm18018_vm11, nan, %v1646_v62  ;;  %vm1797_vm8 = vcmp.eq.s32.totalorder %v13389_v8, 2  ;;  %v1941_v29 = vadd.f32 -0.16666654, %v1940_v15 }
 0x26e   : > { %18405 = vst [vmem:[#allocation44_spill] sm:$0xff] %v13557_v54  ;;  %v13562_v40 = vmul.u32 %v17986_v31, %v2467_v41  ;;  %v1799_v60 = vsel %vm1797_vm8, %v17984_v23, %v13482_v6  ;;  %v13569_v44 = vsel %vm13372_vm10, 0, %v1927_v38  ;;  %v2080_v32 = vsub.s32 4, %v13164_v36 }
 0x26f   : > { %18406 = vst [vmem:[#allocation57_spill] sm:$0xff] %v13569_v44  ;;  %v13572_v14 = vmul.u32 %v2470_v63, %v2467_v41  ;;  %v1800_v10 = vsel %vm1793_vm9, %v1796_v59, %v1799_v60  ;;  %v2365_v33 = vshll.u32 %v13551_v30, 30  ;;  %v2491_v27 = vand.u32 65535, %v13511_v24 }
 0x270   : > { %v2584_v47 = vsel %vm2583_vm14, %v2582_v7, 0  ;;  %v1935_v15 = vmul.f32 %v1934_v1, %v13413_v20  ;;  %v2079_v62 = vsel %vm1958_vm5, %v2078_v17, %v2077_v57  ;;  %v2225_v4 = vadd.s32 127, %v2224_v35 }
 0x271   : > { %v2469_v42 = vand.u32 65535, %v13518_v37  ;;  %v1942_v38 = vmul.f32 %v1941_v29, %v13413_v20  ;;  %v13584_v23 = vand.u32 3, %v13569_v44  ;;  %v2468_v8 = vshrl.u32 %v13520_v48, 16 }
 0x272   : > { %v2497_v59 = vshll.u32 %v13562_v40, 16  ;;  %v13590_v7 = vsel %vm18016_vm4, nan, %v1800_v10  ;;  %v13595_v57 = vsel %vm1958_vm5, %v2080_v32, %v13164_v36  ;;  %v2475_v37 = vshll.u32 %v13572_v14, 16 }
 0x273   : > { %18407 = vst [vmem:[#allocation58_spill] sm:$0xff] %v13590_v7  ;;  %v2586_v1 = vand.u32 31, %v2584_v47  ;;  %v13601_v20 = vsel %vm13540_vm12, %v18400_v12, %v2079_v62  ;;  %v13604_v17 = vsub.s32 %v13484_v51, %v2365_v33  ;;  %v2493_v35 = vmul.u32 %v2491_v27, %v2467_v41 }
 0x274   : > { %v13606_v29 = vmul.u32 %v2491_v27, %v2468_v8  ;;  %v13608_v60 = vadd.f32 1.0, %v1935_v15  ;;  %v2220_v10 = vsub.s32 32, %v13531_v22  ;;  %v2226_v36 = vshll.u32 %v2225_v4, 23 }
 0x275   : > { %v2471_v32 = vmul.u32 %v2469_v42, %v2467_v41  ;;  %v1943_v3 = vadd.f32 1.0, %v1942_v38  ;;  %v13611_v31 = vmul.u32 %v2469_v42, %v2468_v8  ;;  %vm2501_vm0 = vc.u32 %v2493_v35, %v2497_v59 }
 0x276   : > { %18408 = vst [vmem:[#allocation59_spill] sm:$0xff] %v13608_v60  ;;  %v13613_v45 = vadd.s32 %v2497_v59, %v2493_v35  ;;  %v13617_v62 = vmul.f32 %v13601_v20, %v13601_v20  ;;  %v2204_v51 = vadd.s32 %v13247_v11, %v13226_v39  ;;  %v13621_v33 = vsub.s32 32, %v2586_v1 }
 0x277   : > { %vm2479_vm10 = vc.u32 %v2471_v32, %v2475_v37  ;;  %v2221_v27 = vshll.u32 %v13378_v53, %v13531_v22  ;;  %v2368_v41 = vsub.s32 0, %v13604_v17  ;;  %v2481_v15 = vadd.s32 %v2475_v37, %v2471_v32 }
 0x278   : > { %v17991_v4 = vshll.u32 %v13606_v29, 16  ;;  %v2222_v42 = vshrl.u32 %v2204_v51, %v2220_v10  ;;  %v2227_v38 = vor.u32 4788187, %v2226_v36  ;;  %vm2367_vm13 = vcmp.lt.s32.totalorder %v13604_v17, 0 }
 0x279   : > { %v2502_v59 = vsel %vm2501_vm0, 1, %v18311_v19  ;;  %v2477_v35 = vshll.u32 %v13611_v31, 16  ;;  %v2480_v39 = vsel %vm2479_vm10, 1, %v18311_v19  ;;  %v18409_v11 = vshrl.u32 %v13511_v24, 16 }
 0x27a   : > { %vm2505_vm2 = vc.u32 %v13613_v45, %v17991_v4  ;;  %v2474_v53 = vmul.u32 %v2470_v63, %v2468_v8  ;;  %v2601_v37 = vshll.u32 %v18275_v2, %v2586_v1  ;;  %v2602_v10 = vshrl.u32 %v18332_v52, %v13621_v33 }
 0x27b   : > { %v2496_v50 = vmul.u32 %v18409_v11, %v2468_v8  ;;  %v2369_v36 = vsel %vm2367_vm13, %v2368_v41, %v13604_v17  ;;  %vm2483_vm5 = vc.u32 %v2481_v15, %v2477_v35  ;;  %v13641_v51 = vshrl.u32 %v2584_v47, 5 }
 0x27c   : > { %v2482_v24 = vadd.s32 %v2480_v39, %v2474_v53  ;;  %v2506_v11 = vsel %vm2505_vm2, 1, %v18311_v19  ;;  %v2598_v55 = vshll.u32 %v18334_v13, %v2586_v1  ;;  %v2599_v63 = vshrl.u32 %v18275_v2, %v13621_v33 }
 0x27d   : > { %v2504_v32 = vadd.s32 %v2502_v59, %v2496_v50  ;;  %v2592_v8 = vshll.u32 %v18277_v25, %v2586_v1  ;;  %v2593_v4 = vshrl.u32 %v18335_v26, %v13621_v33  ;;  %v2595_v22 = vshll.u32 %v18335_v26, %v2586_v1 }
 0x27e   : > { %v2596_v50 = vshrl.u32 %v18334_v13, %v13621_v33  ;;  %v13654_v47 = vmul.f32 %v1943_v3, %v13397_v21  ;;  %v2085_v41 = vmul.f32 -0.001358992, %v13617_v62  ;;  %v2484_v15 = vsel %vm2483_vm5, 1, %v18311_v19 }
 0x27f   : > { %v2603_v59 = vor.u32 %v2602_v10, %v2601_v37  ;;  %v2223_v35 = vor.u32 %v2222_v42, %v2221_v27  ;;  %v2589_v39 = vshll.u32 %v18259_v58, %v2586_v1  ;;  %v2590_v53 = vshrl.u32 %v18277_v25, %v13621_v33 }
 0x280   : > { %18410 = vst [vmem:[#allocation60_spill] sm:$0xff] %v13654_v47  ;;  %vm2607_vm9 = vcmp.lt.s32.totalorder %v13641_v51, 4  ;;  %v2228_v6 = vand.u32 2147483647, %v2227_v38  ;;  %v2370_v9 = vclz %v2369_v36  ;;  %v2508_v61 = vadd.s32 %v2506_v11, %v2504_v32  ;;  %v13679_v36 = vpop.f32.mrf.mxu1 }
 0x281   : > { %v2600_v44 = vor.u32 %v2599_v63, %v2598_v55  ;;  %v2486_v54 = vadd.s32 %v2484_v15, %v2482_v24  ;;  %v18411_v21 = vand.u32 2147483647, %v13417_v46  ;;  %v13664_v7 = vor.u32 %v2593_v4, %v2592_v8  ;;  %18412 = vst [vmem:[#allocation61_spill] sm:$0xff] %v13679_v36 }
 0x282   : > { %v13666_v56 = vor.u32 %v2596_v50, %v2595_v22  ;;  %v2498_v27 = vshrl.u32 %v13562_v40, 16  ;;  %vm2604_vm14 = vcmp.lt.s32.totalorder %v13641_v51, 1  ;;  %vm2606_vm8 = vcmp.lt.s32.totalorder %v13641_v51, 3 }
 0x283   : > { %v2579_v3 = vand.u32 8388607, %v18411_v21  ;;  %v2617_v1 = vsel %vm2607_vm9, %v2603_v59, 1326507024  ;;  %v2086_v42 = vadd.f32 0.041655596, %v2085_v41  ;;  %v13675_v37 = vor.u32 %v2590_v53, %v2589_v39 }
 0x284   : > { %v2092_v55 = vmul.f32 -0.00019511016, %v13617_v62  ;;  %v2476_v38 = vshrl.u32 %v13572_v14, 16  ;;  %v2230_v4 = vcvt.s32.f32 %v2223_v35  ;;  %v10590_v10 = vadd.s32 4294967294, %v2370_v9  ;;  %v18413_v9 = vld [vmem:[#allocation53_spill] sm:$0xff]  ;;  %v18414_v21 = vld [vmem:[#allocation38_spill] sm:$0xff] }
 0x285   : > { %v2509_v22 = vadd.s32 %v2508_v61, %v2498_v27  ;;  %v2613_v40 = vsel %vm2607_vm9, %v2600_v44, 920167782  ;;  %v2580_v24 = vor.u32 8388608, %v2579_v3  ;;  %v2616_v11 = vsel %vm2604_vm14, %v13664_v7, %v13666_v56 }
 0x286   : > { %v2487_v32 = vadd.s32 %v2486_v54, %v2476_v38  ;;  %v2618_v14 = vsel %vm2606_vm8, %v2600_v44, %v2617_v1  ;;  %vm1948_vm0 = vcmp.eq.s32.totalorder %v13584_v23, 0  ;;  %vm1951_vm10 = vcmp.eq.s32.totalorder %v13584_v23, 2 }
 0x287   : > { %v2231_v61 = vmul.f32 %v2230_v4, %v2228_v6  ;;  %v2434_v63 = vshrl.u32 %v18259_v58, %v18413_v9  ;;  %v2455_v54 = vsel %vm2453_vm7, %v13468_v18, 2102212464  ;;  %v2500_v8 = vshrl.u32 %v13606_v29, 16 }
 0x288   : > { %v2478_v50 = vshrl.u32 %v13611_v31, 16  ;;  %vm2605_vm13 = vcmp.lt.s32.totalorder %v13641_v51, 2  ;;  %v2612_v44 = vsel %vm2604_vm14, %v13675_v37, %v13664_v7  ;;  %v2614_v6 = vsel %vm2606_vm8, %v13666_v56, %v2613_v40 }
 0x289   : > { %vm10591_vm2 = vcmp.lt.s32.totalorder %v10590_v10, 0  ;;  %v2510_v41 = vadd.s32 %v2509_v22, %v2500_v8  ;;  %v13706_v18 = vsel %vm2605_vm13, %v2616_v11, %v2618_v14  ;;  %v2729_v15 = vand.u32 2139095040, %v13679_v36 }
 0x28a   : > { %v18002_v31 = vxor.u32 2147483648, %v13654_v47  ;;  %v18001_v59 = vxor.u32 2147483648, %v13608_v60  ;;  %v13711_v35 = vadd.s32 %v2487_v32, %v2478_v50  ;;  %v13713_v39 = vshll.u32 %v2580_v24, 8 }
 0x28b   : > { %v2093_v53 = vadd.f32 0.008332121, %v2092_v55  ;;  %v18415_v3 = vand.u32 2147483647, %v18414_v21  ;;  %v2454_v1 = vsel %vm2450_vm3, %v2434_v63, %v13464_v16  ;;  %v13726_v38 = vsel %vm2605_vm13, %v2612_v44, %v2614_v6 }
 0x28c   : > { %v2730_v4 = vshrl.u32 %v2729_v15, 23  ;;  %vm1947_vm5 = vcmp.lt.s32.totalorder %v13584_v23, 2  ;;  %v13729_v22 = vsel %vm10591_vm2, 0, %v10590_v10  ;;  %v2456_v55 = vsel %vm2452_vm6, %v13466_v49, %v2455_v54 }
 0x28d   : > { %vm13717_vm7 = vcmp.le.f32.partialorder %v18415_v3, 0.7853982  ;;  %v18418_v40 = vshll.u32 %v13606_v29, 16  ;;  %v18004_v16 = vshrl.u32 %v13706_v18, 16  ;;  %v2087_v24 = vmul.f32 %v2086_v42, %v13617_v62 }
 0x28e   : > { %v2232_v11 = vxor.u32 2147483648, %v2231_v61  ;;  %v2514_v14 = vadd.s32 1, %v2510_v41  ;;  %v10598_v9 = vadd.s32 4294967169, %v2730_v4  ;;  %vm2112_vm3 = vcmp.lt.s32.totalorder %v18414_v21, 0 }
 0x28f   : > { %v13737_v32 = vadd.s32 %v13613_v45, %v18418_v40  ;;  %v2621_v10 = vand.u32 65535, %v13713_v39  ;;  %v18003_v49 = vshrl.u32 %v13726_v38, 16  ;;  %v2094_v29 = vmul.f32 %v2093_v53, %v13617_v62 }
 0x290   : > { %v2378_v45 = vsub.s32 4294967266, %v13729_v22  ;;  %v2457_v63 = vsel %vm2451_vm15, %v2454_v1, %v2456_v55  ;;  %v2736_v42 = vadd.s32 1, %v10598_v9  ;;  %v1950_v54 = vsel %vm1948_vm0, %v13608_v60, %v18002_v31 }
 0x291   : > { %vm2513_vm2 = vc.u32 %v13711_v35, %v13737_v32  ;;  %v1953_v8 = vsel %vm1951_vm10, %v18001_v59, %v13654_v47  ;;  %v13763_v50 = vsel %vm13540_vm12, 0, %v13595_v57  ;;  %v13767_v43 = vmul.u32 %v18004_v16, %v2621_v10 }
 0x292   : > { %18419 = vst [vmem:[#allocation53_spill] sm:$0xff] %v13763_v50  ;;  %v2088_v44 = vadd.f32 -0.4999988, %v2087_v24  ;;  %v2233_v6 = vsel %vm2112_vm3, %v2232_v11, %v2231_v61  ;;  %v2515_v15 = vsel %vm2513_vm2, %v2514_v14, %v2510_v41  ;;  %vm2737_vm6 = vcmp.gt.s32.totalorder %v2736_v42, 0 }
 0x293   : > { %v2511_v53 = vmul.u32 %v13520_v48, %v2457_v63  ;;  %v2623_v3 = vand.u32 65535, %v13706_v18  ;;  %v13775_v1 = vmul.u32 %v18003_v49, %v2621_v10  ;;  %v2738_v5 = vsel %vm2737_vm6, %v2736_v42, 0 }
 0x294   : > { %v2095_v57 = vadd.f32 -0.16666654, %v2094_v29  ;;  %v2374_v4 = vsub.s32 32, %v13729_v22  ;;  %v13778_v55 = vadd.s32 127, %v2378_v45  ;;  %v2740_v40 = vand.u32 31, %v2738_v5 }
 0x295   : > { %v13783_v61 = vsel %vm13717_vm7, %v18414_v21, %v2233_v6  ;;  %v13785_v41 = vadd.s32 %v2515_v15, %v2511_v53  ;;  %v2629_v48 = vshll.u32 %v13767_v43, 16  ;;  %v2645_v24 = vand.u32 65535, %v13726_v38 }
 0x296   : > { %v13791_v11 = vsel %vm1947_vm5, %v1950_v54, %v1953_v8  ;;  %v13794_v14 = vand.u32 3, %v13763_v50  ;;  %v2358_v9 = vadd.s32 %v13441_v28, %v13431_v0  ;;  %v13798_v29 = vsub.s32 32, %v2740_v40 }
 0x297   : > { %v13801_v45 = vmul.f32 %v2088_v44, %v13617_v62  ;;  %v2622_v63 = vshrl.u32 %v13713_v39, 16  ;;  %v2625_v42 = vmul.u32 %v2623_v3, %v2621_v10  ;;  %v2651_v6 = vshll.u32 %v13775_v1, 16 }
 0x298   : > { %18420 = vst [vmem:[#allocation62_spill] sm:$0xff] %v13798_v29  ;;  %v13806_v23 = vmul.f32 %v2095_v57, %v13617_v62  ;;  %v13810_v54 = vmul.f32 %v13783_v61, %v13783_v61  ;;  %v2376_v8 = vshrl.u32 %v2358_v9, %v2374_v4  ;;  %v2380_v0 = vshll.u32 %v13778_v55, 23 }
 0x299   : > { %v2517_v28 = vadd.s32 536870912, %v13785_v41  ;;  %v13814_v15 = vmul.u32 %v2623_v3, %v2622_v63  ;;  %vm13816_vm12 = vc.u32 %v2625_v42, %v2629_v48  ;;  %v2647_v53 = vmul.u32 %v2645_v24, %v2621_v10 }
 0x29a   : > { %v2635_v59 = vadd.s32 %v2629_v48, %v2625_v42  ;;  %v13820_v31 = vmul.u32 %v2645_v24, %v2622_v63  ;;  %v2752_v62 = vshll.u32 %v18334_v13, %v2740_v40  ;;  %v2753_v57 = vshrl.u32 %v18275_v2, %v13798_v29 }
 0x29b   : > { %vm13825_vm15 = vc.u32 %v2647_v53, %v2651_v6  ;;  %v13829_v55 = vadd.s32 %v2651_v6, %v2647_v53  ;;  %v13832_v9 = vshrl.u32 %v2738_v5, 5  ;;  %v2743_v10 = vshll.u32 %v18259_v58, %v2740_v40 }
 0x29c   : > { %v2744_v48 = vshrl.u32 %v18277_v25, %v13798_v29  ;;  %v2746_v24 = vshll.u32 %v18277_v25, %v2740_v40  ;;  %v2749_v42 = vshll.u32 %v18335_v26, %v2740_v40  ;;  %v2747_v49 = vshrl.u32 %v18335_v26, %v13798_v29 }
 0x29d   : > { %v2750_v6 = vshrl.u32 %v18334_v13, %v13798_v29  ;;  %v2755_v53 = vshll.u32 %v18275_v2, %v2740_v40  ;;  %v2756_v5 = vshrl.u32 %v18332_v52, %v13798_v29  ;;  %v13846_v3 = vshrl.u32 %v2517_v28, 30  ;;  %v13860_v29 = vpop.f32.mrf.mxu2 }
 0x29e   : > { %v2631_v16 = vshll.u32 %v13814_v15, 16  ;;  %v2653_v60 = vshll.u32 %v13820_v31, 16  ;;  %v2754_v47 = vor.u32 %v2753_v57, %v2752_v62  ;;  %v18425_v50 = vshrl.u32 %v13706_v18, 16  ;;  %18427 = vst [vmem:[#allocation63_spill] sm:$0xff] %v13860_v29  ;;  %v18431_v62 = vld [vmem:[#allocation39_spill] sm:$0xff] }
 0x29f   : > { %v2634_v12 = vsel %vm13816_vm12, 1, %v18311_v19  ;;  %v18426_v25 = vshrl.u32 %v13726_v38, 16  ;;  %v2656_v28 = vsel %vm13825_vm15, 1, %v18311_v19  ;;  %v18430_v18 = vand.u32 2147483647, %v13679_v36 }
 0x2a0   : > { %v2628_v46 = vmul.u32 %v18425_v50, %v2622_v63  ;;  %vm13862_vm0 = vc.u32 %v2635_v59, %v2631_v16  ;;  %vm2659_vm10 = vc.u32 %v13829_v55, %v2653_v60  ;;  %v13871_v44 = vor.u32 %v2744_v48, %v2743_v10 }
 0x2a1   : > { %v2650_v40 = vmul.u32 %v18426_v25, %v2622_v63  ;;  %v2733_v50 = vand.u32 8388607, %v18430_v18  ;;  %v13873_v25 = vor.u32 %v2747_v49, %v2746_v24  ;;  %v13875_v38 = vor.u32 %v2750_v6, %v2749_v42 }
 0x2a2   : > { %v2757_v63 = vor.u32 %v2756_v5, %v2755_v53  ;;  %vm2761_vm5 = vcmp.lt.s32.totalorder %v13832_v9, 4  ;;  %vm2758_vm2 = vcmp.lt.s32.totalorder %v13832_v9, 1  ;;  %vm2760_vm6 = vcmp.lt.s32.totalorder %v13832_v9, 3 }
 0x2a3   : > { %v2658_v59 = vadd.s32 %v2656_v28, %v2650_v40  ;;  %v2767_v16 = vsel %vm2761_vm5, %v2754_v47, 920167782  ;;  %v2234_v57 = vsub.s32 4, %v18431_v62  ;;  %v2636_v4 = vadd.s32 %v2634_v12, %v2628_v46 }
 0x2a4   : > { %v2660_v10 = vsel %vm2659_vm10, 1, %v18311_v19  ;;  %v2883_v49 = vand.u32 2139095040, %v13860_v29  ;;  %v2375_v48 = vshll.u32 %v13604_v17, %v13729_v22  ;;  %v2381_v24 = vor.u32 4788187, %v2380_v0 }
 0x2a5   : > { %v2519_v42 = vshll.u32 %v13846_v3, 30  ;;  %v2638_v6 = vsel %vm13862_vm0, 1, %v18311_v19  ;;  %v2734_v53 = vor.u32 8388608, %v2733_v50  ;;  %v2766_v46 = vsel %vm2758_vm2, %v13871_v44, %v13873_v25 }
 0x2a6   : > { %v2768_v12 = vsel %vm2760_vm6, %v13875_v38, %v2767_v16  ;;  %v2771_v17 = vsel %vm2761_vm5, %v2757_v63, 1326507024  ;;  %v2246_v22 = vmul.f32 -0.00019511016, %v13810_v54  ;;  %v2377_v0 = vor.u32 %v2376_v8, %v2375_v48 }
 0x2a7   : > { %v2662_v5 = vadd.s32 %v2660_v10, %v2658_v59  ;;  %v2770_v13 = vsel %vm2758_vm2, %v13873_v25, %v13875_v38  ;;  %v2640_v40 = vadd.s32 %v2638_v6, %v2636_v4  ;;  %vm2759_vm12 = vcmp.lt.s32.totalorder %v13832_v9, 2 }
 0x2a8   : > { %v2772_v28 = vsel %vm2760_vm6, %v2754_v47, %v2771_v17  ;;  %v2884_v18 = vshrl.u32 %v2883_v49, 23  ;;  %v13909_v50 = vadd.f32 1.0, %v13801_v45  ;;  %v2382_v63 = vand.u32 2147483647, %v2381_v24 }
 0x2a9   : > { %v2652_v16 = vshrl.u32 %v13775_v1, 16  ;;  %v13914_v8 = vsel %vm2759_vm12, %v2766_v46, %v2768_v12  ;;  %v13917_v59 = vsub.s32 %v13785_v41, %v2519_v42  ;;  %v2630_v4 = vshrl.u32 %v13767_v43, 16  ;;  %v18433_v42 = vld [vmem:[#allocation45_spill] sm:$0xff] }
 0x2aa   : > { %18432 = vst [vmem:[#allocation39_spill] sm:$0xff] %v13909_v50  ;;  %v13922_v10 = vsel %vm2759_vm12, %v2770_v13, %v2772_v28  ;;  %v13924_v47 = vshll.u32 %v2734_v53, 8  ;;  %v2097_v45 = vadd.f32 1.0, %v13806_v23  ;;  %v2247_v49 = vadd.f32 0.008332121, %v2246_v22 }
 0x2ab   : > { %v2384_v48 = vcvt.s32.f32 %v2377_v0  ;;  %v2663_v1 = vadd.s32 %v2662_v5, %v2652_v16  ;;  %v2239_v24 = vmul.f32 -0.001358992, %v13810_v54  ;;  %v2641_v6 = vadd.s32 %v2640_v40, %v2630_v4  ;;  %v18455_v16 = vld [vmem:[#allocation48_spill] sm:$0xff] }
 0x2ac   : > { %v2800_v46 = vshrl.u32 %v13914_v8, 16  ;;  %v10601_v41 = vadd.s32 4294967169, %v2884_v18  ;;  %vm2266_vm15 = vcmp.lt.s32.totalorder %v18433_v42, 0  ;;  %v2588_v12 = vshrl.u32 %v18259_v58, %v13621_v33 }
 0x2ad   : > { %v2385_v43 = vmul.f32 %v2384_v48, %v2382_v63  ;;  %v2654_v53 = vshrl.u32 %v13820_v31, 16  ;;  %v18017_v17 = vshrl.u32 %v13922_v10, 16  ;;  %v2235_v23 = vsel %vm2112_vm3, %v2234_v57, %v18431_v62 }
 0x2ae   : > { %v2522_v22 = vsub.s32 0, %v13917_v59  ;;  %v2632_v0 = vshrl.u32 %v13814_v15, 16  ;;  %v2775_v5 = vand.u32 65535, %v13924_v47  ;;  %v2248_v13 = vmul.f32 %v2247_v49, %v13810_v54 }
 0x2af   : > { %vm2521_vm0 = vcmp.lt.s32.totalorder %v13917_v59, 0  ;;  %v2609_v33 = vsel %vm2607_vm9, %v13666_v56, 2102212464  ;;  %v2664_v40 = vadd.s32 %v2663_v1, %v2654_v53  ;;  %v13946_v28 = vmul.f32 %v2097_v45, %v13601_v20 }
 0x2b0   : > { %v13948_v18 = vadd.s32 %v2641_v6, %v2632_v0  ;;  %v13952_v62 = vmul.u32 %v2800_v46, %v2775_v5  ;;  %v2890_v15 = vadd.s32 1, %v10601_v41  ;;  %v2240_v57 = vadd.f32 0.041655596, %v2239_v24 }
 0x2b1   : > { %18434 = vst [vmem:[#allocation64_spill] sm:$0xff] %v13946_v28  ;;  %v18435_v63 = vand.u32 2147483647, %v18433_v42  ;;  %v2386_v4 = vxor.u32 2147483648, %v2385_v43  ;;  %v2608_v56 = vsel %vm2604_vm14, %v2588_v12, %v13675_v37  ;;  %v13965_v20 = vmul.u32 %v18017_v17, %v2775_v5 }
 0x2b2   : > { %vm2102_vm9 = vcmp.eq.s32.totalorder %v13794_v14, 0  ;;  %v2523_v45 = vsel %vm2521_vm0, %v2522_v22, %v13917_v59  ;;  %v2610_v49 = vsel %vm2606_vm8, %v13664_v7, %v2609_v33  ;;  %v13975_v48 = vadd.s32 %v13829_v55, %v2653_v60 }
 0x2b3   : > { %vm13956_vm3 = vcmp.le.f32.partialorder %v18435_v63, 0.7853982  ;;  %v2799_v1 = vand.u32 65535, %v13914_v8  ;;  %v2249_v24 = vadd.f32 -0.16666654, %v2248_v13  ;;  %v2668_v6 = vadd.s32 1, %v2664_v40 }
 0x2b4   : > { %v2777_v41 = vand.u32 65535, %v13922_v10  ;;  %vm2667_vm14 = vc.u32 %v13948_v18, %v13975_v48  ;;  %v2776_v12 = vshrl.u32 %v13924_v47, 16  ;;  %v2805_v7 = vshll.u32 %v13952_v62, 16 }
 0x2b5   : > { %vm2891_vm8 = vcmp.gt.s32.totalorder %v2890_v15, 0  ;;  %vm1945_vm10 = vweird.f32 %v18387_v34  ;;  %v18019_v60 = vxor.u32 2147483648, %v13946_v28  ;;  %v2524_v31 = vclz %v2523_v45 }
 0x2b6   : > { %v2611_v55 = vsel %vm2605_vm13, %v2608_v56, %v2610_v49  ;;  %v2783_v53 = vshll.u32 %v13965_v20, 16  ;;  %vm2105_vm0 = vcmp.eq.s32.totalorder %v13794_v14, 2  ;;  %v2241_v22 = vmul.f32 %v2240_v57, %v13810_v54 }
 0x2b7   : > { %v2387_v0 = vsel %vm2266_vm15, %v2386_v4, %v2385_v43  ;;  %v2801_v13 = vmul.u32 %v2799_v1, %v2775_v5  ;;  %v13993_v33 = vmul.u32 %v2799_v1, %v2776_v12  ;;  %vm2101_vm4 = vcmp.lt.s32.totalorder %v13794_v14, 2 }
 0x2b8   : > { %v2669_v63 = vsel %vm2667_vm14, %v2668_v6, %v2664_v40  ;;  %v2779_v37 = vmul.u32 %v2777_v41, %v2775_v5  ;;  %v13996_v45 = vmul.u32 %v2777_v41, %v2776_v12  ;;  %v2892_v51 = vsel %vm2891_vm8, %v2890_v15, 0 }
 0x2b9   : > { %v2250_v56 = vmul.f32 %v2249_v24, %v13810_v54  ;;  %v2665_v49 = vmul.u32 %v13713_v39, %v2611_v55  ;;  %vm2809_vm13 = vc.u32 %v2801_v13, %v2805_v7  ;;  %v14000_v17 = vadd.s32 %v2805_v7, %v2801_v13 }
 0x2ba   : > { %v14004_v43 = vsel %vm13717_vm7, 0, %v2235_v23  ;;  %v10593_v57 = vadd.s32 4294967294, %v2524_v31  ;;  %vm2787_vm11 = vc.u32 %v2779_v37, %v2783_v53  ;;  %v2789_v4 = vadd.s32 %v2783_v53, %v2779_v37 }
 0x2bb   : > { %18438 = vst [vmem:[#allocation65_spill] sm:$0xff] %v14004_v43  ;;  %v14009_v5 = vsel %vm13956_vm3, %v18433_v42, %v2387_v0  ;;  %v14011_v40 = vadd.s32 %v2669_v63, %v2665_v49  ;;  %v18020_v15 = vshll.u32 %v13993_v33, 16  ;;  %v2894_v39 = vand.u32 31, %v2892_v51 }
 0x2bc   : > { %v2104_v27 = vsel %vm2102_vm9, %v13909_v50, %v18019_v60  ;;  %v2242_v23 = vadd.f32 -0.4999988, %v2241_v22  ;;  %v2785_v1 = vshll.u32 %v13996_v45, 16  ;;  %v2810_v37 = vsel %vm2809_vm13, 1, %v18311_v19 }
 0x2bd   : > { %v2251_v24 = vadd.f32 1.0, %v2250_v56  ;;  %v2788_v6 = vsel %vm2787_vm11, 1, %v18311_v19  ;;  %v2804_v41 = vmul.u32 %v2800_v46, %v2776_v12  ;;  %vm2813_vm7 = vc.u32 %v14000_v17, %v18020_v15 }
 0x2be   : > { %v14029_v7 = vmul.f32 %v14009_v5, %v14009_v5  ;;  %vm10594_vm9 = vcmp.lt.s32.totalorder %v10593_v57, 0  ;;  %v18439_v31 = vshrl.u32 %v13922_v10, 16  ;;  %vm2791_vm14 = vc.u32 %v2789_v4, %v2785_v1 }
 0x2bf   : > { %v14036_v53 = vsel %vm1945_vm10, nan, %v13791_v11  ;;  %v2671_v8 = vadd.s32 536870912, %v14011_v40  ;;  %v2812_v46 = vadd.s32 %v2810_v37, %v2804_v41  ;;  %v14039_v22 = vsub.s32 32, %v2894_v39 }
 0x2c0   : > { %v2782_v55 = vmul.u32 %v18439_v31, %v2776_v12  ;;  %18440 = vst [vmem:[#allocation66_spill] sm:$0xff] %v14036_v53  ;;  %v18441_v0 = vxor.u32 2147483648, %v13909_v50  ;;  %v14047_v10 = vand.u32 3, %v14004_v43  ;;  %v2814_v63 = vsel %vm2813_vm7, 1, %v18311_v19  ;;  %v18446_v50 = vld [vmem:[#allocation62_spill] sm:$0xff] }
 0x2c1   : > { %v14054_v56 = vsel %vm10594_vm9, 0, %v10593_v57  ;;  %v2792_v49 = vsel %vm2791_vm14, 1, %v18311_v19  ;;  %v14059_v1 = vmul.f32 %v2242_v23, %v13810_v54  ;;  %v14062_v37 = vmul.f32 %v2251_v24, %v13783_v61 }
 0x2c2   : > { %v2107_v13 = vsel %vm2105_vm0, %v18441_v0, %v13946_v28  ;;  %v2790_v12 = vadd.s32 %v2788_v6, %v2782_v55  ;;  %v2393_v41 = vmul.f32 -0.001358992, %v14029_v7  ;;  %v2400_v14 = vmul.f32 -0.00019511016, %v14029_v7 }
 0x2c3   : > { %v14052_v11 = vsel %vm2101_vm4, %v2104_v27, %v2107_v13  ;;  %18442 = vst [vmem:[#allocation67_spill] sm:$0xff] %v14062_v37  ;;  %v14067_v27 = vshrl.u32 %v2671_v8, 30  ;;  %v2816_v57 = vadd.s32 %v2814_v63, %v2812_v46  ;;  %v2910_v31 = vshrl.u32 %v18332_v52, %v14039_v22 }
 0x2c4   : > { %v2512_v55 = vadd.s32 %v13737_v32, %v13711_v35  ;;  %v2528_v54 = vsub.s32 32, %v14054_v56  ;;  %v2794_v23 = vadd.s32 %v2792_v49, %v2790_v12  ;;  %v2907_v61 = vshrl.u32 %v18275_v2, %v14039_v22 }
 0x2c5   : > { %18443 = vst [vmem:[#allocation68_spill] sm:$0xff] %v14067_v27  ;;  %v2532_v24 = vsub.s32 4294967266, %v14054_v56  ;;  %v2806_v0 = vshrl.u32 %v13952_v62, 16  ;;  %v14078_v13 = vshrl.u32 %v2892_v51, 5  ;;  %v2909_v8 = vshll.u32 %v18275_v2, %v2894_v39 }
 0x2c6   : > { %v2784_v46 = vshrl.u32 %v13965_v20, 16  ;;  %v2901_v63 = vshrl.u32 %v18335_v26, %v14039_v22  ;;  %v18444_v35 = vmov 2102212464   ;;  %v2673_v49 = vshll.u32 %v14067_v27, 30 }
 0x2c7   : > { %v2904_v32 = vshrl.u32 %v18444_v35, %v14039_v22  ;;  %v2906_v12 = vshll.u32 %v18444_v35, %v2894_v39  ;;  %v2817_v60 = vadd.s32 %v2816_v57, %v2806_v0  ;;  %v18445_v6 = vmov 2475754826  }
 0x2c8   : > { %v2898_v62 = vshrl.u32 %v18445_v6, %v14039_v22  ;;  %v2911_v51 = vor.u32 %v2910_v31, %v2909_v8  ;;  %v2795_v15 = vadd.s32 %v2794_v23, %v2784_v46  ;;  %v2900_v4 = vshll.u32 %v18445_v6, %v2894_v39 }
 0x2c9   : > { %v2903_v20 = vshll.u32 %v18335_v26, %v2894_v39  ;;  %v2908_v34 = vor.u32 %v2907_v61, %v2906_v12  ;;  %v2742_v28 = vshrl.u32 %v18259_v58, %v18446_v50  ;;  %v2808_v43 = vshrl.u32 %v13993_v33, 16 }
 0x2ca   : > { %v18447_v53 = vand.u32 2147483647, %v13860_v29  ;;  %v2897_v57 = vshll.u32 %v18259_v58, %v2894_v39  ;;  %v2786_v0 = vshrl.u32 %v13996_v45, 16  ;;  %v14099_v27 = vor.u32 %v2901_v63, %v2900_v4 }
 0x2cb   : > { %v14101_v31 = vor.u32 %v2904_v32, %v2903_v20  ;;  %vm2915_vm4 = vcmp.lt.s32.totalorder %v14078_v13, 4  ;;  %v2763_v23 = vsel %vm2761_vm5, %v13875_v38, 2102212464  ;;  %v2818_v50 = vadd.s32 %v2817_v60, %v2808_v43  ;;  %v18448_v60 = vld [vmem:[#allocation33_spill] sm:$0xff]  ;;  %v14168_v20 = vpop.f32.mrf.mxu2 }
 0x2cc   : > { %v2887_v36 = vand.u32 8388607, %v18447_v53  ;;  %v14107_v61 = vor.u32 %v2898_v62, %v2897_v57  ;;  %v2925_v53 = vsel %vm2915_vm4, %v2911_v51, 1326507024  ;;  %v2533_v8 = vadd.s32 127, %v2532_v24  ;;  %18451 = vst [vmem:[#allocation62_spill] sm:$0xff] %v14168_v20 }
 0x2cd   : > { %v14112_v39 = vsub.s32 %v14011_v40, %v2673_v49  ;;  %v14114_v45 = vadd.s32 %v2795_v15, %v2786_v0  ;;  %v2921_v4 = vsel %vm2915_vm4, %v2908_v34, 920167782  ;;  %v2762_v46 = vsel %vm2758_vm2, %v2742_v28, %v13871_v44 }
 0x2ce   : > { %v2888_v38 = vor.u32 8388608, %v2887_v36  ;;  %vm2912_vm11 = vcmp.lt.s32.totalorder %v14078_v13, 1  ;;  %vm2914_vm5 = vcmp.lt.s32.totalorder %v14078_v13, 3  ;;  %vm2099_vm8 = vweird.f32 %v18448_v60 }
 0x2cf   : > { %v2764_v43 = vsel %vm2760_vm6, %v13873_v25, %v2763_v23  ;;  %v18449_v40 = vshll.u32 %v13993_v33, 16  ;;  %v2924_v36 = vsel %vm2912_vm11, %v14099_v27, %v14101_v31  ;;  %v2926_v44 = vsel %vm2914_vm5, %v2908_v34, %v2925_v53 }
 0x2d0   : > { %v2401_v28 = vadd.f32 0.008332121, %v2400_v14  ;;  %v2822_v24 = vadd.s32 1, %v2818_v50  ;;  %v2920_v25 = vsel %vm2912_vm11, %v14107_v61, %v14099_v27  ;;  %vm2256_vm2 = vcmp.eq.s32.totalorder %v14047_v10, 0 }
 0x2d1   : > { %v14130_v15 = vadd.s32 %v14000_v17, %v18449_v40  ;;  %v2922_v17 = vsel %vm2914_vm5, %v14101_v31, %v2921_v4  ;;  %v2534_v33 = vshll.u32 %v2533_v8, 23  ;;  %v2676_v63 = vsub.s32 0, %v14112_v39 }
 0x2d2   : > { %vm2913_vm0 = vcmp.lt.s32.totalorder %v14078_v13, 2  ;;  %v2394_v34 = vadd.f32 0.041655596, %v2393_v41  ;;  %vm2675_vm13 = vcmp.lt.s32.totalorder %v14112_v39, 0  ;;  %v2765_v14 = vsel %vm2759_vm12, %v2762_v46, %v2764_v43 }
 0x2d3   : > { %vm2821_vm6 = vc.u32 %v14114_v45, %v14130_v15  ;;  %v14155_v32 = vsel %vm2913_vm0, %v2924_v36, %v2926_v44  ;;  %v18450_v12 = vsub.s32 4, %v13551_v30  ;;  %v2530_v62 = vshrl.u32 %v2512_v55, %v2528_v54 }
 0x2d4   : > { %v14164_v51 = vsel %vm2913_vm0, %v2920_v25, %v2922_v17  ;;  %v14166_v41 = vshll.u32 %v2888_v38, 8  ;;  %v14171_v9 = vadd.f32 1.0, %v14059_v1  ;;  %v2402_v57 = vmul.f32 %v2401_v28, %v14029_v7 }
 0x2d5   : > { %v2389_v49 = vsel %vm2266_vm15, %v18450_v12, %v13551_v30  ;;  %v2529_v0 = vshll.u32 %v13917_v59, %v14054_v56  ;;  %v2823_v23 = vsel %vm2821_vm6, %v2822_v24, %v2818_v50  ;;  %vm2255_vm12 = vcmp.lt.s32.totalorder %v14047_v10, 2 }
 0x2d6   : > { %18452 = vst [vmem:[#allocation69_spill] sm:$0xff] %v14171_v9  ;;  %v2535_v30 = vor.u32 4788187, %v2534_v33  ;;  %v2677_v55 = vsel %vm2675_vm13, %v2676_v63, %v14112_v39  ;;  %v2819_v54 = vmul.u32 %v13924_v47, %v2765_v14  ;;  %v2932_v53 = vshrl.u32 %v14155_v32, 16 }
 0x2d7   : > { %v18032_v8 = vxor.u32 2147483648, %v14062_v37  ;;  %vm2259_vm15 = vcmp.eq.s32.totalorder %v14047_v10, 2  ;;  %v2395_v1 = vmul.f32 %v2394_v34, %v14029_v7  ;;  %v18033_v4 = vshrl.u32 %v14164_v51, 16 }
 0x2d8   : > { %v2531_v46 = vor.u32 %v2530_v62, %v2529_v0  ;;  %v14184_v59 = vadd.s32 %v2823_v23, %v2819_v54  ;;  %v2929_v56 = vand.u32 65535, %v14166_v41  ;;  %v3037_v50 = vand.u32 2139095040, %v14168_v20 }
 0x2d9   : > { %v14191_v47 = vsel %vm2099_vm8, nan, %v14052_v11  ;;  %v18031_v38 = vxor.u32 2147483648, %v14171_v9  ;;  %v14196_v43 = vsel %vm13956_vm3, 0, %v2389_v49  ;;  %v2678_v40 = vclz %v2677_v55 }
 0x2da   : > { %18453 = vst [vmem:[#allocation70_spill] sm:$0xff] %v14191_v47  ;;  %vm18165_vm7 = vweird.f32 %v18414_v21  ;;  %v2403_v36 = vadd.f32 -0.16666654, %v2402_v57  ;;  %v2536_v44 = vand.u32 2147483647, %v2535_v30  ;;  %v14201_v28 = vmul.u32 %v2932_v53, %v2929_v56 }
 0x2db   : > { %18454 = vst [vmem:[#allocation71_spill] sm:$0xff] %v14196_v43  ;;  %v3038_v24 = vshrl.u32 %v3037_v50, 23  ;;  %v2258_v11 = vsel %vm2256_vm2, %v14171_v9, %v18032_v8  ;;  %v2396_v25 = vadd.f32 -0.4999988, %v2395_v1  ;;  %vm2420_vm3 = vcmp.lt.s32.totalorder %v18455_v16, 0 }
 0x2dc   : > { %v14211_v17 = vmul.u32 %v18033_v4, %v2929_v56  ;;  %v2538_v33 = vcvt.s32.f32 %v2531_v46  ;;  %v2825_v63 = vadd.s32 536870912, %v14184_v59  ;;  %v2931_v34 = vand.u32 65535, %v14155_v32 }
 0x2dd   : > { %v10604_v14 = vadd.s32 4294967169, %v3038_v24  ;;  %v2261_v12 = vsel %vm2259_vm15, %v18031_v38, %v14062_v37  ;;  %v14221_v49 = vand.u32 3, %v14196_v43  ;;  %v10596_v62 = vadd.s32 4294967294, %v2678_v40 }
 0x2de   : > { %v2953_v57 = vand.u32 65535, %v14164_v51  ;;  %v2404_v0 = vmul.f32 %v2403_v36, %v14029_v7  ;;  %v2539_v23 = vmul.f32 %v2538_v33, %v2536_v44  ;;  %v2937_v30 = vshll.u32 %v14201_v28, 16 }
 0x2df   : > { %v3044_v55 = vadd.s32 1, %v10604_v14  ;;  %v2262_v54 = vsel %vm2255_vm12, %v2258_v11, %v2261_v12  ;;  %v2397_v1 = vmul.f32 %v2396_v25, %v14029_v7  ;;  %v2930_v46 = vshrl.u32 %v14166_v41, 16 }
 0x2e0   : > { %v2959_v50 = vshll.u32 %v14211_v17, 16  ;;  %v2542_v24 = vsub.s32 4, %v13846_v3  ;;  %v14232_v40 = vshrl.u32 %v2825_v63, 30  ;;  %v2933_v38 = vmul.u32 %v2931_v34, %v2929_v56 }
 0x2e1   : > { %vm3045_vm9 = vcmp.gt.s32.totalorder %v3044_v55, 0  ;;  %vm10597_vm14 = vcmp.lt.s32.totalorder %v10596_v62, 0  ;;  %v2955_v36 = vmul.u32 %v2953_v57, %v2929_v56  ;;  %v14234_v44 = vmul.u32 %v2953_v57, %v2930_v46 }
 0x2e2   : > { %18456 = vst [vmem:[#allocation72_spill] sm:$0xff] %v14232_v40  ;;  %v3046_v33 = vsel %vm3045_vm9, %v3044_v55, 0  ;;  %v2405_v14 = vadd.f32 1.0, %v2404_v0  ;;  %v2540_v10 = vxor.u32 2147483648, %v2539_v23  ;;  %vm2941_vm2 = vc.u32 %v2933_v38, %v2937_v30 }
 0x2e3   : > { %v3048_v11 = vand.u32 31, %v3046_v33  ;;  %v14238_v7 = vsel %vm18165_vm7, nan, %v2262_v54  ;;  %v14240_v25 = vadd.f32 1.0, %v2397_v1  ;;  %v14242_v12 = vmul.u32 %v2931_v34, %v2930_v46 }
 0x2e4   : > { %18457 = vst [vmem:[#allocation73_spill] sm:$0xff] %v14238_v7  ;;  %v14244_v63 = vadd.s32 %v2959_v50, %v2955_v36  ;;  %v14249_v56 = vsel %vm2420_vm3, %v2542_v24, %v13846_v3  ;;  %v14251_v57 = vsel %vm10597_vm14, 0, %v10596_v62  ;;  %v2827_v0 = vshll.u32 %v14232_v40, 30 }
 0x2e5   : > { %18458 = vst [vmem:[#allocation74_spill] sm:$0xff] %v14240_v25  ;;  %vm2963_vm6 = vc.u32 %v2955_v36, %v2959_v50  ;;  %v2942_v55 = vsel %vm2941_vm2, 1, %v18311_v19  ;;  %v2943_v54 = vadd.s32 %v2937_v30, %v2933_v38  ;;  %v18034_v1 = vshll.u32 %v14234_v44, 16  ;;  %v14267_v50 = vpop.f32.mrf.mxu2 }
 0x2e6   : > { %v14256_v8 = vsub.s32 32, %v3048_v11  ;;  %v14259_v34 = vmul.f32 %v2405_v14, %v14009_v5  ;;  %v2541_v4 = vsel %vm2420_vm3, %v2540_v10, %v2539_v23  ;;  %v2666_v3 = vadd.s32 %v13975_v48, %v13948_v18  ;;  %18460 = vst [vmem:[#allocation76_spill] sm:$0xff] %v14267_v50 }
 0x2e7   : > { %v2936_v62 = vmul.u32 %v2932_v53, %v2930_v46  ;;  %v2686_v38 = vsub.s32 4294967266, %v14251_v57  ;;  %v2939_v30 = vshll.u32 %v14242_v12, 16  ;;  %v2964_v24 = vsel %vm2963_vm6, 1, %v18311_v19 }
 0x2e8   : > { %18459 = vst [vmem:[#allocation75_spill] sm:$0xff] %v14259_v34  ;;  %vm2967_vm13 = vc.u32 %v14244_v63, %v18034_v1  ;;  %v14276_v5 = vsub.s32 %v14184_v59, %v2827_v0  ;;  %v18461_v18 = vshrl.u32 %v14164_v51, 16  ;;  %v18044_v32 = vand.u32 2147483647, %v14168_v20 }
 0x2e9   : > { %v2944_v23 = vadd.s32 %v2942_v55, %v2936_v62  ;;  %vm2945_vm12 = vc.u32 %v2943_v54, %v2939_v30  ;;  %v3052_v53 = vshrl.u32 %v18445_v6, %v14256_v8  ;;  %v3055_v36 = vshrl.u32 %v18335_v26, %v14256_v8 }
 0x2ea   : > { %v2958_v48 = vmul.u32 %v18461_v18, %v2930_v46  ;;  %v3061_v14 = vshrl.u32 %v18275_v2, %v14256_v8  ;;  %v2968_v59 = vsel %vm2967_vm13, 1, %v18311_v19  ;;  %v3058_v0 = vshrl.u32 %v18444_v35, %v14256_v8 }
 0x2eb   : > { %v3191_v51 = vand.u32 2139095040, %v14267_v50  ;;  %v18462_v46 = vand.u32 2147483647, %v18455_v16  ;;  %v3051_v54 = vshll.u32 %v18259_v58, %v3048_v11  ;;  %v3054_v62 = vshll.u32 %v18445_v6, %v3048_v11 }
 0x2ec   : > { %v2966_v10 = vadd.s32 %v2964_v24, %v2958_v48  ;;  %v3060_v30 = vshll.u32 %v18444_v35, %v3048_v11  ;;  %v3064_v24 = vshrl.u32 %v18332_v52, %v14256_v8  ;;  %v2946_v18 = vsel %vm2945_vm12, 1, %v18311_v19 }
 0x2ed   : > { %vm14293_vm15 = vcmp.le.f32.partialorder %v18462_v46, 0.7853982  ;;  %v3041_v48 = vand.u32 8388607, %v18044_v32  ;;  %v14305_v1 = vshrl.u32 %v3046_v33, 5  ;;  %v3057_v46 = vshll.u32 %v18335_v26, %v3048_v11 }
 0x2ee   : > { %v14308_v21 = vor.u32 %v3052_v53, %v3051_v54  ;;  %v14310_v60 = vor.u32 %v3055_v36, %v3054_v62  ;;  %v3062_v9 = vor.u32 %v3061_v14, %v3060_v30  ;;  %v3063_v37 = vshll.u32 %v18275_v2, %v3048_v11 }
 0x2ef   : > { %v2682_v43 = vsub.s32 32, %v14251_v57  ;;  %v2687_v7 = vadd.s32 127, %v2686_v38  ;;  %v2970_v47 = vadd.s32 %v2968_v59, %v2966_v10  ;;  %v14314_v29 = vor.u32 %v3058_v0, %v3057_v46 }
 0x2f0   : > { %vm2829_vm3 = vcmp.lt.s32.totalorder %v14276_v5, 0  ;;  %v2948_v32 = vadd.s32 %v2946_v18, %v2944_v23  ;;  %v3065_v33 = vor.u32 %v3064_v24, %v3063_v37  ;;  %v3192_v20 = vshrl.u32 %v3191_v51, 23 }
 0x2f1   : > { %v2960_v40 = vshrl.u32 %v14211_v17, 16  ;;  %v3042_v53 = vor.u32 8388608, %v3041_v48  ;;  %vm3066_vm9 = vcmp.lt.s32.totalorder %v14305_v1, 1  ;;  %vm3069_vm14 = vcmp.lt.s32.totalorder %v14305_v1, 4 }
 0x2f2   : > { %v2830_v11 = vsub.s32 0, %v14276_v5  ;;  %vm3068_vm2 = vcmp.lt.s32.totalorder %v14305_v1, 3  ;;  %v3074_v38 = vsel %vm3066_vm9, %v14308_v21, %v14310_v60  ;;  %v3075_v37 = vsel %vm3069_vm14, %v3062_v9, 920167782 }
 0x2f3   : > { %v2938_v23 = vshrl.u32 %v14201_v28, 16  ;;  %v2971_v17 = vadd.s32 %v2970_v47, %v2960_v40  ;;  %vm3067_vm6 = vcmp.lt.s32.totalorder %v14305_v1, 2  ;;  %v3076_v36 = vsel %vm3068_vm2, %v14314_v29, %v3075_v37 }
 0x2f4   : > { %v14335_v14 = vsel %vm3067_vm6, %v3074_v38, %v3076_v36  ;;  %v3078_v10 = vsel %vm3066_vm9, %v14310_v60, %v14314_v29  ;;  %v3079_v59 = vsel %vm3069_vm14, %v3065_v33, 1326507024  ;;  %v10607_v28 = vadd.s32 4294967169, %v3192_v20 }
 0x2f5   : > { %vm2410_vm13 = vcmp.eq.s32.totalorder %v14221_v49, 0  ;;  %vm2413_vm12 = vcmp.eq.s32.totalorder %v14221_v49, 2  ;;  %v14348_v47 = vsel %vm14293_vm15, %v18455_v16, %v2541_v4  ;;  %v2949_v40 = vadd.s32 %v2948_v32, %v2938_v23 }
 0x2f6   : > { %v3080_v0 = vsel %vm3068_vm2, %v3062_v9, %v3079_v59  ;;  %v14352_v51 = vshll.u32 %v3042_v53, 8  ;;  %v2684_v54 = vshrl.u32 %v2666_v3, %v2682_v43  ;;  %v2688_v62 = vshll.u32 %v2687_v7, 23 }
 0x2f7   : > { %v2896_v20 = vshrl.u32 %v18259_v58, %v14039_v22  ;;  %v2962_v30 = vshrl.u32 %v14234_v44, 16  ;;  %v2831_v24 = vsel %vm2829_vm3, %v2830_v11, %v14276_v5  ;;  %v2940_v4 = vshrl.u32 %v14242_v12, 16 }
 0x2f8   : > { %v14363_v32 = vsel %vm3067_vm6, %v3078_v10, %v3080_v0  ;;  %v3108_v9 = vshrl.u32 %v14335_v14, 16  ;;  %v2917_v43 = vsel %vm2915_vm4, %v14101_v31, 2102212464  ;;  %v3198_v3 = vadd.s32 1, %v10607_v28 }
 0x2f9   : > { %v2972_v7 = vadd.s32 %v2971_v17, %v2962_v30  ;;  %v3086_v22 = vshrl.u32 %v14363_v32, 16  ;;  %v18050_v18 = vxor.u32 2147483648, %v14259_v34  ;;  %v18049_v48 = vxor.u32 2147483648, %v14240_v25 }
 0x2fa   : > { %v14372_v46 = vadd.s32 %v2949_v40, %v2940_v4  ;;  %v3083_v12 = vand.u32 65535, %v14352_v51  ;;  %v14377_v33 = vmul.f32 %v14348_v47, %v14348_v47  ;;  %v2683_v53 = vshll.u32 %v14112_v39, %v14251_v57 }
 0x2fb   : > { %v2832_v31 = vclz %v2831_v24  ;;  %v2916_v11 = vsel %vm2912_vm11, %v2896_v20, %v14107_v61  ;;  %vm2409_vm4 = vcmp.lt.s32.totalorder %v14221_v49, 2  ;;  %v2918_v38 = vsel %vm2914_vm5, %v14099_v27, %v2917_v43 }
 0x2fc   : > { %v18465_v37 = vshll.u32 %v14234_v44, 16  ;;  %v14393_v17 = vmul.u32 %v3086_v22, %v3083_v12  ;;  %v14397_v39 = vmul.u32 %v3108_v9, %v3083_v12  ;;  %v2685_v57 = vor.u32 %v2684_v54, %v2683_v53 }
 0x2fd   : > { %v2689_v36 = vor.u32 4788187, %v2688_v62  ;;  %v2976_v61 = vadd.s32 1, %v2972_v7  ;;  %vm3199_vm11 = vcmp.gt.s32.totalorder %v3198_v3, 0  ;;  %v14402_v10 = vsel %vm14293_vm15, 0, %v14249_v56 }
 0x2fe   : > { %v14391_v23 = vadd.s32 %v14244_v63, %v18465_v37  ;;  %18466 = vst [vmem:[#allocation77_spill] sm:$0xff] %v14402_v10  ;;  %v3085_v27 = vand.u32 65535, %v14363_v32  ;;  %v3107_v44 = vand.u32 65535, %v14335_v14  ;;  %v2412_v63 = vsel %vm2410_vm13, %v14240_v25, %v18050_v18 }
 0x2ff   : > { %v2415_v56 = vsel %vm2413_vm12, %v18049_v48, %v14259_v34  ;;  %v10599_v55 = vadd.s32 4294967294, %v2832_v31  ;;  %v2919_v59 = vsel %vm2913_vm0, %v2916_v11, %v2918_v38  ;;  %v3084_v28 = vshrl.u32 %v14352_v51, 16 }
 0x300   : > { %vm2975_vm5 = vc.u32 %v14372_v46, %v14391_v23  ;;  %v3091_v40 = vshll.u32 %v14393_v17, 16  ;;  %v3113_v0 = vshll.u32 %v14397_v39, 16  ;;  %v3200_v54 = vsel %vm3199_vm11, %v3198_v3, 0 }
 0x301   : > { %v2547_v62 = vmul.f32 -0.001358992, %v14377_v33  ;;  %v2690_v20 = vand.u32 2147483647, %v2689_v36  ;;  %v2692_v30 = vcvt.s32.f32 %v2685_v57  ;;  %v2977_v24 = vsel %vm2975_vm5, %v2976_v61, %v2972_v7 }
 0x302   : > { %v2973_v4 = vmul.u32 %v14166_v41, %v2919_v59  ;;  %v3087_v32 = vmul.u32 %v3085_v27, %v3083_v12  ;;  %v14425_v43 = vmul.u32 %v3085_v27, %v3084_v28  ;;  %v3109_v53 = vmul.u32 %v3107_v44, %v3083_v12 }
 0x303   : > { %vm10600_vm15 = vcmp.lt.s32.totalorder %v10599_v55, 0  ;;  %v14427_v13 = vmul.u32 %v3107_v44, %v3084_v28  ;;  %v18051_v31 = vand.u32 2147483647, %v14267_v50  ;;  %v3202_v11 = vand.u32 31, %v3200_v54 }
 0x304   : > { %v14430_v38 = vadd.s32 %v2977_v24, %v2973_v4  ;;  %vm3095_vm0 = vc.u32 %v3087_v32, %v3091_v40  ;;  %v3097_v3 = vadd.s32 %v3091_v40, %v3087_v32  ;;  %vm3117_vm3 = vc.u32 %v3109_v53, %v3113_v0 }
 0x305   : > { %v14434_v7 = vsel %vm2409_vm4, %v2412_v63, %v2415_v56  ;;  %v2554_v41 = vmul.f32 -0.00019511016, %v14377_v33  ;;  %v14437_v37 = vadd.s32 %v3113_v0, %v3109_v53  ;;  %v14439_v12 = vsub.s32 32, %v3202_v11 }
 0x306   : > { %v2548_v57 = vadd.f32 0.041655596, %v2547_v62  ;;  %v2693_v36 = vmul.f32 %v2692_v30, %v2690_v20  ;;  %v14441_v61 = vsel %vm10600_vm15, 0, %v10599_v55  ;;  %v3093_v27 = vshll.u32 %v14425_v43, 16  ;;  %v18469_v30 = vld [vmem:[#allocation54_spill] sm:$0xff] }
 0x307   : > { %v3096_v44 = vsel %vm3095_vm0, 1, %v18311_v19  ;;  %v18052_v59 = vshll.u32 %v14427_v13, 16  ;;  %v3118_v49 = vsel %vm3117_vm3, 1, %v18311_v19  ;;  %v3195_v63 = vand.u32 8388607, %v18051_v31 }
 0x308   : > { %v2979_v56 = vadd.s32 536870912, %v14430_v38  ;;  %v3090_v40 = vmul.u32 %v3086_v22, %v3084_v28  ;;  %vm14450_vm13 = vc.u32 %v3097_v3, %v3093_v27  ;;  %v3112_v55 = vmul.u32 %v3108_v9, %v3084_v28 }
 0x309   : > { %vm3121_vm12 = vc.u32 %v14437_v37, %v18052_v59  ;;  %v3206_v62 = vshrl.u32 %v18445_v6, %v14439_v12  ;;  %v3209_v20 = vshrl.u32 %v18335_v26, %v14439_v12  ;;  %v3212_v22 = vshrl.u32 %v18444_v35, %v14439_v12 }
 0x30a   : > { %vm2574_vm4 = vcmp.lt.s32.totalorder %v18469_v30, 0  ;;  %v3098_v24 = vadd.s32 %v3096_v44, %v3090_v40  ;;  %v3120_v4 = vadd.s32 %v3118_v49, %v3112_v55  ;;  %v14466_v32 = vshrl.u32 %v3200_v54, 5 }
 0x30b   : > { %v3205_v14 = vshll.u32 %v18259_v58, %v3202_v11  ;;  %vm18063_vm11 = vweird.f32 %v18433_v42  ;;  %v3208_v9 = vshll.u32 %v18445_v6, %v3202_v11  ;;  %v3211_v28 = vshll.u32 %v18335_v26, %v3202_v11 }
 0x30c   : > { %v3214_v53 = vshll.u32 %v18444_v35, %v3202_v11  ;;  %v3215_v3 = vshrl.u32 %v18275_v2, %v14439_v12  ;;  %v3100_v27 = vsel %vm14450_vm13, 1, %v18311_v19  ;;  %v3122_v54 = vsel %vm3121_vm12, 1, %v18311_v19 }
 0x30d   : > { %v3217_v44 = vshll.u32 %v18275_v2, %v3202_v11  ;;  %v3218_v49 = vshrl.u32 %v18332_v52, %v14439_v12  ;;  %v18470_v40 = vand.u32 2147483647, %v18469_v30  ;;  %v14488_v48 = vor.u32 %v3206_v62, %v3205_v14 }
 0x30e   : > { %v14490_v18 = vor.u32 %v3209_v20, %v3208_v9  ;;  %v14492_v31 = vor.u32 %v3212_v22, %v3211_v28  ;;  %v3216_v0 = vor.u32 %v3215_v3, %v3214_v53  ;;  %v2555_v59 = vadd.f32 0.008332121, %v2554_v41 }
 0x30f   : > { %vm14484_vm5 = vcmp.le.f32.partialorder %v18470_v40, 0.7853982  ;;  %v2694_v25 = vxor.u32 2147483648, %v2693_v36  ;;  %v14494_v34 = vshrl.u32 %v2979_v56, 30  ;;  %v3219_v11 = vor.u32 %v3218_v49, %v3217_v44 }
 0x310   : > { %v2840_v50 = vsub.s32 4294967266, %v14441_v61  ;;  %v3102_v16 = vadd.s32 %v3100_v27, %v3098_v24  ;;  %v3124_v52 = vadd.s32 %v3122_v54, %v3120_v4  ;;  %vm3223_vm15 = vcmp.lt.s32.totalorder %v14466_v32, 4 }
 0x311   : > { %vm3220_vm0 = vcmp.lt.s32.totalorder %v14466_v32, 1  ;;  %vm3222_vm3 = vcmp.lt.s32.totalorder %v14466_v32, 3  ;;  %v3229_v62 = vsel %vm3223_vm15, %v3216_v0, 920167782  ;;  %v3233_v41 = vsel %vm3223_vm15, %v3219_v11, 1326507024 }
 0x312   : > { %v3114_v56 = vshrl.u32 %v14397_v39, 16  ;;  %v3196_v20 = vor.u32 8388608, %v3195_v63  ;;  %v3228_v22 = vsel %vm3220_vm0, %v14488_v48, %v14490_v18  ;;  %v3230_v24 = vsel %vm3222_vm3, %v14492_v31, %v3229_v62 }
 0x313   : > { %v2981_v4 = vshll.u32 %v14494_v34, 30  ;;  %v3092_v14 = vshrl.u32 %v14393_v17, 16  ;;  %v3232_v9 = vsel %vm3220_vm0, %v14490_v18, %v14492_v31  ;;  %v3234_v39 = vsel %vm3222_vm3, %v3216_v0, %v3233_v41 }
 0x314   : > { %v14521_v63 = vand.u32 3, %v14402_v10  ;;  %v2695_v28 = vsel %vm2574_vm4, %v2694_v25, %v2693_v36  ;;  %v3125_v53 = vadd.s32 %v3124_v52, %v3114_v56  ;;  %vm3221_vm13 = vcmp.lt.s32.totalorder %v14466_v32, 2 }
 0x315   : > { %v14529_v17 = vsel %vm18063_vm11, nan, %v14434_v7  ;;  %v2549_v3 = vmul.f32 %v2548_v57, %v14377_v33  ;;  %v3103_v27 = vadd.s32 %v3102_v16, %v3092_v14  ;;  %v14534_v54 = vsel %vm3221_vm13, %v3228_v22, %v3230_v24 }
 0x316   : > { %18473 = vst [vmem:[#allocation78_spill] sm:$0xff] %v14529_v17  ;;  %v2841_v44 = vadd.s32 127, %v2840_v50  ;;  %v3116_v49 = vshrl.u32 %v14427_v13, 16  ;;  %v14539_v52 = vsel %vm3221_vm13, %v3232_v9, %v3234_v39  ;;  %v14541_v25 = vshll.u32 %v3196_v20, 8 }
 0x317   : > { %v2556_v36 = vmul.f32 %v2555_v59, %v14377_v33  ;;  %v14547_v7 = vsel %vm14484_vm5, %v18469_v30, %v2695_v28  ;;  %v14550_v16 = vsub.s32 %v14430_v38, %v2981_v4  ;;  %v3094_v50 = vshrl.u32 %v14425_v43, 16  ;;  %v18474_v59 = vld [vmem:[#allocation68_spill] sm:$0xff] }
 0x318   : > { %v2836_v57 = vsub.s32 32, %v14441_v61  ;;  %v3071_v40 = vsel %vm3069_vm14, %v14314_v29, 2102212464  ;;  %v3126_v0 = vadd.s32 %v3125_v53, %v3116_v49  ;;  %v3262_v11 = vshrl.u32 %v14534_v54, 16 }
 0x319   : > { %v2696_v62 = vsub.s32 4, %v18474_v59  ;;  %v3050_v41 = vshrl.u32 %v18259_v58, %v14256_v8  ;;  %v14561_v56 = vadd.s32 %v3103_v27, %v3094_v50  ;;  %v3240_v38 = vshrl.u32 %v14539_v52, 16 }
 0x31a   : > { %v14566_v43 = vmul.f32 %v14547_v7, %v14547_v7  ;;  %v2820_v20 = vadd.s32 %v14130_v15, %v14114_v45  ;;  %v2842_v29 = vshll.u32 %v2841_v44, 23  ;;  %v3237_v22 = vand.u32 65535, %v14541_v25 }
 0x31b   : > { %v2984_v24 = vsub.s32 0, %v14550_v16  ;;  %v3070_v8 = vsel %vm3066_vm9, %v3050_v41, %v14308_v21  ;;  %v3072_v4 = vsel %vm3068_vm2, %v14310_v60, %v3071_v40  ;;  %v18475_v14 = vshll.u32 %v14427_v13, 16 }
 0x31c   : > { %v2838_v39 = vshrl.u32 %v2820_v20, %v2836_v57  ;;  %vm2983_vm14 = vcmp.lt.s32.totalorder %v14550_v16, 0  ;;  %v3130_v45 = vadd.s32 1, %v3126_v0  ;;  %v14586_v15 = vmul.u32 %v3262_v11, %v3237_v22 }
 0x31d   : > { %v14581_v9 = vadd.s32 %v14437_v37, %v18475_v14  ;;  %v2550_v28 = vadd.f32 -0.4999988, %v2549_v3  ;;  %v2697_v21 = vsel %vm2574_vm4, %v2696_v62, %v18474_v59  ;;  %v14595_v60 = vmul.u32 %v3240_v38, %v3237_v22 }
 0x31e   : > { %v2837_v13 = vshll.u32 %v14276_v5, %v14441_v61  ;;  %v2843_v37 = vor.u32 4788187, %v2842_v29  ;;  %v3073_v53 = vsel %vm3067_vm6, %v3070_v8, %v3072_v4  ;;  %v3261_v3 = vand.u32 65535, %v14534_v54 }
 0x31f   : > { %vm3129_vm9 = vc.u32 %v14561_v56, %v14581_v9  ;;  %v2557_v27 = vadd.f32 -0.16666654, %v2556_v36  ;;  %v2708_v44 = vmul.f32 -0.00019511016, %v14566_v43  ;;  %v2985_v49 = vsel %vm2983_vm14, %v2984_v24, %v14550_v16 }
 0x320   : > { %v3239_v50 = vand.u32 65535, %v14539_v52  ;;  %v2839_v57 = vor.u32 %v2838_v39, %v2837_v13  ;;  %v3131_v40 = vsel %vm3129_vm9, %v3130_v45, %v3126_v0  ;;  %v3238_v59 = vshrl.u32 %v14541_v25, 16  ;;  %v14616_v0 = vpop.f32.mrf.mxu2 }
 0x321   : > { %v3267_v62 = vshll.u32 %v14586_v15, 16  ;;  %v14609_v5 = vsel %vm14484_vm5, 0, %v2697_v21  ;;  %v2701_v1 = vmul.f32 -0.001358992, %v14566_v43  ;;  %v3127_v61 = vmul.u32 %v14352_v51, %v3073_v53  ;;  %18477 = vst [vmem:[#allocation79_spill] sm:$0xff] %v14616_v0 }
 0x322   : > { %18476 = vst [vmem:[#allocation68_spill] sm:$0xff] %v14609_v5  ;;  %v3245_v36 = vshll.u32 %v14595_v60, 16  ;;  %v2844_v41 = vand.u32 2147483647, %v2843_v37  ;;  %v2986_v20 = vclz %v2985_v49  ;;  %v3263_v29 = vmul.u32 %v3261_v3, %v3237_v22 }
 0x323   : > { %v14614_v24 = vmul.u32 %v3261_v3, %v3238_v59  ;;  %v2709_v8 = vadd.f32 0.008332121, %v2708_v44  ;;  %v14618_v4 = vadd.s32 %v3131_v40, %v3127_v61  ;;  %v3241_v14 = vmul.u32 %v3239_v50, %v3237_v22 }
 0x324   : > { %v14620_v55 = vmul.u32 %v3239_v50, %v3238_v59  ;;  %v2551_v39 = vmul.f32 %v2550_v28, %v14377_v33  ;;  %v2846_v45 = vcvt.s32.f32 %v2839_v57  ;;  %vm3271_vm2 = vc.u32 %v3263_v29, %v3267_v62 }
 0x325   : > { %v14623_v51 = vadd.s32 %v3267_v62, %v3263_v29  ;;  %v2558_v21 = vmul.f32 %v2557_v27, %v14377_v33  ;;  %v2702_v13 = vadd.f32 0.041655596, %v2701_v1  ;;  %vm3249_vm6 = vc.u32 %v3241_v14, %v3245_v36 }
 0x326   : > { %v3251_v37 = vadd.s32 %v3245_v36, %v3241_v14  ;;  %v2847_v53 = vmul.f32 %v2846_v45, %v2844_v41  ;;  %v10602_v3 = vadd.s32 4294967294, %v2986_v20  ;;  %v3269_v44 = vshll.u32 %v14614_v24, 16  ;;  %v18479_v45 = vld [vmem:[#allocation61_spill] sm:$0xff] }
 0x327   : > { %v3345_v49 = vand.u32 2139095040, %v14616_v0  ;;  %v2710_v22 = vmul.f32 %v2709_v8, %v14566_v43  ;;  %v3133_v50 = vadd.s32 536870912, %v14618_v4  ;;  %v3247_v28 = vshll.u32 %v14620_v55, 16 }
 0x328   : > { %v3272_v57 = vsel %vm3271_vm2, 1, %v18311_v19  ;;  %v3250_v40 = vsel %vm3249_vm6, 1, %v18311_v19  ;;  %v3266_v33 = vmul.u32 %v3262_v11, %v3238_v59  ;;  %vm3275_vm12 = vc.u32 %v14623_v51, %v3269_v44 }
 0x329   : > { %v3346_v27 = vshrl.u32 %v3345_v49, 23  ;;  %v2559_v62 = vadd.f32 1.0, %v2558_v21  ;;  %v2703_v1 = vmul.f32 %v2702_v13, %v14566_v43  ;;  %v3244_v61 = vmul.u32 %v3240_v38, %v3238_v59 }
 0x32a   : > { %vm3253_vm4 = vc.u32 %v3251_v37, %v3247_v28  ;;  %v2848_v36 = vxor.u32 2147483648, %v2847_v53  ;;  %vm10603_vm5 = vcmp.lt.s32.totalorder %v10602_v3, 0  ;;  %v3274_v41 = vadd.s32 %v3272_v57, %v3266_v33  ;;  %v18496_v37 = vld [vmem:[#allocation63_spill] sm:$0xff] }
 0x32b   : > { %v10610_v20 = vadd.s32 4294967169, %v3346_v27  ;;  %v2711_v29 = vadd.f32 -0.16666654, %v2710_v22  ;;  %v14641_v8 = vshrl.u32 %v3133_v50, 30  ;;  %v3252_v54 = vadd.s32 %v3250_v40, %v3244_v61 }
 0x32c   : > { %v3276_v11 = vsel %vm3275_vm12, 1, %v18311_v19  ;;  %v14644_v14 = vadd.f32 1.0, %v2551_v39  ;;  %vm2728_vm14 = vcmp.lt.s32.totalorder %v18479_v45, 0  ;;  %v3254_v21 = vsel %vm3253_vm4, 1, %v18311_v19 }
 0x32d   : > { %v3352_v13 = vadd.s32 1, %v10610_v20  ;;  %v14649_v52 = vmul.f32 %v2559_v62, %v14348_v47  ;;  %v2704_v38 = vadd.f32 -0.4999988, %v2703_v1  ;;  %v18481_v59 = vand.u32 2147483647, %v18479_v45 }
 0x32e   : > { %18478 = vst [vmem:[#allocation80_spill] sm:$0xff] %v14644_v14  ;;  %v14657_v49 = vsel %vm10603_vm5, 0, %v10602_v3  ;;  %v14660_v39 = vand.u32 3, %v14609_v5  ;;  %v2849_v22 = vsel %vm2728_vm14, %v2848_v36, %v2847_v53  ;;  %v3278_v50 = vadd.s32 %v3276_v11, %v3274_v41  ;;  %v18484_v41 = vld [vmem:[#allocation72_spill] sm:$0xff] }
 0x32f   : > { %18480 = vst [vmem:[#allocation81_spill] sm:$0xff] %v14649_v52  ;;  %vm14653_vm9 = vcmp.le.f32.partialorder %v18481_v59, 0.7853982  ;;  %vm3353_vm2 = vcmp.gt.s32.totalorder %v3352_v13, 0  ;;  %v2712_v47 = vmul.f32 %v2711_v29, %v14566_v43  ;;  %v3135_v28 = vshll.u32 %v14641_v8, 30 }
 0x330   : > { %v3256_v57 = vadd.s32 %v3254_v21, %v3252_v54  ;;  %v3354_v40 = vsel %vm3353_vm2, %v3352_v13, 0  ;;  %v2994_v27 = vsub.s32 4294967266, %v14657_v49  ;;  %v3268_v3 = vshrl.u32 %v14586_v15, 16 }
 0x331   : > { %v3356_v62 = vand.u32 31, %v3354_v40  ;;  %v14671_v61 = vmul.f32 %v2704_v38, %v14566_v43  ;;  %v14676_v53 = vsel %vm14653_vm9, %v18479_v45, %v2849_v22  ;;  %v3246_v36 = vshrl.u32 %v14595_v60, 16 }
 0x332   : > { %v3225_v29 = vsel %vm3223_vm15, %v14492_v31, 2102212464  ;;  %v3279_v15 = vadd.s32 %v3278_v50, %v3268_v3  ;;  %v14685_v11 = vadd.f32 1.0, %v2712_v47  ;;  %v14688_v43 = vsub.s32 %v14618_v4, %v3135_v28 }
 0x333   : > { %v14683_v54 = vsub.s32 32, %v3356_v62  ;;  %v3204_v21 = vshrl.u32 %v18259_v58, %v14439_v12  ;;  %v3257_v13 = vadd.s32 %v3256_v57, %v3246_v36  ;;  %v14694_v60 = vmul.f32 %v14676_v53, %v14676_v53 }
 0x334   : > { %v2974_v38 = vadd.s32 %v14391_v23, %v14372_v46  ;;  %v2995_v31 = vadd.s32 127, %v2994_v27  ;;  %v3270_v59 = vshrl.u32 %v14614_v24, 16  ;;  %v3226_v4 = vsel %vm3222_vm3, %v14490_v18, %v3225_v29  ;;  %v14727_v29 = vpop.f32.mrf.mxu2 }
 0x335   : > { %v3224_v22 = vsel %vm3220_vm0, %v3204_v21, %v14488_v48  ;;  %v3248_v12 = vshrl.u32 %v14620_v55, 16  ;;  %v18061_v50 = vand.u32 2147483647, %v14616_v0  ;;  %v3360_v28 = vshrl.u32 %v18445_v6, %v14683_v54  ;;  %18485 = vst [vmem:[#allocation72_spill] sm:$0xff] %v14727_v29 }
 0x336   : > { %v3280_v47 = vadd.s32 %v3279_v15, %v3270_v59  ;;  %v3363_v46 = vshrl.u32 %v18335_v26, %v14683_v54  ;;  %v3369_v23 = vshrl.u32 %v18275_v2, %v14683_v54  ;;  %vm3137_vm15 = vcmp.lt.s32.totalorder %v14688_v43, 0 }
 0x337   : > { %v3138_v48 = vsub.s32 0, %v14688_v43  ;;  %v14715_v57 = vadd.s32 %v3257_v13, %v3248_v12  ;;  %v3366_v18 = vshrl.u32 %v18444_v35, %v14683_v54  ;;  %v14722_v55 = vadd.s32 %v14623_v51, %v3269_v44 }
 0x338   : > { %v3359_v27 = vshll.u32 %v18259_v58, %v3356_v62  ;;  %v3362_v3 = vshll.u32 %v18445_v6, %v3356_v62  ;;  %v3368_v36 = vshll.u32 %v18444_v35, %v3356_v62  ;;  %v3349_v15 = vand.u32 8388607, %v18061_v50 }
 0x339   : > { %v14731_v21 = vshrl.u32 %v3354_v40, 5  ;;  %v3365_v13 = vshll.u32 %v18335_v26, %v3356_v62  ;;  %v18486_v24 = vmov 1326507024   ;;  %vm2564_vm0 = vcmp.eq.s32.totalorder %v14521_v63, 0 }
 0x33a   : > { %v3372_v59 = vshrl.u32 %v18486_v24, %v14683_v54  ;;  %v3284_v51 = vadd.s32 1, %v3280_v47  ;;  %v14737_v44 = vor.u32 %v3360_v28, %v3359_v27  ;;  %v14739_v12 = vor.u32 %v3363_v46, %v3362_v3 }
 0x33b   : > { %v3370_v33 = vor.u32 %v3369_v23, %v3368_v36  ;;  %v2990_v20 = vsub.s32 32, %v14657_v49  ;;  %vm3283_vm3 = vc.u32 %v14715_v57, %v14722_v55  ;;  %v14744_v40 = vor.u32 %v3366_v18, %v3365_v13  ;;  %v18487_v36 = vld [vmem:[#allocation48_spill] sm:$0xff] }
 0x33c   : > { %v3371_v50 = vshll.u32 %v18275_v2, %v3356_v62  ;;  %v2996_v1 = vshll.u32 %v2995_v31, 23  ;;  %v3139_v42 = vsel %vm3137_vm15, %v3138_v48, %v14688_v43  ;;  %v3227_v28 = vsel %vm3221_vm13, %v3224_v22, %v3226_v4 }
 0x33d   : > { %v3499_v46 = vand.u32 2139095040, %v14727_v29  ;;  %vm2567_vm6 = vcmp.eq.s32.totalorder %v14521_v63, 2  ;;  %v3350_v23 = vor.u32 8388608, %v3349_v15  ;;  %vm3374_vm12 = vcmp.lt.s32.totalorder %v14731_v21, 1 }
 0x33e   : > { %v3373_v27 = vor.u32 %v3372_v59, %v3371_v50  ;;  %vm3377_vm4 = vcmp.lt.s32.totalorder %v14731_v21, 4  ;;  %vm2563_vm5 = vcmp.lt.s32.totalorder %v14521_v63, 2  ;;  %v3285_v62 = vsel %vm3283_vm3, %v3284_v51, %v3280_v47 }
 0x33f   : > { %vm3376_vm2 = vcmp.lt.s32.totalorder %v14731_v21, 3  ;;  %v3382_v32 = vsel %vm3374_vm12, %v14737_v44, %v14739_v12  ;;  %v3383_v31 = vsel %vm3377_vm4, %v3370_v33, 920167782  ;;  %v2855_v22 = vmul.f32 -0.001358992, %v14694_v60 }
 0x340   : > { %v3281_v4 = vmul.u32 %v14541_v25, %v3227_v28  ;;  %vm3375_vm13 = vcmp.lt.s32.totalorder %v14731_v21, 2  ;;  %v3384_v50 = vsel %vm3376_vm2, %v14744_v40, %v3383_v31  ;;  %v2992_v47 = vshrl.u32 %v2974_v38, %v2990_v20 }
 0x341   : > { %v14772_v48 = vsel %vm3375_vm13, %v3382_v32, %v3384_v50  ;;  %v3386_v18 = vsel %vm3374_vm12, %v14739_v12, %v14744_v40  ;;  %v3500_v3 = vshrl.u32 %v3499_v46, 23  ;;  %vm18093_vm15 = vweird.f32 %v18487_v36 }
 0x342   : > { %v3140_v25 = vclz %v3139_v42  ;;  %v14779_v15 = vadd.s32 %v3285_v62, %v3281_v4  ;;  %v3387_v13 = vsel %vm3377_vm4, %v3373_v27, 1326507024  ;;  %v14783_v59 = vshll.u32 %v3350_v23, 8 }
 0x343   : > { %v2862_v20 = vmul.f32 -0.00019511016, %v14694_v60  ;;  %v2991_v38 = vshll.u32 %v14550_v16, %v14657_v49  ;;  %v2997_v51 = vor.u32 4788187, %v2996_v1  ;;  %v3388_v28 = vsel %vm3376_vm2, %v3370_v33, %v3387_v13 }
 0x344   : > { %v18488_v46 = vxor.u32 2147483648, %v14649_v52  ;;  %v14796_v62 = vadd.f32 1.0, %v14671_v61  ;;  %vm2718_vm3 = vcmp.eq.s32.totalorder %v14660_v39, 0  ;;  %vm2721_vm11 = vcmp.eq.s32.totalorder %v14660_v39, 2 }
 0x345   : > { %v14802_v16 = vsel %vm3375_vm13, %v3386_v18, %v3388_v28  ;;  %v18064_v49 = vshrl.u32 %v14772_v48, 16  ;;  %v14807_v33 = vmul.f32 %v14685_v11, %v14547_v7  ;;  %v18491_v1 = vsub.s32 4, %v18484_v41 }
 0x346   : > { %v2566_v42 = vsel %vm2564_vm0, %v14644_v14, %v18488_v46  ;;  %18489 = vst [vmem:[#allocation82_spill] sm:$0xff] %v14796_v62  ;;  %v2993_v23 = vor.u32 %v2992_v47, %v2991_v38  ;;  %v10613_v27 = vadd.s32 4294967169, %v3500_v3  ;;  %v10605_v32 = vadd.s32 4294967294, %v3140_v25 }
 0x347   : > { %18490 = vst [vmem:[#allocation83_spill] sm:$0xff] %v14807_v33  ;;  %v2851_v61 = vsel %vm2728_vm14, %v18491_v1, %v18484_v41  ;;  %v3287_v31 = vadd.s32 536870912, %v14779_v15  ;;  %v3391_v4 = vand.u32 65535, %v14783_v59  ;;  %v3394_v50 = vshrl.u32 %v14802_v16, 16 }
 0x348   : > { %v18492_v18 = vxor.u32 2147483648, %v14644_v14  ;;  %v2856_v11 = vadd.f32 0.041655596, %v2855_v22  ;;  %v2863_v13 = vadd.f32 0.008332121, %v2862_v20  ;;  %v18074_v47 = vxor.u32 2147483648, %v14796_v62 }
 0x349   : > { %v2998_v28 = vand.u32 2147483647, %v2997_v51  ;;  %v14825_v3 = vmul.u32 %v3394_v50, %v3391_v4  ;;  %v14829_v25 = vmul.u32 %v18064_v49, %v3391_v4  ;;  %v18070_v38 = vxor.u32 2147483648, %v14807_v33 }
 0x34a   : > { %v2569_v7 = vsel %vm2567_vm6, %v18492_v18, %v14649_v52  ;;  %v14834_v46 = vsel %vm14653_vm9, 0, %v2851_v61  ;;  %v3000_v22 = vcvt.s32.f32 %v2993_v23  ;;  %v3506_v20 = vadd.s32 1, %v10613_v27 }
 0x34b   : > { %v2570_v41 = vsel %vm2563_vm5, %v2566_v42, %v2569_v7  ;;  %18493 = vst [vmem:[#allocation84_spill] sm:$0xff] %v14834_v46  ;;  %vm10606_vm14 = vcmp.lt.s32.totalorder %v10605_v32, 0  ;;  %v14836_v51 = vshrl.u32 %v3287_v31, 30  ;;  %v3393_v63 = vand.u32 65535, %v14802_v16 }
 0x34c   : > { %v3415_v42 = vand.u32 65535, %v14772_v48  ;;  %v14842_v1 = vsel %vm18093_vm15, nan, %v2570_v41  ;;  %v2857_v18 = vmul.f32 %v2856_v11, %v14694_v60  ;;  %v2864_v7 = vmul.f32 %v2863_v13, %v14694_v60 }
 0x34d   : > { %18494 = vst [vmem:[#allocation85_spill] sm:$0xff] %v14836_v51  ;;  %vm2882_vm9 = vcmp.lt.s32.totalorder %v18496_v37, 0  ;;  %v3001_v61 = vmul.f32 %v3000_v22, %v2998_v28  ;;  %v14848_v23 = vand.u32 3, %v14834_v46  ;;  %v3392_v27 = vshrl.u32 %v14783_v59, 16 }
 0x34e   : > { %18495 = vst [vmem:[#allocation86_spill] sm:$0xff] %v14842_v1  ;;  %v3399_v16 = vshll.u32 %v14825_v3, 16  ;;  %v3421_v31 = vshll.u32 %v14829_v25, 16  ;;  %v14858_v11 = vsel %vm2718_vm3, %v14796_v62, %v18070_v38  ;;  %v14865_v13 = vsel %vm2721_vm11, %v18074_v47, %v14807_v33 }
 0x34f   : > { %v3143_v28 = vsel %vm10606_vm14, 0, %v10605_v32  ;;  %vm3507_vm0 = vcmp.gt.s32.totalorder %v3506_v20, 0  ;;  %v3289_v41 = vshll.u32 %v14836_v51, 30  ;;  %v3395_v22 = vmul.u32 %v3393_v63, %v3391_v4 }
 0x350   : > { %v3417_v49 = vmul.u32 %v3415_v42, %v3391_v4  ;;  %v14868_v36 = vmul.u32 %v3415_v42, %v3392_v27  ;;  %v14870_v14 = vadd.f32 -0.4999988, %v2857_v18  ;;  %v14872_v52 = vadd.f32 -0.16666654, %v2864_v7 }
 0x351   : > { %v3002_v38 = vxor.u32 2147483648, %v3001_v61  ;;  %v14874_v46 = vmul.u32 %v3393_v63, %v3392_v27  ;;  %vm3403_vm6 = vc.u32 %v3395_v22, %v3399_v16  ;;  %v3508_v47 = vsel %vm3507_vm0, %v3506_v20, 0 }
 0x352   : > { %vm3425_vm5 = vc.u32 %v3417_v49, %v3421_v31  ;;  %v14876_v62 = vadd.s32 %v3421_v31, %v3417_v49  ;;  %v3144_v32 = vsub.s32 32, %v3143_v28  ;;  %v3148_v33 = vsub.s32 4294967266, %v3143_v28 }
 0x353   : > { %v3405_v5 = vadd.s32 %v3399_v16, %v3395_v22  ;;  %v3510_v10 = vand.u32 31, %v3508_v47  ;;  %v3128_v4 = vadd.s32 %v14581_v9, %v14561_v56  ;;  %v14881_v42 = vsub.s32 %v14779_v15, %v3289_v41 }
 0x354   : > { %v18079_v18 = vshll.u32 %v14868_v36, 16  ;;  %v3401_v7 = vshll.u32 %v14874_v46, 16  ;;  %v3404_v49 = vsel %vm3403_vm6, 1, %v18311_v19  ;;  %v3426_v20 = vsel %vm3425_vm5, 1, %v18311_v19 }
 0x355   : > { %v14888_v31 = vsub.s32 32, %v3510_v10  ;;  %v14892_v16 = vsel %vm2882_vm9, %v3002_v38, %v3001_v61  ;;  %v3398_v56 = vmul.u32 %v3394_v50, %v3392_v27  ;;  %v18497_v9 = vshrl.u32 %v14772_v48, 16 }
 0x356   : > { %vm3429_vm11 = vc.u32 %v14876_v62, %v18079_v18  ;;  %v3145_v41 = vshll.u32 %v14688_v43, %v3143_v28  ;;  %v3146_v22 = vshrl.u32 %v3128_v4, %v3144_v32  ;;  %v3149_v63 = vadd.s32 127, %v3148_v33 }
 0x357   : > { %v3420_v15 = vmul.u32 %v18497_v9, %v3392_v27  ;;  %vm3407_vm3 = vc.u32 %v3405_v5, %v3401_v7  ;;  %vm3291_vm14 = vcmp.lt.s32.totalorder %v14881_v42, 0  ;;  %v3406_v1 = vadd.s32 %v3404_v49, %v3398_v56 }
 0x358   : > { %v18498_v38 = vand.u32 2147483647, %v14727_v29  ;;  %v3430_v50 = vsel %vm3429_vm11, 1, %v18311_v19  ;;  %v3514_v48 = vshrl.u32 %v18445_v6, %v14888_v31  ;;  %v3517_v27 = vshrl.u32 %v18335_v26, %v14888_v31 }
 0x359   : > { %v3428_v17 = vadd.s32 %v3426_v20, %v3420_v15  ;;  %v3520_v43 = vshrl.u32 %v18444_v35, %v14888_v31  ;;  %v3292_v5 = vsub.s32 0, %v14881_v42  ;;  %v3408_v33 = vsel %vm3407_vm3, 1, %v18311_v19 }
 0x35a   : > { %v3503_v61 = vand.u32 8388607, %v18498_v38  ;;  %v3522_v28 = vshll.u32 %v18444_v35, %v3510_v10  ;;  %v3523_v32 = vshrl.u32 %v18275_v2, %v14888_v31  ;;  %v14915_v4 = vshrl.u32 %v3508_v47, 5 }
 0x35b   : > { %v3513_v7 = vshll.u32 %v18259_v58, %v3510_v10  ;;  %v3516_v49 = vshll.u32 %v18445_v6, %v3510_v10  ;;  %v3519_v20 = vshll.u32 %v18335_v26, %v3510_v10  ;;  %v18499_v56 = vand.u32 2147483647, %v18496_v37 }
 0x35c   : > { %v3432_v15 = vadd.s32 %v3430_v50, %v3428_v17  ;;  %v3524_v38 = vor.u32 %v3523_v32, %v3522_v28  ;;  %v3525_v18 = vshll.u32 %v18275_v2, %v3510_v10  ;;  %v3526_v47 = vshrl.u32 %v18486_v24, %v14888_v31 }
 0x35d   : > { %vm14922_vm0 = vcmp.le.f32.partialorder %v18499_v56, 0.7853982  ;;  %v3410_v29 = vadd.s32 %v3408_v33, %v3406_v1  ;;  %v14929_v0 = vor.u32 %v3514_v48, %v3513_v7  ;;  %v14931_v51 = vor.u32 %v3517_v27, %v3516_v49 }
 0x35e   : > { %v14933_v45 = vor.u32 %v3520_v43, %v3519_v20  ;;  %v3147_v35 = vor.u32 %v3146_v22, %v3145_v41  ;;  %v3150_v26 = vshll.u32 %v3149_v63, 23  ;;  %v3422_v56 = vshrl.u32 %v14829_v25, 16 }
 0x35f   : > { %v3527_v6 = vor.u32 %v3526_v47, %v3525_v18  ;;  %v3293_v17 = vsel %vm3291_vm14, %v3292_v5, %v14881_v42  ;;  %v3400_v10 = vshrl.u32 %v14825_v3, 16  ;;  %v3504_v50 = vor.u32 8388608, %v3503_v61 }
 0x360   : > { %vm3531_vm6 = vcmp.lt.s32.totalorder %v14915_v4, 4  ;;  %vm2717_vm5 = vcmp.lt.s32.totalorder %v14660_v39, 2  ;;  %v3433_v1 = vadd.s32 %v3432_v15, %v3422_v56  ;;  %vm3528_vm11 = vcmp.lt.s32.totalorder %v14915_v4, 1 }
 0x361   : > { %v3537_v63 = vsel %vm3531_vm6, %v3524_v38, 920167782  ;;  %v3541_v25 = vsel %vm3531_vm6, %v3527_v6, 1326507024  ;;  %v3411_v18 = vadd.s32 %v3410_v29, %v3400_v10  ;;  %vm3530_vm3 = vcmp.lt.s32.totalorder %v14915_v4, 3 }
 0x362   : > { %v3536_v3 = vsel %vm3528_vm11, %v14929_v0, %v14931_v51  ;;  %v3540_v41 = vsel %vm3528_vm11, %v14931_v51, %v14933_v45  ;;  %v3151_v22 = vor.u32 4788187, %v3150_v26  ;;  %v3424_v61 = vshrl.u32 %v14868_v36, 16 }
 0x363   : > { %v3538_v6 = vsel %vm3530_vm3, %v14933_v45, %v3537_v63  ;;  %v3542_v29 = vsel %vm3530_vm3, %v3524_v38, %v3541_v25  ;;  %v3294_v48 = vclz %v3293_v17  ;;  %v3402_v27 = vshrl.u32 %v14874_v46, 16 }
 0x364   : > { %vm3529_vm14 = vcmp.lt.s32.totalorder %v14915_v4, 2  ;;  %v14964_v43 = vshll.u32 %v3504_v50, 8  ;;  %v3358_v5 = vshrl.u32 %v18259_v58, %v14683_v54  ;;  %v3434_v26 = vadd.s32 %v3433_v1, %v3424_v61 }
 0x365   : > { %v3539_v33 = vsel %vm3529_vm14, %v3536_v3, %v3538_v6  ;;  %v3543_v28 = vsel %vm3529_vm14, %v3540_v41, %v3542_v29  ;;  %v14976_v32 = vsel %vm14922_vm0, %v18496_v37, %v14892_v16  ;;  %v3154_v46 = vcvt.s32.f32 %v3147_v35 }
 0x366   : > { %v3379_v7 = vsel %vm3377_vm4, %v14744_v40, 2102212464  ;;  %v14981_v49 = vadd.s32 %v3411_v18, %v3402_v27  ;;  %v3152_v54 = vand.u32 2147483647, %v3151_v22  ;;  %v3378_v20 = vsel %vm3374_vm12, %v3358_v5, %v14737_v44  ;;  %v18503_v22 = vld [vmem:[#allocation62_spill] sm:$0xff] }
 0x367   : > { %v3547_v15 = vand.u32 65535, %v3543_v28  ;;  %v3548_v38 = vshrl.u32 %v3543_v28, 16  ;;  %v10608_v47 = vadd.s32 4294967294, %v3294_v48  ;;  %v18502_v56 = vshll.u32 %v14868_v36, 16 }
 0x368   : > { %v3545_v35 = vand.u32 65535, %v14964_v43  ;;  %v3570_v17 = vshrl.u32 %v3539_v33, 16  ;;  %v3380_v40 = vsel %vm3376_vm2, %v14739_v12, %v3379_v7  ;;  %v3438_v10 = vadd.s32 1, %v3434_v26 }
 0x369   : > { %v14989_v16 = vadd.s32 %v14876_v62, %v18502_v56  ;;  %v3546_v50 = vshrl.u32 %v14964_v43, 16  ;;  %v3569_v1 = vand.u32 65535, %v3539_v33  ;;  %v15000_v44 = vsel %vm2717_vm5, %v14858_v11, %v14865_v13 }
 0x36a   : > { %v3004_v36 = vsub.s32 4, %v14494_v34  ;;  %v15005_v62 = vmul.u32 %v3548_v38, %v3545_v35  ;;  %v2859_v12 = vmul.f32 %v14870_v14, %v14694_v60  ;;  %v15011_v63 = vmul.f32 %v14976_v32, %v14976_v32 }
 0x36b   : > { %vm3437_vm12 = vc.u32 %v14981_v49, %v14989_v16  ;;  %v3155_v25 = vmul.f32 %v3154_v46, %v3152_v54  ;;  %v15013_v18 = vmul.u32 %v3547_v15, %v3546_v50  ;;  %v3381_v39 = vsel %vm3375_vm13, %v3378_v20, %v3380_v40 }
 0x36c   : > { %v3549_v11 = vmul.u32 %v3547_v15, %v3545_v35  ;;  %v3553_v13 = vshll.u32 %v15005_v62, 16  ;;  %v3572_v3 = vmul.u32 %v3570_v17, %v3545_v35  ;;  %v2866_v41 = vmul.f32 %v14872_v52, %v14694_v60  ;;  %v15039_v15 = vpop.f32.mrf.mxu2 }
 0x36d   : > { %vm3036_vm4 = vcmp.lt.s32.totalorder %v18503_v22, 0  ;;  %vm10609_vm2 = vcmp.lt.s32.totalorder %v10608_v47, 0  ;;  %v3439_v14 = vsel %vm3437_vm12, %v3438_v10, %v3434_v26  ;;  %v15021_v61 = vmul.u32 %v3569_v1, %v3546_v50  ;;  %18507 = vst [vmem:[#allocation87_spill] sm:$0xff] %v15039_v15 }
 0x36e   : > { %v3555_v6 = vshll.u32 %v15013_v18, 16  ;;  %vm3557_vm5 = vc.u32 %v3549_v11, %v3553_v13  ;;  %v3559_v29 = vadd.s32 %v3553_v13, %v3549_v11  ;;  %v3575_v48 = vshll.u32 %v3572_v3, 16 }
 0x36f   : > { %v3016_v21 = vmul.f32 -0.00019511016, %v15011_v63  ;;  %v3435_v27 = vmul.u32 %v14783_v59, %v3381_v39  ;;  %v3552_v5 = vmul.u32 %v3548_v38, %v3546_v50  ;;  %v3558_v33 = vsel %vm3557_vm5, 1, %v18311_v19 }
 0x370   : > { %v3009_v52 = vmul.f32 -0.001358992, %v15011_v63  ;;  %v18504_v60 = vand.u32 2147483647, %v18503_v22  ;;  %v3156_v28 = vxor.u32 2147483648, %v3155_v25  ;;  %vm3561_vm12 = vc.u32 %v3559_v29, %v3555_v6 }
 0x371   : > { %v3571_v46 = vmul.u32 %v3569_v1, %v3545_v35  ;;  %v15035_v7 = vsel %vm10609_vm2, 0, %v10608_v47  ;;  %v15037_v54 = vadd.s32 %v3439_v14, %v3435_v27  ;;  %v3560_v59 = vadd.s32 %v3558_v33, %v3552_v5 }
 0x372   : > { %vm15030_vm13 = vcmp.le.f32.partialorder %v18504_v60, 0.7853982  ;;  %v3574_v20 = vmul.u32 %v3570_v17, %v3546_v50  ;;  %v3562_v38 = vsel %vm3561_vm12, 1, %v18311_v19  ;;  %v3577_v56 = vshll.u32 %v15021_v61, 16 }
 0x373   : > { %vm3579_vm5 = vc.u32 %v3571_v46, %v3575_v48  ;;  %v3581_v40 = vadd.s32 %v3575_v48, %v3571_v46  ;;  %v2867_v10 = vadd.f32 1.0, %v2866_v41  ;;  %v3005_v35 = vsel %vm2882_vm9, %v3004_v36, %v14494_v34 }
 0x374   : > { %v3017_v1 = vadd.f32 0.008332121, %v3016_v21  ;;  %v3580_v47 = vsel %vm3579_vm5, 1, %v18311_v19  ;;  %v15047_v39 = vadd.f32 1.0, %v2859_v12  ;;  %v3010_v11 = vadd.f32 0.041655596, %v3009_v52 }
 0x375   : > { %v3582_v17 = vadd.s32 %v3580_v47, %v3574_v20  ;;  %vm3583_vm2 = vc.u32 %v3581_v40, %v3577_v56  ;;  %v3302_v50 = vsub.s32 4294967266, %v15035_v7  ;;  %v3564_v13 = vadd.s32 %v3562_v38, %v3560_v59 }
 0x376   : > { %18508 = vst [vmem:[#allocation88_spill] sm:$0xff] %v15047_v39  ;;  %v3584_v14 = vsel %vm3583_vm2, 1, %v18311_v19  ;;  %v3653_v6 = vand.u32 2139095040, %v15039_v15  ;;  %v3157_v41 = vsel %vm3036_vm4, %v3156_v28, %v3155_v25  ;;  %v3441_v34 = vadd.s32 536870912, %v15037_v54 }
 0x377   : > { %v3576_v36 = vshrl.u32 %v3572_v3, 16  ;;  %v3586_v29 = vadd.s32 %v3584_v14, %v3582_v17  ;;  %vm18092_vm9 = vweird.f32 %v18469_v30  ;;  %v15057_v12 = vmul.f32 %v2867_v10, %v14676_v53 }
 0x378   : > { %v3018_v48 = vmul.f32 %v3017_v1, %v15011_v63  ;;  %v3554_v21 = vshrl.u32 %v15005_v62, 16  ;;  %v3654_v27 = vshrl.u32 %v3653_v6, 23  ;;  %v18090_v5 = vxor.u32 2147483648, %v15047_v39 }
 0x379   : > { %18509 = vst [vmem:[#allocation89_spill] sm:$0xff] %v15057_v12  ;;  %v15064_v33 = vsel %vm14922_vm0, 0, %v3005_v35  ;;  %v3298_v25 = vsub.s32 32, %v15035_v7  ;;  %v3587_v3 = vadd.s32 %v3586_v29, %v3576_v36  ;;  %v15070_v52 = vsel %vm15030_vm13, %v18503_v22, %v3157_v41 }
 0x37a   : > { %18510 = vst [vmem:[#allocation90_spill] sm:$0xff] %v15064_v33  ;;  %v3303_v53 = vadd.s32 127, %v3302_v50  ;;  %v3565_v60 = vadd.s32 %v3564_v13, %v3554_v21  ;;  %v10616_v28 = vadd.s32 4294967169, %v3654_v27  ;;  %vm2872_vm12 = vcmp.eq.s32.totalorder %v14848_v23, 0 }
 0x37b   : > { %v3011_v62 = vmul.f32 %v3010_v11, %v15011_v63  ;;  %v3282_v9 = vadd.s32 %v14722_v55, %v14715_v57  ;;  %v15076_v46 = vshrl.u32 %v3441_v34, 30  ;;  %v3578_v59 = vshrl.u32 %v15021_v61, 16 }
 0x37c   : > { %v18091_v20 = vxor.u32 2147483648, %v15057_v12  ;;  %v3019_v38 = vadd.f32 -0.16666654, %v3018_v48  ;;  %v3556_v10 = vshrl.u32 %v15013_v18, 16  ;;  %v3660_v35 = vadd.s32 1, %v10616_v28 }
 0x37d   : > { %v15083_v1 = vmul.f32 %v15070_v52, %v15070_v52  ;;  %v3300_v47 = vshrl.u32 %v3282_v9, %v3298_v25  ;;  %v3533_v11 = vsel %vm3531_vm6, %v14933_v45, 2102212464  ;;  %v3588_v57 = vadd.s32 %v3587_v3, %v3578_v59 }
 0x37e   : > { %v3304_v55 = vshll.u32 %v3303_v53, 23  ;;  %v3512_v61 = vshrl.u32 %v18259_v58, %v14888_v31  ;;  %v15090_v17 = vadd.s32 %v3565_v60, %v3556_v10  ;;  %vm3661_vm0 = vcmp.gt.s32.totalorder %v3660_v35, 0 }
 0x37f   : > { %v3012_v50 = vadd.f32 -0.4999988, %v3011_v62  ;;  %v3299_v18 = vshll.u32 %v14881_v42, %v15035_v7  ;;  %v3443_v13 = vshll.u32 %v15076_v46, 30  ;;  %v3662_v14 = vsel %vm3661_vm0, %v3660_v35, 0 }
 0x380   : > { %v3532_v6 = vsel %vm3528_vm11, %v3512_v61, %v14929_v0  ;;  %v3534_v45 = vsel %vm3530_vm3, %v14931_v51, %v3533_v11  ;;  %v15101_v41 = vadd.s32 %v3581_v40, %v3577_v56  ;;  %v3664_v31 = vand.u32 31, %v3662_v14  ;;  %v15152_v61 = vpop.f32.mrf.mxu2 }
 0x381   : > { %v15106_v34 = vsel %vm18092_vm9, nan, %v15000_v44  ;;  %vm2875_vm6 = vcmp.eq.s32.totalorder %v14848_v23, 2  ;;  %v3020_v42 = vmul.f32 %v3019_v38, %v15011_v63  ;;  %v3592_v7 = vadd.s32 1, %v3588_v57  ;;  %18515 = vst [vmem:[#allocation92_spill] sm:$0xff] %v15152_v61 }
 0x382   : > { %18511 = vst [vmem:[#allocation91_spill] sm:$0xff] %v15106_v34  ;;  %v3163_v36 = vmul.f32 -0.001358992, %v15083_v1  ;;  %v3301_v0 = vor.u32 %v3300_v47, %v3299_v18  ;;  %v3305_v29 = vor.u32 4788187, %v3304_v55  ;;  %vm3591_vm11 = vc.u32 %v15090_v17, %v15101_v41 }
 0x383   : > { %v15114_v51 = vand.u32 3, %v15064_v33  ;;  %v15117_v56 = vsub.s32 %v15037_v54, %v3443_v13  ;;  %v3535_v44 = vsel %vm3529_vm14, %v3532_v6, %v3534_v45  ;;  %v15121_v40 = vsub.s32 32, %v3664_v31 }
 0x384   : > { %v15128_v48 = vsel %vm2872_vm12, %v15047_v39, %v18091_v20  ;;  %v2877_v21 = vsel %vm2875_vm6, %v18090_v5, %v15057_v12  ;;  %v3013_v27 = vmul.f32 %v3012_v50, %v15011_v63  ;;  %v18094_v54 = vand.u32 2147483647, %v15039_v15 }
 0x385   : > { %v3021_v25 = vadd.f32 1.0, %v3020_v42  ;;  %v3158_v4 = vsub.s32 4, %v14641_v8  ;;  %v3170_v3 = vmul.f32 -0.00019511016, %v15083_v1  ;;  %v3593_v53 = vsel %vm3591_vm11, %v3592_v7, %v3588_v57 }
 0x386   : > { %v3164_v60 = vadd.f32 0.041655596, %v3163_v36  ;;  %v3306_v28 = vand.u32 2147483647, %v3305_v29  ;;  %v3308_v62 = vcvt.s32.f32 %v3301_v0  ;;  %v3589_v9 = vmul.u32 %v14964_v43, %v3535_v44  ;;  %v18516_v0 = vld [vmem:[#allocation76_spill] sm:$0xff] }
 0x387   : > { %vm3445_vm3 = vcmp.lt.s32.totalorder %v15117_v56, 0  ;;  %v18512_v59 = vmov 2475754826   ;;  %v18513_v63 = vmov 2131351028   ;;  %v3677_v35 = vshrl.u32 %v18275_v2, %v15121_v40 }
 0x388   : > { %v3668_v38 = vshrl.u32 %v18512_v59, %v15121_v40  ;;  %v3671_v10 = vshrl.u32 %v18513_v63, %v15121_v40  ;;  %v3446_v47 = vsub.s32 0, %v15117_v56  ;;  %v15146_v11 = vadd.s32 %v3593_v53, %v3589_v9 }
 0x389   : > { %v3657_v57 = vand.u32 8388607, %v18094_v54  ;;  %v18514_v43 = vmov 2102212464   ;;  %vm2871_vm14 = vcmp.lt.s32.totalorder %v14848_v23, 2  ;;  %v3667_v50 = vshll.u32 %v18259_v58, %v3664_v31 }
 0x38a   : > { %v3674_v55 = vshrl.u32 %v18514_v43, %v15121_v40  ;;  %v3670_v18 = vshll.u32 %v18512_v59, %v3664_v31  ;;  %v3676_v13 = vshll.u32 %v18514_v43, %v3664_v31  ;;  %v3680_v6 = vshrl.u32 %v18486_v24, %v15121_v40 }
 0x38b   : > { %v3171_v45 = vadd.f32 0.008332121, %v3170_v3  ;;  %v3309_v42 = vmul.f32 %v3308_v62, %v3306_v28  ;;  %v15160_v7 = vshrl.u32 %v3662_v14, 5  ;;  %v3673_v36 = vshll.u32 %v18513_v63, %v3664_v31  ;;  %v18517_v28 = vld [vmem:[#allocation61_spill] sm:$0xff] }
 0x38c   : > { %vm3190_vm5 = vcmp.lt.s32.totalorder %v18516_v0, 0  ;;  %v15164_v29 = vor.u32 %v3668_v38, %v3667_v50  ;;  %v15166_v44 = vor.u32 %v3671_v10, %v3670_v18  ;;  %v3678_v53 = vor.u32 %v3677_v35, %v3676_v13 }
 0x38d   : > { %v3679_v9 = vshll.u32 %v18275_v2, %v3664_v31  ;;  %v3447_v5 = vsel %vm3445_vm3, %v3446_v47, %v15117_v56  ;;  %v3658_v20 = vor.u32 8388608, %v3657_v57  ;;  %v15172_v3 = vor.u32 %v3674_v55, %v3673_v36 }
 0x38e   : > { %v3807_v14 = vand.u32 2139095040, %v15152_v61  ;;  %vm18143_vm2 = vweird.f32 %v18517_v28  ;;  %v15177_v62 = vmul.f32 %v3021_v25, %v14976_v32  ;;  %v3165_v38 = vmul.f32 %v3164_v60, %v15083_v1 }
 0x38f   : > { %v3595_v10 = vadd.s32 536870912, %v15146_v11  ;;  %v3681_v35 = vor.u32 %v3680_v6, %v3679_v9  ;;  %v3172_v31 = vmul.f32 %v3171_v45, %v15083_v1  ;;  %v18519_v50 = vand.u32 2147483647, %v18516_v0 }
 0x390   : > { %18518 = vst [vmem:[#allocation93_spill] sm:$0xff] %v15177_v62  ;;  %v3310_v57 = vxor.u32 2147483648, %v3309_v42  ;;  %vm3682_vm0 = vcmp.lt.s32.totalorder %v15160_v7, 1  ;;  %vm3685_vm6 = vcmp.lt.s32.totalorder %v15160_v7, 4  ;;  %vm3026_vm11 = vcmp.eq.s32.totalorder %v15114_v51, 0 }
 0x391   : > { %vm15184_vm12 = vcmp.le.f32.partialorder %v18519_v50, 0.7853982  ;;  %v3448_v32 = vclz %v3447_v5  ;;  %vm3684_vm3 = vcmp.lt.s32.totalorder %v15160_v7, 3  ;;  %v3690_v25 = vsel %vm3682_vm0, %v15164_v29, %v15166_v44 }
 0x392   : > { %v3691_v60 = vsel %vm3685_vm6, %v3678_v53, 920167782  ;;  %vm3683_vm9 = vcmp.lt.s32.totalorder %v15160_v7, 2  ;;  %v15202_v18 = vshll.u32 %v3658_v20, 8  ;;  %v3808_v13 = vshrl.u32 %v3807_v14, 23 }
 0x393   : > { %v3692_v55 = vsel %vm3684_vm3, %v15172_v3, %v3691_v60  ;;  %v15204_v5 = vshrl.u32 %v3595_v10, 30  ;;  %v3694_v45 = vsel %vm3682_vm0, %v15166_v44, %v15172_v3  ;;  %v3695_v36 = vsel %vm3685_vm6, %v3681_v35, 1326507024  ;;  %v18524_v60 = vld [vmem:[#allocation85_spill] sm:$0xff] }
 0x394   : > { %v15208_v6 = vsel %vm3683_vm9, %v3690_v25, %v3692_v55  ;;  %v2878_v20 = vsel %vm2871_vm14, %v15128_v48, %v2877_v21  ;;  %v15219_v9 = vadd.f32 1.0, %v3013_v27  ;;  %vm3025_vm15 = vcmp.lt.s32.totalorder %v15114_v51, 2 }
 0x395   : > { %18522 = vst [vmem:[#allocation94_spill] sm:$0xff] %v15204_v5  ;;  %v3173_v14 = vadd.f32 -0.16666654, %v3172_v31  ;;  %v3696_v10 = vsel %vm3684_vm3, %v3678_v53, %v3695_v36  ;;  %v18097_v50 = vxor.u32 2147483648, %v15177_v62  ;;  %v3159_v35 = vsel %vm3036_vm4, %v3158_v4, %v14641_v8 }
 0x396   : > { %18523 = vst [vmem:[#allocation95_spill] sm:$0xff] %v15219_v9  ;;  %v3166_v25 = vadd.f32 -0.4999988, %v3165_v38  ;;  %v3312_v23 = vsub.s32 4, %v18524_v60  ;;  %v3311_v48 = vsel %vm3190_vm5, %v3310_v57, %v3309_v42  ;;  %v3697_v21 = vsel %vm3683_vm9, %v3694_v45, %v3696_v10 }
 0x397   : > { %v3724_v27 = vshrl.u32 %v15208_v6, 16  ;;  %v10619_v53 = vadd.s32 4294967169, %v3808_v13  ;;  %v10611_v31 = vadd.s32 4294967294, %v3448_v32  ;;  %v3597_v55 = vshll.u32 %v15204_v5, 30 }
 0x398   : > { %v3699_v36 = vand.u32 65535, %v15202_v18  ;;  %v3702_v54 = vshrl.u32 %v3697_v21, 16  ;;  %v15240_v8 = vsel %vm18143_vm2, nan, %v2878_v20  ;;  %vm3029_vm4 = vcmp.eq.s32.totalorder %v15114_v51, 2 }
 0x399   : > { %18525 = vst [vmem:[#allocation85_spill] sm:$0xff] %v15240_v8  ;;  %v18098_v4 = vxor.u32 2147483648, %v15219_v9  ;;  %v3174_v42 = vmul.f32 %v3173_v14, %v15083_v1  ;;  %v15247_v38 = vsel %vm15030_vm13, 0, %v3159_v35  ;;  %v15252_v57 = vsel %vm15184_vm12, %v18516_v0, %v3311_v48 }
 0x39a   : > { %18526 = vst [vmem:[#allocation96_spill] sm:$0xff] %v15247_v38  ;;  %v15254_v32 = vmul.u32 %v3702_v54, %v3699_v36  ;;  %v15256_v13 = vmul.u32 %v3724_v27, %v3699_v36  ;;  %v3028_v45 = vsel %vm3026_vm11, %v15219_v9, %v18097_v50  ;;  %v3167_v20 = vmul.f32 %v3166_v25, %v15083_v1 }
 0x39b   : > { %v3313_v26 = vsel %vm3190_vm5, %v3312_v23, %v18524_v60  ;;  %v3814_v14 = vadd.s32 1, %v10619_v53  ;;  %vm10612_vm13 = vcmp.lt.s32.totalorder %v10611_v31, 0  ;;  %v15268_v10 = vsub.s32 %v15146_v11, %v3597_v55 }
 0x39c   : > { %v3701_v35 = vand.u32 65535, %v3697_v21  ;;  %v3723_v48 = vand.u32 65535, %v15208_v6  ;;  %v3031_v28 = vsel %vm3029_vm4, %v18098_v4, %v15177_v62  ;;  %v3175_v30 = vadd.f32 1.0, %v3174_v42 }
 0x39d   : > { %v15275_v50 = vand.u32 3, %v15247_v38  ;;  %v15279_v1 = vmul.f32 %v15252_v57, %v15252_v57  ;;  %v15283_v25 = vsel %vm3025_vm15, %v3028_v45, %v3031_v28  ;;  %v3700_v11 = vshrl.u32 %v15202_v18, 16 }
 0x39e   : > { %v3707_v6 = vshll.u32 %v15254_v32, 16  ;;  %v3729_v60 = vshll.u32 %v15256_v13, 16  ;;  %v15288_v23 = vadd.f32 1.0, %v3167_v20  ;;  %v15292_v21 = vsel %vm15184_vm12, 0, %v3313_v26 }
 0x39f   : > { %18528 = vst [vmem:[#allocation98_spill] sm:$0xff] %v15292_v21  ;;  %v15294_v53 = vsel %vm10612_vm13, 0, %v10611_v31  ;;  %vm3815_vm14 = vcmp.gt.s32.totalorder %v3814_v14, 0  ;;  %v3600_v55 = vsub.s32 0, %v15268_v10  ;;  %v3703_v51 = vmul.u32 %v3701_v35, %v3699_v36 }
 0x3a0   : > { %18527 = vst [vmem:[#allocation97_spill] sm:$0xff] %v15288_v23  ;;  %v3725_v28 = vmul.u32 %v3723_v48, %v3699_v36  ;;  %v15297_v42 = vmul.u32 %v3723_v48, %v3700_v11  ;;  %v15300_v45 = vmul.f32 %v3175_v30, %v15070_v52  ;;  %v3317_v4 = vmul.f32 -0.001358992, %v15279_v1 }
 0x3a1   : > { %vm3599_vm15 = vcmp.lt.s32.totalorder %v15268_v10, 0  ;;  %v3816_v20 = vsel %vm3815_vm14, %v3814_v14, 0  ;;  %v15304_v47 = vmul.u32 %v3701_v35, %v3700_v11  ;;  %vm3711_vm5 = vc.u32 %v3703_v51, %v3707_v6 }
 0x3a2   : > { %18529 = vst [vmem:[#allocation99_spill] sm:$0xff] %v15300_v45  ;;  %vm3733_vm12 = vc.u32 %v3725_v28, %v3729_v60  ;;  %v15306_v31 = vadd.s32 %v3729_v60, %v3725_v28  ;;  %v15309_v26 = vmul.f32 -0.00019511016, %v15279_v1  ;;  %v3456_v36 = vsub.s32 4294967266, %v15294_v53 }
 0x3a3   : > { %v3818_v30 = vand.u32 31, %v3816_v20  ;;  %v3436_v52 = vadd.s32 %v14989_v16, %v14981_v49  ;;  %v3601_v9 = vsel %vm3599_vm15, %v3600_v55, %v15268_v10  ;;  %v3713_v14 = vadd.s32 %v3707_v6, %v3703_v51 }
 0x3a4   : > { %v18109_v35 = vshll.u32 %v15297_v42, 16  ;;  %v15317_v62 = vadd.f32 0.041655596, %v3317_v4  ;;  %v3712_v60 = vsel %vm3711_vm5, 1, %v18311_v19  ;;  %v3734_v28 = vsel %vm3733_vm12, 1, %v18311_v19 }
 0x3a5   : > { %v15321_v39 = vsub.s32 32, %v3818_v30  ;;  %v3706_v12 = vmul.u32 %v3702_v54, %v3700_v11  ;;  %v3709_v48 = vshll.u32 %v15304_v47, 16  ;;  %v3728_v38 = vmul.u32 %v3724_v27, %v3700_v11 }
 0x3a6   : > { %vm3737_vm11 = vc.u32 %v15306_v31, %v18109_v35  ;;  %v3452_v49 = vsub.s32 32, %v15294_v53  ;;  %v3457_v16 = vadd.s32 127, %v3456_v36  ;;  %v3602_v6 = vclz %v3601_v9 }
 0x3a7   : > { %v18530_v4 = vand.u32 2147483647, %v15152_v61  ;;  %v3714_v51 = vadd.s32 %v3712_v60, %v3706_v12  ;;  %vm3715_vm4 = vc.u32 %v3713_v14, %v3709_v48  ;;  %v3736_v33 = vadd.s32 %v3734_v28, %v3728_v38 }
 0x3a8   : > { %v3825_v54 = vshrl.u32 %v18513_v63, %v15321_v39  ;;  %v3738_v8 = vsel %vm3737_vm11, 1, %v18311_v19  ;;  %v15333_v27 = vshrl.u32 %v3816_v20, 5  ;;  %v3824_v11 = vshll.u32 %v18512_v59, %v3818_v30 }
 0x3a9   : > { %v3811_v55 = vand.u32 8388607, %v18530_v4  ;;  %v3828_v35 = vshrl.u32 %v18514_v43, %v15321_v39  ;;  %v3822_v9 = vshrl.u32 %v18512_v59, %v15321_v39  ;;  %v3827_v36 = vshll.u32 %v18513_v63, %v3818_v30 }
 0x3aa   : > { %v3830_v12 = vshll.u32 %v18514_v43, %v3818_v30  ;;  %v3831_v38 = vshrl.u32 %v18275_v2, %v15321_v39  ;;  %v3454_v48 = vshrl.u32 %v3436_v52, %v3452_v49  ;;  %v3716_v14 = vsel %vm3715_vm4, 1, %v18311_v19 }
 0x3ab   : > { %v3833_v20 = vshll.u32 %v18275_v2, %v3818_v30  ;;  %v3834_v60 = vshrl.u32 %v18486_v24, %v15321_v39  ;;  %v3821_v28 = vshll.u32 %v18259_v58, %v3818_v30  ;;  %v15349_v4 = vor.u32 %v3825_v54, %v3824_v11 }
 0x3ac   : > { %v15351_v34 = vor.u32 %v3828_v35, %v3827_v36  ;;  %v3832_v61 = vor.u32 %v3831_v38, %v3830_v12  ;;  %v10614_v0 = vadd.s32 4294967294, %v3602_v6  ;;  %v3740_v15 = vadd.s32 %v3738_v8, %v3736_v33 }
 0x3ad   : > { %v3812_v5 = vor.u32 8388608, %v3811_v55  ;;  %v3835_v43 = vor.u32 %v3834_v60, %v3833_v20  ;;  %v3458_v63 = vshll.u32 %v3457_v16, 23  ;;  %v3718_v52 = vadd.s32 %v3716_v14, %v3714_v51 }
 0x3ae   : > { %v15353_v49 = vor.u32 %v3822_v9, %v3821_v28  ;;  %vm3839_vm13 = vcmp.lt.s32.totalorder %v15333_v27, 4  ;;  %v3730_v2 = vshrl.u32 %v15256_v13, 16  ;;  %vm3836_vm14 = vcmp.lt.s32.totalorder %v15333_v27, 1 }
 0x3af   : > { %v3845_v30 = vsel %vm3839_vm13, %v3832_v61, 920167782  ;;  %v3849_v35 = vsel %vm3839_vm13, %v3835_v43, 1326507024  ;;  %v3453_v33 = vshll.u32 %v15117_v56, %v15294_v53  ;;  %v3708_v8 = vshrl.u32 %v15254_v32, 16 }
 0x3b0   : > { %vm3838_vm15 = vcmp.lt.s32.totalorder %v15333_v27, 3  ;;  %v3848_v13 = vsel %vm3836_vm14, %v15349_v4, %v15351_v34  ;;  %vm10615_vm5 = vcmp.lt.s32.totalorder %v10614_v0, 0  ;;  %v3741_v16 = vadd.s32 %v3740_v15, %v3730_v2 }
 0x3b1   : > { %v3850_v6 = vsel %vm3838_vm15, %v3832_v61, %v3849_v35  ;;  %v15372_v55 = vshll.u32 %v3812_v5, 8  ;;  %vm3183_vm12 = vcmp.eq.s32.totalorder %v15275_v50, 2  ;;  %v3719_v43 = vadd.s32 %v3718_v52, %v3708_v8 }
 0x3b2   : > { %vm3837_vm11 = vcmp.lt.s32.totalorder %v15333_v27, 2  ;;  %v3844_v56 = vsel %vm3836_vm14, %v15353_v49, %v15349_v4  ;;  %v3846_v32 = vsel %vm3838_vm15, %v15351_v34, %v3845_v30  ;;  %vm3180_vm4 = vcmp.eq.s32.totalorder %v15275_v50, 0 }
 0x3b3   : > { %v3455_v2 = vor.u32 %v3454_v48, %v3453_v33  ;;  %v3459_v15 = vor.u32 4788187, %v3458_v63  ;;  %v3732_v61 = vshrl.u32 %v15297_v42, 16  ;;  %v15387_v5 = vsel %vm3837_vm11, %v3848_v13, %v3850_v6 }
 0x3b4   : > { %v15389_v53 = vsel %vm10615_vm5, 0, %v10614_v0  ;;  %v3666_v51 = vshrl.u32 %v18259_v58, %v15121_v40  ;;  %v3687_v54 = vsel %vm3685_vm6, %v15172_v3, 2102212464  ;;  %v3710_v11 = vshrl.u32 %v15304_v47, 16 }
 0x3b5   : > { %v3742_v9 = vadd.s32 %v3741_v16, %v3732_v61  ;;  %v3847_v63 = vsel %vm3837_vm11, %v3844_v56, %v3846_v32  ;;  %v3853_v36 = vand.u32 65535, %v15372_v55  ;;  %v3856_v12 = vshrl.u32 %v15387_v5, 16 }
 0x3b6   : > { %v18122_v0 = vxor.u32 2147483648, %v15300_v45  ;;  %v18121_v38 = vxor.u32 2147483648, %v15288_v23  ;;  %v3325_v40 = vadd.f32 0.008332121, %v15309_v26  ;;  %v15404_v48 = vadd.s32 %v3719_v43, %v3710_v11 }
 0x3b7   : > { %v3460_v14 = vand.u32 2147483647, %v3459_v15  ;;  %v3686_v3 = vsel %vm3682_vm0, %v3666_v51, %v15164_v29  ;;  %v3855_v47 = vand.u32 65535, %v15387_v5  ;;  %v15410_v20 = vmul.u32 %v3856_v12, %v3853_v36 }
 0x3b8   : > { %v3610_v60 = vsub.s32 4294967266, %v15389_v53  ;;  %v3688_v28 = vsel %vm3684_vm3, %v15166_v44, %v3687_v54  ;;  %v18531_v52 = vshll.u32 %v15297_v42, 16  ;;  %v3878_v30 = vshrl.u32 %v3847_v63, 16 }
 0x3b9   : > { %v3319_v35 = vmul.f32 %v15317_v62, %v15279_v1  ;;  %v3462_v29 = vcvt.s32.f32 %v3455_v2  ;;  %v3746_v33 = vadd.s32 1, %v3742_v9  ;;  %v3877_v8 = vand.u32 65535, %v3847_v63 }
 0x3ba   : > { %v15419_v26 = vadd.s32 %v15306_v31, %v18531_v52  ;;  %v3326_v13 = vmul.f32 %v3325_v40, %v15279_v1  ;;  %v3854_v16 = vshrl.u32 %v15372_v55, 16  ;;  %v3861_v44 = vshll.u32 %v15410_v20, 16  ;;  %v18532_v31 = vld [vmem:[#allocation79_spill] sm:$0xff] }
 0x3bb   : > { %v3185_v42 = vsel %vm3183_vm12, %v18121_v38, %v15300_v45  ;;  %vm3344_vm6 = vcmp.lt.s32.totalorder %v18532_v31, 0  ;;  %v3463_v62 = vmul.f32 %v3462_v29, %v3460_v14  ;;  %v3689_v6 = vsel %vm3683_vm9, %v3686_v3, %v3688_v28 }
 0x3bc   : > { %vm3745_vm0 = vc.u32 %v15404_v48, %v15419_v26  ;;  %v3857_v43 = vmul.u32 %v3855_v47, %v3853_v36  ;;  %v3182_v56 = vsel %vm3180_vm4, %v15288_v23, %v18122_v0  ;;  %v3611_v32 = vadd.s32 127, %v3610_v60 }
 0x3bd   : > { %v15441_v2 = vmul.u32 %v3855_v47, %v3854_v16  ;;  %v15443_v15 = vmul.u32 %v3878_v30, %v3853_v36  ;;  %vm3179_vm3 = vcmp.lt.s32.totalorder %v15275_v50, 2  ;;  %v3320_v61 = vadd.f32 -0.4999988, %v3319_v35 }
 0x3be   : > { %v3747_v5 = vsel %vm3745_vm0, %v3746_v33, %v3742_v9  ;;  %vm3865_vm5 = vc.u32 %v3857_v43, %v3861_v44  ;;  %v15446_v51 = vmul.u32 %v3877_v8, %v3854_v16  ;;  %v3327_v7 = vadd.f32 -0.16666654, %v3326_v13 }
 0x3bf   : > { %v3743_v54 = vmul.u32 %v15202_v18, %v3689_v6  ;;  %v3867_v11 = vadd.s32 %v3861_v44, %v3857_v43  ;;  %v3883_v63 = vshll.u32 %v15443_v15, 16  ;;  %v3464_v40 = vxor.u32 2147483648, %v3463_v62  ;;  %v15458_v18 = vpop.f32.mrf.mxu2 }
 0x3c0   : > { %v3590_v14 = vadd.s32 %v15101_v41, %v15090_v17  ;;  %v3606_v3 = vsub.s32 32, %v15389_v53  ;;  %v3879_v47 = vmul.u32 %v3877_v8, %v3853_v36  ;;  %vm18142_vm9 = vweird.f32 %v18496_v37  ;;  %18533 = vst [vmem:[#allocation100_spill] sm:$0xff] %v15458_v18 }
 0x3c1   : > { %v3612_v60 = vshll.u32 %v3611_v32, 23  ;;  %v15454_v9 = vadd.s32 %v3747_v5, %v3743_v54  ;;  %v3863_v28 = vshll.u32 %v15441_v2, 16  ;;  %v3866_v52 = vsel %vm3865_vm5, 1, %v18311_v19 }
 0x3c2   : > { %vm18139_vm12 = vweird.f32 %v18503_v22  ;;  %v3882_v35 = vmul.u32 %v3878_v30, %v3854_v16  ;;  %v3885_v29 = vshll.u32 %v15446_v51, 16  ;;  %vm3887_vm4 = vc.u32 %v3879_v47, %v3883_v63 }
 0x3c3   : > { %v15462_v17 = vadd.s32 %v3883_v63, %v3879_v47  ;;  %v3321_v41 = vmul.f32 %v3320_v61, %v15279_v1  ;;  %v3860_v36 = vmul.u32 %v3856_v12, %v3854_v16  ;;  %vm3869_vm0 = vc.u32 %v3867_v11, %v3863_v28 }
 0x3c4   : > { %v3888_v33 = vsel %vm3887_vm4, 1, %v18311_v19  ;;  %v3328_v8 = vmul.f32 %v3327_v7, %v15279_v1  ;;  %v3608_v13 = vshrl.u32 %v3590_v14, %v3606_v3  ;;  %v3465_v30 = vsel %vm3344_vm6, %v3464_v40, %v3463_v62 }
 0x3c5   : > { %v3890_v44 = vadd.s32 %v3888_v33, %v3882_v35  ;;  %vm3891_vm5 = vc.u32 %v15462_v17, %v3885_v29  ;;  %v3868_v6 = vadd.s32 %v3866_v52, %v3860_v36  ;;  %v3961_v32 = vand.u32 2139095040, %v15458_v18  ;;  %v15511_v36 = vpop.f32.mrf.mxu3 }
 0x3c6   : > { %v3892_v43 = vsel %vm3891_vm5, 1, %v18311_v19  ;;  %v3607_v12 = vshll.u32 %v15268_v10, %v15389_v53  ;;  %v3613_v16 = vor.u32 4788187, %v3612_v60  ;;  %v3749_v1 = vadd.s32 536870912, %v15454_v9  ;;  %18540 = vst [vmem:[#allocation104_spill] sm:$0xff] %v15511_v36 }
 0x3c7   : > { %v3870_v61 = vsel %vm3869_vm0, 1, %v18311_v19  ;;  %v3186_v5 = vsel %vm3179_vm3, %v3182_v56, %v3185_v42  ;;  %v15481_v7 = vand.u32 3, %v15292_v21  ;;  %v18534_v62 = vand.u32 2147483647, %v18532_v31 }
 0x3c8   : > { %v3962_v11 = vshrl.u32 %v3961_v32, 23  ;;  %v15489_v63 = vadd.f32 1.0, %v3321_v41  ;;  %v3466_v10 = vsub.s32 4, %v15076_v46  ;;  %v3609_v53 = vor.u32 %v3608_v13, %v3607_v12 }
 0x3c9   : > { %vm15485_vm4 = vcmp.le.f32.partialorder %v18534_v62, 0.7853982  ;;  %v3894_v40 = vadd.s32 %v3892_v43, %v3890_v44  ;;  %v3329_v14 = vadd.f32 1.0, %v3328_v8  ;;  %v3872_v42 = vadd.s32 %v3870_v61, %v3868_v6 }
 0x3ca   : > { %18537 = vst [vmem:[#allocation101_spill] sm:$0xff] %v15489_v63  ;;  %v15495_v50 = vsel %vm15485_vm4, %v18532_v31, %v3465_v30  ;;  %v10622_v56 = vadd.s32 4294967169, %v3962_v11  ;;  %v15500_v3 = vsel %vm18142_vm9, nan, %v15283_v25  ;;  %v3614_v47 = vand.u32 2147483647, %v3613_v16  ;;  %v18542_v30 = vld [vmem:[#allocation72_spill] sm:$0xff] }
 0x3cb   : > { %18538 = vst [vmem:[#allocation102_spill] sm:$0xff] %v15500_v3  ;;  %v15502_v60 = vshrl.u32 %v3749_v1, 30  ;;  %v3884_v28 = vshrl.u32 %v15443_v15, 16  ;;  %v15507_v52 = vsel %vm18139_vm12, nan, %v3186_v5  ;;  %vm3337_vm3 = vcmp.eq.s32.totalorder %v15481_v7, 2 }
 0x3cc   : > { %18539 = vst [vmem:[#allocation103_spill] sm:$0xff] %v15507_v52  ;;  %v3862_v35 = vshrl.u32 %v15410_v20, 16  ;;  %v3968_v41 = vadd.s32 1, %v10622_v56  ;;  %v3467_v25 = vsel %vm3344_vm6, %v3466_v10, %v15076_v46  ;;  %v15518_v33 = vmul.f32 %v15495_v50, %v15495_v50 }
 0x3cd   : > { %v3616_v15 = vcvt.s32.f32 %v3609_v53  ;;  %v3895_v8 = vadd.s32 %v3894_v40, %v3884_v28  ;;  %v15521_v13 = vmul.f32 %v3329_v14, %v15252_v57  ;;  %v18120_v44 = vxor.u32 2147483648, %v15489_v63 }
 0x3ce   : > { %vm3498_vm0 = vcmp.lt.s32.totalorder %v18542_v30, 0  ;;  %v3873_v20 = vadd.s32 %v3872_v42, %v3862_v35  ;;  %vm3969_vm5 = vcmp.gt.s32.totalorder %v3968_v41, 0  ;;  %v3751_v43 = vshll.u32 %v15502_v60, 30 }
 0x3cf   : > { %18541 = vst [vmem:[#allocation105_spill] sm:$0xff] %v15521_v13  ;;  %v3617_v6 = vmul.f32 %v3616_v15, %v3614_v47  ;;  %v3886_v46 = vshrl.u32 %v15446_v51, 16  ;;  %v3970_v32 = vsel %vm3969_vm5, %v3968_v41, 0  ;;  %v15529_v12 = vsel %vm15485_vm4, 0, %v3467_v25 }
 0x3d0   : > { %18543 = vst [vmem:[#allocation106_spill] sm:$0xff] %v15529_v12  ;;  %v3864_v16 = vshrl.u32 %v15441_v2, 16  ;;  %v3972_v57 = vand.u32 31, %v3970_v32  ;;  %v4115_v1 = vand.u32 2139095040, %v15511_v36  ;;  %v3478_v61 = vmul.f32 -0.00019511016, %v15518_v33 }
 0x3d1   : > { %v3841_v5 = vsel %vm3839_vm13, %v15351_v34, 2102212464  ;;  %v3896_v62 = vadd.s32 %v3895_v8, %v3886_v46  ;;  %v18123_v11 = vand.u32 2147483647, %v15458_v18  ;;  %v3820_v54 = vshrl.u32 %v18259_v58, %v15321_v39 }
 0x3d2   : > { %v15541_v53 = vadd.s32 %v3873_v20, %v3864_v16  ;;  %v15543_v2 = vsub.s32 32, %v3972_v57  ;;  %vm3334_vm6 = vcmp.eq.s32.totalorder %v15481_v7, 0  ;;  %v15551_v34 = vsel %vm3337_vm3, %v18120_v44, %v15521_v13 }
 0x3d3   : > { %v15554_v40 = vand.u32 3, %v15529_v12  ;;  %v3618_v14 = vxor.u32 2147483648, %v3617_v6  ;;  %v15557_v42 = vsub.s32 %v15454_v9, %v3751_v43  ;;  %v3471_v39 = vmul.f32 -0.001358992, %v15518_v33 }
 0x3d4   : > { %v18544_v56 = vand.u32 2147483647, %v18542_v30  ;;  %v3840_v28 = vsel %vm3836_vm14, %v3820_v54, %v15353_v49  ;;  %v3842_v35 = vsel %vm3838_vm15, %v15349_v4, %v3841_v5  ;;  %v15575_v9 = vadd.s32 %v15462_v17, %v3885_v29 }
 0x3d5   : > { %v3479_v41 = vadd.f32 0.008332121, %v3478_v61  ;;  %v3900_v25 = vadd.s32 1, %v3896_v62  ;;  %v3965_v15 = vand.u32 8388607, %v18123_v11  ;;  %v4116_v8 = vshrl.u32 %v4115_v1, 23 }
 0x3d6   : > { %vm15562_vm13 = vcmp.le.f32.partialorder %v18544_v56, 0.7853982  ;;  %vm3899_vm4 = vc.u32 %v15541_v53, %v15575_v9  ;;  %v3976_v49 = vshrl.u32 %v18512_v59, %v15543_v2  ;;  %v18547_v20 = vmov 2131351028  }
 0x3d7   : > { %v3979_v4 = vshrl.u32 %v18547_v20, %v15543_v2  ;;  %v18548_v51 = vmov 920167782   ;;  %v3619_v29 = vsel %vm3498_vm0, %v3618_v14, %v3617_v6  ;;  %v3754_v17 = vsub.s32 0, %v15557_v42 }
 0x3d8   : > { %v3985_v43 = vshrl.u32 %v18548_v51, %v15543_v2  ;;  %v3843_v46 = vsel %vm3837_vm11, %v3840_v28, %v3842_v35  ;;  %v3975_v16 = vshll.u32 %v18259_v58, %v3972_v57  ;;  %v3978_v1 = vshll.u32 %v18512_v59, %v3972_v57 }
 0x3d9   : > { %v18549_v61 = vmov 2102212464   ;;  %v3988_v56 = vshrl.u32 %v18486_v24, %v15543_v2  ;;  %v3901_v44 = vsel %vm3899_vm4, %v3900_v25, %v3896_v62  ;;  %v3966_v38 = vor.u32 8388608, %v3965_v15 }
 0x3da   : > { %v3982_v5 = vshrl.u32 %v18549_v61, %v15543_v2  ;;  %v3984_v54 = vshll.u32 %v18549_v61, %v3972_v57  ;;  %v15599_v6 = vshrl.u32 %v3970_v32, 5  ;;  %v3981_v14 = vshll.u32 %v18547_v20, %v3972_v57 }
 0x3db   : > { %v15602_v27 = vor.u32 %v3976_v49, %v3975_v16  ;;  %v15604_v28 = vor.u32 %v3979_v4, %v3978_v1  ;;  %v3987_v0 = vshll.u32 %v18548_v51, %v3972_v57  ;;  %v3480_v11 = vmul.f32 %v3479_v41, %v15518_v33 }
 0x3dc   : > { %v3986_v35 = vor.u32 %v3985_v43, %v3984_v54  ;;  %vm3753_vm14 = vcmp.lt.s32.totalorder %v15557_v42, 0  ;;  %v3897_v10 = vmul.u32 %v15372_v55, %v3843_v46  ;;  %v10625_v22 = vadd.s32 4294967169, %v4116_v8 }
 0x3dd   : > { %v18550_v62 = vxor.u32 2147483648, %v15521_v13  ;;  %v3472_v25 = vadd.f32 0.041655596, %v3471_v39  ;;  %v15617_v15 = vor.u32 %v3982_v5, %v3981_v14  ;;  %v3989_v49 = vor.u32 %v3988_v56, %v3987_v0  ;;  %v18551_v14 = vld [vmem:[#allocation94_spill] sm:$0xff] }
 0x3de   : > { %v15622_v57 = vsel %vm15562_vm13, %v18542_v30, %v3619_v29  ;;  %v15624_v41 = vadd.s32 %v3901_v44, %v3897_v10  ;;  %vm3990_vm15 = vcmp.lt.s32.totalorder %v15599_v6, 1  ;;  %vm3993_vm11 = vcmp.lt.s32.totalorder %v15599_v6, 4 }
 0x3df   : > { %v15615_v32 = vsel %vm3334_vm6, %v15489_v63, %v18550_v62  ;;  %v3755_v55 = vsel %vm3753_vm14, %v3754_v17, %v15557_v42  ;;  %v3998_v39 = vsel %vm3990_vm15, %v15602_v27, %v15604_v28  ;;  %v3999_v0 = vsel %vm3993_vm11, %v3986_v35, 920167782 }
 0x3e0   : > { %v15635_v8 = vshll.u32 %v3966_v38, 8  ;;  %v3481_v4 = vadd.f32 -0.16666654, %v3480_v11  ;;  %vm3992_vm3 = vcmp.lt.s32.totalorder %v15599_v6, 3  ;;  %v4122_v10 = vadd.s32 1, %v10625_v22 }
 0x3e1   : > { %v15641_v43 = vmul.f32 %v15622_v57, %v15622_v57  ;;  %vm3991_vm5 = vcmp.lt.s32.totalorder %v15599_v6, 2  ;;  %v4000_v29 = vsel %vm3992_vm3, %v15617_v15, %v3999_v0  ;;  %v4003_v38 = vsel %vm3993_vm11, %v3989_v49, 1326507024 }
 0x3e2   : > { %v3756_v17 = vclz %v3755_v55  ;;  %v3903_v11 = vadd.s32 536870912, %v15624_v41  ;;  %v4001_v46 = vsel %vm3991_vm5, %v3998_v39, %v4000_v29  ;;  %v4002_v22 = vsel %vm3990_vm15, %v15604_v28, %v15617_v15 }
 0x3e3   : > { %v3473_v16 = vmul.f32 %v3472_v25, %v15518_v33  ;;  %v4004_v1 = vsel %vm3992_vm3, %v3986_v35, %v4003_v38  ;;  %v4007_v5 = vand.u32 65535, %v15635_v8  ;;  %v4032_v54 = vshrl.u32 %v4001_v46, 16 }
 0x3e4   : > { %v3482_v56 = vmul.f32 %v3481_v4, %v15518_v33  ;;  %v3620_v62 = vsub.s32 4, %v18551_v14  ;;  %v4031_v49 = vand.u32 65535, %v4001_v46  ;;  %vm4123_vm6 = vcmp.gt.s32.totalorder %v4122_v10, 0 }
 0x3e5   : > { %v3625_v55 = vmul.f32 -0.001358992, %v15641_v43  ;;  %v3632_v39 = vmul.f32 -0.00019511016, %v15641_v43  ;;  %v4005_v0 = vsel %vm3991_vm5, %v4002_v22, %v4004_v1  ;;  %v4034_v25 = vmul.u32 %v4032_v54, %v4007_v5 }
 0x3e6   : > { %v10617_v29 = vadd.s32 4294967294, %v3756_v17  ;;  %v15666_v44 = vshrl.u32 %v3903_v11, 30  ;;  %v4008_v35 = vshrl.u32 %v15635_v8, 16  ;;  %v4009_v38 = vand.u32 65535, %v4005_v0 }
 0x3e7   : > { %v15669_v63 = vadd.f32 -0.4999988, %v3473_v16  ;;  %v4010_v4 = vshrl.u32 %v4005_v0, 16  ;;  %v4037_v13 = vshll.u32 %v4034_v25, 16  ;;  %v4124_v46 = vsel %vm4123_vm6, %v4122_v10, 0 }
 0x3e8   : > { %v15671_v37 = vadd.f32 1.0, %v3482_v56  ;;  %v15676_v23 = vsel %vm3498_vm0, %v3620_v62, %v18551_v14  ;;  %v15680_v17 = vadd.s32 %v15419_v26, %v15404_v48  ;;  %v4035_v11 = vmul.u32 %v4031_v49, %v4008_v35 }
 0x3e9   : > { %v15682_v22 = vadd.f32 0.041655596, %v3625_v55  ;;  %v4012_v1 = vmul.u32 %v4010_v4, %v4007_v5  ;;  %v4013_v16 = vmul.u32 %v4009_v38, %v4008_v35  ;;  %v4033_v45 = vmul.u32 %v4031_v49, %v4007_v5 }
 0x3ea   : > { %v3633_v0 = vadd.f32 0.008332121, %v3632_v39  ;;  %vm10618_vm4 = vcmp.lt.s32.totalorder %v10617_v29, 0  ;;  %v3905_v10 = vshll.u32 %v15666_v44, 30  ;;  %v4126_v56 = vand.u32 31, %v4124_v46 }
 0x3eb   : > { %v4011_v12 = vmul.u32 %v4009_v38, %v4007_v5  ;;  %v4015_v21 = vshll.u32 %v4012_v1, 16  ;;  %v4036_v52 = vmul.u32 %v4032_v54, %v4008_v35  ;;  %vm4041_vm0 = vc.u32 %v4033_v45, %v4037_v13 }
 0x3ec   : > { %v4014_v14 = vmul.u32 %v4010_v4, %v4008_v35  ;;  %v4039_v62 = vshll.u32 %v4035_v11, 16  ;;  %v4042_v48 = vsel %vm4041_vm0, 1, %v18311_v19  ;;  %v4043_v26 = vadd.s32 %v4037_v13, %v4033_v45 }
 0x3ed   : > { %v4017_v3 = vshll.u32 %v4013_v16, 16  ;;  %vm4019_vm14 = vc.u32 %v4011_v12, %v4015_v21  ;;  %v4021_v55 = vadd.s32 %v4015_v21, %v4011_v12  ;;  %v4044_v18 = vadd.s32 %v4042_v48, %v4036_v52 }
 0x3ee   : > { %v15686_v30 = vsel %vm10618_vm4, 0, %v10617_v29  ;;  %v4020_v49 = vsel %vm4019_vm14, 1, %v18311_v19  ;;  %vm4045_vm6 = vc.u32 %v4043_v26, %v4039_v62  ;;  %v18552_v39 = vand.u32 2147483647, %v15511_v36 }
 0x3ef   : > { %v15692_v54 = vsub.s32 %v15624_v41, %v3905_v10  ;;  %v4022_v35 = vadd.s32 %v4020_v49, %v4014_v14  ;;  %vm4023_vm12 = vc.u32 %v4021_v55, %v4017_v3  ;;  %v4046_v38 = vsel %vm4045_vm6, 1, %v18311_v19 }
 0x3f0   : > { %v4119_v5 = vand.u32 8388607, %v18552_v39  ;;  %v4024_v45 = vsel %vm4023_vm12, 1, %v18311_v19  ;;  %v4038_v13 = vshrl.u32 %v4034_v25, 16  ;;  %v4048_v21 = vadd.s32 %v4046_v38, %v4044_v18 }
 0x3f1   : > { %v15696_v52 = vsub.s32 32, %v4126_v56  ;;  %v3634_v12 = vmul.f32 %v3633_v0, %v15641_v43  ;;  %v3764_v29 = vsub.s32 4294967266, %v15686_v30  ;;  %v4016_v4 = vshrl.u32 %v4012_v1, 16 }
 0x3f2   : > { %v4026_v48 = vadd.s32 %v4024_v45, %v4022_v35  ;;  %v4040_v39 = vshrl.u32 %v4035_v11, 16  ;;  %v4049_v36 = vadd.s32 %v4048_v21, %v4038_v13  ;;  %v4120_v41 = vor.u32 8388608, %v4119_v5 }
 0x3f3   : > { %v15700_v10 = vshrl.u32 %v4124_v46, 5  ;;  %vm3907_vm4 = vcmp.lt.s32.totalorder %v15692_v54, 0  ;;  %v3974_v3 = vshrl.u32 %v18259_v58, %v15543_v2  ;;  %v4018_v25 = vshrl.u32 %v4013_v16, 16 }
 0x3f4   : > { %v4027_v18 = vadd.s32 %v4026_v48, %v4016_v4  ;;  %v3995_v0 = vsel %vm3993_vm11, %v15617_v15, 2102212464  ;;  %v4050_v14 = vadd.s32 %v4049_v36, %v4040_v39  ;;  %v4133_v1 = vshrl.u32 %v18547_v20, %v15696_v52 }
 0x3f5   : > { %v4136_v11 = vshrl.u32 %v18549_v61, %v15696_v52  ;;  %v3908_v46 = vsub.s32 0, %v15692_v54  ;;  %v4139_v2 = vshrl.u32 %v18548_v51, %v15696_v52  ;;  %v4142_v16 = vshrl.u32 %v18486_v24, %v15696_v52 }
 0x3f6   : > { %v15713_v55 = vadd.s32 %v4027_v18, %v4018_v25  ;;  %v3994_v36 = vsel %vm3990_vm15, %v3974_v3, %v15602_v27  ;;  %v4132_v15 = vshll.u32 %v18512_v59, %v4126_v56  ;;  %v4135_v49 = vshll.u32 %v18547_v20, %v4126_v56 }
 0x3f7   : > { %v4138_v5 = vshll.u32 %v18549_v61, %v4126_v56  ;;  %v3996_v35 = vsel %vm3992_vm3, %v15604_v28, %v3995_v0  ;;  %v15728_v38 = vadd.s32 %v4043_v26, %v4039_v62  ;;  %v4130_v45 = vshrl.u32 %v18512_v59, %v15696_v52 }
 0x3f8   : > { %v4141_v13 = vshll.u32 %v18548_v51, %v4126_v56  ;;  %v4054_v21 = vadd.s32 1, %v4050_v14  ;;  %v15733_v4 = vor.u32 %v4133_v1, %v4132_v15  ;;  %v15735_v27 = vor.u32 %v4136_v11, %v4135_v49 }
 0x3f9   : > { %v4140_v48 = vor.u32 %v4139_v2, %v4138_v5  ;;  %v3909_v39 = vsel %vm3907_vm4, %v3908_v46, %v15692_v54  ;;  %vm4053_vm12 = vc.u32 %v15713_v55, %v15728_v38  ;;  %v4129_v28 = vshll.u32 %v18259_v58, %v4126_v56 }
 0x3fa   : > { %v4143_v62 = vor.u32 %v4142_v16, %v4141_v13  ;;  %v3627_v26 = vmul.f32 %v15682_v22, %v15641_v43  ;;  %v3760_v3 = vsub.s32 32, %v15686_v30  ;;  %v3765_v25 = vadd.s32 127, %v3764_v29 }
 0x3fb   : > { %v3997_v18 = vsel %vm3991_vm5, %v3994_v36, %v3996_v35  ;;  %vm3333_vm15 = vcmp.lt.s32.totalorder %v15481_v7, 2  ;;  %v3635_v0 = vadd.f32 -0.16666654, %v3634_v12  ;;  %v15749_v1 = vor.u32 %v4130_v45, %v4129_v28 }
 0x3fc   : > { %vm4144_vm11 = vcmp.lt.s32.totalorder %v15700_v10, 1  ;;  %vm4147_vm3 = vcmp.lt.s32.totalorder %v15700_v10, 4  ;;  %v3910_v56 = vclz %v3909_v39  ;;  %v4055_v11 = vsel %vm4053_vm12, %v4054_v21, %v4050_v14 }
 0x3fd   : > { %v4153_v22 = vsel %vm4147_vm3, %v4140_v48, 920167782  ;;  %v4156_v6 = vsel %vm4144_vm11, %v15733_v4, %v15735_v27  ;;  %v4051_v29 = vmul.u32 %v15635_v8, %v3997_v18  ;;  %vm4146_vm5 = vcmp.lt.s32.totalorder %v15700_v10, 3 }
 0x3fe   : > { %v4157_v12 = vsel %vm4147_vm3, %v4143_v62, 1326507024  ;;  %v15763_v46 = vshll.u32 %v4120_v41, 8  ;;  %v3762_v2 = vshrl.u32 %v15680_v17, %v3760_v3  ;;  %v3766_v14 = vshll.u32 %v3765_v25, 23 }
 0x3ff   : > { %vm4145_vm0 = vcmp.lt.s32.totalorder %v15700_v10, 2  ;;  %v4158_v16 = vsel %vm4146_vm5, %v4140_v48, %v4157_v12  ;;  %v15769_v36 = vadd.s32 %v4055_v11, %v4051_v29  ;;  %v4152_v8 = vsel %vm4144_vm11, %v15749_v1, %v15733_v4 }
 0x400   : > { %v4154_v41 = vsel %vm4146_vm5, %v15735_v27, %v4153_v22  ;;  %v4159_v17 = vsel %vm4145_vm0, %v4156_v6, %v4158_v16  ;;  %v3475_v15 = vmul.f32 %v15669_v63, %v15518_v33  ;;  %v15785_v49 = vsel %vm15562_vm13, 0, %v15676_v23 }
 0x401   : > { %18553 = vst [vmem:[#allocation94_spill] sm:$0xff] %v15785_v49  ;;  %v10620_v5 = vadd.s32 4294967294, %v3910_v56  ;;  %v4163_v35 = vand.u32 65535, %v4159_v17  ;;  %v3628_v45 = vadd.f32 -0.4999988, %v3627_v26  ;;  %v3761_v13 = vshll.u32 %v15557_v42, %v15686_v30 }
 0x402   : > { %v4161_v21 = vand.u32 65535, %v15763_v46  ;;  %v4164_v48 = vshrl.u32 %v4159_v17, 16  ;;  %v15792_v39 = vmul.f32 %v15671_v37, %v15495_v50  ;;  %v3767_v28 = vor.u32 4788187, %v3766_v14 }
 0x403   : > { %v4155_v63 = vsel %vm4145_vm0, %v4152_v8, %v4154_v41  ;;  %v4162_v23 = vshrl.u32 %v15763_v46, 16  ;;  %v3636_v33 = vmul.f32 %v3635_v0, %v15641_v43  ;;  %v3763_v47 = vor.u32 %v3762_v2, %v3761_v13  ;;  %v18557_v41 = vld [vmem:[#allocation87_spill] sm:$0xff] }
 0x404   : > { %18554 = vst [vmem:[#allocation107_spill] sm:$0xff] %v15792_v39  ;;  %v4057_v62 = vadd.s32 536870912, %v15769_v36  ;;  %v4166_v26 = vmul.u32 %v4164_v48, %v4161_v21  ;;  %v15803_v30 = vsel %vm3333_vm15, %v15615_v32, %v15551_v34  ;;  %v15806_v37 = vand.u32 3, %v15785_v49 }
 0x405   : > { %vm10621_vm13 = vcmp.lt.s32.totalorder %v10620_v5, 0  ;;  %v15808_v50 = vmul.u32 %v4163_v35, %v4162_v23  ;;  %v15810_v42 = vadd.f32 1.0, %v3475_v15  ;;  %v3629_v3 = vmul.f32 %v3628_v45, %v15641_v43 }
 0x406   : > { %v4185_v25 = vand.u32 65535, %v4155_v63  ;;  %v4186_v18 = vshrl.u32 %v4155_v63, 16  ;;  %v18147_v0 = vxor.u32 2147483648, %v15792_v39  ;;  %v3768_v56 = vand.u32 2147483647, %v3767_v28 }
 0x407   : > { %18555 = vst [vmem:[#allocation108_spill] sm:$0xff] %v15810_v42  ;;  %v4165_v11 = vmul.u32 %v4163_v35, %v4161_v21  ;;  %v4169_v22 = vshll.u32 %v4166_v26, 16  ;;  %v3637_v7 = vadd.f32 1.0, %v3636_v33  ;;  %v3770_v34 = vcvt.s32.f32 %v3763_v47 }
 0x408   : > { %v15814_v32 = vsel %vm10621_vm13, 0, %v10620_v5  ;;  %v15816_v6 = vshrl.u32 %v4057_v62, 30  ;;  %v4168_v29 = vmul.u32 %v4164_v48, %v4162_v23  ;;  %v4171_v12 = vshll.u32 %v15808_v50, 16 }
 0x409   : > { %vm4173_vm14 = vc.u32 %v4165_v11, %v4169_v22  ;;  %v4175_v2 = vadd.s32 %v4169_v22, %v4165_v11  ;;  %v15819_v14 = vadd.f32 1.0, %v3629_v3  ;;  %v4188_v16 = vmul.u32 %v4186_v18, %v4161_v21 }
 0x40a   : > { %v4174_v43 = vsel %vm4173_vm14, 1, %v18311_v19  ;;  %v4189_v8 = vmul.u32 %v4185_v25, %v4162_v23  ;;  %vm3652_vm6 = vcmp.lt.s32.totalorder %v18557_v41, 0  ;;  %v3771_v17 = vmul.f32 %v3770_v34, %v3768_v56  ;;  %v15836_v34 = vpop.f32.mrf.mxu3 }
 0x40b   : > { %18556 = vst [vmem:[#allocation109_spill] sm:$0xff] %v15819_v14  ;;  %v3918_v15 = vsub.s32 4294967266, %v15814_v32  ;;  %v4176_v5 = vadd.s32 %v4174_v43, %v4168_v29  ;;  %vm4177_vm4 = vc.u32 %v4175_v2, %v4171_v12  ;;  %v3774_v35 = vsub.s32 4, %v15502_v60 }
 0x40c   : > { %v4178_v45 = vsel %vm4177_vm4, 1, %v18311_v19  ;;  %v4187_v13 = vmul.u32 %v4185_v25, %v4161_v21  ;;  %v4191_v48 = vshll.u32 %v4188_v16, 16  ;;  %v15827_v28 = vmul.f32 %v3637_v7, %v15622_v57 }
 0x40d   : > { %v4059_v63 = vshll.u32 %v15816_v6, 30  ;;  %v4170_v33 = vshrl.u32 %v4166_v26, 16  ;;  %v4180_v47 = vadd.s32 %v4178_v45, %v4176_v5  ;;  %v18559_v62 = vand.u32 2147483647, %v18557_v41 }
 0x40e   : > { %18558 = vst [vmem:[#allocation110_spill] sm:$0xff] %v15827_v28  ;;  %v4190_v56 = vmul.u32 %v4186_v18, %v4162_v23  ;;  %v4193_v11 = vshll.u32 %v4189_v8, 16  ;;  %vm4195_vm15 = vc.u32 %v4187_v13, %v4191_v48  ;;  %v4197_v22 = vadd.s32 %v4191_v48, %v4187_v13 }
 0x40f   : > { %vm15832_vm12 = vcmp.le.f32.partialorder %v18559_v62, 0.7853982  ;;  %vm3488_vm13 = vcmp.eq.s32.totalorder %v15554_v40, 0  ;;  %v3772_v57 = vxor.u32 2147483648, %v3771_v17  ;;  %v3919_v21 = vadd.s32 127, %v3918_v15 }
 0x410   : > { %v4181_v25 = vadd.s32 %v4180_v47, %v4170_v33  ;;  %v4196_v26 = vsel %vm4195_vm15, 1, %v18311_v19  ;;  %v3914_v7 = vsub.s32 32, %v15814_v32  ;;  %v4149_v29 = vsel %vm4147_vm3, %v15735_v27, 2102212464 }
 0x411   : > { %v4198_v12 = vadd.s32 %v4196_v26, %v4190_v56  ;;  %vm4199_vm14 = vc.u32 %v4197_v22, %v4193_v11  ;;  %v15845_v23 = vsub.s32 %v15769_v36, %v4059_v63  ;;  %v4128_v18 = vshrl.u32 %v18259_v58, %v15696_v52 }
 0x412   : > { %v4172_v2 = vshrl.u32 %v15808_v50, 16  ;;  %v4200_v43 = vsel %vm4199_vm14, 1, %v18311_v19  ;;  %vm3642_vm4 = vcmp.eq.s32.totalorder %v15806_v37, 0  ;;  %v3898_v15 = vadd.s32 %v15575_v9, %v15541_v53 }
 0x413   : > { %v4192_v5 = vshrl.u32 %v4188_v16, 16  ;;  %v4202_v45 = vadd.s32 %v4200_v43, %v4198_v12  ;;  %v4269_v27 = vand.u32 2139095040, %v15836_v34  ;;  %vm3491_vm3 = vcmp.eq.s32.totalorder %v15554_v40, 2 }
 0x414   : > { %v3920_v36 = vshll.u32 %v3919_v21, 23  ;;  %v4148_v52 = vsel %vm4144_vm11, %v4128_v18, %v15749_v1  ;;  %v4150_v50 = vsel %vm4146_vm5, %v15733_v4, %v4149_v29  ;;  %v15862_v13 = vadd.s32 %v4181_v25, %v4172_v2 }
 0x415   : > { %vm3487_vm15 = vcmp.lt.s32.totalorder %v15554_v40, 2  ;;  %v3773_v53 = vsel %vm3652_vm6, %v3772_v57, %v3771_v17  ;;  %v4194_v9 = vshrl.u32 %v4189_v8, 16  ;;  %v4203_v16 = vadd.s32 %v4202_v45, %v4192_v5  ;;  %v18562_v17 = vld [vmem:[#allocation76_spill] sm:$0xff] }
 0x416   : > { %v4270_v48 = vshrl.u32 %v4269_v27, 23  ;;  %vm3641_vm14 = vcmp.lt.s32.totalorder %v15806_v37, 2  ;;  %v18146_v63 = vxor.u32 2147483648, %v15827_v28  ;;  %v3916_v33 = vshrl.u32 %v3898_v15, %v3914_v7 }
 0x417   : > { %v4062_v1 = vsub.s32 0, %v15845_v23  ;;  %v15870_v47 = vadd.s32 %v4197_v22, %v4193_v11  ;;  %vm4061_vm11 = vcmp.lt.s32.totalorder %v15845_v23, 0  ;;  %v4151_v4 = vsel %vm4145_vm0, %v4148_v52, %v4150_v50 }
 0x418   : > { %v4204_v62 = vadd.s32 %v4203_v16, %v4194_v9  ;;  %v10628_v56 = vadd.s32 4294967169, %v4270_v48  ;;  %vm18164_vm5 = vweird.f32 %v18562_v17  ;;  %vm18163_vm9 = vweird.f32 %v18532_v31  ;;  %v18564_v48 = vld [vmem:[#allocation72_spill] sm:$0xff] }
 0x419   : > { %v15880_v8 = vsel %vm15832_vm12, %v18557_v41, %v3773_v53  ;;  %v3915_v11 = vshll.u32 %v15692_v54, %v15814_v32  ;;  %v3921_v22 = vor.u32 4788187, %v3920_v36  ;;  %vm4207_vm2 = vc.u32 %v15862_v13, %v15870_v47 }
 0x41a   : > { %v3490_v10 = vsel %vm3488_vm13, %v15810_v42, %v18147_v0  ;;  %v18145_v57 = vxor.u32 2147483648, %v15810_v42  ;;  %v4208_v21 = vadd.s32 1, %v4204_v62  ;;  %v4276_v25 = vadd.s32 1, %v10628_v56 }
 0x41b   : > { %v18144_v26 = vxor.u32 2147483648, %v15819_v14  ;;  %v3917_v7 = vor.u32 %v3916_v33, %v3915_v11  ;;  %v4063_v54 = vsel %vm4061_vm11, %v4062_v1, %v15845_v23  ;;  %v4205_v32 = vmul.u32 %v15763_v46, %v4151_v4  ;;  %v18567_v4 = vld [vmem:[#allocation92_spill] sm:$0xff] }
 0x41c   : > { %v3775_v29 = vsel %vm3652_vm6, %v3774_v35, %v15502_v60  ;;  %v15904_v12 = vmul.f32 %v15880_v8, %v15880_v8  ;;  %v4209_v18 = vsel %vm4207_vm2, %v4208_v21, %v4204_v62  ;;  %vm4277_vm0 = vcmp.gt.s32.totalorder %v4276_v25, 0 }
 0x41d   : > { %v3644_v2 = vsel %vm3642_vm4, %v15819_v14, %v18146_v63  ;;  %v3922_v43 = vand.u32 2147483647, %v3921_v22  ;;  %v4210_v46 = vadd.s32 %v4209_v18, %v4205_v32  ;;  %v4278_v15 = vsel %vm4277_vm0, %v4276_v25, 0 }
 0x41e   : > { %v3493_v60 = vsel %vm3491_vm3, %v18145_v57, %v15792_v39  ;;  %vm3645_vm6 = vcmp.eq.s32.totalorder %v15806_v37, 2  ;;  %v4064_v35 = vclz %v4063_v54  ;;  %v4280_v5 = vand.u32 31, %v4278_v15 }
 0x41f   : > { %v3494_v45 = vsel %vm3487_vm15, %v3490_v10, %v3493_v60  ;;  %v3647_v27 = vsel %vm3645_vm6, %v18144_v26, %v15827_v28  ;;  %v3924_v36 = vcvt.s32.f32 %v3917_v7  ;;  %v4211_v52 = vadd.s32 536870912, %v4210_v46 }
 0x420   : > { %v3648_v50 = vsel %vm3641_vm14, %v3644_v2, %v3647_v27  ;;  %v15926_v53 = vsel %vm15832_vm12, 0, %v3775_v29  ;;  %v3779_v9 = vmul.f32 -0.001358992, %v15904_v12  ;;  %v15929_v16 = vsub.s32 32, %v4280_v5  ;;  %v15975_v27 = vpop.f32.mrf.mxu3 }
 0x421   : > { %18563 = vst [vmem:[#allocation111_spill] sm:$0xff] %v15926_v53  ;;  %vm18162_vm2 = vweird.f32 %v18564_v48  ;;  %v3925_v40 = vmul.f32 %v3924_v36, %v3922_v43  ;;  %v15932_v33 = vshrl.u32 %v4211_v52, 30  ;;  %v18148_v1 = vand.u32 2147483647, %v15836_v34 }
 0x422   : > { %v15938_v37 = vsel %vm18164_vm5, nan, %v15803_v30  ;;  %v15942_v3 = vsel %vm18163_vm9, nan, %v3494_v45  ;;  %vm3806_vm12 = vcmp.lt.s32.totalorder %v18567_v4, 0  ;;  %v10623_v62 = vadd.s32 4294967294, %v4064_v35 }
 0x423   : > { %18565 = vst [vmem:[#allocation112_spill] sm:$0xff] %v15938_v37  ;;  %v15947_v56 = vsel %vm18162_vm2, nan, %v3648_v50  ;;  %v3786_v11 = vmul.f32 -0.00019511016, %v15904_v12  ;;  %v15951_v22 = vand.u32 3, %v15926_v53  ;;  %v4213_v10 = vshll.u32 %v15932_v33, 30 }
 0x424   : > { %18566 = vst [vmem:[#allocation113_spill] sm:$0xff] %v15942_v3  ;;  %v3780_v30 = vadd.f32 0.041655596, %v3779_v9  ;;  %v18569_v21 = vand.u32 2147483647, %v18567_v4  ;;  %v4284_v7 = vshrl.u32 %v18512_v59, %v15929_v16  ;;  %v4287_v54 = vshrl.u32 %v18547_v20, %v15929_v16 }
 0x425   : > { %18568 = vst [vmem:[#allocation114_spill] sm:$0xff] %v15947_v56  ;;  %v4293_v32 = vshrl.u32 %v18548_v51, %v15929_v16  ;;  %v3926_v29 = vxor.u32 2147483648, %v3925_v40  ;;  %v15966_v18 = vsub.s32 %v4210_v46, %v4213_v10  ;;  %v4273_v2 = vand.u32 8388607, %v18148_v1 }
 0x426   : > { %vm15956_vm13 = vcmp.le.f32.partialorder %v18569_v21, 0.7853982  ;;  %v4290_v43 = vshrl.u32 %v18549_v61, %v15929_v16  ;;  %vm10624_vm4 = vcmp.lt.s32.totalorder %v10623_v62, 0  ;;  %v4283_v60 = vshll.u32 %v18259_v58, %v4280_v5 }
 0x427   : > { %v4286_v35 = vshll.u32 %v18512_v59, %v4280_v5  ;;  %v4292_v45 = vshll.u32 %v18549_v61, %v4280_v5  ;;  %v4216_v36 = vsub.s32 0, %v15966_v18  ;;  %v15978_v52 = vshrl.u32 %v4278_v15, 5 }
 0x428   : > { %v4289_v46 = vshll.u32 %v18547_v20, %v4280_v5  ;;  %v4296_v50 = vshrl.u32 %v18486_v24, %v15929_v16  ;;  %vm4215_vm3 = vcmp.lt.s32.totalorder %v15966_v18, 0  ;;  %v15984_v9 = vor.u32 %v4284_v7, %v4283_v60 }
 0x429   : > { %v15986_v10 = vor.u32 %v4287_v54, %v4286_v35  ;;  %v4294_v21 = vor.u32 %v4293_v32, %v4292_v45  ;;  %v15988_v26 = vsel %vm10624_vm4, 0, %v10623_v62  ;;  %v4274_v57 = vor.u32 8388608, %v4273_v2 }
 0x42a   : > { %v4291_v63 = vor.u32 %v4290_v43, %v4289_v46  ;;  %v4295_v0 = vshll.u32 %v18548_v51, %v4280_v5  ;;  %v3787_v15 = vadd.f32 0.008332121, %v3786_v11  ;;  %v3927_v1 = vsel %vm3806_vm12, %v3926_v29, %v3925_v40 }
 0x42b   : > { %v3928_v48 = vsub.s32 4, %v15666_v44  ;;  %v4423_v31 = vand.u32 2139095040, %v15975_v27  ;;  %v4217_v7 = vsel %vm4215_vm3, %v4216_v36, %v15966_v18  ;;  %vm4298_vm15 = vcmp.lt.s32.totalorder %v15978_v52, 1 }
 0x42c   : > { %v4297_v60 = vor.u32 %v4296_v50, %v4295_v0  ;;  %vm4301_vm14 = vcmp.lt.s32.totalorder %v15978_v52, 4  ;;  %v4072_v62 = vsub.s32 4294967266, %v15988_v26  ;;  %vm4300_vm11 = vcmp.lt.s32.totalorder %v15978_v52, 3 }
 0x42d   : > { %v4306_v5 = vsel %vm4298_vm15, %v15984_v9, %v15986_v10  ;;  %v4307_v40 = vsel %vm4301_vm14, %v4294_v21, 920167782  ;;  %v16009_v0 = vsel %vm15956_vm13, %v18567_v4, %v3927_v1  ;;  %vm4299_vm0 = vcmp.lt.s32.totalorder %v15978_v52, 2 }
 0x42e   : > { %v4308_v11 = vsel %vm4300_vm11, %v4291_v63, %v4307_v40  ;;  %v16014_v54 = vshll.u32 %v4274_v57, 8  ;;  %v4218_v32 = vclz %v4217_v7  ;;  %v4310_v2 = vsel %vm4298_vm15, %v15986_v10, %v4291_v63 }
 0x42f   : > { %v4309_v29 = vsel %vm4299_vm0, %v4306_v5, %v4308_v11  ;;  %v4424_v43 = vshrl.u32 %v4423_v31, 23  ;;  %v3781_v35 = vmul.f32 %v3780_v30, %v15904_v12  ;;  %v3788_v1 = vmul.f32 %v3787_v15, %v15904_v12 }
 0x430   : > { %v3929_v45 = vsel %vm3806_vm12, %v3928_v48, %v15666_v44  ;;  %v4311_v57 = vsel %vm4301_vm14, %v4297_v60, 1326507024  ;;  %v16030_v36 = vmul.f32 %v16009_v0, %v16009_v0  ;;  %v4068_v46 = vsub.s32 32, %v15988_v26 }
 0x431   : > { %v16033_v50 = vadd.s32 127, %v4072_v62  ;;  %v4312_v31 = vsel %vm4300_vm11, %v4294_v21, %v4311_v57  ;;  %v4315_v15 = vand.u32 65535, %v16014_v54  ;;  %v4339_v44 = vand.u32 65535, %v4309_v29 }
 0x432   : > { %v4313_v30 = vsel %vm4299_vm0, %v4310_v2, %v4312_v31  ;;  %v4340_v48 = vshrl.u32 %v4309_v29, 16  ;;  %v10626_v7 = vadd.s32 4294967294, %v4218_v32  ;;  %v4316_v60 = vshrl.u32 %v16014_v54, 16 }
 0x433   : > { %v4317_v5 = vand.u32 65535, %v4313_v30  ;;  %v10631_v40 = vadd.s32 4294967169, %v4424_v43  ;;  %v3782_v11 = vadd.f32 -0.4999988, %v3781_v35  ;;  %v4052_v62 = vadd.s32 %v15728_v38, %v15713_v55 }
 0x434   : > { %v4318_v17 = vshrl.u32 %v4313_v30, 16  ;;  %v4342_v14 = vmul.u32 %v4340_v48, %v4315_v15  ;;  %v3789_v28 = vadd.f32 -0.16666654, %v3788_v1  ;;  %v16045_v21 = vsel %vm15956_vm13, 0, %v3929_v45 }
 0x435   : > { %18572 = vst [vmem:[#allocation115_spill] sm:$0xff] %v16045_v21  ;;  %v3940_v2 = vmul.f32 -0.00019511016, %v16030_v36  ;;  %v4321_v57 = vmul.u32 %v4317_v5, %v4316_v60  ;;  %v4070_v29 = vshrl.u32 %v4052_v62, %v4068_v46  ;;  %v4074_v32 = vshll.u32 %v16033_v50, 23 }
 0x436   : > { %v4320_v31 = vmul.u32 %v4318_v17, %v4315_v15  ;;  %v4343_v42 = vmul.u32 %v4339_v44, %v4316_v60  ;;  %vm10627_vm6 = vcmp.lt.s32.totalorder %v10626_v7, 0  ;;  %v4303_v43 = vsel %vm4301_vm14, %v4291_v63, 2102212464 }
 0x437   : > { %v4430_v38 = vadd.s32 1, %v10631_v40  ;;  %v4319_v35 = vmul.u32 %v4317_v5, %v4315_v15  ;;  %v4341_v25 = vmul.u32 %v4339_v44, %v4315_v15  ;;  %v4345_v45 = vshll.u32 %v4342_v14, 16 }
 0x438   : > { %v4323_v1 = vshll.u32 %v4320_v31, 16  ;;  %v4322_v30 = vmul.u32 %v4318_v17, %v4316_v60  ;;  %v4325_v39 = vshll.u32 %v4321_v57, 16  ;;  %v4344_v53 = vmul.u32 %v4340_v48, %v4316_v60 }
 0x439   : > { %v4347_v49 = vshll.u32 %v4343_v42, 16  ;;  %vm4349_vm13 = vc.u32 %v4341_v25, %v4345_v45  ;;  %v4351_v50 = vadd.s32 %v4345_v45, %v4341_v25  ;;  %v16053_v62 = vsel %vm10627_vm6, 0, %v10626_v7 }
 0x43a   : > { %vm4327_vm12 = vc.u32 %v4319_v35, %v4323_v1  ;;  %v4329_v46 = vadd.s32 %v4323_v1, %v4319_v35  ;;  %v4350_v55 = vsel %vm4349_vm13, 1, %v18311_v19  ;;  %vm4431_vm4 = vcmp.gt.s32.totalorder %v4430_v38, 0 }
 0x43b   : > { %v4328_v63 = vsel %vm4327_vm12, 1, %v18311_v19  ;;  %v4352_v15 = vadd.s32 %v4350_v55, %v4344_v53  ;;  %vm4353_vm14 = vc.u32 %v4351_v50, %v4347_v49  ;;  %v4282_v17 = vshrl.u32 %v18259_v58, %v15929_v16 }
 0x43c   : > { %v4330_v5 = vadd.s32 %v4328_v63, %v4322_v30  ;;  %vm4331_vm3 = vc.u32 %v4329_v46, %v4325_v39  ;;  %v4324_v44 = vshrl.u32 %v4320_v31, 16  ;;  %v4354_v60 = vsel %vm4353_vm14, 1, %v18311_v19 }
 0x43d   : > { %v4332_v48 = vsel %vm4331_vm3, 1, %v18311_v19  ;;  %v4346_v7 = vshrl.u32 %v4342_v14, 16  ;;  %v4356_v35 = vadd.s32 %v4354_v60, %v4352_v15  ;;  %v4432_v1 = vsel %vm4431_vm4, %v4430_v38, 0 }
 0x43e   : > { %v4334_v40 = vadd.s32 %v4332_v48, %v4330_v5  ;;  %v4226_v25 = vsub.s32 4294967266, %v16053_v62  ;;  %v4302_v39 = vsel %vm4298_vm15, %v4282_v17, %v15984_v9  ;;  %v4304_v53 = vsel %vm4300_vm11, %v15986_v10, %v4303_v43 }
 0x43f   : > { %v4434_v16 = vand.u32 31, %v4432_v1  ;;  %v4326_v31 = vshrl.u32 %v4321_v57, 16  ;;  %v4348_v45 = vshrl.u32 %v4343_v42, 16  ;;  %v4357_v30 = vadd.s32 %v4356_v35, %v4346_v7 }
 0x440   : > { %v4335_v55 = vadd.s32 %v4334_v40, %v4324_v44  ;;  %v3783_v46 = vmul.f32 %v3782_v11, %v15904_v12  ;;  %v3790_v14 = vmul.f32 %v3789_v28, %v15904_v12  ;;  %v4069_v38 = vshll.u32 %v15845_v23, %v15988_v26 }
 0x441   : > { %v16072_v63 = vsub.s32 32, %v4434_v16  ;;  %v4305_v9 = vsel %vm4299_vm0, %v4302_v39, %v4304_v53  ;;  %v16078_v10 = vadd.s32 %v4351_v50, %v4347_v49  ;;  %v4358_v57 = vadd.s32 %v4357_v30, %v4348_v45 }
 0x442   : > { %v16076_v5 = vadd.s32 %v4335_v55, %v4326_v31  ;;  %v3933_v42 = vmul.f32 -0.001358992, %v16030_v36  ;;  %v3941_v43 = vadd.f32 0.008332121, %v3940_v2  ;;  %v4071_v15 = vor.u32 %v4070_v29, %v4069_v38 }
 0x443   : > { %v4075_v11 = vor.u32 4788187, %v4074_v32  ;;  %v4227_v17 = vadd.s32 127, %v4226_v25  ;;  %v4362_v28 = vadd.s32 1, %v4358_v57  ;;  %v18573_v23 = vand.u32 2147483647, %v15975_v27 }
 0x444   : > { %vm4361_vm15 = vc.u32 %v16076_v5, %v16078_v10  ;;  %v4359_v12 = vmul.u32 %v16014_v54, %v4305_v9  ;;  %v4438_v49 = vshrl.u32 %v18512_v59, %v16072_v63  ;;  %v4441_v52 = vshrl.u32 %v18547_v20, %v16072_v63 }
 0x445   : > { %v4427_v26 = vand.u32 8388607, %v18573_v23  ;;  %v4444_v2 = vshrl.u32 %v18549_v61, %v16072_v63  ;;  %v4363_v29 = vsel %vm4361_vm15, %v4362_v28, %v4358_v57  ;;  %v16092_v32 = vshrl.u32 %v4432_v1, 5 }
 0x446   : > { %v4446_v50 = vshll.u32 %v18549_v61, %v4434_v16  ;;  %v4447_v44 = vshrl.u32 %v18548_v51, %v16072_v63  ;;  %v4364_v48 = vadd.s32 %v4363_v29, %v4359_v12  ;;  %v4437_v54 = vshll.u32 %v18259_v58, %v4434_v16 }
 0x447   : > { %v4440_v60 = vshll.u32 %v18512_v59, %v4434_v16  ;;  %v4443_v40 = vshll.u32 %v18547_v20, %v4434_v16  ;;  %v4222_v7 = vsub.s32 32, %v16053_v62  ;;  %v4449_v25 = vshll.u32 %v18548_v51, %v4434_v16 }
 0x448   : > { %v4448_v35 = vor.u32 %v4447_v44, %v4446_v50  ;;  %v4450_v1 = vshrl.u32 %v18486_v24, %v16072_v63  ;;  %v4365_v39 = vadd.s32 536870912, %v4364_v48  ;;  %v16104_v53 = vor.u32 %v4438_v49, %v4437_v54 }
 0x449   : > { %v16106_v31 = vor.u32 %v4441_v52, %v4440_v60  ;;  %v16108_v55 = vor.u32 %v4444_v2, %v4443_v40  ;;  %v4076_v45 = vand.u32 2147483647, %v4075_v11  ;;  %v4078_v30 = vcvt.s32.f32 %v4071_v15  ;;  %v18574_v15 = vld [vmem:[#allocation100_spill] sm:$0xff] }
 0x44a   : > { %v4206_v38 = vadd.s32 %v15870_v47, %v15862_v13  ;;  %v4451_v9 = vor.u32 %v4450_v1, %v4449_v25  ;;  %v4228_v57 = vshll.u32 %v4227_v17, 23  ;;  %v16112_v28 = vshrl.u32 %v4365_v39, 30 }
 0x44b   : > { %v4428_v16 = vor.u32 8388608, %v4427_v26  ;;  %vm4455_vm11 = vcmp.lt.s32.totalorder %v16092_v32, 4  ;;  %vm4452_vm0 = vcmp.lt.s32.totalorder %v16092_v32, 1  ;;  %vm3960_vm6 = vcmp.lt.s32.totalorder %v18574_v15, 0 }
 0x44c   : > { %v4224_v23 = vshrl.u32 %v4206_v38, %v4222_v7  ;;  %v4461_v12 = vsel %vm4455_vm11, %v4448_v35, 920167782  ;;  %v4465_v11 = vsel %vm4455_vm11, %v4451_v9, 1326507024  ;;  %v4367_v13 = vshll.u32 %v16112_v28, 30 }
 0x44d   : > { %vm4454_vm12 = vcmp.lt.s32.totalorder %v16092_v32, 3  ;;  %v4460_v47 = vsel %vm4452_vm0, %v16104_v53, %v16106_v31  ;;  %v4464_v17 = vsel %vm4452_vm0, %v16106_v31, %v16108_v55  ;;  %v4079_v26 = vmul.f32 %v4078_v30, %v4076_v45 }
 0x44e   : > { %v4223_v49 = vshll.u32 %v15966_v18, %v16053_v62  ;;  %v4462_v52 = vsel %vm4454_vm12, %v16108_v55, %v4461_v12  ;;  %v4466_v2 = vsel %vm4454_vm12, %v4448_v35, %v4465_v11  ;;  %v4229_v29 = vor.u32 4788187, %v4228_v57 }
 0x44f   : > { %v16138_v50 = vsub.s32 %v4364_v48, %v4367_v13  ;;  %vm4453_vm13 = vcmp.lt.s32.totalorder %v16092_v32, 2  ;;  %v16141_v44 = vshll.u32 %v4428_v16, 8  ;;  %v16143_v54 = vadd.f32 1.0, %v3783_v46 }
 0x450   : > { %v3791_v60 = vadd.f32 1.0, %v3790_v14  ;;  %v4463_v18 = vsel %vm4453_vm13, %v4460_v47, %v4462_v52  ;;  %v4467_v62 = vsel %vm4453_vm13, %v4464_v17, %v4466_v2  ;;  %v3934_v40 = vadd.f32 0.041655596, %v3933_v42 }
 0x451   : > { %18575 = vst [vmem:[#allocation116_spill] sm:$0xff] %v16143_v54  ;;  %v18576_v7 = vand.u32 2147483647, %v18574_v15  ;;  %v4225_v48 = vor.u32 %v4224_v23, %v4223_v49  ;;  %vm4369_vm3 = vcmp.lt.s32.totalorder %v16138_v50, 0  ;;  %v4370_v46 = vsub.s32 0, %v16138_v50 }
 0x452   : > { %v3942_v14 = vmul.f32 %v3941_v43, %v16030_v36  ;;  %v4080_v25 = vxor.u32 2147483648, %v4079_v26  ;;  %v4471_v1 = vand.u32 65535, %v4467_v62  ;;  %v4472_v39 = vshrl.u32 %v4467_v62, 16  ;;  %v18581_v62 = vld [vmem:[#allocation104_spill] sm:$0xff] }
 0x453   : > { %vm16151_vm4 = vcmp.le.f32.partialorder %v18576_v7, 0.7853982  ;;  %v4230_v45 = vand.u32 2147483647, %v4229_v29  ;;  %v4371_v30 = vsel %vm4369_vm3, %v4370_v46, %v16138_v50  ;;  %v4469_v42 = vand.u32 65535, %v16141_v44 }
 0x454   : > { %v4494_v38 = vshrl.u32 %v4463_v18, 16  ;;  %v16161_v9 = vmul.f32 %v3791_v60, %v15880_v8  ;;  %v4372_v57 = vclz %v4371_v30  ;;  %v4470_v16 = vshrl.u32 %v16141_v44, 16 }
 0x455   : > { %v4493_v23 = vand.u32 65535, %v4463_v18  ;;  %v16166_v43 = vand.u32 3, %v16045_v21  ;;  %v4232_v11 = vcvt.s32.f32 %v4225_v48  ;;  %v4474_v13 = vmul.u32 %v4472_v39, %v4469_v42 }
 0x456   : > { %18579 = vst [vmem:[#allocation117_spill] sm:$0xff] %v16161_v9  ;;  %v3935_v47 = vmul.f32 %v3934_v40, %v16030_v36  ;;  %v3943_v17 = vadd.f32 -0.16666654, %v3942_v14  ;;  %v4081_v49 = vsel %vm3960_vm6, %v4080_v25, %v4079_v26  ;;  %v4475_v52 = vmul.u32 %v4471_v1, %v4470_v16 }
 0x457   : > { %18580 = vst [vmem:[#allocation118_spill] sm:$0xff] %v16166_v43  ;;  %v4233_v8 = vmul.f32 %v4232_v11, %v4230_v45  ;;  %v4473_v2 = vmul.u32 %v4471_v1, %v4469_v42  ;;  %v4477_v29 = vshll.u32 %v4474_v13, 16  ;;  %v4496_v60 = vmul.u32 %v4494_v38, %v4469_v42 }
 0x458   : > { %vm4114_vm14 = vcmp.lt.s32.totalorder %v18581_v62, 0  ;;  %v10629_v7 = vadd.s32 4294967294, %v4372_v57  ;;  %v4476_v46 = vmul.u32 %v4472_v39, %v4470_v16  ;;  %v4497_v30 = vmul.u32 %v4493_v23, %v4470_v16 }
 0x459   : > { %v4479_v48 = vshll.u32 %v4475_v52, 16  ;;  %vm4481_vm15 = vc.u32 %v4473_v2, %v4477_v29  ;;  %v4483_v12 = vadd.s32 %v4477_v29, %v4473_v2  ;;  %v4499_v40 = vshll.u32 %v4496_v60, 16  ;;  %v16189_v29 = vpop.f32.mrf.mxu3 }
 0x45a   : > { %vm3799_vm3 = vcmp.eq.s32.totalorder %v15951_v22, 2  ;;  %v3936_v14 = vadd.f32 -0.4999988, %v3935_v47  ;;  %v3944_v26 = vmul.f32 %v3943_v17, %v16030_v36  ;;  %v16178_v25 = vsel %vm16151_vm4, %v18574_v15, %v4081_v49  ;;  %18585 = vst [vmem:[#allocation119_spill] sm:$0xff] %v16189_v29 }
 0x45b   : > { %v4482_v1 = vsel %vm4481_vm15, 1, %v18311_v19  ;;  %vm3796_vm2 = vcmp.eq.s32.totalorder %v15951_v22, 0  ;;  %v4234_v39 = vxor.u32 2147483648, %v4233_v8  ;;  %vm4485_vm9 = vc.u32 %v4483_v12, %v4479_v48 }
 0x45c   : > { %v4484_v45 = vadd.s32 %v4482_v1, %v4476_v46  ;;  %v4495_v57 = vmul.u32 %v4493_v23, %v4469_v42  ;;  %v18582_v11 = vand.u32 2147483647, %v18581_v62  ;;  %vm10630_vm7 = vcmp.lt.s32.totalorder %v10629_v7, 0 }
 0x45d   : > { %v4478_v47 = vshrl.u32 %v4474_v13, 16  ;;  %v4486_v17 = vsel %vm4485_vm9, 1, %v18311_v19  ;;  %v4498_v49 = vmul.u32 %v4494_v38, %v4470_v16  ;;  %v4501_v21 = vshll.u32 %v4497_v30, 16 }
 0x45e   : > { %vm16184_vm5 = vcmp.le.f32.partialorder %v18582_v11, 0.7853982  ;;  %v4488_v18 = vadd.s32 %v4486_v17, %v4484_v45  ;;  %vm4503_vm15 = vc.u32 %v4495_v57, %v4499_v40  ;;  %v4505_v4 = vadd.s32 %v4499_v40, %v4495_v57 }
 0x45f   : > { %v16193_v42 = vmul.f32 %v16178_v25, %v16178_v25  ;;  %v4436_v23 = vshrl.u32 %v18259_v58, %v16072_v63  ;;  %v4457_v12 = vsel %vm4455_vm11, %v16108_v55, 2102212464  ;;  %v4504_v13 = vsel %vm4503_vm15, 1, %v18311_v19 }
 0x460   : > { %v16201_v38 = vsel %vm10630_vm7, 0, %v10629_v7  ;;  %v4489_v16 = vadd.s32 %v4488_v18, %v4478_v47  ;;  %v4506_v46 = vadd.s32 %v4504_v13, %v4498_v49  ;;  %vm4507_vm9 = vc.u32 %v4505_v4, %v4501_v21 }
 0x461   : > { %v4082_v48 = vsub.s32 4, %v15816_v6  ;;  %v4480_v40 = vshrl.u32 %v4475_v52, 16  ;;  %v4508_v1 = vsel %vm4507_vm9, 1, %v18311_v19  ;;  %v4577_v45 = vand.u32 2139095040, %v16189_v29 }
 0x462   : > { %v4235_v63 = vsel %vm4114_vm14, %v4234_v39, %v4233_v8  ;;  %v4456_v55 = vsel %vm4452_vm0, %v4436_v23, %v16104_v53  ;;  %v4500_v57 = vshrl.u32 %v4496_v60, 16  ;;  %v4510_v7 = vadd.s32 %v4508_v1, %v4506_v46 }
 0x463   : > { %v4380_v18 = vsub.s32 4294967266, %v16201_v38  ;;  %v4458_v11 = vsel %vm4454_vm12, %v16106_v31, %v4457_v12  ;;  %v16215_v52 = vadd.s32 %v4489_v16, %v4480_v40  ;;  %v4578_v47 = vshrl.u32 %v4577_v45, 23 }
 0x464   : > { %v18586_v17 = vxor.u32 2147483648, %v16143_v54  ;;  %v4087_v39 = vmul.f32 -0.001358992, %v16193_v42  ;;  %v4502_v53 = vshrl.u32 %v4497_v30, 16  ;;  %v4511_v60 = vadd.s32 %v4510_v7, %v4500_v57 }
 0x465   : > { %vm3795_vm7 = vcmp.lt.s32.totalorder %v15951_v22, 2  ;;  %v18587_v49 = vxor.u32 2147483648, %v16161_v9  ;;  %v3937_v23 = vmul.f32 %v3936_v14, %v16030_v36  ;;  %v16230_v12 = vadd.s32 %v4505_v4, %v4501_v21 }
 0x466   : > { %v3801_v8 = vsel %vm3799_vm3, %v18586_v17, %v16161_v9  ;;  %v10634_v13 = vadd.s32 4294967169, %v4578_v47  ;;  %v3945_v16 = vadd.f32 1.0, %v3944_v26  ;;  %v16235_v46 = vsel %vm16184_vm5, %v18581_v62, %v4235_v63 }
 0x467   : > { %v3798_v31 = vsel %vm3796_vm2, %v16143_v54, %v18587_v49  ;;  %v4459_v30 = vsel %vm4453_vm13, %v4456_v55, %v4458_v11  ;;  %v4512_v40 = vadd.s32 %v4511_v60, %v4502_v53  ;;  %v4083_v1 = vsel %vm3960_vm6, %v4082_v48, %v15816_v6 }
 0x468   : > { %v4381_v45 = vadd.s32 127, %v4380_v18  ;;  %vm4515_vm2 = vc.u32 %v16215_v52, %v16230_v12  ;;  %v4584_v4 = vadd.s32 1, %v10634_v13  ;;  %v4088_v36 = vadd.f32 0.041655596, %v4087_v39 }
 0x469   : > { %v4094_v21 = vmul.f32 -0.00019511016, %v16193_v42  ;;  %v4236_v14 = vsub.s32 4, %v15932_v33  ;;  %v4516_v26 = vadd.s32 1, %v4512_v40  ;;  %v16248_v32 = vmul.f32 %v16235_v46, %v16235_v46 }
 0x46a   : > { %v4376_v63 = vsub.s32 32, %v16201_v38  ;;  %v4513_v55 = vmul.u32 %v16141_v44, %v4459_v30  ;;  %vm4585_vm11 = vcmp.gt.s32.totalorder %v4584_v4, 0  ;;  %v16252_v6 = vadd.f32 1.0, %v3937_v23 }
 0x46b   : > { %v16255_v48 = vmul.f32 %v3945_v16, %v16009_v0  ;;  %v4517_v57 = vsel %vm4515_vm2, %v4516_v26, %v4512_v40  ;;  %v4586_v7 = vsel %vm4585_vm11, %v4584_v4, 0  ;;  %v4360_v18 = vadd.s32 %v16078_v10, %v16076_v5 }
 0x46c   : > { %18588 = vst [vmem:[#allocation120_spill] sm:$0xff] %v16252_v6  ;;  %v4382_v11 = vshll.u32 %v4381_v45, 23  ;;  %v4518_v47 = vadd.s32 %v4517_v57, %v4513_v55  ;;  %v4588_v17 = vand.u32 31, %v4586_v7  ;;  %v16261_v39 = vsel %vm16151_vm4, 0, %v4083_v1  ;;  %v16284_v45 = vpop.f32.mrf.mxu3 }
 0x46d   : > { %18589 = vst [vmem:[#allocation121_spill] sm:$0xff] %v16255_v48  ;;  %v4089_v44 = vmul.f32 %v4088_v36, %v16193_v42  ;;  %v4095_v53 = vadd.f32 0.008332121, %v4094_v21  ;;  %v4237_v0 = vsel %vm4114_vm14, %v4236_v14, %v15932_v33  ;;  %v4241_v60 = vmul.f32 -0.001358992, %v16248_v32 }
 0x46e   : > { %18590 = vst [vmem:[#allocation122_spill] sm:$0xff] %v16261_v39  ;;  %v4248_v49 = vmul.f32 -0.00019511016, %v16248_v32  ;;  %v4378_v23 = vshrl.u32 %v4360_v18, %v4376_v63  ;;  %v4519_v5 = vadd.s32 536870912, %v4518_v47  ;;  %v16271_v10 = vsel %vm3795_vm7, %v3798_v31, %v3801_v8 }
 0x46f   : > { %18591 = vst [vmem:[#allocation123_spill] sm:$0xff] %v16271_v10  ;;  %v18168_v13 = vand.u32 2147483647, %v16189_v29  ;;  %v16275_v16 = vsub.s32 32, %v4588_v17  ;;  %v16278_v30 = vand.u32 3, %v16261_v39  ;;  %v4377_v33 = vshll.u32 %v16138_v50, %v16201_v38 }
 0x470   : > { %v4383_v40 = vor.u32 4788187, %v4382_v11  ;;  %v16282_v1 = vshrl.u32 %v4519_v5, 30  ;;  %18593 = vst [vmem:[#allocation125_spill] sm:$0xff] %v16284_v45  ;;  %v16287_v8 = vadd.f32 -0.4999988, %v4089_v44  ;;  %v4096_v31 = vmul.f32 %v4095_v53, %v16193_v42 }
 0x471   : > { %18592 = vst [vmem:[#allocation124_spill] sm:$0xff] %v16278_v30  ;;  %v16292_v4 = vsel %vm16184_vm5, 0, %v4237_v0  ;;  %v4242_v36 = vadd.f32 0.041655596, %v4241_v60  ;;  %v4249_v21 = vadd.f32 0.008332121, %v4248_v49  ;;  %v4379_v14 = vor.u32 %v4378_v23, %v4377_v33 }
 0x472   : > { %18594 = vst [vmem:[#allocation126_spill] sm:$0xff] %v16292_v4  ;;  %v4521_v50 = vshll.u32 %v16282_v1, 30  ;;  %v4581_v38 = vand.u32 8388607, %v18168_v13  ;;  %v4592_v26 = vshrl.u32 %v18512_v59, %v16275_v16  ;;  %v4595_v63 = vshrl.u32 %v18547_v20, %v16275_v16 }
 0x473   : > { %v4601_v55 = vshrl.u32 %v18548_v51, %v16275_v16  ;;  %v4384_v2 = vand.u32 2147483647, %v4383_v40  ;;  %v4598_v18 = vshrl.u32 %v18549_v61, %v16275_v16  ;;  %v4731_v11 = vand.u32 2139095040, %v16284_v45 }
 0x474   : > { %v16303_v57 = vsub.s32 %v4518_v47, %v4521_v50  ;;  %v4591_v44 = vshll.u32 %v18259_v58, %v4588_v17  ;;  %v4594_v53 = vshll.u32 %v18512_v59, %v4588_v17  ;;  %v4600_v0 = vshll.u32 %v18549_v61, %v4588_v17  ;;  %v16524_v37 = vpop.f32.mrf.mxu3 }
 0x475   : > { %v4604_v60 = vshrl.u32 %v18486_v24, %v16275_v16  ;;  %v16315_v47 = vshrl.u32 %v4586_v7, 5  ;;  %v4597_v23 = vshll.u32 %v18547_v20, %v4588_v17  ;;  %v4603_v50 = vshll.u32 %v18548_v51, %v4588_v17  ;;  %18604 = vst [vmem:[#allocation130_spill] sm:$0xff] %v16524_v37 }
 0x476   : > { %vm4523_vm5 = vcmp.lt.s32.totalorder %v16303_v57, 0  ;;  %v4524_v49 = vsub.s32 0, %v16303_v57  ;;  %v4593_v5 = vor.u32 %v4592_v26, %v4591_v44  ;;  %v16318_v33 = vor.u32 %v4595_v63, %v4594_v53 }
 0x477   : > { %v4602_v40 = vor.u32 %v4601_v55, %v4600_v0  ;;  %v4386_v35 = vcvt.s32.f32 %v4379_v14  ;;  %v4582_v13 = vor.u32 8388608, %v4581_v38  ;;  %v4599_v54 = vor.u32 %v4598_v18, %v4597_v23 }
 0x478   : > { %v4525_v22 = vsel %vm4523_vm5, %v4524_v49, %v16303_v57  ;;  %v4243_v9 = vmul.f32 %v4242_v36, %v16248_v32  ;;  %v4250_v39 = vmul.f32 %v4249_v21, %v16248_v32  ;;  %vm4268_vm0 = vcmp.lt.s32.totalorder %v15836_v34, 0 }
 0x479   : > { %v4526_v7 = vclz %v4525_v22  ;;  %v4605_v15 = vor.u32 %v4604_v60, %v4603_v50  ;;  %v4387_v30 = vmul.f32 %v4386_v35, %v4384_v2  ;;  %vm4606_vm6 = vcmp.lt.s32.totalorder %v16315_v47, 1 }
 0x47a   : > { %vm4609_vm12 = vcmp.lt.s32.totalorder %v16315_v47, 4  ;;  %v4732_v26 = vshrl.u32 %v4731_v11, 23  ;;  %vm4608_vm13 = vcmp.lt.s32.totalorder %v16315_v47, 3  ;;  %v4614_v14 = vsel %vm4606_vm6, %v4593_v5, %v16318_v33 }
 0x47b   : > { %v10632_v17 = vadd.s32 4294967294, %v4526_v7  ;;  %v4615_v36 = vsel %vm4609_vm12, %v4602_v40, 920167782  ;;  %v16333_v21 = vadd.f32 -0.16666654, %v4096_v31  ;;  %vm4607_vm4 = vcmp.lt.s32.totalorder %v16315_v47, 2 }
 0x47c   : > { %v4616_v35 = vsel %vm4608_vm13, %v4599_v54, %v4615_v36  ;;  %v16338_v22 = vshll.u32 %v4582_v13, 8  ;;  %v4618_v63 = vsel %vm4606_vm6, %v16318_v33, %v4599_v54  ;;  %v4619_v55 = vsel %vm4609_vm12, %v4605_v15, 1326507024 }
 0x47d   : > { %vm10633_vm14 = vcmp.lt.s32.totalorder %v10632_v17, 0  ;;  %v4617_v38 = vsel %vm4607_vm4, %v4614_v14, %v4616_v35  ;;  %v16347_v31 = vadd.f32 -0.4999988, %v4243_v9  ;;  %v4388_v2 = vxor.u32 2147483648, %v4387_v30 }
 0x47e   : > { %v4529_v18 = vsel %vm10633_vm14, 0, %v10632_v17  ;;  %v4620_v11 = vsel %vm4608_vm13, %v4602_v40, %v4619_v55  ;;  %v16351_v13 = vadd.f32 -0.16666654, %v4250_v39  ;;  %v4647_v53 = vand.u32 65535, %v4617_v38 }
 0x47f   : > { %v4534_v44 = vsub.s32 4294967266, %v4529_v18  ;;  %v10637_v0 = vadd.s32 4294967169, %v4732_v26  ;;  %v4621_v60 = vsel %vm4607_vm4, %v4618_v63, %v4620_v11  ;;  %v4623_v49 = vand.u32 65535, %v16338_v22 }
 0x480   : > { %v4624_v23 = vshrl.u32 %v16338_v22, 16  ;;  %v4648_v15 = vshrl.u32 %v4617_v38, 16  ;;  %v4590_v50 = vshrl.u32 %v18259_v58, %v16275_v16  ;;  %v4625_v7 = vand.u32 65535, %v4621_v60 }
 0x481   : > { %v4535_v9 = vadd.s32 127, %v4534_v44  ;;  %v4626_v17 = vshrl.u32 %v4621_v60, 16  ;;  %v4389_v39 = vsel %vm4268_vm0, %v4388_v2, %v4387_v30  ;;  %v4514_v40 = vadd.s32 %v16230_v12, %v16215_v52 }
 0x482   : > { %v4530_v26 = vsub.s32 32, %v4529_v18  ;;  %v4650_v14 = vmul.u32 %v4648_v15, %v4623_v49  ;;  %v4610_v36 = vsel %vm4606_vm6, %v4590_v50, %v4593_v5  ;;  %v4651_v63 = vmul.u32 %v4647_v53, %v4624_v23 }
 0x483   : > { %v4628_v35 = vmul.u32 %v4626_v17, %v4623_v49  ;;  %v4738_v38 = vadd.s32 1, %v10637_v0  ;;  %v18595_v55 = vand.u32 2147483647, %v15836_v34  ;;  %v4531_v11 = vshll.u32 %v16303_v57, %v4529_v18 }
 0x484   : > { %v4611_v30 = vsel %vm4609_vm12, %v4599_v54, 2102212464  ;;  %v4629_v52 = vmul.u32 %v4625_v7, %v4624_v23  ;;  %v4653_v12 = vshll.u32 %v4650_v14, 16  ;;  %v4536_v2 = vshll.u32 %v4535_v9, 23 }
 0x485   : > { %vm16367_vm3 = vcmp.le.f32.partialorder %v18595_v55, 0.7853982  ;;  %v4627_v44 = vmul.u32 %v4625_v7, %v4623_v49  ;;  %v4631_v60 = vshll.u32 %v4628_v35, 16  ;;  %v4649_v5 = vmul.u32 %v4647_v53, %v4623_v49 }
 0x486   : > { %v4532_v50 = vshrl.u32 %v4514_v40, %v4530_v26  ;;  %v4630_v6 = vmul.u32 %v4626_v17, %v4624_v23  ;;  %v4633_v0 = vshll.u32 %v4629_v52, 16  ;;  %v4652_v48 = vmul.u32 %v4648_v15, %v4624_v23 }
 0x487   : > { %vm4635_vm15 = vc.u32 %v4627_v44, %v4631_v60  ;;  %v4637_v55 = vadd.s32 %v4631_v60, %v4627_v44  ;;  %v4655_v10 = vshll.u32 %v4651_v63, 16  ;;  %vm4657_vm9 = vc.u32 %v4649_v5, %v4653_v12 }
 0x488   : > { %v4636_v56 = vsel %vm4635_vm15, 1, %v18311_v19  ;;  %v4658_v57 = vsel %vm4657_vm9, 1, %v18311_v19  ;;  %v4659_v18 = vadd.s32 %v4653_v12, %v4649_v5  ;;  %vm4739_vm7 = vcmp.gt.s32.totalorder %v4738_v38, 0 }
 0x489   : > { %v4537_v54 = vor.u32 4788187, %v4536_v2  ;;  %v4638_v43 = vadd.s32 %v4636_v56, %v4630_v6  ;;  %vm4639_vm2 = vc.u32 %v4637_v55, %v4633_v0  ;;  %v4660_v9 = vadd.s32 %v4658_v57, %v4652_v48 }
 0x48a   : > { %v4612_v53 = vsel %vm4608_vm13, %v16318_v33, %v4611_v30  ;;  %v4640_v49 = vsel %vm4639_vm2, 1, %v18311_v19  ;;  %vm4661_vm11 = vc.u32 %v4659_v18, %v4655_v10  ;;  %v4740_v23 = vsel %vm4739_vm7, %v4738_v38, 0 }
 0x48b   : > { %v4533_v15 = vor.u32 %v4532_v50, %v4531_v11  ;;  %v4632_v7 = vshrl.u32 %v4628_v35, 16  ;;  %v4642_v17 = vadd.s32 %v4640_v49, %v4638_v43  ;;  %v4662_v40 = vsel %vm4661_vm11, 1, %v18311_v19 }
 0x48c   : > { %v4654_v26 = vshrl.u32 %v4650_v14, 16  ;;  %v4664_v12 = vadd.s32 %v4662_v40, %v4660_v9  ;;  %v18181_v2 = vand.u32 2147483647, %v16284_v45  ;;  %v4742_v56 = vand.u32 31, %v4740_v23 }
 0x48d   : > { %v16385_v6 = vsel %vm16367_vm3, %v15836_v34, %v4389_v39  ;;  %v4538_v48 = vand.u32 2147483647, %v4537_v54  ;;  %v4634_v33 = vshrl.u32 %v4629_v52, 16  ;;  %v4643_v30 = vadd.s32 %v4642_v17, %v4632_v7 }
 0x48e   : > { %v4613_v38 = vsel %vm4607_vm4, %v4610_v36, %v4612_v53  ;;  %v4656_v35 = vshrl.u32 %v4651_v63, 16  ;;  %v4665_v43 = vadd.s32 %v4664_v12, %v4654_v26  ;;  %v16389_v11 = vsub.s32 32, %v4742_v56 }
 0x48f   : > { %v4245_v14 = vmul.f32 %v16347_v31, %v16248_v32  ;;  %v4540_v44 = vcvt.s32.f32 %v4533_v15  ;;  %v16393_v60 = vadd.s32 %v4643_v30, %v4634_v33  ;;  %v16395_v5 = vadd.s32 %v4659_v18, %v4655_v10 }
 0x490   : > { %v4252_v39 = vmul.f32 %v16351_v13, %v16248_v32  ;;  %v16401_v52 = vmul.f32 %v16385_v6, %v16385_v6  ;;  %v4666_v47 = vadd.s32 %v4665_v43, %v4656_v35  ;;  %v4735_v36 = vand.u32 8388607, %v18181_v2 }
 0x491   : > { %v4541_v63 = vmul.f32 %v4540_v44, %v4538_v48  ;;  %v4667_v50 = vmul.u32 %v16338_v22, %v4613_v38  ;;  %vm4669_vm5 = vc.u32 %v16393_v60, %v16395_v5  ;;  %v4749_v10 = vshrl.u32 %v18547_v20, %v16389_v11 }
 0x492   : > { %v4670_v31 = vadd.s32 1, %v4666_v47  ;;  %v16410_v0 = vshrl.u32 %v4740_v23, 5  ;;  %v4748_v32 = vshll.u32 %v18512_v59, %v4742_v56  ;;  %v4752_v13 = vshrl.u32 %v18549_v61, %v16389_v11 }
 0x493   : > { %vm4422_vm6 = vcmp.lt.s32.totalorder %v15975_v27, 0  ;;  %v4746_v55 = vshrl.u32 %v18512_v59, %v16389_v11  ;;  %v4751_v22 = vshll.u32 %v18547_v20, %v4742_v56  ;;  %v4754_v57 = vshll.u32 %v18549_v61, %v4742_v56 }
 0x494   : > { %v4755_v18 = vshrl.u32 %v18548_v51, %v16389_v11  ;;  %v4671_v54 = vsel %vm4669_vm5, %v4670_v31, %v4666_v47  ;;  %v4745_v9 = vshll.u32 %v18259_v58, %v4742_v56  ;;  %v4757_v53 = vshll.u32 %v18548_v51, %v4742_v56 }
 0x495   : > { %v4758_v49 = vshrl.u32 %v18486_v24, %v16389_v11  ;;  %v4672_v23 = vadd.s32 %v4671_v54, %v4667_v50  ;;  %v16426_v15 = vor.u32 %v4749_v10, %v4748_v32  ;;  %v16428_v7 = vor.u32 %v4752_v13, %v4751_v22 }
 0x496   : > { %v4756_v17 = vor.u32 %v4755_v18, %v4754_v57  ;;  %v4253_v40 = vadd.f32 1.0, %v4252_v39  ;;  %v4395_v26 = vmul.f32 -0.001358992, %v16401_v52  ;;  %v18598_v12 = vand.u32 2147483647, %v15975_v27 }
 0x497   : > { %v4736_v33 = vor.u32 8388608, %v4735_v36  ;;  %v4759_v56 = vor.u32 %v4758_v49, %v4757_v53  ;;  %v4402_v30 = vmul.f32 -0.00019511016, %v16401_v52  ;;  %v4673_v38 = vadd.s32 536870912, %v4672_v23 }
 0x498   : > { %vm16433_vm12 = vcmp.le.f32.partialorder %v18598_v12, 0.7853982  ;;  %v16438_v35 = vor.u32 %v4746_v55, %v4745_v9  ;;  %vm4763_vm13 = vcmp.lt.s32.totalorder %v16410_v0, 4  ;;  %v4542_v43 = vxor.u32 2147483648, %v4541_v63 }
 0x499   : > { %vm4760_vm4 = vcmp.lt.s32.totalorder %v16410_v0, 1  ;;  %v4769_v44 = vsel %vm4763_vm13, %v4756_v17, 920167782  ;;  %v4773_v39 = vsel %vm4763_vm13, %v4759_v56, 1326507024  ;;  %v4390_v47 = vsub.s32 4, %v16112_v28 }
 0x49a   : > { %v16447_v36 = vshrl.u32 %v4673_v38, 30  ;;  %vm4762_vm14 = vcmp.lt.s32.totalorder %v16410_v0, 3  ;;  %v4772_v50 = vsel %vm4760_vm4, %v16426_v15, %v16428_v7  ;;  %v4098_v10 = vmul.f32 %v16333_v21, %v16193_v42 }
 0x49b   : > { %v16457_v31 = vand.u32 3, %v16292_v4  ;;  %v4774_v32 = vsel %vm4762_vm14, %v4756_v17, %v4773_v39  ;;  %v16461_v13 = vshll.u32 %v4736_v33, 8  ;;  %vm4761_vm15 = vcmp.lt.s32.totalorder %v16410_v0, 2 }
 0x49c   : > { %v4675_v55 = vshll.u32 %v16447_v36, 30  ;;  %v4768_v22 = vsel %vm4760_vm4, %v16438_v35, %v16426_v15  ;;  %v4770_v21 = vsel %vm4762_vm14, %v16428_v7, %v4769_v44  ;;  %v4396_v57 = vadd.f32 0.041655596, %v4395_v26 }
 0x49d   : > { %v4403_v18 = vadd.f32 0.008332121, %v4402_v30  ;;  %v4543_v54 = vsel %vm4422_vm6, %v4542_v43, %v4541_v63  ;;  %v4775_v9 = vsel %vm4761_vm15, %v4772_v50, %v4774_v32  ;;  %v16476_v53 = vadd.f32 1.0, %v4245_v14 }
 0x49e   : > { %v16479_v49 = vmul.f32 %v4253_v40, %v16235_v46  ;;  %v4391_v17 = vsel %vm4268_vm0, %v4390_v47, %v16112_v28  ;;  %v16484_v12 = vsub.s32 %v4672_v23, %v4675_v55  ;;  %v4771_v26 = vsel %vm4761_vm15, %v4768_v22, %v4770_v21 }
 0x49f   : > { %18601 = vst [vmem:[#allocation127_spill] sm:$0xff] %v16476_v53  ;;  %v4777_v33 = vand.u32 65535, %v16461_v13  ;;  %v4779_v63 = vand.u32 65535, %v4775_v9  ;;  %v4780_v56 = vshrl.u32 %v4775_v9, 16  ;;  %v16492_v14 = vsel %vm16433_vm12, %v15975_v27, %v4543_v54 }
 0x4a0   : > { %18602 = vst [vmem:[#allocation128_spill] sm:$0xff] %v16479_v49  ;;  %vm4677_vm9 = vcmp.lt.s32.totalorder %v16484_v12, 0  ;;  %v4678_v46 = vsub.s32 0, %v16484_v12  ;;  %v4778_v28 = vshrl.u32 %v16461_v13, 16  ;;  %v16497_v23 = vadd.f32 1.0, %v4098_v10 }
 0x4a1   : > { %v4397_v40 = vmul.f32 %v4396_v57, %v16401_v52  ;;  %v4404_v30 = vmul.f32 %v4403_v18, %v16401_v52  ;;  %v4782_v38 = vmul.u32 %v4780_v56, %v4777_v33  ;;  %v4802_v47 = vshrl.u32 %v4771_v26, 16 }
 0x4a2   : > { %v4679_v44 = vsel %vm4677_vm9, %v4678_v46, %v16484_v12  ;;  %v4783_v39 = vmul.u32 %v4779_v63, %v4778_v28  ;;  %v16505_v50 = vsel %vm16367_vm3, 0, %v4391_v17  ;;  %v16509_v32 = vmul.f32 %v16492_v14, %v16492_v14 }
 0x4a3   : > { %18603 = vst [vmem:[#allocation129_spill] sm:$0xff] %v16505_v50  ;;  %v4680_v10 = vclz %v4679_v44  ;;  %v4801_v55 = vand.u32 65535, %v4771_v26  ;;  %v4781_v57 = vmul.u32 %v4779_v63, %v4777_v33  ;;  %v4785_v18 = vshll.u32 %v4782_v38, 16 }
 0x4a4   : > { %v16513_v54 = vadd.f32 -0.4999988, %v4397_v40  ;;  %v16515_v9 = vadd.f32 -0.16666654, %v4404_v30  ;;  %v4784_v16 = vmul.u32 %v4780_v56, %v4778_v28  ;;  %v4787_v17 = vshll.u32 %v4783_v39, 16 }
 0x4a5   : > { %v10635_v46 = vadd.s32 4294967294, %v4680_v10  ;;  %vm4789_vm0 = vc.u32 %v4781_v57, %v4785_v18  ;;  %v4791_v2 = vadd.s32 %v4785_v18, %v4781_v57  ;;  %v4804_v43 = vmul.u32 %v4802_v47, %v4777_v33 }
 0x4a6   : > { %v4556_v4 = vmul.f32 -0.00019511016, %v16509_v32  ;;  %v4790_v26 = vsel %vm4789_vm0, 1, %v18311_v19  ;;  %v4805_v44 = vmul.u32 %v4801_v55, %v4778_v28  ;;  %vm4261_vm2 = vcmp.eq.s32.totalorder %v16457_v31, 2 }
 0x4a7   : > { %vm10636_vm3 = vcmp.lt.s32.totalorder %v10635_v46, 0  ;;  %v4792_v21 = vadd.s32 %v4790_v26, %v4784_v16  ;;  %vm4793_vm7 = vc.u32 %v4791_v2, %v4787_v17  ;;  %v4807_v63 = vshll.u32 %v4804_v43, 16 }
 0x4a8   : > { %v4683_v22 = vsel %vm10636_vm3, 0, %v10635_v46  ;;  %v4794_v56 = vsel %vm4793_vm7, 1, %v18311_v19  ;;  %v4803_v10 = vmul.u32 %v4801_v55, %v4777_v33  ;;  %vm4258_vm11 = vcmp.eq.s32.totalorder %v16457_v31, 0 }
 0x4a9   : > { %v4684_v40 = vsub.s32 32, %v4683_v22  ;;  %v4688_v30 = vsub.s32 4294967266, %v4683_v22  ;;  %v4668_v57 = vadd.s32 %v16395_v5, %v16393_v60  ;;  %v4786_v18 = vshrl.u32 %v4782_v38, 16 }
 0x4aa   : > { %v4796_v41 = vadd.s32 %v4794_v56, %v4792_v21  ;;  %v4806_v3 = vmul.u32 %v4802_v47, %v4778_v28  ;;  %v4809_v2 = vshll.u32 %v4805_v44, 16  ;;  %vm4811_vm5 = vc.u32 %v4803_v10, %v4807_v63 }
 0x4ab   : > { %v4689_v46 = vadd.s32 127, %v4688_v30  ;;  %v4813_v16 = vadd.s32 %v4807_v63, %v4803_v10  ;;  %v4744_v17 = vshrl.u32 %v18259_v58, %v16389_v11  ;;  %v4765_v33 = vsel %vm4763_vm13, %v16428_v7, 2102212464 }
 0x4ac   : > { %v4797_v55 = vadd.s32 %v4796_v41, %v4786_v18  ;;  %v4812_v26 = vsel %vm4811_vm5, 1, %v18311_v19  ;;  %v4686_v60 = vshrl.u32 %v4668_v57, %v4684_v40  ;;  %v4557_v28 = vadd.f32 0.008332121, %v4556_v4 }
 0x4ad   : > { %v4690_v5 = vshll.u32 %v4689_v46, 23  ;;  %v4814_v38 = vadd.s32 %v4812_v26, %v4806_v3  ;;  %vm4815_vm9 = vc.u32 %v4813_v16, %v4809_v2  ;;  %v4788_v47 = vshrl.u32 %v4783_v39, 16 }
 0x4ae   : > { %v4816_v21 = vsel %vm4815_vm9, 1, %v18311_v19  ;;  %v4885_v63 = vand.u32 2139095040, %v16524_v37  ;;  %vm4257_vm0 = vcmp.lt.s32.totalorder %v16457_v31, 2  ;;  %v4685_v11 = vshll.u32 %v16484_v12, %v4683_v22 }
 0x4af   : > { %v4691_v30 = vor.u32 4788187, %v4690_v5  ;;  %v4808_v56 = vshrl.u32 %v4804_v43, 16  ;;  %v4818_v7 = vadd.s32 %v4816_v21, %v4814_v38  ;;  %v4764_v41 = vsel %vm4760_vm4, %v4744_v17, %v16438_v35 }
 0x4b0   : > { %v4766_v3 = vsel %vm4762_vm14, %v16426_v15, %v4765_v33  ;;  %v16542_v4 = vadd.s32 %v4797_v55, %v4788_v47  ;;  %v4886_v39 = vshrl.u32 %v4885_v63, 23  ;;  %v4549_v40 = vmul.f32 -0.001358992, %v16509_v32 }
 0x4b1   : > { %v4687_v10 = vor.u32 %v4686_v60, %v4685_v11  ;;  %v4810_v57 = vshrl.u32 %v4805_v44, 16  ;;  %v4819_v18 = vadd.s32 %v4818_v7, %v4808_v56  ;;  %vm18212_vm13 = vweird.f32 %v18581_v62 }
 0x4b2   : > { %v18605_v12 = vxor.u32 2147483648, %v16476_v53  ;;  %v4558_v43 = vmul.f32 %v4557_v28, %v16509_v32  ;;  %v16552_v22 = vadd.s32 %v4813_v16, %v4809_v2  ;;  %v10640_v15 = vadd.s32 4294967169, %v4886_v39 }
 0x4b3   : > { %v18606_v46 = vxor.u32 2147483648, %v16479_v49  ;;  %v4692_v17 = vand.u32 2147483647, %v4691_v30  ;;  %v4767_v33 = vsel %vm4761_vm15, %v4764_v41, %v4766_v3  ;;  %v4820_v55 = vadd.s32 %v4819_v18, %v4810_v57  ;;  %v16604_v18 = vpop.f32.mrf.mxu3 }
 0x4b4   : > { %v4263_v35 = vsel %vm4261_vm2, %v18605_v12, %v16479_v49  ;;  %v4406_v26 = vmul.f32 %v16515_v9, %v16401_v52  ;;  %v18607_v60 = vsub.s32 4, %v16282_v1  ;;  %vm4823_vm4 = vc.u32 %v16542_v4, %v16552_v22  ;;  %18613 = vst [vmem:[#allocation136_spill] sm:$0xff] %v16604_v18 }
 0x4b5   : > { %v4260_v44 = vsel %vm4258_vm11, %v16476_v53, %v18606_v46  ;;  %v4892_v16 = vadd.s32 1, %v10640_v15  ;;  %v4399_v5 = vmul.f32 %v16513_v54, %v16401_v52  ;;  %v4550_v38 = vadd.f32 0.041655596, %v4549_v40 }
 0x4b6   : > { %v4545_v2 = vsel %vm4422_vm6, %v18607_v60, %v16282_v1  ;;  %v4694_v0 = vcvt.s32.f32 %v4687_v10  ;;  %v4824_v28 = vadd.s32 1, %v4820_v55  ;;  %v4559_v47 = vadd.f32 -0.16666654, %v4558_v43 }
 0x4b7   : > { %v4821_v21 = vmul.u32 %v16461_v13, %v4767_v33  ;;  %v18185_v9 = vand.u32 2147483647, %v16524_v37  ;;  %vm4893_vm14 = vcmp.gt.s32.totalorder %v4892_v16, 0  ;;  %v16575_v63 = vand.u32 3, %v16505_v50 }
 0x4b8   : > { %v4695_v1 = vmul.f32 %v4694_v0, %v4692_v17  ;;  %v4825_v11 = vsel %vm4823_vm4, %v4824_v28, %v4820_v55  ;;  %v4894_v30 = vsel %vm4893_vm14, %v4892_v16, 0  ;;  %v4264_v56 = vsel %vm4257_vm0, %v4260_v44, %v4263_v35 }
 0x4b9   : > { %v4407_v7 = vadd.f32 1.0, %v4406_v26  ;;  %v4826_v52 = vadd.s32 %v4825_v11, %v4821_v21  ;;  %v4896_v54 = vand.u32 31, %v4894_v30  ;;  %v16581_v41 = vmul.f32 %v16287_v8, %v16193_v42 }
 0x4ba   : > { %v16583_v13 = vadd.f32 1.0, %v4399_v5  ;;  %v16587_v3 = vsel %vm16433_vm12, 0, %v4545_v2  ;;  %v4551_v39 = vmul.f32 %v4550_v38, %v16509_v32  ;;  %v4560_v40 = vmul.f32 %v4559_v47, %v16509_v32 }
 0x4bb   : > { %18608 = vst [vmem:[#allocation131_spill] sm:$0xff] %v16581_v41  ;;  %v4827_v10 = vadd.s32 536870912, %v4826_v52  ;;  %v4889_v31 = vand.u32 8388607, %v18185_v9  ;;  %v16593_v57 = vsub.s32 32, %v4896_v54  ;;  %v16597_v42 = vmul.f32 %v16497_v23, %v16178_v25 }
 0x4bc   : > { %18609 = vst [vmem:[#allocation132_spill] sm:$0xff] %v16583_v13  ;;  %v16601_v8 = vsel %vm18212_vm13, nan, %v4264_v56  ;;  %vm4415_vm6 = vcmp.eq.s32.totalorder %v16575_v63, 2  ;;  %v4696_v48 = vxor.u32 2147483648, %v4695_v1  ;;  %v16607_v12 = vmul.f32 %v4407_v7, %v16385_v6 }
 0x4bd   : > { %18610 = vst [vmem:[#allocation133_spill] sm:$0xff] %v16587_v3  ;;  %v16610_v35 = vand.u32 3, %v16587_v3  ;;  %v18615_v43 = vand.u32 2147483647, %v16189_v29  ;;  %vm4576_vm15 = vcmp.lt.s32.totalorder %v16189_v29, 0  ;;  %v16619_v23 = vshrl.u32 %v4827_v10, 30 }
 0x4be   : > { %18611 = vst [vmem:[#allocation134_spill] sm:$0xff] %v16597_v42  ;;  %v18184_v15 = vxor.u32 2147483648, %v16583_v13  ;;  %v4552_v46 = vadd.f32 -0.4999988, %v4551_v39  ;;  %v4900_v6 = vshrl.u32 %v18512_v59, %v16593_v57  ;;  %v4903_v44 = vshrl.u32 %v18547_v20, %v16593_v57 }
 0x4bf   : > { %18612 = vst [vmem:[#allocation135_spill] sm:$0xff] %v16601_v8  ;;  %vm16614_vm12 = vcmp.le.f32.partialorder %v18615_v43, 0.7853982  ;;  %v4561_v17 = vadd.f32 1.0, %v4560_v40  ;;  %v4829_v33 = vshll.u32 %v16619_v23, 30  ;;  %v4890_v55 = vor.u32 8388608, %v4889_v31 }
 0x4c0   : > { %18614 = vst [vmem:[#allocation137_spill] sm:$0xff] %v16607_v12  ;;  %v4909_v26 = vshrl.u32 %v18548_v51, %v16593_v57  ;;  %v4697_v60 = vsel %vm4576_vm15, %v4696_v48, %v4695_v1  ;;  %v4899_v2 = vshll.u32 %v18259_v58, %v4896_v54  ;;  %v4902_v16 = vshll.u32 %v18512_v59, %v4896_v54 }
 0x4c1   : > { %v5039_v5 = vand.u32 2139095040, %v16604_v18  ;;  %v16634_v38 = vsub.s32 %v4826_v52, %v4829_v33  ;;  %v4906_v0 = vshrl.u32 %v18549_v61, %v16593_v57  ;;  %v4908_v28 = vshll.u32 %v18549_v61, %v4896_v54 }
 0x4c2   : > { %v4912_v47 = vshrl.u32 %v18486_v24, %v16593_v57  ;;  %v16641_v21 = vshrl.u32 %v4894_v30, 5  ;;  %v16643_v11 = vor.u32 %v4900_v6, %v4899_v2  ;;  %v16645_v1 = vor.u32 %v4903_v44, %v4902_v16 }
 0x4c3   : > { %v4905_v56 = vshll.u32 %v18547_v20, %v4896_v54  ;;  %vm4831_vm3 = vcmp.lt.s32.totalorder %v16634_v38, 0  ;;  %v4832_v7 = vsub.s32 0, %v16634_v38  ;;  %v4910_v52 = vor.u32 %v4909_v26, %v4908_v28 }
 0x4c4   : > { %v4911_v39 = vshll.u32 %v18548_v51, %v4896_v54  ;;  %v16657_v30 = vsel %vm4415_vm6, %v18184_v15, %v16607_v12  ;;  %v16660_v10 = vmul.f32 %v4552_v46, %v16509_v32  ;;  %v16666_v54 = vshll.u32 %v4890_v55, 8 }
 0x4c5   : > { %v4833_v48 = vsel %vm4831_vm3, %v4832_v7, %v16634_v38  ;;  %v16664_v43 = vor.u32 %v4906_v0, %v4905_v56  ;;  %v16671_v44 = vsel %vm16614_vm12, %v16189_v29, %v4697_v60  ;;  %vm4914_vm7 = vcmp.lt.s32.totalorder %v16641_v21, 1 }
 0x4c6   : > { %v4913_v6 = vor.u32 %v4912_v47, %v4911_v39  ;;  %v4834_v33 = vclz %v4833_v48  ;;  %vm4917_vm2 = vcmp.lt.s32.totalorder %v16641_v21, 4  ;;  %v16676_v32 = vmul.f32 %v4561_v17, %v16492_v14 }
 0x4c7   : > { %v4922_v46 = vsel %vm4914_vm7, %v16643_v11, %v16645_v1  ;;  %v4923_v55 = vsel %vm4917_vm2, %v4910_v52, 920167782  ;;  %v5040_v26 = vshrl.u32 %v5039_v5, 23  ;;  %v4822_v60 = vadd.s32 %v16552_v22, %v16542_v4 }
 0x4c8   : > { %18618 = vst [vmem:[#allocation138_spill] sm:$0xff] %v16676_v32  ;;  %v10638_v2 = vadd.s32 4294967294, %v4834_v33  ;;  %vm4916_vm11 = vcmp.lt.s32.totalorder %v16641_v21, 3  ;;  %v18186_v16 = vand.u32 2147483647, %v16604_v18  ;;  %v16690_v14 = vmul.f32 %v16671_v44, %v16671_v44 }
 0x4c9   : > { %vm4915_vm5 = vcmp.lt.s32.totalorder %v16641_v21, 2  ;;  %v4924_v17 = vsel %vm4916_vm11, %v16664_v43, %v4923_v55  ;;  %v4927_v5 = vsel %vm4917_vm2, %v4913_v6, 1326507024  ;;  %v4926_v22 = vsel %vm4914_vm7, %v16645_v1, %v16664_v43 }
 0x4ca   : > { %vm10639_vm9 = vcmp.lt.s32.totalorder %v10638_v2, 0  ;;  %v4925_v4 = vsel %vm4915_vm5, %v4922_v46, %v4924_v17  ;;  %v4931_v0 = vand.u32 65535, %v16666_v54  ;;  %v4928_v47 = vsel %vm4916_vm11, %v4910_v52, %v4927_v5 }
 0x4cb   : > { %v4837_v28 = vsel %vm10639_vm9, 0, %v10638_v2  ;;  %v4956_v56 = vshrl.u32 %v4925_v4, 16  ;;  %v10643_v7 = vadd.s32 4294967169, %v5040_v26  ;;  %v4955_v6 = vand.u32 65535, %v4925_v4 }
 0x4cc   : > { %v4838_v39 = vsub.s32 32, %v4837_v28  ;;  %v4842_v48 = vsub.s32 4294967266, %v4837_v28  ;;  %v16709_v33 = vand.u32 8388607, %v18186_v16  ;;  %v4703_v46 = vmul.f32 -0.001358992, %v16690_v14 }
 0x4cd   : > { %v4710_v55 = vmul.f32 -0.00019511016, %v16690_v14  ;;  %v4929_v17 = vsel %vm4915_vm5, %v4926_v22, %v4928_v47  ;;  %v4958_v2 = vmul.u32 %v4956_v56, %v4931_v0  ;;  %v4932_v52 = vshrl.u32 %v16666_v54, 16 }
 0x4ce   : > { %v4840_v15 = vshrl.u32 %v4822_v60, %v4838_v39  ;;  %v4843_v9 = vadd.s32 127, %v4842_v48  ;;  %v4933_v26 = vand.u32 65535, %v4929_v17  ;;  %v4898_v5 = vshrl.u32 %v18259_v58, %v16593_v57 }
 0x4cf   : > { %v4934_v4 = vshrl.u32 %v4929_v17, 16  ;;  %v4961_v31 = vshll.u32 %v4958_v2, 16  ;;  %v5046_v16 = vadd.s32 1, %v10643_v7  ;;  %v4839_v40 = vshll.u32 %v16634_v38, %v4837_v28 }
 0x4d0   : > { %v4844_v62 = vshll.u32 %v4843_v9, 23  ;;  %v4937_v53 = vmul.u32 %v4933_v26, %v4932_v52  ;;  %v4959_v49 = vmul.u32 %v4955_v6, %v4932_v52  ;;  %v4704_v3 = vadd.f32 0.041655596, %v4703_v46 }
 0x4d1   : > { %v4711_v50 = vadd.f32 0.008332121, %v4710_v55  ;;  %v4936_v22 = vmul.u32 %v4934_v4, %v4931_v0  ;;  %v4957_v47 = vmul.u32 %v4955_v6, %v4931_v0  ;;  %vm4412_vm0 = vcmp.eq.s32.totalorder %v16575_v63, 0 }
 0x4d2   : > { %v4841_v60 = vor.u32 %v4840_v15, %v4839_v40  ;;  %v4845_v39 = vor.u32 4788187, %v4844_v62  ;;  %v4918_v57 = vsel %vm4914_vm7, %v4898_v5, %v16643_v11  ;;  %v4960_v48 = vmul.u32 %v4956_v56, %v4932_v52 }
 0x4d3   : > { %v4935_v17 = vmul.u32 %v4933_v26, %v4931_v0  ;;  %v4938_v7 = vmul.u32 %v4934_v4, %v4932_v52  ;;  %v4939_v42 = vshll.u32 %v4936_v22, 16  ;;  %vm4965_vm4 = vc.u32 %v4957_v47, %v4961_v31 }
 0x4d4   : > { %v4941_v9 = vshll.u32 %v4937_v53, 16  ;;  %v4963_v38 = vshll.u32 %v4959_v49, 16  ;;  %v4966_v28 = vsel %vm4965_vm4, 1, %v18311_v19  ;;  %v4967_v46 = vadd.s32 %v4961_v31, %v4957_v47 }
 0x4d5   : > { %vm4943_vm14 = vc.u32 %v4935_v17, %v4939_v42  ;;  %v4945_v6 = vadd.s32 %v4939_v42, %v4935_v17  ;;  %v4968_v55 = vadd.s32 %v4966_v28, %v4960_v48  ;;  %vm5047_vm6 = vcmp.gt.s32.totalorder %v5046_v16, 0 }
 0x4d6   : > { %v4846_v15 = vand.u32 2147483647, %v4845_v39  ;;  %v4919_v62 = vsel %vm4917_vm2, %v16664_v43, 2102212464  ;;  %v4944_v11 = vsel %vm4943_vm14, 1, %v18311_v19  ;;  %vm4969_vm3 = vc.u32 %v4967_v46, %v4963_v38 }
 0x4d7   : > { %v4946_v40 = vadd.s32 %v4944_v11, %v4938_v7  ;;  %vm4947_vm7 = vc.u32 %v4945_v6, %v4941_v9  ;;  %v4970_v0 = vsel %vm4969_vm3, 1, %v18311_v19  ;;  %v5048_v56 = vsel %vm5047_vm6, %v5046_v16, 0 }
 0x4d8   : > { %v4848_v52 = vcvt.s32.f32 %v4841_v60  ;;  %v4948_v31 = vsel %vm4947_vm7, 1, %v18311_v19  ;;  %v4962_v26 = vshrl.u32 %v4958_v2, 16  ;;  %v4972_v42 = vadd.s32 %v4970_v0, %v4968_v55 }
 0x4d9   : > { %vm4730_vm9 = vcmp.lt.s32.totalorder %v16284_v45, 0  ;;  %v4920_v5 = vsel %vm4916_vm11, %v16645_v1, %v4919_v62  ;;  %v4940_v43 = vshrl.u32 %v4936_v22, 16  ;;  %v4950_v4 = vadd.s32 %v4948_v31, %v4946_v40 }
 0x4da   : > { %v5050_v47 = vand.u32 31, %v5048_v56  ;;  %v4712_v39 = vmul.f32 %v4711_v50, %v16690_v14  ;;  %v4849_v48 = vmul.f32 %v4848_v52, %v4846_v15  ;;  %v4964_v17 = vshrl.u32 %v4959_v49, 16 }
 0x4db   : > { %v4973_v7 = vadd.s32 %v4972_v42, %v4962_v26  ;;  %vm4411_vm2 = vcmp.lt.s32.totalorder %v16575_v63, 2  ;;  %v18619_v16 = vxor.u32 2147483648, %v16607_v12  ;;  %v4942_v60 = vshrl.u32 %v4937_v53, 16 }
 0x4dc   : > { %v4951_v9 = vadd.s32 %v4950_v4, %v4940_v43  ;;  %v16741_v28 = vsub.s32 32, %v5050_v47  ;;  %v16744_v1 = vadd.f32 1.0, %v16660_v10  ;;  %v18621_v50 = vsub.s32 4, %v16447_v36 }
 0x4dd   : > { %v4414_v2 = vsel %vm4412_vm0, %v16583_v13, %v18619_v16  ;;  %v18622_v22 = vand.u32 2147483647, %v16284_v45  ;;  %v4921_v53 = vsel %vm4915_vm5, %v4918_v57, %v4920_v5  ;;  %v4974_v55 = vadd.s32 %v4973_v7, %v4964_v17 }
 0x4de   : > { %18620 = vst [vmem:[#allocation139_spill] sm:$0xff] %v16744_v1  ;;  %v4699_v49 = vsel %vm4576_vm15, %v18621_v50, %v16447_v36  ;;  %vm4566_vm0 = vcmp.eq.s32.totalorder %v16610_v35, 0  ;;  %v18196_v10 = vxor.u32 2147483648, %v16676_v32  ;;  %v16761_v15 = vadd.s32 %v4951_v9, %v4942_v60 }
 0x4df   : > { %vm16753_vm11 = vcmp.le.f32.partialorder %v18622_v22, 0.7853982  ;;  %v16763_v62 = vadd.s32 %v4967_v46, %v4963_v38  ;;  %v5044_v36 = vor.u32 8388608, %v16709_v33  ;;  %v4705_v11 = vmul.f32 %v4704_v3, %v16690_v14 }
 0x4e0   : > { %v4713_v40 = vadd.f32 -0.16666654, %v4712_v39  ;;  %v4850_v0 = vxor.u32 2147483648, %v4849_v48  ;;  %v4978_v52 = vadd.s32 1, %v4974_v55  ;;  %v4975_v31 = vmul.u32 %v16666_v54, %v4921_v53 }
 0x4e1   : > { %vm4977_vm15 = vc.u32 %v16761_v15, %v16763_v62  ;;  %v5057_v21 = vshrl.u32 %v18547_v20, %v16741_v28  ;;  %v5060_v57 = vshrl.u32 %v18549_v61, %v16741_v28  ;;  %v16774_v46 = vshrl.u32 %v5048_v56, 5 }
 0x4e2   : > { %v4979_v38 = vsel %vm4977_vm15, %v4978_v52, %v4974_v55  ;;  %v5056_v33 = vshll.u32 %v18512_v59, %v5050_v47  ;;  %v5059_v3 = vshll.u32 %v18547_v20, %v5050_v47  ;;  %vm4569_vm5 = vcmp.eq.s32.totalorder %v16610_v35, 2 }
 0x4e3   : > { %v4980_v26 = vadd.s32 %v4979_v38, %v4975_v31  ;;  %v5054_v54 = vshrl.u32 %v18512_v59, %v16741_v28  ;;  %v5062_v42 = vshll.u32 %v18549_v61, %v5050_v47  ;;  %v5063_v5 = vshrl.u32 %v18548_v51, %v16741_v28 }
 0x4e4   : > { %v4851_v43 = vsel %vm4730_vm9, %v4850_v0, %v4849_v48  ;;  %v5053_v56 = vshll.u32 %v18259_v58, %v5050_v47  ;;  %v5065_v4 = vshll.u32 %v18548_v51, %v5050_v47  ;;  %v5066_v39 = vshrl.u32 %v18486_v24, %v16741_v28 }
 0x4e5   : > { %vm4565_vm4 = vcmp.lt.s32.totalorder %v16610_v35, 2  ;;  %v4981_v17 = vadd.s32 536870912, %v4980_v26  ;;  %v16791_v7 = vor.u32 %v5057_v21, %v5056_v33  ;;  %v16793_v16 = vor.u32 %v5060_v57, %v5059_v3 }
 0x4e6   : > { %v5064_v60 = vor.u32 %v5063_v5, %v5062_v42  ;;  %v16798_v9 = vsel %vm4411_vm2, %v4414_v2, %v16657_v30  ;;  %v18195_v48 = vxor.u32 2147483648, %v16744_v1  ;;  %v16803_v47 = vsel %vm16614_vm12, 0, %v4699_v49 }
 0x4e7   : > { %18625 = vst [vmem:[#allocation140_spill] sm:$0xff] %v16803_v47  ;;  %v5067_v50 = vor.u32 %v5066_v39, %v5065_v4  ;;  %v16808_v22 = vsel %vm16753_vm11, %v16284_v45, %v4851_v43  ;;  %v16810_v53 = vshrl.u32 %v4981_v17, 30  ;;  %v16812_v55 = vor.u32 %v5054_v54, %v5053_v56 }
 0x4e8   : > { %vm5071_vm14 = vcmp.lt.s32.totalorder %v16774_v46, 4  ;;  %v4568_v63 = vsel %vm4566_vm0, %v16744_v1, %v18196_v10  ;;  %v4706_v25 = vadd.f32 -0.4999988, %v4705_v11  ;;  %vm5068_vm12 = vcmp.lt.s32.totalorder %v16774_v46, 1 }
 0x4e9   : > { %v5077_v30 = vsel %vm5071_vm14, %v5064_v60, 920167782  ;;  %v4714_v2 = vmul.f32 %v4713_v40, %v16690_v14  ;;  %v4983_v49 = vshll.u32 %v16810_v53, 30  ;;  %v5080_v0 = vsel %vm5068_vm12, %v16791_v7, %v16793_v16 }
 0x4ea   : > { %v16829_v52 = vshll.u32 %v5044_v36, 8  ;;  %v16833_v31 = vmul.f32 %v16808_v22, %v16808_v22  ;;  %vm5069_vm6 = vcmp.lt.s32.totalorder %v16774_v46, 2  ;;  %vm5070_vm3 = vcmp.lt.s32.totalorder %v16774_v46, 3 }
 0x4eb   : > { %v5081_v11 = vsel %vm5071_vm14, %v5067_v50, 1326507024  ;;  %v4984_v40 = vsub.s32 %v4980_v26, %v4983_v49  ;;  %v5076_v21 = vsel %vm5068_vm12, %v16812_v55, %v16791_v7  ;;  %v5078_v36 = vsel %vm5070_vm3, %v16793_v16, %v5077_v30 }
 0x4ec   : > { %v5082_v57 = vsel %vm5070_vm3, %v5064_v60, %v5081_v11  ;;  %v4571_v38 = vsel %vm4569_vm5, %v18195_v48, %v16676_v32  ;;  %v4707_v33 = vmul.f32 %v4706_v25, %v16690_v14  ;;  %v16855_v3 = vand.u32 3, %v16803_v47  ;;  %v16880_v47 = vpop.f32.mrf.mxu3 }
 0x4ed   : > { %v5083_v26 = vsel %vm5069_vm6, %v5080_v0, %v5082_v57  ;;  %v4715_v54 = vadd.f32 1.0, %v4714_v2  ;;  %vm4985_vm7 = vcmp.lt.s32.totalorder %v4984_v40, 0  ;;  %v4986_v42 = vsub.s32 0, %v4984_v40  ;;  %18626 = vst [vmem:[#allocation141_spill] sm:$0xff] %v16880_v47 }
 0x4ee   : > { %v5087_v5 = vand.u32 65535, %v5083_v26  ;;  %v16861_v43 = vsel %vm4565_vm4, %v4568_v63, %v4571_v38  ;;  %v5079_v56 = vsel %vm5069_vm6, %v5076_v21, %v5078_v36  ;;  %v5085_v4 = vand.u32 65535, %v16829_v52 }
 0x4ef   : > { %v5088_v14 = vshrl.u32 %v5083_v26, 16  ;;  %v4857_v39 = vmul.f32 -0.001358992, %v16833_v31  ;;  %v4864_v17 = vmul.f32 -0.00019511016, %v16833_v31  ;;  %v4987_v60 = vsel %vm4985_vm7, %v4986_v42, %v4984_v40 }
 0x4f0   : > { %v5086_v50 = vshrl.u32 %v16829_v52, 16  ;;  %v16869_v25 = vadd.f32 1.0, %v4707_v33  ;;  %v4988_v35 = vclz %v4987_v60  ;;  %v16873_v2 = vmul.f32 %v4715_v54, %v16671_v44 }
 0x4f1   : > { %v5090_v63 = vmul.u32 %v5088_v14, %v5085_v4  ;;  %v5109_v0 = vand.u32 65535, %v5079_v56  ;;  %v5110_v11 = vshrl.u32 %v5079_v56, 16  ;;  %v4976_v21 = vadd.s32 %v16763_v62, %v16761_v15 }
 0x4f2   : > { %v5091_v49 = vmul.u32 %v5087_v5, %v5086_v50  ;;  %v10641_v36 = vadd.s32 4294967294, %v4988_v35  ;;  %v5089_v57 = vmul.u32 %v5087_v5, %v5085_v4  ;;  %v4858_v26 = vadd.f32 0.041655596, %v4857_v39 }
 0x4f3   : > { %v5093_v38 = vshll.u32 %v5090_v63, 16  ;;  %v4865_v42 = vadd.f32 0.008332121, %v4864_v17  ;;  %v5092_v33 = vmul.u32 %v5088_v14, %v5086_v50  ;;  %v5112_v48 = vmul.u32 %v5110_v11, %v5085_v4 }
 0x4f4   : > { %vm10642_vm2 = vcmp.lt.s32.totalorder %v10641_v36, 0  ;;  %v5095_v10 = vshll.u32 %v5091_v49, 16  ;;  %v5113_v54 = vmul.u32 %v5109_v0, %v5086_v50  ;;  %v5111_v15 = vmul.u32 %v5109_v0, %v5085_v4 }
 0x4f5   : > { %vm5097_vm0 = vc.u32 %v5089_v57, %v5093_v38  ;;  %v5099_v60 = vadd.s32 %v5093_v38, %v5089_v57  ;;  %v4991_v30 = vsel %vm10642_vm2, 0, %v10641_v36  ;;  %v5115_v1 = vshll.u32 %v5112_v48, 16 }
 0x4f6   : > { %v5098_v44 = vsel %vm5097_vm0, 1, %v18311_v19  ;;  %v4992_v56 = vsub.s32 32, %v4991_v30  ;;  %v4996_v32 = vsub.s32 4294967266, %v4991_v30  ;;  %v4993_v62 = vshll.u32 %v4984_v40, %v4991_v30 }
 0x4f7   : > { %v5100_v13 = vadd.s32 %v5098_v44, %v5092_v33  ;;  %v5094_v5 = vshrl.u32 %v5090_v63, 16  ;;  %vm5101_vm15 = vc.u32 %v5099_v60, %v5095_v10  ;;  %v5114_v39 = vmul.u32 %v5110_v11, %v5086_v50 }
 0x4f8   : > { %v4994_v17 = vshrl.u32 %v4976_v21, %v4992_v56  ;;  %v4997_v14 = vadd.s32 127, %v4996_v32  ;;  %v5102_v35 = vsel %vm5101_vm15, 1, %v18311_v19  ;;  %vm5119_vm5 = vc.u32 %v5111_v15, %v5115_v1 }
 0x4f9   : > { %v5104_v12 = vadd.s32 %v5102_v35, %v5100_v13  ;;  %v5117_v57 = vshll.u32 %v5113_v54, 16  ;;  %v5120_v36 = vsel %vm5119_vm5, 1, %v18311_v19  ;;  %v5121_v38 = vadd.s32 %v5115_v1, %v5111_v15 }
 0x4fa   : > { %v4995_v41 = vor.u32 %v4994_v17, %v4993_v62  ;;  %v4998_v8 = vshll.u32 %v4997_v14, 23  ;;  %v5052_v40 = vshrl.u32 %v18259_v58, %v16741_v28  ;;  %v5122_v4 = vadd.s32 %v5120_v36, %v5114_v39 }
 0x4fb   : > { %vm4720_vm4 = vcmp.eq.s32.totalorder %v16855_v3, 0  ;;  %v4866_v32 = vmul.f32 %v4865_v42, %v16833_v31  ;;  %v5073_v13 = vsel %vm5071_vm14, %v16793_v16, 2102212464  ;;  %v5105_v10 = vadd.s32 %v5104_v12, %v5094_v5 }
 0x4fc   : > { %vm5123_vm7 = vc.u32 %v5121_v38, %v5117_v57  ;;  %v4859_v1 = vmul.f32 %v4858_v26, %v16833_v31  ;;  %v4999_v50 = vor.u32 4788187, %v4998_v8  ;;  %v5096_v30 = vshrl.u32 %v5091_v49, 16 }
 0x4fd   : > { %v5124_v63 = vsel %vm5123_vm7, 1, %v18311_v19  ;;  %v5072_v28 = vsel %vm5068_vm12, %v5052_v40, %v16812_v55  ;;  %v5116_v0 = vshrl.u32 %v5112_v48, 16  ;;  %v5193_v21 = vand.u32 2139095040, %v16880_v47 }
 0x4fe   : > { %v5126_v11 = vadd.s32 %v5124_v63, %v5122_v4  ;;  %vm4723_vm2 = vcmp.eq.s32.totalorder %v16855_v3, 2  ;;  %v5000_v42 = vand.u32 2147483647, %v4999_v50  ;;  %v5002_v16 = vcvt.s32.f32 %v4995_v41 }
 0x4ff   : > { %v5074_v12 = vsel %vm5070_vm3, %v16791_v7, %v5073_v13  ;;  %v16899_v8 = vadd.s32 %v5105_v10, %v5096_v30  ;;  %vm4719_vm14 = vcmp.lt.s32.totalorder %v16855_v3, 2  ;;  %v4867_v49 = vadd.f32 -0.16666654, %v4866_v32 }
 0x500   : > { %v5118_v26 = vshrl.u32 %v5113_v54, 16  ;;  %v5127_v33 = vadd.s32 %v5126_v11, %v5116_v0  ;;  %v5194_v55 = vshrl.u32 %v5193_v21, 23  ;;  %v18223_v48 = vxor.u32 2147483648, %v16873_v2 }
 0x501   : > { %v18627_v60 = vand.u32 2147483647, %v16524_v37  ;;  %v5003_v41 = vmul.f32 %v5002_v16, %v5000_v42  ;;  %v16909_v56 = vadd.s32 %v5121_v38, %v5117_v57  ;;  %vm18211_vm3 = vweird.f32 %v15836_v34 }
 0x502   : > { %vm18210_vm0 = vweird.f32 %v15975_v27  ;;  %vm4884_vm15 = vcmp.lt.s32.totalorder %v16524_v37, 0  ;;  %v5075_v7 = vsel %vm5069_vm6, %v5072_v28, %v5074_v12  ;;  %v5128_v54 = vadd.s32 %v5127_v33, %v5118_v26 }
 0x503   : > { %vm16905_vm12 = vcmp.le.f32.partialorder %v18627_v60, 0.7853982  ;;  %v10646_v15 = vadd.s32 4294967169, %v5194_v55  ;;  %v18222_v62 = vxor.u32 2147483648, %v16869_v25  ;;  %v18630_v5 = vsub.s32 4, %v16619_v23 }
 0x504   : > { %v5004_v17 = vxor.u32 2147483648, %v5003_v41  ;;  %vm5131_vm5 = vc.u32 %v16899_v8, %v16909_v56  ;;  %v4860_v14 = vadd.f32 -0.4999988, %v4859_v1  ;;  %v4868_v35 = vmul.f32 %v4867_v49, %v16833_v31 }
 0x505   : > { %v4853_v39 = vsel %vm4730_vm9, %v18630_v5, %v16619_v23  ;;  %v5132_v57 = vadd.s32 1, %v5128_v54  ;;  %v5200_v46 = vadd.s32 1, %v10646_v15  ;;  %v4722_v36 = vsel %vm4720_vm4, %v16869_v25, %v18223_v48 }
 0x506   : > { %v5005_v38 = vsel %vm4884_vm15, %v5004_v17, %v5003_v41  ;;  %v5006_v23 = vsub.s32 4, %v16810_v53  ;;  %v5129_v40 = vmul.u32 %v16829_v52, %v5075_v7  ;;  %v5190_v13 = vand.u32 2147483647, %v16880_v47 }
 0x507   : > { %v16937_v4 = vsel %vm16905_vm12, %v16524_v37, %v5005_v38  ;;  %v5133_v32 = vsel %vm5131_vm5, %v5132_v57, %v5128_v54  ;;  %vm5201_vm9 = vcmp.gt.s32.totalorder %v5200_v46, 0  ;;  %v16942_v10 = vsel %vm16753_vm11, 0, %v4853_v39 }
 0x508   : > { %v16946_v1 = vmul.f32 %v16937_v4, %v16937_v4  ;;  %v5134_v50 = vadd.s32 %v5133_v32, %v5129_v40  ;;  %v5202_v30 = vsel %vm5201_vm9, %v5200_v46, 0  ;;  %v4725_v52 = vsel %vm4723_vm2, %v18222_v62, %v16873_v2 }
 0x509   : > { %v4861_v63 = vmul.f32 %v4860_v14, %v16833_v31  ;;  %v4869_v28 = vadd.f32 1.0, %v4868_v35  ;;  %v5204_v0 = vand.u32 31, %v5202_v30  ;;  %v4726_v6 = vsel %vm4719_vm14, %v4722_v36, %v4725_v52 }
 0x50a   : > { %v5011_v11 = vmul.f32 -0.001358992, %v16946_v1  ;;  %v5018_v21 = vmul.f32 -0.00019511016, %v16946_v1  ;;  %v5135_v42 = vadd.s32 536870912, %v5134_v50  ;;  %vm18206_vm11 = vweird.f32 %v16189_v29  ;;  %v18803_v29 = vld [vmem:[#allocation126_spill] sm:$0xff] }
 0x50b   : > { %v5007_v16 = vsel %vm4884_vm15, %v5006_v23, %v16810_v53  ;;  %v5197_v12 = vand.u32 8388607, %v5190_v13  ;;  %v16964_v31 = vsub.s32 32, %v5204_v0  ;;  %v16969_v3 = vsel %vm18211_vm3, nan, %v16798_v9 }
 0x50c   : > { %v16974_v49 = vsel %vm18210_vm0, nan, %v16861_v43  ;;  %v5019_v26 = vadd.f32 0.008332121, %v5018_v21  ;;  %v16976_v33 = vshrl.u32 %v5135_v42, 30  ;;  %v16980_v53 = vsel %vm18206_vm11, nan, %v4726_v6 }
 0x50d   : > { %v16982_v55 = vadd.f32 1.0, %v4861_v63  ;;  %v16985_v60 = vmul.f32 %v4869_v28, %v16808_v22  ;;  %v16988_v9 = vand.u32 3, %v16942_v10  ;;  %v16992_v41 = vsel %vm16905_vm12, 0, %v5007_v16 }
 0x50e   : > { %v5012_v43 = vadd.f32 0.041655596, %v5011_v11  ;;  %v5020_v7 = vmul.f32 %v5019_v26, %v16946_v1  ;;  %v5137_v54 = vshll.u32 %v16976_v33, 30  ;;  %v5198_v15 = vor.u32 8388608, %v5197_v12 }
 0x50f   : > { %v5208_v5 = vshrl.u32 %v18512_v59, %v16964_v31  ;;  %v5211_v22 = vshrl.u32 %v18547_v20, %v16964_v31  ;;  %v5217_v39 = vshrl.u32 %v18548_v51, %v16964_v31  ;;  %v17002_v14 = vshrl.u32 %v5202_v30, 5 }
 0x510   : > { %v5138_v17 = vsub.s32 %v5134_v50, %v5137_v54  ;;  %v5207_v44 = vshll.u32 %v18259_v58, %v5204_v0  ;;  %v5214_v35 = vshrl.u32 %v18549_v61, %v16964_v31  ;;  %v5021_v57 = vadd.f32 -0.16666654, %v5020_v7 }
 0x511   : > { %v5210_v46 = vshll.u32 %v18512_v59, %v5204_v0  ;;  %v5213_v36 = vshll.u32 %v18547_v20, %v5204_v0  ;;  %v5216_v38 = vshll.u32 %v18549_v61, %v5204_v0  ;;  %v5013_v23 = vmul.f32 %v5012_v43, %v16946_v1 }
 0x512   : > { %vm5139_vm6 = vcmp.lt.s32.totalorder %v5138_v17, 0  ;;  %v5140_v40 = vsub.s32 0, %v5138_v17  ;;  %v5220_v32 = vshrl.u32 %v18486_v24, %v16964_v31  ;;  %v18217_v50 = vxor.u32 2147483648, %v16982_v55 }
 0x513   : > { %v5209_v30 = vor.u32 %v5208_v5, %v5207_v44  ;;  %v5212_v52 = vor.u32 %v5211_v22, %v5210_v46  ;;  %v5218_v63 = vor.u32 %v5217_v39, %v5216_v38  ;;  %v5215_v6 = vor.u32 %v5214_v35, %v5213_v36 }
 0x514   : > { %v5141_v28 = vsel %vm5139_vm6, %v5140_v40, %v5138_v17  ;;  %v5219_v59 = vshll.u32 %v18548_v51, %v5204_v0  ;;  %v17015_v11 = vshll.u32 %v5198_v15, 8  ;;  %v18221_v20 = vxor.u32 2147483648, %v16985_v60 }
 0x515   : > { %v5022_v61 = vmul.f32 %v5021_v57, %v16946_v1  ;;  %v17020_v21 = vand.u32 3, %v16992_v41  ;;  %v5142_v42 = vclz %v5141_v28  ;;  %v5014_v24 = vadd.f32 -0.4999988, %v5013_v23 }
 0x516   : > { %v5221_v16 = vor.u32 %v5220_v32, %v5219_v59  ;;  %vm5222_vm4 = vcmp.lt.s32.totalorder %v17002_v14, 1  ;;  %vm5225_vm7 = vcmp.lt.s32.totalorder %v17002_v14, 4  ;;  %vm5224_vm2 = vcmp.lt.s32.totalorder %v17002_v14, 3 }
 0x517   : > { %v10644_v12 = vadd.s32 4294967294, %v5142_v42  ;;  %v5230_v51 = vsel %vm5222_vm4, %v5209_v30, %v5212_v52  ;;  %v5231_v0 = vsel %vm5225_vm7, %v5218_v63, 920167782  ;;  %v5130_v26 = vadd.s32 %v16909_v56, %v16899_v8 }
 0x518   : > { %vm5223_vm14 = vcmp.lt.s32.totalorder %v17002_v14, 2  ;;  %v5232_v43 = vsel %vm5224_vm2, %v5215_v6, %v5231_v0  ;;  %v5239_v7 = vand.u32 65535, %v17015_v11  ;;  %v5023_v54 = vadd.f32 1.0, %v5022_v61  ;;  %v17071_v0 = vld [vmem:[%s17851_s2] ss:$0 sm:$0xff] }
 0x519   : > { %vm10645_vm12 = vcmp.lt.s32.totalorder %v10644_v12, 0  ;;  %v5233_v15 = vsel %vm5223_vm14, %v5230_v51, %v5232_v43  ;;  %v5240_v5 = vshrl.u32 %v17015_v11, 16  ;;  %v5234_v39 = vsel %vm5222_vm4, %v5212_v52, %v5215_v6 }
 0x51a   : > { %v5145_v22 = vsel %vm10645_vm12, 0, %v10644_v12  ;;  %v5235_v8 = vsel %vm5225_vm7, %v5221_v16, 1326507024  ;;  %v5263_v56 = vand.u32 65535, %v5233_v15  ;;  %v17043_v44 = vmul.f32 %v5014_v24, %v16946_v1 }
 0x51b   : > { %v5146_v35 = vsub.s32 32, %v5145_v22  ;;  %v5150_v57 = vsub.s32 4294967266, %v5145_v22  ;;  %v5206_v46 = vshrl.u32 %v18259_v58, %v16964_v31  ;;  %v5147_v36 = vshll.u32 %v5138_v17, %v5145_v22 }
 0x51c   : > { %v5227_v38 = vsel %vm5225_vm7, %v5215_v6, 2102212464  ;;  %v5236_v23 = vsel %vm5224_vm2, %v5218_v63, %v5235_v8  ;;  %v5264_v40 = vshrl.u32 %v5233_v15, 16  ;;  %v17054_v59 = vmul.u32 %v5263_v56, %v5240_v5 }
 0x51d   : > { %v5148_v32 = vshrl.u32 %v5130_v26, %v5146_v35  ;;  %v5151_v28 = vadd.s32 127, %v5150_v57  ;;  %v5237_v1 = vsel %vm5223_vm14, %v5234_v39, %v5236_v23  ;;  %v17057_v61 = vmul.f32 %v5023_v54, %v16937_v4  ;;  %v18634_v23 = vld [vmem:[#allocation20_spill] sm:$0xff] }
 0x51e   : > { %v5241_v58 = vand.u32 65535, %v5237_v1  ;;  %v5242_v31 = vshrl.u32 %v5237_v1, 16  ;;  %v5266_v17 = vmul.u32 %v5264_v40, %v5239_v7  ;;  %v5226_v63 = vsel %vm5222_vm4, %v5206_v46, %v5209_v30 }
 0x51f   : > { %v5149_v6 = vor.u32 %v5148_v32, %v5147_v36  ;;  %v5152_v42 = vshll.u32 %v5151_v28, 23  ;;  %v5228_v24 = vsel %vm5224_vm2, %v5212_v52, %v5227_v38  ;;  %vm5038_vm15 = vcmp.lt.s32.totalorder %v16604_v18, 0 }
 0x520   : > { %v5244_v16 = vmul.u32 %v5242_v31, %v5239_v7  ;;  %v5245_v12 = vmul.u32 %v5241_v58, %v5240_v5  ;;  %v5265_v4 = vmul.u32 %v5263_v56, %v5239_v7  ;;  %v5268_v51 = vmul.u32 %v5264_v40, %v5240_v5 }
 0x521   : > { %v18631_v26 = vand.u32 2147483647, %v16604_v18  ;;  %v5153_v52 = vor.u32 4788187, %v5152_v42  ;;  %v5243_v43 = vmul.u32 %v5241_v58, %v5239_v7  ;;  %v5269_v54 = vshll.u32 %v5266_v17, 16  ;;  %v18635_v42 = vld [vmem:[#allocation28_spill] sm:$0xff] }
 0x522   : > { %v5271_v15 = vshll.u32 %v17054_v59, 16  ;;  %v5156_v22 = vcvt.s32.f32 %v5149_v6  ;;  %v5246_v39 = vmul.u32 %v5242_v31, %v5240_v5  ;;  %v5247_v8 = vshll.u32 %v5244_v16, 16 }
 0x523   : > { %vm17075_vm5 = vcmp.le.f32.partialorder %v18631_v26, 0.7853982  ;;  %v5270_v56 = vshrl.u32 %v5266_v17, 16  ;;  %vm4874_vm9 = vcmp.eq.s32.totalorder %v16988_v9, 0  ;;  %v5154_v35 = vand.u32 2147483647, %v5153_v52 }
 0x524   : > { %v5249_v57 = vshll.u32 %v5245_v12, 16  ;;  %vm5273_vm6 = vc.u32 %v5265_v4, %v5269_v54  ;;  %v5275_v46 = vadd.s32 %v5269_v54, %v5265_v4  ;;  %vm5251_vm4 = vc.u32 %v5243_v43, %v5247_v8  ;;  %v18637_v52 = vld [vmem:[#allocation17_spill] sm:$0xff]  ;;  %v18638_v54 = vld [vmem:[#allocation58_spill] sm:$0xff] }
 0x525   : > { %v5253_v36 = vadd.s32 %v5247_v8, %v5243_v43  ;;  %v5274_v38 = vsel %vm5273_vm6, 1, %v18311_v19  ;;  %v5347_v7 = vmul.f32 %v17071_v0, %v18634_v23  ;;  %v5157_v40 = vmul.f32 %v5156_v22, %v5154_v35  ;;  %v18639_v35 = vld [vmem:[#allocation66_spill] sm:$0xff] }
 0x526   : > { %v5252_v32 = vsel %vm5251_vm4, 1, %v18311_v19  ;;  %v5276_v5 = vadd.s32 %v5274_v38, %v5268_v51  ;;  %vm5277_vm7 = vc.u32 %v5275_v46, %v5271_v15  ;;  %v5248_v28 = vshrl.u32 %v5244_v16, 16  ;;  %v18636_v51 = vld [vmem:[#allocation29_spill] sm:$0xff] }
 0x527   : > { %v5254_v1 = vadd.s32 %v5252_v32, %v5246_v39  ;;  %vm5255_vm2 = vc.u32 %v5253_v36, %v5249_v57  ;;  %v5278_v58 = vsel %vm5277_vm7, 1, %v18311_v19  ;;  %10371 = vst [vmem:[%s17087_s8] sm:$0xff] %v5347_v7  ;;  %v5158_v31 = vxor.u32 2147483648, %v5157_v40  ;;  %v18640_v7 = vld [vmem:[#allocation70_spill] sm:$0xff] }
 0x528   : > { %v5256_v17 = vsel %vm5255_vm2, 1, %v18311_v19  ;;  %v5280_v6 = vadd.s32 %v5278_v58, %v5276_v5  ;;  %v5348_v4 = vmul.f32 %v17071_v0, %v18635_v42  ;;  %vm4877_vm12 = vcmp.eq.s32.totalorder %v16988_v9, 2  ;;  %v18641_v5 = vld [vmem:[#allocation73_spill] sm:$0xff] }
 0x529   : > { %v5258_v16 = vadd.s32 %v5256_v17, %v5254_v1  ;;  %v5349_v26 = vmul.f32 %v17071_v0, %v18636_v51  ;;  %v5350_v43 = vmul.f32 %v17071_v0, %v18637_v52  ;;  %v5355_v22 = vmul.f32 %v17071_v0, %v18638_v54  ;;  %v18645_v54 = vld [vmem:[#allocation42_spill] sm:$0xff] }
 0x52a   : > { %v5159_v19 = vsel %vm5038_vm15, %v5158_v31, %v5157_v40  ;;  %v5272_v39 = vshrl.u32 %v17054_v59, 16  ;;  %v5281_v8 = vadd.s32 %v5280_v6, %v5270_v56  ;;  %v5356_v57 = vmul.f32 %v17071_v0, %v18639_v35  ;;  %10373 = vst [vmem:[%s17087_s8 + $0x10] sm:$0xff] %v5348_v4  ;;  %v18642_v31 = vld [vmem:[#allocation102_spill] sm:$0xff]  ;;  %v18643_v6 = vld [vmem:[#allocation103_spill] sm:$0xff] }
 0x52b   : > { %vm4873_vm6 = vcmp.lt.s32.totalorder %v16988_v9, 2  ;;  %v17110_v36 = vsel %vm17075_vm5, %v16604_v18, %v5159_v19  ;;  %v5250_v38 = vshrl.u32 %v5245_v12, 16  ;;  %v5259_v23 = vadd.s32 %v5258_v16, %v5248_v28  ;;  %10375 = vst [vmem:[%s17087_s8 + $0x20] sm:$0xff] %v5349_v26 }
 0x52c   : > { %v5357_v40 = vmul.f32 %v17071_v0, %v18640_v7  ;;  %v5164_v59 = vmul.f32 %v17110_v36, %v17110_v36  ;;  %v5229_v56 = vsel %vm5223_vm14, %v5226_v63, %v5228_v24  ;;  %v5282_v32 = vadd.s32 %v5281_v8, %v5272_v39  ;;  %10377 = vst [vmem:[%s17087_s8 + $0x30] sm:$0xff] %v5350_v43  ;;  %v18649_v7 = vld [vmem:[#allocation87_spill] sm:$0xff] }
 0x52d   : > { %v5358_v1 = vmul.f32 %v17071_v0, %v18641_v5  ;;  %v4876_v12 = vsel %vm4874_vm9, %v16982_v55, %v18221_v20  ;;  %v17127_v28 = vadd.s32 %v5259_v23, %v5250_v38  ;;  %v17129_v58 = vadd.s32 %v5275_v46, %v5271_v15  ;;  %10387 = vst [vmem:[%s17087_s8 + $0x80] sm:$0xff] %v5355_v22  ;;  %v18646_v22 = vld [vmem:[#allocation78_spill] sm:$0xff]  ;;  %v18648_v38 = vld [vmem:[#allocation113_spill] sm:$0xff] }
 0x52e   : > { %v5363_v14 = vmul.f32 %v17071_v0, %v18642_v31  ;;  %vm18209_vm14 = vweird.f32 %v16284_v45  ;;  %v5165_v63 = vmul.f32 -0.001358992, %v5164_v59  ;;  %v5172_v24 = vmul.f32 -0.00019511016, %v5164_v59  ;;  %10389 = vst [vmem:[%s17087_s8 + $0x90] sm:$0xff] %v5356_v57  ;;  %v18727_v20 = vld [vmem:[#allocation10_spill] sm:$0xff] }
 0x52f   : > { %v5286_v17 = vadd.s32 1, %v5282_v32  ;;  %v5364_v42 = vmul.f32 %v17071_v0, %v18643_v6  ;;  %v17139_v4 = vadd.f32 1.0, %v17043_v44  ;;  %v5160_v15 = vsub.s32 4, %v16976_v33  ;;  %10391 = vst [vmem:[%s17087_s8 + $0xa0] sm:$0xff] %v5357_v40 }
 0x530   : > { %v5283_v46 = vmul.u32 %v17015_v11, %v5229_v56  ;;  %vm5285_vm9 = vc.u32 %v17127_v28, %v17129_v58  ;;  %v18216_v16 = vxor.u32 2147483648, %v17057_v61  ;;  %v5166_v51 = vadd.f32 0.041655596, %v5165_v63  ;;  %10393 = vst [vmem:[%s17087_s8 + $0xb0] sm:$0xff] %v5358_v1  ;;  %v18647_v11 = vld [vmem:[#allocation112_spill] sm:$0xff]  ;;  %v18651_v1 = vld [vmem:[#allocation118_spill] sm:$0xff] }
 0x531   : > { %18644 = vst [vmem:[#allocation20_spill] sm:$0xff] %v17139_v4  ;;  %v5173_v26 = vadd.f32 0.008332121, %v5172_v24  ;;  %v5287_v52 = vsel %vm5285_vm9, %v5286_v17, %v5282_v32  ;;  %v5351_v44 = vmul.f32 %v17071_v0, %v18645_v54  ;;  %v5359_v19 = vmul.f32 %v17071_v0, %v18646_v22  ;;  %v18650_v32 = vld [vmem:[#allocation135_spill] sm:$0xff] }
 0x532   : > { %v5288_v43 = vadd.s32 %v5287_v52, %v5283_v46  ;;  %v5365_v39 = vmul.f32 %v17071_v0, %v18647_v11  ;;  %10403 = vst [vmem:[%s17087_s8 + $0x100] sm:$0xff] %v5363_v14  ;;  %v4879_v8 = vsel %vm4877_vm12, %v18217_v50, %v16985_v60  ;;  %v5167_v35 = vmul.f32 %v5166_v51, %v5164_v59  ;;  %v18652_v51 = vld [vmem:[#allocation114_spill] sm:$0xff] }
 0x533   : > { %v5174_v57 = vmul.f32 %v5173_v26, %v5164_v59  ;;  %v5366_v23 = vmul.f32 %v17071_v0, %v18648_v38  ;;  %10405 = vst [vmem:[%s17087_s8 + $0x110] sm:$0xff] %v5364_v42  ;;  %vm18220_vm4 = vweird.f32 %v18649_v7  ;;  %vm5028_vm7 = vcmp.eq.s32.totalorder %v17020_v21, 0 }
 0x534   : > { %v18214_v40 = vxor.u32 2147483648, %v17139_v4  ;;  %v5289_v56 = vadd.s32 536870912, %v5288_v43  ;;  %v5371_v5 = vmul.f32 %v17071_v0, %v18650_v32  ;;  %10379 = vst [vmem:[%s17087_s8 + $0x40] sm:$0xff] %v5351_v44  ;;  %vm3950_vm2 = vcmp.eq.s32.totalorder %v18651_v1, 0  ;;  %v18660_v32 = vld [vmem:[#allocation123_spill] sm:$0xff] }
 0x535   : > { %vm3953_vm12 = vcmp.eq.s32.totalorder %v18651_v1, 2  ;;  %v4880_v31 = vsel %vm4873_vm6, %v4876_v12, %v4879_v8  ;;  %v5168_v14 = vadd.f32 -0.4999988, %v5167_v35  ;;  %v5175_v63 = vadd.f32 -0.16666654, %v5174_v57  ;;  %10395 = vst [vmem:[%s17087_s8 + $0xc0] sm:$0xff] %v5359_v19 }
 0x536   : > { %v5372_v24 = vmul.f32 %v17071_v0, %v16969_v3  ;;  %vm5027_vm9 = vcmp.lt.s32.totalorder %v17020_v21, 2  ;;  %v5030_v17 = vsel %vm5028_vm7, %v17139_v4, %v18216_v16  ;;  %v5161_v6 = vsel %vm5038_vm15, %v5160_v15, %v16976_v33  ;;  %10407 = vst [vmem:[%s17087_s8 + $0x120] sm:$0xff] %v5365_v39  ;;  %v18654_v19 = vld [vmem:[#allocation43_spill] sm:$0xff]  ;;  %v18655_v39 = vld [vmem:[#allocation86_spill] sm:$0xff] }
 0x537   : > { %v17183_v42 = vshrl.u32 %v5289_v56, 30  ;;  %vm5031_vm6 = vcmp.eq.s32.totalorder %v17020_v21, 2  ;;  %v5169_v9 = vmul.f32 %v5168_v14, %v5164_v59  ;;  %v5176_v3 = vmul.f32 %v5175_v63, %v5164_v59  ;;  %10409 = vst [vmem:[%s17087_s8 + $0x130] sm:$0xff] %v5366_v23  ;;  %v18653_v59 = vld [vmem:[#allocation131_spill] sm:$0xff]  ;;  %v18656_v21 = vld [vmem:[#allocation134_spill] sm:$0xff]  ;;  %v18659_v23 = vld [vmem:[#allocation92_spill] sm:$0xff] }
 0x538   : > { %v5373_v12 = vmul.f32 %v17071_v0, %v16974_v49  ;;  %vm3949_vm11 = vcmp.lt.s32.totalorder %v18651_v1, 2  ;;  %v4881_v46 = vsel %vm18209_vm14, nan, %v4880_v31  ;;  %v5033_v33 = vsel %vm5031_vm6, %v18214_v40, %v17057_v61  ;;  %10419 = vst [vmem:[%s17087_s8 + $0x180] sm:$0xff] %v5371_v5  ;;  %v18661_v63 = vld [vmem:[#allocation121_spill] sm:$0xff] }
 0x539   : > { %v5291_v15 = vshll.u32 %v17183_v42, 30  ;;  %v5367_v26 = vmul.f32 %v17071_v0, %v18652_v51  ;;  %v17201_v49 = vadd.f32 1.0, %v18653_v59  ;;  %v5034_v52 = vsel %vm5027_vm9, %v5030_v17, %v5033_v33  ;;  %10421 = vst [vmem:[%s17087_s8 + $0x190] sm:$0xff] %v5372_v24  ;;  %v18663_v17 = vld [vmem:[#allocation120_spill] sm:$0xff] }
 0x53a   : > { %v17207_v54 = vsel %vm17075_vm5, 0, %v5161_v6  ;;  %v5177_v44 = vadd.f32 1.0, %v5176_v3  ;;  %v5352_v11 = vmul.f32 %v17071_v0, %v18654_v19  ;;  %v5360_v8 = vmul.f32 %v17071_v0, %v18655_v39  ;;  %10423 = vst [vmem:[%s17087_s8 + $0x1a0] sm:$0xff] %v5373_v12  ;;  %v18665_v12 = vld [vmem:[#allocation124_spill] sm:$0xff] }
 0x53b   : > { %v17210_v22 = vsub.s32 %v5288_v43, %v5291_v15  ;;  %v5374_v35 = vmul.f32 %v17071_v0, %v16980_v53  ;;  %10411 = vst [vmem:[%s17087_s8 + $0x140] sm:$0xff] %v5367_v26  ;;  %v18227_v30 = vxor.u32 2147483648, %v18656_v21  ;;  %v17220_v57 = vadd.f32 1.0, %v5169_v9  ;;  %v18666_v39 = vld [vmem:[#allocation52_spill] sm:$0xff] }
 0x53c   : > { %v17223_v38 = vmul.f32 %v5177_v44, %v17110_v36  ;;  %v5375_v43 = vmul.f32 %v17071_v0, %v4881_v46  ;;  %vm18219_vm15 = vweird.f32 %v18659_v23  ;;  %vm18207_vm5 = vweird.f32 %v16524_v37  ;;  %10381 = vst [vmem:[%s17087_s8 + $0x50] sm:$0xff] %v5352_v11  ;;  %v18784_v37 = vld [vmem:[#allocation45_spill] sm:$0xff] }
 0x53d   : > { %18657 = vst [vmem:[#allocation28_spill] sm:$0xff] %v17220_v57  ;;  %v5180_v56 = vand.u32 3, %v17207_v54  ;;  %vm5293_vm7 = vcmp.lt.s32.totalorder %v17210_v22, 0  ;;  %v5294_v53 = vsub.s32 0, %v17210_v22  ;;  %v3803_v36 = vsel %vm18220_vm4, nan, %v18660_v32 }
 0x53e   : > { %18658 = vst [vmem:[#allocation29_spill] sm:$0xff] %v17223_v38  ;;  %v18226_v5 = vxor.u32 2147483648, %v17201_v49  ;;  %v5035_v31 = vsel %vm18207_vm5, nan, %v5034_v52  ;;  %v18215_v14 = vxor.u32 2147483648, %v17223_v38  ;;  %v18662_v24 = vxor.u32 2147483648, %v18661_v63 }
 0x53f   : > { %10397 = vst [vmem:[%s17087_s8 + $0xd0] sm:$0xff] %v5360_v8  ;;  %v18664_v9 = vxor.u32 2147483648, %v18663_v17  ;;  %vm4103_vm9 = vcmp.lt.s32.totalorder %v18665_v12, 2  ;;  %v5295_v46 = vsel %vm5293_vm7, %v5294_v53, %v17210_v22  ;;  %vm4104_vm6 = vcmp.eq.s32.totalorder %v18665_v12, 0  ;;  %v18668_v53 = vld [vmem:[#allocation12_spill] sm:$0xff] }
 0x540   : > { %v3952_v6 = vsel %vm3950_vm2, %v18663_v17, %v18662_v24  ;;  %10425 = vst [vmem:[%s17087_s8 + $0x1b0] sm:$0xff] %v5374_v35  ;;  %vm4107_vm5 = vcmp.eq.s32.totalorder %v18665_v12, 2  ;;  %v18213_v33 = vxor.u32 2147483648, %v17220_v57  ;;  %v5296_v15 = vclz %v5295_v46  ;;  %v18667_v35 = vld [vmem:[#allocation91_spill] sm:$0xff] }
 0x541   : > { %v3955_v3 = vsel %vm3953_vm12, %v18664_v9, %v18661_v63  ;;  %10427 = vst [vmem:[%s17087_s8 + $0x1c0] sm:$0xff] %v5375_v43  ;;  %v4106_v51 = vsel %vm4104_vm6, %v17201_v49, %v18227_v30  ;;  %vm5182_vm2 = vcmp.eq.s32.totalorder %v5180_v56, 0  ;;  %v5368_v26 = vmul.f32 %v17071_v0, %v3803_v36  ;;  %v18670_v9 = vld [vmem:[#allocation14_spill] sm:$0xff] }
 0x542   : > { %v5376_v59 = vmul.f32 %v17071_v0, %v5035_v31  ;;  %v3956_v52 = vsel %vm3949_vm11, %v3952_v6, %v3955_v3  ;;  %v4109_v44 = vsel %vm4107_vm5, %v18226_v5, %v18656_v21  ;;  %v5184_v19 = vsel %vm5182_vm2, %v17220_v57, %v18215_v14  ;;  %v18669_v31 = vld [vmem:[#allocation100_spill] sm:$0xff]  ;;  %v18770_v5 = vld [vmem:[#allocation82_spill] sm:$0xff] }
 0x543   : > { %v10647_v11 = vadd.s32 4294967294, %v5296_v15  ;;  %vm5185_vm12 = vcmp.eq.s32.totalorder %v5180_v56, 2  ;;  %v5353_v8 = vmul.f32 %v17071_v0, %v18666_v39  ;;  %v5361_v43 = vmul.f32 %v17071_v0, %v18667_v35  ;;  %10413 = vst [vmem:[%s17087_s8 + $0x150] sm:$0xff] %v5368_v26 }
 0x544   : > { %v5523_v1 = vadd.s32 3, %v18668_v53  ;;  %v4110_v32 = vsel %vm4103_vm9, %v4106_v51, %v4109_v44  ;;  %vm5181_vm11 = vcmp.lt.s32.totalorder %v5180_v56, 2  ;;  %v5187_v36 = vsel %vm5185_vm12, %v18213_v33, %v17223_v38  ;;  %10429 = vst [vmem:[%s17087_s8 + $0x1d0] sm:$0xff] %v5376_v59  ;;  %v18671_v59 = vld [vmem:[#allocation21_spill] sm:$0xff]  ;;  %v18674_v53 = vld [vmem:[#allocation44_spill] sm:$0xff] }
 0x545   : > { %vm10648_vm5 = vcmp.lt.s32.totalorder %v10647_v11, 0  ;;  %vm18218_vm7 = vweird.f32 %v18669_v31  ;;  %v5188_v24 = vsel %vm5181_vm11, %v5184_v19, %v5187_v36  ;;  %v5678_v3 = vadd.s32 3, %v18670_v9  ;;  %10383 = vst [vmem:[%s17087_s8 + $0x60] sm:$0xff] %v5353_v8  ;;  %v18676_v9 = vld [vmem:[#allocation37_spill] sm:$0xff] }
 0x546   : > { %v5299_v6 = vsel %vm10648_vm5, 0, %v10647_v11  ;;  %v3957_v46 = vsel %vm18219_vm15, nan, %v3956_v52  ;;  %v5284_v12 = vadd.s32 %v17129_v58, %v17127_v28  ;;  %10399 = vst [vmem:[%s17087_s8 + $0xe0] sm:$0xff] %v5361_v43  ;;  %v4111_v51 = vsel %vm18218_vm7, nan, %v4110_v32 }
 0x547   : > { %v5300_v56 = vsub.s32 32, %v5299_v6  ;;  %v5304_v15 = vsub.s32 4294967266, %v5299_v6  ;;  %vm18208_vm9 = vweird.f32 %v16604_v18  ;;  %v5524_v26 = vand.u32 3, %v5523_v1 }
 0x548   : > { %v5833_v44 = vadd.s32 3, %v18671_v59  ;;  %v5189_v19 = vsel %vm18208_vm9, nan, %v5188_v24  ;;  %v5301_v52 = vshll.u32 %v17210_v22, %v5299_v6  ;;  %vm5192_vm6 = vcmp.lt.s32.totalorder %v16880_v47, 0  ;;  %v18675_v22 = vld [vmem:[#allocation85_spill] sm:$0xff] }
 0x549   : > { %v5302_v11 = vshrl.u32 %v5284_v12, %v5300_v56  ;;  %v5305_v39 = vadd.s32 127, %v5304_v15  ;;  %v5369_v28 = vmul.f32 %v17071_v0, %v3957_v46  ;;  %v5679_v58 = vand.u32 3, %v5678_v3  ;;  %v18677_v15 = vld [vmem:[#allocation15_spill] sm:$0xff]  ;;  %v18679_v59 = vld [vmem:[#allocation13_spill] sm:$0xff] }
 0x54a   : > { %vm17302_vm2 = vcmp.le.f32.partialorder %v5190_v13, 0.7853982  ;;  %v5354_v1 = vmul.f32 %v17071_v0, %v18674_v53  ;;  %v5362_v32 = vmul.f32 %v17071_v0, %v18675_v22  ;;  %v5370_v36 = vmul.f32 %v17071_v0, %v4111_v51  ;;  %v18684_v53 = vld [vmem:[#allocation30_spill] sm:$0xff] }
 0x54b   : > { %v5303_v35 = vor.u32 %v5302_v11, %v5301_v52  ;;  %v5306_v43 = vshll.u32 %v5305_v39, 23  ;;  %v5377_v24 = vmul.f32 %v17071_v0, %v5189_v19  ;;  %v5834_v6 = vand.u32 3, %v5833_v44  ;;  %10415 = vst [vmem:[%s17087_s8 + $0x160] sm:$0xff] %v5369_v28  ;;  %v18680_v19 = vld [vmem:[#allocation25_spill] sm:$0xff]  ;;  %v18681_v11 = vld [vmem:[#allocation19_spill] sm:$0xff]  ;;  %v18683_v28 = vld [vmem:[#allocation18_spill] sm:$0xff] }
 0x54c   : > { %v6763_v3 = vadd.s32 3, %v18676_v9  ;;  %v5314_v46 = vsub.s32 4, %v17183_v42  ;;  %vm5525_vm12 = vcmp.lt.s32.totalorder %v5524_v26, 2  ;;  %vm5526_vm11 = vcmp.eq.s32.totalorder %v5524_v26, 0  ;;  %10385 = vst [vmem:[%s17087_s8 + $0x70] sm:$0xff] %v5354_v1 }
 0x54d   : > { %v5307_v13 = vor.u32 4788187, %v5306_v43  ;;  %vm5529_vm5 = vcmp.eq.s32.totalorder %v5524_v26, 2  ;;  %vm5680_vm9 = vcmp.lt.s32.totalorder %v5679_v58, 2  ;;  %vm5681_vm14 = vcmp.eq.s32.totalorder %v5679_v58, 0  ;;  %10401 = vst [vmem:[%s17087_s8 + $0xf0] sm:$0xff] %v5362_v32 }
 0x54e   : > { %vm5684_vm0 = vcmp.eq.s32.totalorder %v5679_v58, 2  ;;  %v5310_v56 = vcvt.s32.f32 %v5303_v35  ;;  %v18678_v51 = vxor.u32 2147483648, %v18677_v15  ;;  %v5988_v52 = vadd.s32 3, %v18680_v19  ;;  %10417 = vst [vmem:[%s17087_s8 + $0x170] sm:$0xff] %v5370_v36  ;;  %v18686_v36 = vld [vmem:[#allocation22_spill] sm:$0xff] }
 0x54f   : > { %v5308_v12 = vand.u32 2147483647, %v5307_v13  ;;  %v18682_v39 = vxor.u32 2147483648, %v18681_v11  ;;  %vm5835_vm3 = vcmp.lt.s32.totalorder %v5834_v6, 2  ;;  %vm5836_vm13 = vcmp.eq.s32.totalorder %v5834_v6, 0  ;;  %10431 = vst [vmem:[%s17087_s8 + $0x1e0] sm:$0xff] %v5377_v24 }
 0x550   : > { %v5528_v44 = vsel %vm5526_vm11, %v18679_v59, %v18678_v51  ;;  %v6143_v1 = vadd.s32 3, %v18684_v53  ;;  %v5315_v35 = vsel %vm5192_vm6, %v5314_v46, %v17183_v42  ;;  %v18685_v32 = vxor.u32 2147483648, %v18679_v59  ;;  %v18688_v51 = vld [vmem:[#allocation24_spill] sm:$0xff] }
 0x551   : > { %v5683_v43 = vsel %vm5681_vm14, %v18683_v28, %v18682_v39  ;;  %v5311_v22 = vmul.f32 %v5310_v56, %v5308_v12  ;;  %v18687_v13 = vxor.u32 2147483648, %v18686_v36  ;;  %v18689_v53 = vxor.u32 2147483648, %v18683_v28  ;;  %v18690_v12 = vld [vmem:[#allocation32_spill] sm:$0xff] }
 0x552   : > { %v5531_v9 = vsel %vm5529_vm5, %v18685_v32, %v18677_v15  ;;  %vm5839_vm14 = vcmp.eq.s32.totalorder %v5834_v6, 2  ;;  %v6298_v56 = vadd.s32 3, %v18690_v12  ;;  %v18691_v15 = vxor.u32 2147483648, %v18688_v51  ;;  %v18699_v12 = vld [vmem:[#allocation27_spill] sm:$0xff] }
 0x553   : > { %v5838_v19 = vsel %vm5836_vm13, %v18688_v51, %v18687_v13  ;;  %v5532_v39 = vsel %vm5525_vm12, %v5528_v44, %v5531_v9  ;;  %v5686_v24 = vsel %vm5684_vm0, %v18689_v53, %v18681_v11  ;;  %v5312_v42 = vxor.u32 2147483648, %v5311_v22  ;;  %v18692_v9 = vld [vmem:[#allocation41_spill] sm:$0xff] }
 0x554   : > { %v5687_v46 = vsel %vm5680_vm9, %v5683_v43, %v5686_v24  ;;  %v5841_v59 = vsel %vm5839_vm14, %v18691_v15, %v18686_v36  ;;  %v5989_v32 = vand.u32 3, %v5988_v52  ;;  %v17349_v26 = vsel %vm17302_vm2, 0, %v5315_v35  ;;  %v18694_v35 = vld [vmem:[#allocation6_spill] sm:$0xff]  ;;  %v18696_v36 = vld [vmem:[#allocation7_spill] sm:$0xff]  ;;  %v18698_v51 = vld [vmem:[#allocation49_spill] sm:$0xff] }
 0x555   : > { %v5842_v44 = vsel %vm5835_vm3, %v5838_v19, %v5841_v59  ;;  %v6144_v28 = vand.u32 3, %v6143_v1  ;;  %v5313_v11 = vsel %vm5192_vm6, %v5312_v42, %v5311_v22  ;;  %v6453_v13 = vadd.s32 3, %v18692_v9  ;;  %v18701_v42 = vld [vmem:[#allocation26_spill] sm:$0xff]  ;;  %v18702_v59 = vld [vmem:[#allocation35_spill] sm:$0xff] }
 0x556   : > { %v17355_v53 = vand.u32 3, %v6763_v3  ;;  %v17360_v58 = vsel %vm17302_vm2, %v16880_v47, %v5313_v11  ;;  %v17364_v43 = vsel %vm559_vm1, nan, %v5532_v39  ;;  %vm18695_vm13 = vweird.f32 %v18694_v35  ;;  %v18704_v9 = vld [vmem:[#allocation34_spill] sm:$0xff] }
 0x557   : > { %v17368_v6 = vsel %vm18695_vm13, nan, %v5687_v46  ;;  %v6299_v1 = vand.u32 3, %v6298_v56  ;;  %v5318_v22 = vmul.f32 %v17360_v58, %v17360_v58  ;;  %v17373_v3 = vand.u32 3, %v17349_v26 }
 0x558   : > { %vm18697_vm3 = vweird.f32 %v18696_v36  ;;  %vm5990_vm0 = vcmp.lt.s32.totalorder %v5989_v32, 2  ;;  %vm5991_vm9 = vcmp.eq.s32.totalorder %v5989_v32, 0  ;;  %vm5994_vm6 = vcmp.eq.s32.totalorder %v5989_v32, 2  ;;  %v18710_v32 = vld [vmem:[#allocation57_spill] sm:$0xff] }
 0x559   : > { %v17377_v8 = vsel %vm18697_vm3, nan, %v5842_v44  ;;  %vm6146_vm1 = vcmp.eq.s32.totalorder %v6144_v28, 0  ;;  %v6608_v19 = vadd.s32 3, %v18698_v51  ;;  %v5319_v39 = vmul.f32 -0.001358992, %v5318_v22 }
 0x55a   : > { %v5326_v24 = vmul.f32 -0.00019511016, %v5318_v22  ;;  %v18700_v56 = vxor.u32 2147483648, %v18699_v12  ;;  %v6454_v15 = vand.u32 3, %v6453_v13  ;;  %vm6145_vm2 = vcmp.lt.s32.totalorder %v6144_v28, 2 }
 0x55b   : > { %v18703_v11 = vxor.u32 2147483648, %v18702_v59  ;;  %vm6149_vm12 = vcmp.eq.s32.totalorder %v6144_v28, 2  ;;  %vm6300_vm11 = vcmp.lt.s32.totalorder %v6299_v1, 2  ;;  %v5320_v44 = vadd.f32 0.041655596, %v5319_v39  ;;  %v18707_v28 = vld [vmem:[#allocation36_spill] sm:$0xff] }
 0x55c   : > { %v5993_v46 = vsel %vm5991_vm9, %v18701_v42, %v18700_v56  ;;  %v5327_v35 = vadd.f32 0.008332121, %v5326_v24  ;;  %v18705_v36 = vxor.u32 2147483648, %v18701_v42  ;;  %vm6301_vm5 = vcmp.eq.s32.totalorder %v6299_v1, 0  ;;  %v18709_v39 = vld [vmem:[#allocation40_spill] sm:$0xff] }
 0x55d   : > { %v6148_v52 = vsel %vm6146_vm1, %v18704_v9, %v18703_v11  ;;  %v18706_v56 = vxor.u32 2147483648, %v18704_v9  ;;  %vm6304_vm14 = vcmp.eq.s32.totalorder %v6299_v1, 2  ;;  %v6609_v40 = vand.u32 3, %v6608_v19 }
 0x55e   : > { %v5996_v51 = vsel %vm5994_vm6, %v18705_v36, %v18699_v12  ;;  %v5321_v14 = vmul.f32 %v5320_v44, %v5318_v22  ;;  %v5328_v16 = vmul.f32 %v5327_v35, %v5318_v22  ;;  %v18708_v50 = vxor.u32 2147483648, %v18707_v28  ;;  %v18716_v36 = vld [vmem:[#allocation53_spill] sm:$0xff] }
 0x55f   : > { %v5997_v33 = vsel %vm5990_vm0, %v5993_v46, %v5996_v51  ;;  %v6151_v13 = vsel %vm6149_vm12, %v18706_v56, %v18702_v59  ;;  %vm6455_vm13 = vcmp.lt.s32.totalorder %v6454_v15, 2  ;;  %vm6456_vm3 = vcmp.eq.s32.totalorder %v6454_v15, 0  ;;  %v18717_v56 = vld [vmem:[#allocation47_spill] sm:$0xff] }
 0x560   : > { %v6152_v11 = vsel %vm6145_vm2, %v6148_v52, %v6151_v13  ;;  %v6303_v24 = vsel %vm6301_vm5, %v18709_v39, %v18708_v50  ;;  %vm6459_vm9 = vcmp.eq.s32.totalorder %v6454_v15, 2  ;;  %vm6765_vm6 = vcmp.lt.s32.totalorder %v17355_v53, 2  ;;  %v18712_v50 = vld [vmem:[#allocation8_spill] sm:$0xff]  ;;  %v18714_v52 = vld [vmem:[#allocation9_spill] sm:$0xff] }
 0x561   : > { %v6918_v12 = vadd.s32 3, %v18710_v32  ;;  %v5322_v42 = vadd.f32 -0.4999988, %v5321_v14  ;;  %v5329_v46 = vadd.f32 -0.16666654, %v5328_v16  ;;  %v18711_v59 = vxor.u32 2147483648, %v18709_v39 }
 0x562   : > { %vm6766_vm0 = vcmp.eq.s32.totalorder %v17355_v53, 0  ;;  %vm5336_vm1 = vcmp.eq.s32.totalorder %v17373_v3, 0  ;;  %vm5339_vm2 = vcmp.eq.s32.totalorder %v17373_v3, 2  ;;  %vm18713_vm12 = vweird.f32 %v18712_v50  ;;  %v18720_v39 = vld [vmem:[#allocation51_spill] sm:$0xff]  ;;  %v18722_v32 = vld [vmem:[#allocation50_spill] sm:$0xff] }
 0x563   : > { %v6306_v19 = vsel %vm6304_vm14, %v18711_v59, %v18707_v28  ;;  %v17406_v9 = vsel %vm18713_vm12, nan, %v5997_v33  ;;  %vm18715_vm5 = vweird.f32 %v18714_v52  ;;  %vm6610_vm7 = vcmp.lt.s32.totalorder %v6609_v40, 2  ;;  %v18719_v33 = vld [vmem:[#allocation46_spill] sm:$0xff]  ;;  %v18726_v52 = vld [vmem:[#allocation65_spill] sm:$0xff] }
 0x564   : > { %v17410_v44 = vsel %vm18715_vm5, nan, %v6152_v11  ;;  %v6307_v16 = vsel %vm6300_vm11, %v6303_v24, %v6306_v19  ;;  %v5323_v14 = vmul.f32 %v5322_v42, %v5318_v22  ;;  %v5330_v35 = vmul.f32 %v5329_v46, %v5318_v22  ;;  %v18723_v46 = vld [vmem:[#allocation55_spill] sm:$0xff]  ;;  %v18725_v19 = vld [vmem:[#allocation56_spill] sm:$0xff] }
 0x565   : > { %vm5335_vm14 = vcmp.lt.s32.totalorder %v17373_v3, 2  ;;  %vm6611_vm15 = vcmp.eq.s32.totalorder %v6609_v40, 0  ;;  %v7073_v51 = vadd.s32 3, %v18716_v36  ;;  %vm5333_vm4 = vweird.f32 %v16880_v47 }
 0x566   : > { %v18718_v13 = vxor.u32 2147483648, %v18717_v56  ;;  %v18721_v11 = vxor.u32 2147483648, %v18720_v39  ;;  %vm6614_vm11 = vcmp.eq.s32.totalorder %v6609_v40, 2  ;;  %v6919_v24 = vand.u32 3, %v6918_v12 }
 0x567   : > { %v17423_v42 = vadd.f32 1.0, %v5323_v14  ;;  %v5331_v22 = vadd.f32 1.0, %v5330_v35  ;;  %v18724_v59 = vxor.u32 2147483648, %v18723_v46  ;;  %v7228_v36 = vadd.s32 3, %v18726_v52 }
 0x568   : > { %v6458_v28 = vsel %vm6456_vm3, %v18719_v33, %v18718_v13  ;;  %v6613_v1 = vsel %vm6611_vm15, %v18722_v32, %v18721_v11  ;;  %vm18728_vm12 = vweird.f32 %v18727_v20  ;;  %v18729_v11 = vxor.u32 2147483648, %v18719_v33 }
 0x569   : > { %v6768_v50 = vsel %vm6766_vm0, %v18725_v19, %v18724_v59  ;;  %v17433_v13 = vsel %vm18728_vm12, nan, %v6307_v16  ;;  %v18730_v14 = vxor.u32 2147483648, %v18722_v32  ;;  %vm6769_vm15 = vcmp.eq.s32.totalorder %v17355_v53, 2 }
 0x56a   : > { %v6461_v12 = vsel %vm6459_vm9, %v18729_v11, %v18717_v56  ;;  %v17444_v62 = vmul.f32 %v5331_v22, %v17360_v58  ;;  %v18224_v59 = vxor.u32 2147483648, %v17423_v42  ;;  %v18731_v20 = vxor.u32 2147483648, %v18725_v19  ;;  %v18732_v11 = vld [vmem:[#allocation60_spill] sm:$0xff]  ;;  %v18734_v22 = vld [vmem:[#allocation59_spill] sm:$0xff] }
 0x56b   : > { %v6616_v35 = vsel %vm6614_vm11, %v18730_v14, %v18720_v39  ;;  %v7074_v52 = vand.u32 3, %v7073_v51  ;;  %v6462_v33 = vsel %vm6455_vm13, %v6458_v28, %v6461_v12  ;;  %vm6921_vm3 = vcmp.eq.s32.totalorder %v6919_v24, 0  ;;  %v18736_v28 = vld [vmem:[#allocation71_spill] sm:$0xff] }
 0x56c   : > { %v6771_v16 = vsel %vm6769_vm15, %v18731_v20, %v18723_v46  ;;  %v6617_v56 = vsel %vm6610_vm7, %v6613_v1, %v6616_v35  ;;  %v18225_v39 = vxor.u32 2147483648, %v17444_v62  ;;  %v18733_v58 = vxor.u32 2147483648, %v18732_v11  ;;  %v18737_v1 = vld [vmem:[#allocation77_spill] sm:$0xff]  ;;  %v18740_v35 = vld [vmem:[#allocation39_spill] sm:$0xff] }
 0x56d   : > { %v6772_v32 = vsel %vm6765_vm6, %v6768_v50, %v6771_v16  ;;  %vm6924_vm9 = vcmp.eq.s32.totalorder %v6919_v24, 2  ;;  %v7229_v48 = vand.u32 3, %v7228_v36  ;;  %vm6920_vm0 = vcmp.lt.s32.totalorder %v6919_v24, 2  ;;  %v18738_v36 = vld [vmem:[#allocation64_spill] sm:$0xff] }
 0x56e   : > { %v6923_v14 = vsel %vm6921_vm3, %v18734_v22, %v18733_v58  ;;  %v18735_v51 = vxor.u32 2147483648, %v18734_v22  ;;  %v7383_v40 = vadd.s32 3, %v18736_v28  ;;  %v7538_v46 = vadd.s32 3, %v18737_v1  ;;  %v18742_v22 = vld [vmem:[#allocation68_spill] sm:$0xff]  ;;  %v18743_v28 = vld [vmem:[#allocation67_spill] sm:$0xff] }
 0x56f   : > { %v5338_v53 = vsel %vm5336_vm1, %v17423_v42, %v18225_v39  ;;  %v5341_v24 = vsel %vm5339_vm2, %v18224_v59, %v17444_v62  ;;  %vm7075_vm7 = vcmp.lt.s32.totalorder %v7074_v52, 2  ;;  %vm7076_vm13 = vcmp.eq.s32.totalorder %v7074_v52, 0 }
 0x570   : > { %v6926_v15 = vsel %vm6924_vm9, %v18735_v51, %v18732_v11  ;;  %v5342_v19 = vsel %vm5335_vm14, %v5338_v53, %v5341_v24  ;;  %v18739_v12 = vxor.u32 2147483648, %v18738_v36  ;;  %vm7079_vm6 = vcmp.eq.s32.totalorder %v7074_v52, 2  ;;  %v18746_v52 = vld [vmem:[#allocation11_spill] sm:$0xff] }
 0x571   : > { %v6927_v50 = vsel %vm6920_vm0, %v6923_v14, %v6926_v15  ;;  %v5343_v16 = vsel %vm5333_vm4, nan, %v5342_v19  ;;  %v18741_v11 = vxor.u32 2147483648, %v18740_v35  ;;  %vm7231_vm1 = vcmp.eq.s32.totalorder %v7229_v48, 0  ;;  %v18745_v15 = vld [vmem:[#allocation69_spill] sm:$0xff] }
 0x572   : > { %v7078_v20 = vsel %vm7076_vm13, %v18740_v35, %v18739_v12  ;;  %v7693_v51 = vadd.s32 3, %v18742_v22  ;;  %v5378_v3 = vmul.f32 %v17071_v0, %v5343_v16  ;;  %v18744_v14 = vxor.u32 2147483648, %v18743_v28  ;;  %v18748_v35 = vld [vmem:[#allocation84_spill] sm:$0xff] }
 0x573   : > { %v7081_v58 = vsel %vm7079_vm6, %v18741_v11, %v18738_v36  ;;  %v7384_v53 = vand.u32 3, %v7383_v40  ;;  %v7539_v24 = vand.u32 3, %v7538_v46  ;;  %vm18747_vm2 = vweird.f32 %v18746_v52  ;;  %v18749_v36 = vld [vmem:[#allocation16_spill] sm:$0xff]  ;;  %v18753_v46 = vld [vmem:[#allocation23_spill] sm:$0xff] }
 0x574   : > { %v7233_v1 = vsel %vm7231_vm1, %v18745_v15, %v18744_v14  ;;  %v17490_v12 = vsel %vm18747_vm2, nan, %v6462_v33  ;;  %v7082_v19 = vsel %vm7075_vm7, %v7078_v20, %v7081_v58  ;;  %vm7234_vm5 = vcmp.eq.s32.totalorder %v7229_v48, 2  ;;  %v18752_v14 = vld [vmem:[#allocation90_spill] sm:$0xff]  ;;  %10433 = vst [vmem:[%s17087_s8 + $0x1f0] sm:$0xff] %v5378_v3 }
 0x575   : > { %v7848_v59 = vadd.s32 3, %v18748_v35  ;;  %vm18750_vm14 = vweird.f32 %v18749_v36  ;;  %vm7230_vm11 = vcmp.lt.s32.totalorder %v7229_v48, 2  ;;  %v18751_v16 = vxor.u32 2147483648, %v18745_v15  ;;  %v18759_v3 = vld [vmem:[#allocation74_spill] sm:$0xff] }
 0x576   : > { %v17495_v11 = vsel %vm18750_vm14, nan, %v6617_v56  ;;  %v8003_v40 = vadd.s32 3, %v18752_v14  ;;  %vm18754_vm12 = vweird.f32 %v18753_v46  ;;  %v17508_v58 = vsel %vm1945_vm10, nan, %v6927_v50  ;;  %v18762_v14 = vld [vmem:[#allocation80_spill] sm:$0xff]  ;;  %v18763_v20 = vld [vmem:[#allocation38_spill] sm:$0xff] }
 0x577   : > { %v7236_v22 = vsel %vm7234_vm5, %v18751_v16, %v18743_v28  ;;  %v17504_v33 = vsel %vm18754_vm12, nan, %v6772_v32  ;;  %v7694_v35 = vand.u32 3, %v7693_v51  ;;  %v17512_v48 = vsel %vm2099_vm8, nan, %v7082_v19  ;;  %v18757_v28 = vld [vmem:[#allocation75_spill] sm:$0xff]  ;;  %v18760_v32 = vld [vmem:[#allocation81_spill] sm:$0xff]  ;;  %v18765_v19 = vld [vmem:[#allocation96_spill] sm:$0xff] }
 0x578   : > { %v7237_v52 = vsel %vm7230_vm11, %v7233_v1, %v7236_v22  ;;  %vm7385_vm15 = vcmp.lt.s32.totalorder %v7384_v53, 2  ;;  %vm7386_vm3 = vcmp.eq.s32.totalorder %v7384_v53, 0  ;;  %vm7541_vm9 = vcmp.eq.s32.totalorder %v7539_v24, 0 }
 0x579   : > { %v18758_v15 = vxor.u32 2147483648, %v18757_v28  ;;  %vm7389_vm0 = vcmp.eq.s32.totalorder %v7384_v53, 2  ;;  %v18761_v16 = vxor.u32 2147483648, %v18760_v32  ;;  %v7849_v50 = vand.u32 3, %v7848_v59 }
 0x57a   : > { %vm18764_vm10 = vweird.f32 %v18763_v20  ;;  %vm7544_vm7 = vcmp.eq.s32.totalorder %v7539_v24, 2  ;;  %v8004_v1 = vand.u32 3, %v8003_v40  ;;  %v8158_v22 = vadd.s32 3, %v18765_v19  ;;  %v18768_v20 = vld [vmem:[#allocation83_spill] sm:$0xff]  ;;  %v18771_v40 = vld [vmem:[#allocation98_spill] sm:$0xff] }
 0x57b   : > { %v7388_v36 = vsel %vm7386_vm3, %v18759_v3, %v18758_v15  ;;  %v7543_v46 = vsel %vm7541_vm9, %v18762_v14, %v18761_v16  ;;  %v17522_v51 = vsel %vm18764_vm10, nan, %v7237_v52  ;;  %v18766_v56 = vxor.u32 2147483648, %v18759_v3  ;;  %v18773_v3 = vld [vmem:[#allocation89_spill] sm:$0xff] }
 0x57c   : > { %vm7540_vm8 = vcmp.lt.s32.totalorder %v7539_v24, 2  ;;  %v18767_v53 = vxor.u32 2147483648, %v18762_v14  ;;  %vm7696_vm13 = vcmp.eq.s32.totalorder %v7694_v35, 0  ;;  %vm7695_vm6 = vcmp.lt.s32.totalorder %v7694_v35, 2 }
 0x57d   : > { %v7391_v39 = vsel %vm7389_vm0, %v18766_v56, %v18757_v28  ;;  %v18769_v52 = vxor.u32 2147483648, %v18768_v20  ;;  %vm7699_vm1 = vcmp.eq.s32.totalorder %v7694_v35, 2  ;;  %vm7850_vm2 = vcmp.lt.s32.totalorder %v7849_v50, 2 }
 0x57e   : > { %v7546_v15 = vsel %vm7544_vm7, %v18767_v53, %v18760_v32  ;;  %v7392_v16 = vsel %vm7385_vm15, %v7388_v36, %v7391_v39  ;;  %vm7851_vm5 = vcmp.eq.s32.totalorder %v7849_v50, 0  ;;  %v8313_v19 = vadd.s32 3, %v18771_v40  ;;  %v18775_v32 = vld [vmem:[#allocation88_spill] sm:$0xff] }
 0x57f   : > { %v7547_v59 = vsel %vm7540_vm8, %v7543_v46, %v7546_v15  ;;  %v7698_v30 = vsel %vm7696_vm13, %v18770_v5, %v18769_v52  ;;  %v18772_v24 = vxor.u32 2147483648, %v18770_v5  ;;  %v18774_v14 = vxor.u32 2147483648, %v18773_v3  ;;  %v18776_v46 = vld [vmem:[#allocation93_spill] sm:$0xff]  ;;  %v18778_v15 = vld [vmem:[#allocation95_spill] sm:$0xff]  ;;  %v18779_v52 = vld [vmem:[#allocation106_spill] sm:$0xff] }
 0x580   : > { %vm8006_vm14 = vcmp.eq.s32.totalorder %v8004_v1, 0  ;;  %v8159_v39 = vand.u32 3, %v8158_v22  ;;  %vm7854_vm11 = vcmp.eq.s32.totalorder %v7849_v50, 2  ;;  %v18777_v53 = vxor.u32 2147483648, %v18776_v46  ;;  %v18781_v5 = vld [vmem:[#allocation94_spill] sm:$0xff] }
 0x581   : > { %v7701_v28 = vsel %vm7699_vm1, %v18772_v24, %v18768_v20  ;;  %v7853_v56 = vsel %vm7851_vm5, %v18775_v32, %v18774_v14  ;;  %v8468_v47 = vadd.s32 3, %v18779_v52  ;;  %v18780_v40 = vxor.u32 2147483648, %v18775_v32  ;;  %v18786_v52 = vld [vmem:[#allocation48_spill] sm:$0xff] }
 0x582   : > { %v7702_v36 = vsel %vm7695_vm6, %v7698_v30, %v7701_v28  ;;  %v8008_v35 = vsel %vm8006_vm14, %v18778_v15, %v18777_v53  ;;  %vm8005_vm12 = vcmp.lt.s32.totalorder %v8004_v1, 2  ;;  %vm8009_vm15 = vcmp.eq.s32.totalorder %v8004_v1, 2  ;;  %v18783_v28 = vld [vmem:[#allocation111_spill] sm:$0xff]  ;;  %v18788_v1 = vld [vmem:[#allocation54_spill] sm:$0xff] }
 0x583   : > { %v7856_v18 = vsel %vm7854_vm11, %v18780_v40, %v18773_v3  ;;  %v8623_v20 = vadd.s32 3, %v18781_v5  ;;  %v18782_v22 = vxor.u32 2147483648, %v18778_v15  ;;  %v8314_v50 = vand.u32 3, %v8313_v19  ;;  %v18793_v5 = vld [vmem:[#allocation115_spill] sm:$0xff] }
 0x584   : > { %v7857_v24 = vsel %vm7850_vm2, %v7853_v56, %v7856_v18  ;;  %v8778_v14 = vadd.s32 3, %v18783_v28  ;;  %vm18785_vm3 = vweird.f32 %v18784_v37  ;;  %vm18787_vm9 = vweird.f32 %v18786_v52  ;;  %v18790_v56 = vld [vmem:[#allocation99_spill] sm:$0xff]  ;;  %v18794_v37 = vld [vmem:[#allocation61_spill] sm:$0xff] }
 0x585   : > { %v8011_v30 = vsel %vm8009_vm15, %v18782_v22, %v18776_v46  ;;  %v17555_v53 = vsel %vm18785_vm3, nan, %v7392_v16  ;;  %v17559_v32 = vsel %vm18787_vm9, nan, %v7547_v59  ;;  %vm8161_vm0 = vcmp.eq.s32.totalorder %v8159_v39, 0  ;;  %v18792_v46 = vld [vmem:[#allocation97_spill] sm:$0xff] }
 0x586   : > { %v8012_v3 = vsel %vm8005_vm12, %v8008_v35, %v8011_v30  ;;  %vm18789_vm10 = vweird.f32 %v18788_v1  ;;  %v18791_v15 = vxor.u32 2147483648, %v18790_v56  ;;  %v8469_v40 = vand.u32 3, %v8468_v47  ;;  %v18796_v35 = vld [vmem:[#allocation63_spill] sm:$0xff]  ;;  %v18799_v1 = vld [vmem:[#allocation105_spill] sm:$0xff] }
 0x587   : > { %v17563_v18 = vsel %vm18789_vm10, nan, %v7702_v36  ;;  %v8933_v22 = vadd.s32 3, %v18793_v5  ;;  %vm18795_vm7 = vweird.f32 %v18794_v37  ;;  %vm8160_vm8 = vcmp.lt.s32.totalorder %v8159_v39, 2  ;;  %v18801_v5 = vld [vmem:[#allocation101_spill] sm:$0xff] }
 0x588   : > { %v8163_v19 = vsel %vm8161_vm0, %v18792_v46, %v18791_v15  ;;  %v17571_v16 = vsel %vm18795_vm7, nan, %v7857_v24  ;;  %vm8164_vm13 = vcmp.eq.s32.totalorder %v8159_v39, 2  ;;  %v8624_v59 = vand.u32 3, %v8623_v20  ;;  %v18802_v24 = vld [vmem:[#allocation122_spill] sm:$0xff] }
 0x589   : > { %vm18797_vm6 = vweird.f32 %v18796_v35  ;;  %v18798_v36 = vxor.u32 2147483648, %v18792_v46  ;;  %vm8316_vm1 = vcmp.eq.s32.totalorder %v8314_v50, 0  ;;  %v8779_v52 = vand.u32 3, %v8778_v14 }
 0x58a   : > { %v17575_v30 = vsel %vm18797_vm6, nan, %v8012_v3  ;;  %v18800_v15 = vxor.u32 2147483648, %v18799_v1  ;;  %v9088_v45 = vadd.s32 3, %v18802_v24  ;;  %v9243_v39 = vadd.s32 3, %v18803_v29  ;;  %v18810_v24 = vld [vmem:[#allocation109_spill] sm:$0xff] }
 0x58b   : > { %v8166_v28 = vsel %vm8164_vm13, %v18798_v36, %v18790_v56  ;;  %vm8315_vm2 = vcmp.lt.s32.totalorder %v8314_v50, 2  ;;  %vm8319_vm5 = vcmp.eq.s32.totalorder %v8314_v50, 2  ;;  %vm8471_vm14 = vcmp.eq.s32.totalorder %v8469_v40, 0  ;;  %v18805_v56 = vld [vmem:[#allocation107_spill] sm:$0xff] }
 0x58c   : > { %v8167_v47 = vsel %vm8160_vm8, %v8163_v19, %v8166_v28  ;;  %v8318_v37 = vsel %vm8316_vm1, %v18801_v5, %v18800_v15  ;;  %v8934_v20 = vand.u32 3, %v8933_v22  ;;  %v18804_v3 = vxor.u32 2147483648, %v18801_v5  ;;  %v18807_v19 = vld [vmem:[#allocation108_spill] sm:$0xff]  ;;  %v18808_v28 = vld [vmem:[#allocation110_spill] sm:$0xff]  ;;  %v18812_v5 = vld [vmem:[#allocation117_spill] sm:$0xff] }
 0x58d   : > { %vm8470_vm11 = vcmp.lt.s32.totalorder %v8469_v40, 2  ;;  %v18806_v14 = vxor.u32 2147483648, %v18805_v56  ;;  %vm8626_vm12 = vcmp.eq.s32.totalorder %v8624_v59, 0  ;;  %vm8474_vm15 = vcmp.eq.s32.totalorder %v8469_v40, 2 }
 0x58e   : > { %v8321_v46 = vsel %vm8319_vm5, %v18804_v3, %v18799_v1  ;;  %v18809_v15 = vxor.u32 2147483648, %v18808_v28  ;;  %vm8781_vm3 = vcmp.eq.s32.totalorder %v8779_v52, 0  ;;  %v18811_v50 = vxor.u32 2147483648, %v18807_v19  ;;  %v18814_v3 = vld [vmem:[#allocation116_spill] sm:$0xff] }
 0x58f   : > { %v8473_v35 = vsel %vm8471_vm14, %v18807_v19, %v18806_v14  ;;  %v8322_v36 = vsel %vm8315_vm2, %v8318_v37, %v8321_v46  ;;  %vm8629_vm9 = vcmp.eq.s32.totalorder %v8624_v59, 2  ;;  %v18813_v1 = vxor.u32 2147483648, %v18812_v5 }
 0x590   : > { %v8628_v29 = vsel %vm8626_vm12, %v18810_v24, %v18809_v15  ;;  %v8476_v22 = vsel %vm8474_vm15, %v18811_v50, %v18805_v56  ;;  %v9089_v38 = vand.u32 3, %v9088_v45  ;;  %vm8625_vm0 = vcmp.lt.s32.totalorder %v8624_v59, 2  ;;  %v18817_v56 = vld [vmem:[#allocation62_spill] sm:$0xff]  ;;  %v18819_v50 = vld [vmem:[#allocation76_spill] sm:$0xff] }
 0x591   : > { %v8783_v57 = vsel %vm8781_vm3, %v18814_v3, %v18813_v1  ;;  %v8477_v4 = vsel %vm8470_vm11, %v8473_v35, %v8476_v22  ;;  %v18815_v40 = vxor.u32 2147483648, %v18810_v24  ;;  %vm8784_vm10 = vcmp.eq.s32.totalorder %v8779_v52, 2  ;;  %v18822_v24 = vld [vmem:[#allocation79_spill] sm:$0xff]  ;;  %v18824_v22 = vld [vmem:[#allocation72_spill] sm:$0xff] }
 0x592   : > { %vm8780_vm7 = vcmp.lt.s32.totalorder %v8779_v52, 2  ;;  %v18816_v14 = vxor.u32 2147483648, %v18814_v3  ;;  %vm8936_vm8 = vcmp.eq.s32.totalorder %v8934_v20, 0  ;;  %vm18818_vm13 = vweird.f32 %v18817_v56  ;;  %v18832_v56 = vld [vmem:[#allocation128_spill] sm:$0xff] }
 0x593   : > { %v8631_v37 = vsel %vm8629_vm9, %v18815_v40, %v18808_v28  ;;  %v17608_v15 = vsel %vm18818_vm13, nan, %v8167_v47  ;;  %vm18820_vm6 = vweird.f32 %v18819_v50  ;;  %v18821_v35 = vxor.u32 2147483648, %v18661_v63  ;;  %v18834_v50 = vld [vmem:[#allocation127_spill] sm:$0xff] }
 0x594   : > { %v8632_v46 = vsel %vm8625_vm0, %v8628_v29, %v8631_v37  ;;  %v8786_v19 = vsel %vm8784_vm10, %v18816_v14, %v18812_v5  ;;  %v17612_v45 = vsel %vm18820_vm6, nan, %v8322_v36  ;;  %vm18823_vm1 = vweird.f32 %v18822_v24 }
 0x595   : > { %v8787_v59 = vsel %vm8780_vm7, %v8783_v57, %v8786_v19  ;;  %v8938_v28 = vsel %vm8936_vm8, %v18663_v17, %v18821_v35  ;;  %v17619_v52 = vsel %vm18823_vm1, nan, %v8477_v4  ;;  %vm8939_vm2 = vcmp.eq.s32.totalorder %v8934_v20, 2 }
 0x596   : > { %vm9091_vm5 = vcmp.eq.s32.totalorder %v9089_v38, 0  ;;  %v9244_v29 = vand.u32 3, %v9243_v39  ;;  %vm18825_vm14 = vweird.f32 %v18824_v22  ;;  %vm8935_vm11 = vcmp.lt.s32.totalorder %v8934_v20, 2  ;;  %v18829_v39 = vld [vmem:[#allocation129_spill] sm:$0xff] }
 0x597   : > { %v17623_v47 = vsel %vm18825_vm14, nan, %v8632_v46  ;;  %v18826_v36 = vxor.u32 2147483648, %v18663_v17  ;;  %v18827_v5 = vxor.u32 2147483648, %v18656_v21  ;;  %vm18828_vm12 = vweird.f32 %v18649_v7  ;;  %v18831_v17 = vld [vmem:[#allocation133_spill] sm:$0xff] }
 0x598   : > { %v17633_v4 = vsel %vm18828_vm12, nan, %v8787_v59  ;;  %vm9094_vm15 = vcmp.eq.s32.totalorder %v9089_v38, 2  ;;  %v9398_v40 = vadd.s32 3, %v18829_v39  ;;  %vm9090_vm3 = vcmp.lt.s32.totalorder %v9089_v38, 2 }
 0x599   : > { %v8941_v57 = vsel %vm8939_vm2, %v18826_v36, %v18661_v63  ;;  %v9093_v1 = vsel %vm9091_vm5, %v17201_v49, %v18827_v5  ;;  %v18830_v20 = vxor.u32 2147483648, %v17201_v49  ;;  %v9553_v63 = vadd.s32 3, %v18831_v17 }
 0x59a   : > { %v8942_v3 = vsel %vm8935_vm11, %v8938_v28, %v8941_v57  ;;  %v10328_v46 = vadd.s32 3, %v17349_v26  ;;  %vm9246_vm9 = vcmp.eq.s32.totalorder %v9244_v29, 0  ;;  %v10339_v7 = vmul.f32 %v17071_v0, %v17364_v43  ;;  %v18835_v28 = vld [vmem:[#allocation140_spill] sm:$0xff] }
 0x59b   : > { %v9096_v37 = vsel %vm9094_vm15, %v18830_v20, %v18656_v21  ;;  %v10340_v19 = vmul.f32 %v17071_v0, %v17368_v6  ;;  %vm9249_vm0 = vcmp.eq.s32.totalorder %v9244_v29, 2  ;;  %v10341_v49 = vmul.f32 %v17071_v0, %v17377_v8  ;;  %v18843_v20 = vld [vmem:[#allocation132_spill] sm:$0xff] }
 0x59c   : > { %v9097_v14 = vsel %vm9090_vm3, %v9093_v1, %v9096_v37  ;;  %v10329_v38 = vand.u32 3, %v10328_v46  ;;  %v10342_v21 = vmul.f32 %v17071_v0, %v17406_v9  ;;  %v18833_v26 = vxor.u32 2147483648, %v18832_v56  ;;  %10372 = vst [vmem:[%s17087_s8 + $0x8] sm:$0xff] %v10339_v7 }
 0x59d   : > { %v9399_v35 = vand.u32 3, %v9398_v40  ;;  %v9708_v24 = vadd.s32 3, %v18835_v28  ;;  %v10343_v43 = vmul.f32 %v17071_v0, %v17410_v44  ;;  %v9554_v6 = vand.u32 3, %v9553_v63  ;;  %10374 = vst [vmem:[%s17087_s8 + $0x18] sm:$0xff] %v10340_v19 }
 0x59e   : > { %v9248_v59 = vsel %vm9246_vm9, %v18834_v50, %v18833_v26  ;;  %vm10331_vm10 = vcmp.eq.s32.totalorder %v10329_v38, 0  ;;  %vm10334_vm7 = vcmp.eq.s32.totalorder %v10329_v38, 2  ;;  %v10344_v8 = vmul.f32 %v17071_v0, %v17433_v13  ;;  %10376 = vst [vmem:[%s17087_s8 + $0x28] sm:$0xff] %v10341_v49 }
 0x59f   : > { %vm10330_vm8 = vcmp.lt.s32.totalorder %v10329_v38, 2  ;;  %v18836_v9 = vxor.u32 2147483648, %v17444_v62  ;;  %v18837_v36 = vxor.u32 2147483648, %v17423_v42  ;;  %v10345_v44 = vmul.f32 %v17071_v0, %v17490_v12  ;;  %10378 = vst [vmem:[%s17087_s8 + $0x38] sm:$0xff] %v10342_v21 }
 0x5a0   : > { %vm9245_vm13 = vcmp.lt.s32.totalorder %v9244_v29, 2  ;;  %v18838_v13 = vxor.u32 2147483648, %v18834_v50  ;;  %v10346_v39 = vmul.f32 %v17071_v0, %v17495_v11  ;;  %vm18839_vm6 = vweird.f32 %v18659_v23  ;;  %10380 = vst [vmem:[%s17087_s8 + $0x48] sm:$0xff] %v10343_v43  ;;  %v18849_v50 = vld [vmem:[#allocation104_spill] sm:$0xff] }
 0x5a1   : > { %v10333_v22 = vsel %vm10331_vm10, %v17423_v42, %v18836_v9  ;;  %v10336_v57 = vsel %vm10334_vm7, %v18837_v36, %v17444_v62  ;;  %v17679_v62 = vsel %vm18839_vm6, nan, %v8942_v3  ;;  %vm18840_vm1 = vweird.f32 %v18669_v31  ;;  %10382 = vst [vmem:[%s17087_s8 + $0x58] sm:$0xff] %v10344_v8  ;;  %v18841_v3 = vld [vmem:[#allocation137_spill] sm:$0xff] }
 0x5a2   : > { %v9251_v5 = vsel %vm9249_vm0, %v18838_v13, %v18832_v56  ;;  %v17672_v1 = vsel %vm10330_vm8, %v10333_v22, %v10336_v57  ;;  %v17683_v42 = vsel %vm18840_vm1, nan, %v9097_v14  ;;  %v10347_v29 = vmul.f32 %v17071_v0, %v17504_v33  ;;  %10384 = vst [vmem:[%s17087_s8 + $0x68] sm:$0xff] %v10345_v44 }
 0x5a3   : > { %v9252_v12 = vsel %vm9245_vm13, %v9248_v59, %v9251_v5  ;;  %vm9401_vm2 = vcmp.eq.s32.totalorder %v9399_v35, 0  ;;  %v9863_v40 = vadd.s32 3, %v16942_v10  ;;  %v10018_v11 = vadd.s32 3, %v16992_v41  ;;  %v18844_v10 = vld [vmem:[#allocation138_spill] sm:$0xff]  ;;  %v18846_v41 = vld [vmem:[#allocation139_spill] sm:$0xff]  ;;  %10386 = vst [vmem:[%s17087_s8 + $0x78] sm:$0xff] %v10346_v39 }
 0x5a4   : > { %v10348_v23 = vmul.f32 %v17071_v0, %v17508_v58  ;;  %v18842_v31 = vxor.u32 2147483648, %v18841_v3  ;;  %vm9556_vm5 = vcmp.eq.s32.totalorder %v9554_v6, 0  ;;  %v9709_v17 = vand.u32 3, %v9708_v24  ;;  %10388 = vst [vmem:[%s17087_s8 + $0x88] sm:$0xff] %v10347_v29  ;;  %v18861_v5 = vld [vmem:[#allocation28_spill] sm:$0xff] }
 0x5a5   : > { %v10349_v33 = vmul.f32 %v17071_v0, %v17512_v48  ;;  %vm9404_vm14 = vcmp.eq.s32.totalorder %v9399_v35, 2  ;;  %v18845_v63 = vxor.u32 2147483648, %v18844_v10  ;;  %v10173_v58 = vadd.s32 3, %v17207_v54 }
 0x5a6   : > { %v9403_v37 = vsel %vm9401_vm2, %v18843_v20, %v18842_v31  ;;  %v10350_v14 = vmul.f32 %v17071_v0, %v17522_v51  ;;  %vm9400_vm11 = vcmp.lt.s32.totalorder %v9399_v35, 2  ;;  %v18847_v7 = vxor.u32 2147483648, %v18843_v20  ;;  %10390 = vst [vmem:[%s17087_s8 + $0x98] sm:$0xff] %v10348_v23  ;;  %v18866_v20 = vld [vmem:[#allocation125_spill] sm:$0xff] }
 0x5a7   : > { %v9558_v46 = vsel %vm9556_vm5, %v18846_v41, %v18845_v63  ;;  %vm9559_vm12 = vcmp.eq.s32.totalorder %v9554_v6, 2  ;;  %v10351_v48 = vmul.f32 %v17071_v0, %v17555_v53  ;;  %vm9555_vm15 = vcmp.lt.s32.totalorder %v9554_v6, 2  ;;  %v17721_v53 = vld [vmem:[%s17851_s2] ss:$0 sm:$0xff]  ;;  %10392 = vst [vmem:[%s17087_s8 + $0xa8] sm:$0xff] %v10349_v33  ;;  %v18870_v63 = vld [vmem:[#allocation136_spill] sm:$0xff] }
 0x5a8   : > { %v9406_v19 = vsel %vm9404_vm14, %v18847_v7, %v18841_v3  ;;  %v18848_v54 = vxor.u32 2147483648, %v18846_v41  ;;  %v10352_v51 = vmul.f32 %v17071_v0, %v17559_v32  ;;  %vm9711_vm3 = vcmp.eq.s32.totalorder %v9709_v17, 0  ;;  %10394 = vst [vmem:[%s17087_s8 + $0xb8] sm:$0xff] %v10350_v14 }
 0x5a9   : > { %v9407_v38 = vsel %vm9400_vm11, %v9403_v37, %v9406_v19  ;;  %v9864_v56 = vand.u32 3, %v9863_v40  ;;  %v10353_v26 = vmul.f32 %v17721_v53, %v17563_v18  ;;  %vm18850_vm9 = vweird.f32 %v18849_v50  ;;  %10396 = vst [vmem:[%s17087_s8 + $0xc8] sm:$0xff] %v10351_v48 }
 0x5aa   : > { %v9561_v49 = vsel %vm9559_vm12, %v18848_v54, %v18844_v10  ;;  %v9253_v59 = vsel %vm18850_vm9, nan, %v9252_v12  ;;  %v18851_v0 = vxor.u32 2147483648, %v16873_v2  ;;  %v10019_v35 = vand.u32 3, %v10018_v11  ;;  %10398 = vst [vmem:[%s17087_s8 + $0xd8] sm:$0xff] %v10352_v51 }
 0x5ab   : > { %v9562_v21 = vsel %vm9555_vm15, %v9558_v46, %v9561_v49  ;;  %v10354_v28 = vmul.f32 %v17721_v53, %v17571_v16  ;;  %vm9710_vm0 = vcmp.lt.s32.totalorder %v9709_v17, 2  ;;  %vm9714_vm10 = vcmp.eq.s32.totalorder %v9709_v17, 2  ;;  %10400 = vst [vmem:[%s17087_s8 + $0xe8] sm:$0xff] %v10353_v26 }
 0x5ac   : > { %v9713_v32 = vsel %vm9711_vm3, %v16869_v25, %v18851_v0  ;;  %v10174_v24 = vand.u32 3, %v10173_v58  ;;  %v10355_v18 = vmul.f32 %v17721_v53, %v17575_v30  ;;  %vm18852_vm7 = vweird.f32 %v15836_v34 }
 0x5ad   : > { %v9408_v43 = vsel %vm18852_vm7, nan, %v9407_v38  ;;  %vm18853_vm8 = vweird.f32 %v15975_v27  ;;  %v18854_v8 = vxor.u32 2147483648, %v16869_v25  ;;  %v10356_v9 = vmul.f32 %v17721_v53, %v17608_v15  ;;  %10402 = vst [vmem:[%s17087_s8 + $0xf8] sm:$0xff] %v10354_v28 }
 0x5ae   : > { %v9563_v6 = vsel %vm18853_vm8, nan, %v9562_v21  ;;  %vm9865_vm13 = vcmp.lt.s32.totalorder %v9864_v56, 2  ;;  %vm9866_vm6 = vcmp.eq.s32.totalorder %v9864_v56, 0  ;;  %v10357_v30 = vmul.f32 %v17721_v53, %v17612_v45  ;;  %v18858_v45 = vld [vmem:[#allocation20_spill] sm:$0xff]  ;;  %10404 = vst [vmem:[%s17087_s8 + $0x108] sm:$0xff] %v10355_v18 }
 0x5af   : > { %v9716_v16 = vsel %vm9714_vm10, %v18854_v8, %v16873_v2  ;;  %v18855_v34 = vxor.u32 2147483648, %v16985_v60  ;;  %vm9869_vm1 = vcmp.eq.s32.totalorder %v9864_v56, 2  ;;  %vm10021_vm2 = vcmp.eq.s32.totalorder %v10019_v35, 0  ;;  %10406 = vst [vmem:[%s17087_s8 + $0x118] sm:$0xff] %v10356_v9 }
 0x5b0   : > { %v9717_v22 = vsel %vm9710_vm0, %v9713_v32, %v9716_v16  ;;  %v10358_v25 = vmul.f32 %v17721_v53, %v17619_v52  ;;  %v18856_v2 = vxor.u32 2147483648, %v16982_v55  ;;  %v18857_v36 = vxor.u32 2147483648, %v17057_v61  ;;  %v18859_v52 = vld [vmem:[#allocation29_spill] sm:$0xff]  ;;  %10408 = vst [vmem:[%s17087_s8 + $0x128] sm:$0xff] %v10357_v30 }
 0x5b1   : > { %v9868_v27 = vsel %vm9866_vm6, %v16982_v55, %v18855_v34  ;;  %vm10176_vm5 = vcmp.eq.s32.totalorder %v10174_v24, 0  ;;  %v10359_v44 = vmul.f32 %v17721_v53, %v17623_v47  ;;  %vm10020_vm14 = vcmp.lt.s32.totalorder %v10019_v35, 2 }
 0x5b2   : > { %v9871_v15 = vsel %vm9869_vm1, %v18856_v2, %v16985_v60  ;;  %v10023_v57 = vsel %vm10021_vm2, %v18858_v45, %v18857_v36  ;;  %vm10024_vm11 = vcmp.eq.s32.totalorder %v10019_v35, 2  ;;  %v18860_v13 = vxor.u32 2147483648, %v18859_v52  ;;  %10410 = vst [vmem:[%s17087_s8 + $0x138] sm:$0xff] %v10358_v25 }
 0x5b3   : > { %v10360_v55 = vmul.f32 %v17721_v53, %v17633_v4  ;;  %v9872_v60 = vsel %vm9865_vm13, %v9868_v27, %v9871_v15  ;;  %v18862_v12 = vxor.u32 2147483648, %v18858_v45  ;;  %vm10179_vm12 = vcmp.eq.s32.totalorder %v10174_v24, 2  ;;  %10412 = vst [vmem:[%s17087_s8 + $0x148] sm:$0xff] %v10359_v44 }
 0x5b4   : > { %v10178_v39 = vsel %vm10176_vm5, %v18861_v5, %v18860_v13  ;;  %v10361_v29 = vmul.f32 %v17721_v53, %v17679_v62  ;;  %vm10175_vm15 = vcmp.lt.s32.totalorder %v10174_v24, 2  ;;  %v18863_v4 = vxor.u32 2147483648, %v18861_v5 }
 0x5b5   : > { %v10026_v47 = vsel %vm10024_vm11, %v18862_v12, %v17057_v61  ;;  %v10362_v23 = vmul.f32 %v17721_v53, %v17683_v42  ;;  %v18864_v61 = vld [vmem:[#allocation119_spill] sm:$0xff]  ;;  %v10363_v62 = vmul.f32 %v17721_v53, %v9253_v59  ;;  %vm18867_vm9 = vweird.f32 %v18866_v20  ;;  %10414 = vst [vmem:[%s17087_s8 + $0x158] sm:$0xff] %v10360_v55  ;;  %v18868_v42 = vld [vmem:[#allocation130_spill] sm:$0xff] }
 0x5b6   : > { %v10027_v40 = vsel %vm10020_vm14, %v10023_v57, %v10026_v47  ;;  %v10181_v11 = vsel %vm10179_vm12, %v18863_v4, %v18859_v52  ;;  %vm18865_vm3 = vweird.f32 %v18864_v61  ;;  %v9873_v37 = vsel %vm18867_vm9, nan, %v9872_v60  ;;  %10416 = vst [vmem:[%s17087_s8 + $0x168] sm:$0xff] %v10361_v29 }
 0x5b7   : > { %v9718_v3 = vsel %vm18865_vm3, nan, %v9717_v22  ;;  %v10182_v31 = vsel %vm10175_vm15, %v10178_v39, %v10181_v11  ;;  %v10364_v17 = vmul.f32 %v17721_v53, %v9408_v43  ;;  %vm18869_vm0 = vweird.f32 %v18868_v42  ;;  %10418 = vst [vmem:[%s17087_s8 + $0x178] sm:$0xff] %v10362_v23 }
 0x5b8   : > { %v10028_v33 = vsel %vm18869_vm0, nan, %v10027_v40  ;;  %v10365_v10 = vmul.f32 %v17721_v53, %v9563_v6  ;;  %vm18871_vm10 = vweird.f32 %v18870_v63  ;;  %v10366_v46 = vmul.f32 %v17721_v53, %v9718_v3  ;;  %10420 = vst [vmem:[%s17087_s8 + $0x188] sm:$0xff] %v10363_v62 }
 0x5b9   : > { %v10183_v41 = vsel %vm18871_vm10, nan, %v10182_v31  ;;  %v10338_v14 = vsel %vm5333_vm4, nan, %v17672_v1  ;;  %v10367_v7 = vmul.f32 %v17721_v53, %v9873_v37  ;;  %v10368_v19 = vmul.f32 %v17721_v53, %v10028_v33  ;;  %10422 = vst [vmem:[%s17087_s8 + $0x198] sm:$0xff] %v10364_v17 }
 0x5ba   : > { %v10369_v48 = vmul.f32 %v17721_v53, %v10183_v41  ;;  %10424 = vst [vmem:[%s17087_s8 + $0x1a8] sm:$0xff] %v10365_v10  ;;  %v10370_v38 = vmul.f32 %v17721_v53, %v10338_v14 }
 0x5bb   : > { %10426 = vst [vmem:[%s17087_s8 + $0x1b8] sm:$0xff] %v10366_v46 }
 0x5bc   : > { %10428 = vst [vmem:[%s17087_s8 + $0x1c8] sm:$0xff] %v10367_v7 }
 0x5bd   : > { %10430 = vst [vmem:[%s17087_s8 + $0x1d8] sm:$0xff] %v10368_v19 }
 0x5be   : > { %10432 = vst [vmem:[%s17087_s8 + $0x1e8] sm:$0xff] %v10369_v48 }
 0x5bf   : > { %10434 = vst [vmem:[%s17087_s8 + $0x1f8] sm:$0xff] %v10370_v38 }
 0x5c0   : > { %10833 = shalt.err (!%p10830_p3)
}
 0x5c1   : > { %s10877_s4 = smov 256   ;;  %s10878_s7 = smov 16  }
 0x5c2   : > { %10756 = dma.vmem_to_hbm [thread:$0]  (%p10937_p5), %s10450_s20, 8192, %s10452_s24, %s10436_s25, %s10877_s4, %s10877_s4, %s10878_s7  }
 0x5c3 PF: > { %p10762_p4 = scmp.ge.s32.totalorder %s10868_s15, 2  ;;  %s10466_s8 = sand.u32 1, %s10856_s12  }
 0x5c4   : > { %s10467_s9 = scalar_lea.sflag [#allocation3], %s10466_s8 }
 0x5c5   : > { %p10759_p7 = pnand %p10762_p4, %p10941_p6 }
 0x5c7   : > { %p10760_p8 = pneg %p10759_p7 }
 0x5c9   : > { %10851 = dma.done.wait (%p10760_p8), %s10467_s9, 8192  }
 0x5ca   : > { %10853 = vsyncadd (%p10760_p8), %s10467_s9, 4294959104  ;;  %p13_p9 = scmp.ge.s32.totalorder %s10924_s18, 5   ;;  %s18873_s12 = smov %s10860_s13 }
 0x5cb   : > { %s18874_s13 = smov %s10864_s14  ;;  %s18875_s14 = smov %s10935_s21 }
 0x5cc   : > { %s18876_s15 = smov %s10924_s18  ;;  %15 = sbr.rel (!%p13_p9) target bundleno = 3 (0x3), region = 67 }
 0x5d1   :  { %10473 = vsyncpa [#allocation3], 1 }
 0x5d2   :  { %10475 = vsyncpa [#allocation3 + $0x1], 1 }

</bundles_post_ra>
